<compile_context>
chip_gen: v7x
topology: tpu7x:2x2x1
jax: 0.10.0
libtpu: 0.0.40
codegen_flags: <defaults>
</compile_context>

<pallas_src>
import jax
import jax.numpy as jnp
from jax import lax
from jax.experimental import pallas as pl
from jax.experimental.pallas import tpu as pltpu

HIDDEN = 1024


def _round_up(x, m):
    return (x + m - 1) // m * m


def _make_kernel(action_num, out_w):
    def kernel(x_ref, w1_ref, w23_ref, wo_ref, bias_ref, out_ref):
        # Bias slab [8, 2048] f32:
        #   row 0 = [b1 | b2], row 1 = [bv1 | ba1], row 2 = [ba2 | bv2 | 0...]
        b1 = bias_ref[0:1, :HIDDEN]
        b2 = bias_ref[0:1, HIDDEN:2 * HIDDEN]
        bh = bias_ref[1:2, :]
        bo = bias_ref[2:3, :out_w]

        # feature_layer: Linear -> ReLU -> Linear -> ReLU (bf16 in, f32 acc).
        x = x_ref[...].astype(jnp.bfloat16)
        h1 = jnp.maximum(
            jnp.dot(x, w1_ref[...], preferred_element_type=jnp.float32) + b1,
            0.0,
        )
        feat = jnp.maximum(
            jnp.dot(h1.astype(jnp.bfloat16), w23_ref[:, :HIDDEN],
                    preferred_element_type=jnp.float32) + b2,
            0.0,
        )

        # Fused first stage of value/advantage streams: [vh | ah] in one matmul.
        hidden = jnp.maximum(
            jnp.dot(feat.astype(jnp.bfloat16), w23_ref[:, HIDDEN:],
                    preferred_element_type=jnp.float32) + bh,
            0.0,
        )

        # Fused heads, lane-dense transposed weight [out_w, 2048]:
        #   rows 0..A-1 contract the advantage half, row A the value half.
        head = lax.dot_general(
            hidden.astype(jnp.bfloat16), wo_ref[...],
            dimension_numbers=(((1,), (1,)), ((), ())),
            preferred_element_type=jnp.float32,
        ) + bo

        adv = head[:, :action_num]                       # lane-0 aligned
        values = head[:, action_num:action_num + 1]      # single value column

        # qvals = values + (advantages - advantages.mean())   [global mean]
        out_ref[...] = values + (adv - jnp.mean(adv))

    return kernel


def _dueling_forward(state, packed_params, *, action_num):
    """state: [B, obs_dim] float32. packed_params from pack_params(). -> [B, A]."""
    w1, w23, wo_t, bias = packed_params
    b, obs_dim = state.shape
    out_w = wo_t.shape[0]

    flops = 2 * b * (
        obs_dim * HIDDEN            # feature layer 1
        + HIDDEN * HIDDEN           # feature layer 2
        + HIDDEN * 2 * HIDDEN       # fused stream hidden layer
        + 2 * HIDDEN * out_w        # fused head
    )
    bytes_accessed = (
        sum(int(a.size) * a.dtype.itemsize for a in (state, w1, w23, wo_t, bias))
        + b * action_num * 4
    )

    vmem_spec = pl.BlockSpec(memory_space=pltpu.MemorySpace.VMEM)
    return pl.pallas_call(
        _make_kernel(action_num, out_w),
        out_shape=jax.ShapeDtypeStruct((b, action_num), jnp.float32),
        in_specs=[vmem_spec] * 5,
        out_specs=vmem_spec,
        compiler_params=pltpu.CompilerParams(vmem_limit_bytes=16 << 20),
        cost_estimate=pl.CostEstimate(
            flops=flops, transcendentals=0, bytes_accessed=bytes_accessed
        ),
    )(state, w1, w23, wo_t, bias)


dueling_forward = jax.jit(_dueling_forward, static_argnames=("action_num",))


def init_params(key, obs_dim, action_num):
    """PyTorch-nn.Linear-style init: U(-1/sqrt(fan_in), +1/sqrt(fan_in))."""
    def linear(k, fan_in, fan_out):
        kw, kb = jax.random.split(k)
        bound = 1.0 / jnp.sqrt(jnp.float32(fan_in))
        w = jax.random.uniform(kw, (fan_in, fan_out), jnp.float32, -bound, bound)
        b = jax.random.uniform(kb, (1, fan_out), jnp.float32, -bound, bound)
        return w, b

    keys = jax.random.split(key, 6)
    w1, b1 = linear(keys[0], obs_dim, HIDDEN)      # feature_layer[0]
    w2, b2 = linear(keys[1], HIDDEN, HIDDEN)       # feature_layer[2]
    wv1, bv1 = linear(keys[2], HIDDEN, HIDDEN)     # value_stream[0]
    wv2, bv2 = linear(keys[3], HIDDEN, 1)          # value_stream[2]
    wa1, ba1 = linear(keys[4], HIDDEN, HIDDEN)     # advantage_stream[0]
    wa2, ba2 = linear(keys[5], HIDDEN, action_num) # advantage_stream[2]
    return (w1, b1, w2, b2, wv1, bv1, wv2, bv2, wa1, ba1, wa2, ba2)


def pack_params(params, action_num):
    """One-time (outside jit) packing: fuse streams, lane/sublane-dense layout,
    bf16 weights (f32 biases)."""
    (w1, b1, w2, b2, wv1, bv1, wv2, bv2, wa1, ba1, wa2, ba2) = params
    out_w = max(16, _round_up(action_num + 1, 16))

    # Packed [1024, 3072] bf16: [w2 | wv1 | wa1]  (one contiguous DMA).
    w23 = jnp.concatenate([w2, wv1, wa1], axis=1).astype(jnp.bfloat16)

    # Transposed, lane-dense fused head [out_w, 2048] bf16:
    #   rows 0..A-1 = wa2^T acting on the advantage half of `hidden`,
    #   row A       = wv2^T acting on the value half, remaining rows zero.
    wo_t = jnp.zeros((out_w, 2 * HIDDEN), jnp.float32)
    wo_t = wo_t.at[:action_num, HIDDEN:].set(wa2.T)
    wo_t = wo_t.at[action_num, :HIDDEN].set(wv2[:, 0])
    wo_t = wo_t.astype(jnp.bfloat16)

    # Sublane-dense bias slab [8, 2048] f32 (64 KiB exact, no padding waste).
    bias = jnp.zeros((8, 2 * HIDDEN), jnp.float32)
    bias = bias.at[0, :HIDDEN].set(b1[0])
    bias = bias.at[0, HIDDEN:].set(b2[0])
    bias = bias.at[1, :HIDDEN].set(bv1[0])
    bias = bias.at[1, HIDDEN:].set(ba1[0])
    bias = bias.at[2, :action_num].set(ba2[0])
    bias = bias.at[2, action_num].set(bv2[0, 0])

    return (w1.astype(jnp.bfloat16), w23, wo_t, bias)


def reference_forward(state, packed_params, action_num):
    """Pure-JAX reference mirroring the kernel math (and PyTorch semantics)."""
    w1, w23, wo_t, bias = packed_params
    out_w = wo_t.shape[0]
    b1 = bias[0:1, :HIDDEN]
    b2 = bias[0:1, HIDDEN:2 * HIDDEN]
    bh = bias[1:2, :]
    bo = bias[2:3, :out_w]

    def dot(a, w):
        return jnp.dot(a.astype(jnp.bfloat16), w, preferred_element_type=jnp.float32)

    h1 = jax.nn.relu(dot(state, w1) + b1)
    feat = jax.nn.relu(dot(h1, w23[:, :HIDDEN]) + b2)
    hidden = jax.nn.relu(dot(feat, w23[:, HIDDEN:]) + bh)
    head = dot(hidden, wo_t.T) + bo
    adv = head[:, :action_num]
    values = head[:, action_num:action_num + 1]
    return values + (adv - jnp.mean(adv))


if __name__ == "__main__":
    obs_dim = 32
    action_num = 8
    batch = 2

    key = jax.random.PRNGKey(0)
    k_params, k_state = jax.random.split(key)
    params = init_params(k_params, obs_dim, action_num)
    packed = pack_params(params, action_num)   # packed once; reused across calls
    state = jax.random.normal(k_state, (batch, obs_dim), jnp.float32)

    q = jax.block_until_ready(dueling_forward(state, packed, action_num=action_num))

    q_ref = reference_forward(state, packed, action_num)
    assert q.shape == (batch, action_num)
    assert jnp.allclose(q, q_ref, atol=5e-2, rtol=5e-2), (q, q_ref)

    print("KERNEL_OK")
</pallas_src>

<mosaic_0001>
module attributes {stable_mosaic.version = 11 : i64} {
  func.func @kernel(%arg0: memref<2x32xf32, #tpu.memory_space<vmem>>, %arg1: memref<32x1024xbf16, #tpu.memory_space<vmem>>, %arg2: memref<1024x3072xbf16, #tpu.memory_space<vmem>>, %arg3: memref<16x2048xbf16, #tpu.memory_space<vmem>>, %arg4: memref<8x2048xf32, #tpu.memory_space<vmem>>, %arg5: memref<2x8xf32, #tpu.memory_space<vmem>>) attributes {dimension_semantics = [], scalar_prefetch = 0 : i64, scratch_operands = 0 : i64, tpu.core_type = #tpu.core_type<tc>} {
    %c0 = arith.constant 0 : index
    %c0_0 = arith.constant 0 : index
    %0 = vector.load %arg4[%c0, %c0_0] : memref<8x2048xf32, #tpu.memory_space<vmem>>, vector<1x1024xf32>
    %c0_1 = arith.constant 0 : index
    %c1024 = arith.constant 1024 : index
    %1 = vector.load %arg4[%c0_1, %c1024] : memref<8x2048xf32, #tpu.memory_space<vmem>>, vector<1x1024xf32>
    %c1 = arith.constant 1 : index
    %c0_2 = arith.constant 0 : index
    %2 = vector.load %arg4[%c1, %c0_2] : memref<8x2048xf32, #tpu.memory_space<vmem>>, vector<1x2048xf32>
    %c2 = arith.constant 2 : index
    %c0_3 = arith.constant 0 : index
    %3 = vector.load %arg4[%c2, %c0_3] : memref<8x2048xf32, #tpu.memory_space<vmem>>, vector<1x16xf32>
    %c0_4 = arith.constant 0 : index
    %c0_5 = arith.constant 0 : index
    %4 = vector.load %arg0[%c0_4, %c0_5] : memref<2x32xf32, #tpu.memory_space<vmem>>, vector<2x32xf32>
    %5 = arith.truncf %4 : vector<2x32xf32> to vector<2x32xbf16>
    %c0_6 = arith.constant 0 : index
    %c0_7 = arith.constant 0 : index
    %6 = vector.load %arg1[%c0_6, %c0_7] : memref<32x1024xbf16, #tpu.memory_space<vmem>>, vector<32x1024xbf16>
    %cst = arith.constant dense<0.000000e+00> : vector<2x1024xf32>
    %7 = tpu.matmul %5, %6, %cst {dimension_numbers = #tpu.dot_dimension_numbers<[1], [0], [0], [1], [0, 0, 1, 1], [], []>} : vector<2x32xbf16>, vector<32x1024xbf16>, vector<2x1024xf32> -> vector<2x1024xf32>
    %8 = vector.broadcast %0 : vector<1x1024xf32> to vector<2x1024xf32>
    %9 = arith.addf %7, %8 : vector<2x1024xf32>
    %cst_8 = arith.constant 0.000000e+00 : f32
    %10 = vector.broadcast %cst_8 : f32 to vector<2x1024xf32>
    %11 = arith.maximumf %9, %10 : vector<2x1024xf32>
    %12 = arith.truncf %11 : vector<2x1024xf32> to vector<2x1024xbf16>
    %c0_9 = arith.constant 0 : index
    %c0_10 = arith.constant 0 : index
    %13 = vector.load %arg2[%c0_9, %c0_10] : memref<1024x3072xbf16, #tpu.memory_space<vmem>>, vector<1024x1024xbf16>
    %cst_11 = arith.constant dense<0.000000e+00> : vector<2x1024xf32>
    %14 = tpu.matmul %12, %13, %cst_11 {dimension_numbers = #tpu.dot_dimension_numbers<[1], [0], [0], [1], [0, 0, 1, 1], [], []>} : vector<2x1024xbf16>, vector<1024x1024xbf16>, vector<2x1024xf32> -> vector<2x1024xf32>
    %15 = vector.broadcast %1 : vector<1x1024xf32> to vector<2x1024xf32>
    %16 = arith.addf %14, %15 : vector<2x1024xf32>
    %cst_12 = arith.constant 0.000000e+00 : f32
    %17 = vector.broadcast %cst_12 : f32 to vector<2x1024xf32>
    %18 = arith.maximumf %16, %17 : vector<2x1024xf32>
    %19 = arith.truncf %18 : vector<2x1024xf32> to vector<2x1024xbf16>
    %c0_13 = arith.constant 0 : index
    %c1024_14 = arith.constant 1024 : index
    %20 = vector.load %arg2[%c0_13, %c1024_14] : memref<1024x3072xbf16, #tpu.memory_space<vmem>>, vector<1024x2048xbf16>
    %cst_15 = arith.constant dense<0.000000e+00> : vector<2x2048xf32>
    %21 = tpu.matmul %19, %20, %cst_15 {dimension_numbers = #tpu.dot_dimension_numbers<[1], [0], [0], [1], [0, 0, 1, 1], [], []>} : vector<2x1024xbf16>, vector<1024x2048xbf16>, vector<2x2048xf32> -> vector<2x2048xf32>
    %22 = vector.broadcast %2 : vector<1x2048xf32> to vector<2x2048xf32>
    %23 = arith.addf %21, %22 : vector<2x2048xf32>
    %cst_16 = arith.constant 0.000000e+00 : f32
    %24 = vector.broadcast %cst_16 : f32 to vector<2x2048xf32>
    %25 = arith.maximumf %23, %24 : vector<2x2048xf32>
    %26 = arith.truncf %25 : vector<2x2048xf32> to vector<2x2048xbf16>
    %c0_17 = arith.constant 0 : index
    %c0_18 = arith.constant 0 : index
    %27 = vector.load %arg3[%c0_17, %c0_18] : memref<16x2048xbf16, #tpu.memory_space<vmem>>, vector<16x2048xbf16>
    %cst_19 = arith.constant dense<0.000000e+00> : vector<2x16xf32>
    %28 = tpu.matmul %26, %27, %cst_19 {dimension_numbers = #tpu.dot_dimension_numbers<[1], [1], [0], [0], [0, 0, 1, 0], [], []>} : vector<2x2048xbf16>, vector<16x2048xbf16>, vector<2x16xf32> -> vector<2x16xf32>
    %29 = vector.broadcast %3 : vector<1x16xf32> to vector<2x16xf32>
    %30 = arith.addf %28, %29 : vector<2x16xf32>
    %31 = vector.extract_strided_slice %30 {offsets = [0, 0], sizes = [2, 8], strides = [1, 1]} : vector<2x16xf32> to vector<2x8xf32>
    %32 = vector.extract_strided_slice %30 {offsets = [0, 8], sizes = [2, 1], strides = [1, 1]} : vector<2x16xf32> to vector<2x1xf32>
    %33 = vector.shape_cast %31 : vector<2x8xf32> to vector<1x2x8xf32>
    %cst_20 = arith.constant dense<0.000000e+00> : vector<1xf32>
    %34 = vector.multi_reduction <add>, %33, %cst_20 [1, 2] : vector<1x2x8xf32> to vector<1xf32>
    %35 = vector.shape_cast %34 : vector<1xf32> to vector<1x1x1xf32>
    %36 = vector.extract %35[0, 0, 0] : f32 from vector<1x1x1xf32>
    %cst_21 = arith.constant 1.600000e+01 : f32
    %37 = arith.divf %36, %cst_21 : f32
    %38 = vector.broadcast %37 : f32 to vector<2x8xf32>
    %39 = arith.subf %31, %38 : vector<2x8xf32>
    %40 = vector.broadcast %32 : vector<2x1xf32> to vector<2x8xf32>
    %41 = arith.addf %40, %39 : vector<2x8xf32>
    %c0_22 = arith.constant 0 : index
    %c0_23 = arith.constant 0 : index
    %42 = vector.load %arg5[%c0_22, %c0_23] : memref<2x8xf32, #tpu.memory_space<vmem>>, vector<2x8xf32>
    tpu.vector_store %arg5[%c0_22, %c0_23], %41 {strides = array<i32>} : memref<2x8xf32, #tpu.memory_space<vmem>>, vector<2x8xf32>,
    return
  }
}

</mosaic_0001>

<bundles_post_ra>
// kernel: _dueling_forward.1
= control target key start
LH: loop header
LB: loop body
LE: loop exit
PB: predicated region body
PF: predicated region fallthrough
CT: control target
= control target key end

     0   :  { %10 = vsyncpa [#allocation3], 0  ;;  %s14590_s0 = inlined_call_operand.hbm [shape: f32[2,32], index: 0, kind: input, shape index: {}]   ;;  %s14591_s1 = inlined_call_operand.hbm [shape: bf16[32,1024], index: 1, kind: input, shape index: {}]   ;;  %s14592_s2 = inlined_call_operand.hbm [shape: bf16[1024,3072], index: 2, kind: input, shape index: {}]   ;;  %s14593_s3 = inlined_call_operand.hbm [shape: bf16[16,2048], index: 3, kind: input, shape index: {}]   ;;  %s14594_s4 = inlined_call_operand.hbm [shape: f32[8,2048], index: 4, kind: input, shape index: {}]   ;;  %s14595_s5 = inlined_call_operand.hbm [shape: f32[2,8], index: 5, kind: output, shape index: {}]  }
   0x1   :  { %11 = vsyncpa [#allocation6], 0 }
   0x2   :  { %12 = vsyncpa [#allocation9], 0 }
   0x3   :  { %13 = vsyncpa [#allocation4], 0  ;;  %s14159_s18 = smov [#allocation5]   ;;  %s14019_s22 = scalar_lea.hbm %s14591_s1, 2048 }
   0x4   :  { %s29_s19 = sshll.u32 %s14159_s18, 4  ;;  %p14020_p0 = scmp.ne.s32.totalorder %s14591_s1, %s14019_s22  ;;  %s30_s19 = int_to_ptr.vmem [resolvable:$true] %s29_s19 }
   0x5   :  { %p14023_p1 = scmp.lt.u32.totalorder %s14019_s22, %s14591_s1 }
   0x7   :  { %p14025_p2 = pnand %p14023_p1, %p14020_p0 }
   0x9   :  { %14028 = shalt.err (!%p14025_p2)
}
   0xa   :  { %s14029_s27 = scalar_lea.vmem %s30_s19, 2048  ;;  %p14034_p4 = scmp.lt.s32.totalorder %s30_s19, %s30_s19 }
   0xb   :  { %p14030_p3 = scmp.ne.s32.totalorder %s30_s19, %s14029_s27  ;;  %p14035_p5 = scmp.lt.s32.totalorder %s14029_s27, %s14029_s27 }
   0xd   :  { %p14036_p6 = por %p14035_p5, %p14034_p4 }
   0xf   :  { %p14037_p7 = pnand %p14036_p6, %p14030_p3 }
  0x11   :  { %14040 = shalt.err (!%p14037_p7)
}
  0x12   :  { %s14160_s28 = smov 512   ;;  %s14161_s29 = smov 32  }
  0x13   :  { %35 = dma.hbm_to_vmem [thread:$0]  %s14591_s1, 2048, %s30_s19, [#allocation6], %s14160_s28, %s14160_s28, %s14161_s29  }
  0x14   :  { %s14162_s7 = smov [#allocation8]   ;;  %s14041_s11 = scalar_lea.hbm %s14593_s3, 2048 }
  0x15   :  { %s53_s8 = sshll.u32 %s14162_s7, 4  ;;  %p14042_p8 = scmp.ne.s32.totalorder %s14593_s3, %s14041_s11  ;;  %s54_s8 = int_to_ptr.vmem [resolvable:$true] %s53_s8 }
  0x16   :  { %p14045_p9 = scmp.lt.u32.totalorder %s14041_s11, %s14593_s3 }
  0x18   :  { %p14047_p10 = pnand %p14045_p9, %p14042_p8 }
  0x1a   :  { %14050 = shalt.err (!%p14047_p10)
}
  0x1b   :  { %s14051_s16 = scalar_lea.vmem %s54_s8, 2048  ;;  %p14056_p12 = scmp.lt.s32.totalorder %s54_s8, %s54_s8 }
  0x1c   :  { %p14052_p11 = scmp.ne.s32.totalorder %s54_s8, %s14051_s16  ;;  %p14057_p13 = scmp.lt.s32.totalorder %s14051_s16, %s14051_s16 }
  0x1e   :  { %p14058_p0 = por %p14057_p13, %p14056_p12 }
  0x20   :  { %p14059_p1 = pnand %p14058_p0, %p14052_p11 }
  0x22   :  { %14062 = shalt.err (!%p14059_p1)
}
  0x23   :  { %s14163_s1 = smov 1024   ;;  %s14164_s17 = smov 64  }
  0x24   :  { %59 = dma.hbm_to_vmem [thread:$0]  %s14593_s3, 2048, %s54_s8, [#allocation9], %s14163_s1, %s14163_s1, %s14164_s17  }
  0x25   :  { %s14165_s20 = smov [#allocation2]   ;;  %s14166_s22 = smov [#allocation7]  }
  0x26   :  { %s20_s21 = sshll.u32 %s14165_s20, 4  ;;  %s41_s23 = sshll.u32 %s14166_s22, 4  ;;  %s21_s21 = int_to_ptr.vmem [resolvable:$true] %s20_s21  ;;  %s14227_s23 = int_to_ptr.vmem [resolvable:$true] %s41_s23 }
  0x27   :  { %s14063_s26 = scalar_lea.hbm %s14590_s0, 32 }
  0x28   :  { %p14064_p2 = scmp.ne.s32.totalorder %s14590_s0, %s14063_s26  ;;  %p14067_p3 = scmp.lt.u32.totalorder %s14063_s26, %s14590_s0 }
  0x2a   :  { %p14069_p4 = pnand %p14067_p3, %p14064_p2 }
  0x2c   :  { %14072 = shalt.err (!%p14069_p4)
}
  0x2d   :  { %s14073_s3 = scalar_lea.vmem %s21_s21, 32  ;;  %p14078_p6 = scmp.lt.s32.totalorder %s21_s21, %s21_s21 }
  0x2e   :  { %p14074_p5 = scmp.ne.s32.totalorder %s21_s21, %s14073_s3  ;;  %p14079_p7 = scmp.lt.s32.totalorder %s14073_s3, %s14073_s3 }
  0x30   :  { %p14080_p8 = por %p14079_p7, %p14078_p6 }
  0x32   :  { %p14081_p9 = pnand %p14080_p8, %p14074_p5 }
  0x34   :  { %14084 = shalt.err (!%p14081_p9)
}
  0x35   :  { %23 = dma.hbm_to_vmem [thread:$0]  %s14590_s0, 32, %s21_s21, [#allocation3]  }
  0x36   :  { %s14085_s10 = scalar_lea.hbm %s14592_s2, 196608 }
  0x37   :  { %p14086_p10 = scmp.ne.s32.totalorder %s14592_s2, %s14085_s10  ;;  %p14089_p11 = scmp.lt.u32.totalorder %s14085_s10, %s14592_s2 }
  0x39   :  { %p14091_p12 = pnand %p14089_p11, %p14086_p10 }
  0x3b   :  { %14094 = shalt.err (!%p14091_p12)
}
  0x3c   :  { %s14095_s15 = scalar_lea.vmem %s14227_s23, 196608  ;;  %p14100_p0 = scmp.lt.s32.totalorder %s14227_s23, %s14227_s23 }
  0x3d   :  { %p14096_p13 = scmp.ne.s32.totalorder %s14227_s23, %s14095_s15  ;;  %p14101_p1 = scmp.lt.s32.totalorder %s14095_s15, %s14095_s15 }
  0x3f   :  { %p14102_p2 = por %p14101_p1, %p14100_p0 }
  0x41   :  { %p14103_p3 = pnand %p14102_p2, %p14096_p13 }
  0x43   :  { %14106 = shalt.err (!%p14103_p3)
}
  0x44   :  { %s14167_s0 = smov 1536   ;;  %s14168_s16 = smov 96  }
  0x45   :  { %47 = dma.hbm_to_vmem [thread:$0]  %s14592_s2, 196608, %s14227_s23, [#allocation6], %s14167_s0, %s14167_s0, %s14168_s16  }
  0x46   :  { %s14169_s18 = smov [#allocation10]   ;;  %s14107_s22 = scalar_lea.hbm %s14594_s4, 2048 }
  0x47   :  { %s66_s19 = sshll.u32 %s14169_s18, 4  ;;  %p14108_p4 = scmp.ne.s32.totalorder %s14594_s4, %s14107_s22  ;;  %s67_s19 = int_to_ptr.vmem [resolvable:$true] %s66_s19 }
  0x48   :  { %p14111_p5 = scmp.lt.u32.totalorder %s14107_s22, %s14594_s4 }
  0x4a   :  { %p14113_p6 = pnand %p14111_p5, %p14108_p4 }
  0x4c   :  { %14116 = shalt.err (!%p14113_p6)
}
  0x4d   :  { %s14117_s28 = scalar_lea.vmem %s67_s19, 2048  ;;  %p14122_p8 = scmp.lt.s32.totalorder %s67_s19, %s67_s19 }
  0x4e   :  { %p14118_p7 = scmp.ne.s32.totalorder %s67_s19, %s14117_s28  ;;  %p14123_p9 = scmp.lt.s32.totalorder %s14117_s28, %s14117_s28 }
  0x50   :  { %p14124_p10 = por %p14123_p9, %p14122_p8 }
  0x52   :  { %p14125_p11 = pnand %p14124_p10, %p14118_p7 }
  0x54   :  { %14128 = shalt.err (!%p14125_p11)
}
  0x55   :  { %69 = dma.hbm_to_vmem [thread:$0]  %s14594_s4, 2048, %s67_s19, [#allocation9]  }
  0x56   :  { %14151 = dma.done.wait [#allocation3], 32  }
  0x57   :  { %14152 = vsyncadd [#allocation3], 4294967264 }
  0x58   :  { %14153 = dma.done.wait [#allocation6], 198656  }
  0x59   :  { %14154 = vsyncadd [#allocation6], 4294768640 }
  0x5a   :  { %14155 = dma.done.wait [#allocation9], 4096  }
  0x5b   :  { %14156 = vsyncadd [#allocation9], 4294963200  ;;  %v14170_v0 = vmov 0   ;;  %v104_v1 = vld [vmem:[#allocation5] sm:$0xff]  ;;  %v105_v8 = vld [vmem:[#allocation5 + $0x8] sm:$0xff]  ;;  %vm241_vm0 = vcmask 261120  }
  0x5c   :  { %277 = vmatprep.mubr.bf16.mxu1 %v14170_v0  ;;  %v108_v2 = vld [vmem:[#allocation5 + $0x20] sm:$0xff]  ;;  %v109_v9 = vld [vmem:[#allocation5 + $0x28] sm:$0xff]  ;;  %v102_v11 = vld [vmem:[#allocation2] sm:$0x3]  ;;  %vm12196_vm1 = vcmask 58368   ;;  %s14172_s30 = smov [#allocation11]  }
  0x5d   :  { %v112_v3 = vld [vmem:[#allocation5 + $0x40] sm:$0xff]  ;;  %v12237_v4 = vcombine.high %v104_v1, %v108_v2  ;;  %v12236_v5 = vcombine.low %v104_v1, %v108_v2  ;;  %v12239_v12 = vcombine.high %v105_v8, %v109_v9  ;;  %v113_v14 = vld [vmem:[#allocation5 + $0x48] sm:$0xff]  ;;  %v14271_v17 = vpack.c.bf16 %v102_v11, %v102_v11  ;;  %v106_v27 = vld [vmem:[#allocation5 + $0x10] sm:$0xff]  ;;  %s12225_s3 = sshll.u32 %s14172_s30, 4  ;;  %s12226_s3 = int_to_ptr.vmem [resolvable:$true] %s12225_s3 }
  0x5e   :  { %v116_v6 = vld [vmem:[#allocation5 + $0x60] sm:$0xff]  ;;  %v117_v15 = vld [vmem:[#allocation5 + $0x68] sm:$0xff]  ;;  %v12238_v22 = vcombine.low %v105_v8, %v109_v9  ;;  %v110_v28 = vld [vmem:[#allocation5 + $0x30] sm:$0xff]  ;;  %s14129_s6 = scalar_lea.vmem %s12226_s3, 32  ;;  %p14134_p13 = scmp.lt.s32.totalorder %s12226_s3, %s12226_s3 }
  0x5f   :  { %v12245_v7 = vcombine.high %v112_v3, %v116_v6  ;;  %245 = vmatprep.subr.bf16.mxu1 %v12237_v4  ;;  %v12244_v10 = vcombine.low %v112_v3, %v116_v6  ;;  %v425_v13 = vld [vmem:[#allocation7] sm:$0xff]  ;;  %v12247_v26 = vcombine.high %v113_v14, %v117_v15  ;;  %v12246_v31 = vcombine.low %v113_v14, %v117_v15  ;;  %v114_v35 = vld [vmem:[#allocation5 + $0x50] sm:$0xff]  ;;  %v107_v43 = vld [vmem:[#allocation5 + $0x18] sm:$0xff]  ;;  %p14130_p12 = scmp.ne.s32.totalorder %s12226_s3, %s14129_s6  ;;  %p14135_p0 = scmp.lt.s32.totalorder %s14129_s6, %s14129_s6 }
  0x60   :  { %246 = vmatpush1.bf16.msra.mxu1 %v12236_v5  ;;  %v429_v16 = vld [vmem:[#allocation7 + $0x60] sm:$0xff]  ;;  %v12241_v34 = vcombine.high %v106_v27, %v110_v28  ;;  %v118_v36 = vld [vmem:[#allocation5 + $0x70] sm:$0xff]  ;;  %v12240_v39 = vcombine.low %v106_v27, %v110_v28  ;;  %v111_v44 = vld [vmem:[#allocation5 + $0x38] sm:$0xff] }
  0x61   :  { %247 = vmatprep.subr.bf16.mxu1 %v12245_v7  ;;  %v12257_v18 = vcombine.high %v425_v13, %v429_v16  ;;  %v12256_v19 = vcombine.low %v425_v13, %v429_v16  ;;  %v433_v20 = vld [vmem:[#allocation7 + $0xc0] sm:$0xff]  ;;  %v12249_v42 = vcombine.high %v114_v35, %v118_v36  ;;  %v12248_v47 = vcombine.low %v114_v35, %v118_v36  ;;  %v115_v51 = vld [vmem:[#allocation5 + $0x58] sm:$0xff]  ;;  %v426_v59 = vld [vmem:[#allocation7 + $0x8] sm:$0xff]  ;;  %p14136_p1 = por %p14135_p0, %p14134_p13 }
  0x62   :  { %v437_v21 = vld [vmem:[#allocation7 + $0x120] sm:$0xff]  ;;  %v12243_v50 = vcombine.high %v107_v43, %v111_v44  ;;  %v119_v52 = vld [vmem:[#allocation5 + $0x78] sm:$0xff]  ;;  %v12242_v55 = vcombine.low %v107_v43, %v111_v44  ;;  %v430_v60 = vld [vmem:[#allocation7 + $0x68] sm:$0xff] }
  0x63   :  { %v12265_v23 = vcombine.high %v433_v20, %v437_v21  ;;  %v441_v24 = vld [vmem:[#allocation7 + $0x180] sm:$0xff]  ;;  %3538 = vmatprep.subr.bf16.mxu0 %v12257_v18  ;;  %v12264_v29 = vcombine.low %v433_v20, %v437_v21  ;;  %v12251_v58 = vcombine.high %v115_v51, %v119_v52  ;;  %v12250_v63 = vcombine.low %v115_v51, %v119_v52  ;;  %v434_v4 = vld [vmem:[#allocation7 + $0xc8] sm:$0xff]  ;;  %p14137_p2 = pnand %p14136_p1, %p14130_p12 }
  0x64   :  { %248 = vmatpush1.bf16.msra.mxu1 %v12244_v10  ;;  %v445_v25 = vld [vmem:[#allocation7 + $0x1e0] sm:$0xff]  ;;  %3539 = vmatpush1.bf16.msra.mxu0 %v12256_v19  ;;  %v12259_v3 = vcombine.high %v426_v59, %v430_v60  ;;  %v438_v5 = vld [vmem:[#allocation7 + $0x128] sm:$0xff]  ;;  %v12258_v8 = vcombine.low %v426_v59, %v430_v60 }
  0x65   :  { %286 = vmatprep.subr.bf16.mxu1 %v12239_v12  ;;  %3540 = vmatprep.subr.bf16.mxu0 %v12265_v23  ;;  %v12273_v30 = vcombine.high %v441_v24, %v445_v25  ;;  %v449_v32 = vld [vmem:[#allocation7 + $0x240] sm:$0xff]  ;;  %v12272_v37 = vcombine.low %v441_v24, %v445_v25  ;;  %v12267_v11 = vcombine.high %v434_v4, %v438_v5  ;;  %v442_v12 = vld [vmem:[#allocation7 + $0x188] sm:$0xff] }
  0x66   :  { %v453_v33 = vld [vmem:[#allocation7 + $0x2a0] sm:$0xff]  ;;  %v446_v13 = vld [vmem:[#allocation7 + $0x1e8] sm:$0xff]  ;;  %v12266_v15 = vcombine.low %v434_v4, %v438_v5 }
  0x67   :  { %12252 = vmatmul.mubr.msk.bf16.vlgmr.msra.gmra.mrb[0].mxu1 %vm241_vm0, %v14271_v17  ;;  %v12281_v38 = vcombine.high %v449_v32, %v453_v33  ;;  %v457_v40 = vld [vmem:[#allocation7 + $0x300] sm:$0xff]  ;;  %v12280_v45 = vcombine.low %v449_v32, %v453_v33  ;;  %v12275_v19 = vcombine.high %v442_v12, %v446_v13  ;;  %v450_v20 = vld [vmem:[#allocation7 + $0x248] sm:$0xff]  ;;  %v12274_v24 = vcombine.low %v442_v12, %v446_v13 }
  0x68   :  { %287 = vmatpush1.bf16.msra.mxu1 %v12238_v22  ;;  %318 = vmatprep.mubr.bf16.mxu1 %v14170_v0  ;;  %v461_v41 = vld [vmem:[#allocation7 + $0x360] sm:$0xff]  ;;  %v454_v21 = vld [vmem:[#allocation7 + $0x2a8] sm:$0xff] }
  0x69   :  { %288 = vmatprep.subr.bf16.mxu1 %v12247_v26  ;;  %3541 = vmatpush1.bf16.msra.mxu0 %v12264_v29  ;;  %v12289_v46 = vcombine.high %v457_v40, %v461_v41  ;;  %v465_v48 = vld [vmem:[#allocation7 + $0x3c0] sm:$0xff]  ;;  %v12288_v53 = vcombine.low %v457_v40, %v461_v41  ;;  %v458_v27 = vld [vmem:[#allocation7 + $0x308] sm:$0xff] }
  0x6a   :  { %3542 = vmatprep.subr.bf16.mxu0 %v12273_v30  ;;  %v469_v49 = vld [vmem:[#allocation7 + $0x420] sm:$0xff]  ;;  %v462_v28 = vld [vmem:[#allocation7 + $0x368] sm:$0xff] }
  0x6b   :  { %v12297_v54 = vcombine.high %v465_v48, %v469_v49  ;;  %v473_v56 = vld [vmem:[#allocation7 + $0x480] sm:$0xff]  ;;  %v12296_v61 = vcombine.low %v465_v48, %v469_v49  ;;  %v466_v35 = vld [vmem:[#allocation7 + $0x3c8] sm:$0xff] }
  0x6c   :  { %289 = vmatpush1.bf16.msra.mxu1 %v12246_v31  ;;  %v477_v57 = vld [vmem:[#allocation7 + $0x4e0] sm:$0xff]  ;;  %v12282_v31 = vcombine.low %v450_v20, %v454_v21  ;;  %v470_v36 = vld [vmem:[#allocation7 + $0x428] sm:$0xff] }
  0x6d   :  { %327 = vmatprep.subr.bf16.mxu1 %v12241_v34  ;;  %3543 = vmatpush1.bf16.msra.mxu0 %v12272_v37  ;;  %v12305_v62 = vcombine.high %v473_v56, %v477_v57  ;;  %v481_v1 = vld [vmem:[#allocation7 + $0x540] sm:$0xff]  ;;  %v12304_v6 = vcombine.low %v473_v56, %v477_v57  ;;  %v12291_v34 = vcombine.high %v458_v27, %v462_v28  ;;  %v474_v43 = vld [vmem:[#allocation7 + $0x488] sm:$0xff] }
  0x6e   :  { %3544 = vmatprep.subr.bf16.mxu0 %v12281_v38  ;;  %v485_v2 = vld [vmem:[#allocation7 + $0x5a0] sm:$0xff]  ;;  %v478_v44 = vld [vmem:[#allocation7 + $0x4e8] sm:$0xff] }
  0x6f   :  { %12253 = vmatmul.mubr.msk.bf16.vlgmr.msra.gmra.mrb[4].mxu1 %vm241_vm0, %v14271_v17  ;;  %v12313_v7 = vcombine.high %v481_v1, %v485_v2  ;;  %v489_v9 = vld [vmem:[#allocation7 + $0x600] sm:$0xff]  ;;  %v482_v51 = vld [vmem:[#allocation7 + $0x548] sm:$0xff] }
  0x70   :  { %328 = vmatpush1.bf16.msra.mxu1 %v12240_v39  ;;  %359 = vmatprep.mubr.bf16.mxu1 %v14170_v0  ;;  %v493_v10 = vld [vmem:[#allocation7 + $0x660] sm:$0xff]  ;;  %v12290_v39 = vcombine.low %v458_v27, %v462_v28  ;;  %v486_v52 = vld [vmem:[#allocation7 + $0x5a8] sm:$0xff] }
  0x71   :  { %329 = vmatprep.subr.bf16.mxu1 %v12249_v42  ;;  %3545 = vmatpush1.bf16.msra.mxu0 %v12280_v45  ;;  %v12321_v14 = vcombine.high %v489_v9, %v493_v10  ;;  %v497_v16 = vld [vmem:[#allocation7 + $0x6c0] sm:$0xff]  ;;  %v12320_v22 = vcombine.low %v489_v9, %v493_v10  ;;  %v12299_v42 = vcombine.high %v466_v35, %v470_v36  ;;  %v490_v57 = vld [vmem:[#allocation7 + $0x608] sm:$0xff] }
  0x72   :  { %3546 = vmatprep.subr.bf16.mxu0 %v12289_v46  ;;  %v501_v18 = vld [vmem:[#allocation7 + $0x720] sm:$0xff]  ;;  %v12315_v56 = vcombine.high %v482_v51, %v486_v52  ;;  %v12314_v60 = vcombine.low %v482_v51, %v486_v52  ;;  %v510_v4 = vld [vmem:[#allocation7 + $0x7e8] sm:$0xff] }
  0x73   :  { %v12329_v23 = vcombine.high %v497_v16, %v501_v18  ;;  %v505_v25 = vld [vmem:[#allocation7 + $0x780] sm:$0xff]  ;;  %v12328_v29 = vcombine.low %v497_v16, %v501_v18  ;;  %v526_v12 = vld [vmem:[#allocation7 + $0x968] sm:$0xff] }
  0x74   :  { %330 = vmatpush1.bf16.msra.mxu1 %v12248_v47  ;;  %v509_v26 = vld [vmem:[#allocation7 + $0x7e0] sm:$0xff]  ;;  %v12298_v47 = vcombine.low %v466_v35, %v470_v36 }
  0x75   :  { %368 = vmatprep.subr.bf16.mxu1 %v12243_v50  ;;  %3547 = vmatpush1.bf16.msra.mxu0 %v12288_v53  ;;  %v12337_v30 = vcombine.high %v505_v25, %v509_v26  ;;  %v513_v32 = vld [vmem:[#allocation7 + $0x840] sm:$0xff]  ;;  %v12336_v37 = vcombine.low %v505_v25, %v509_v26  ;;  %v12307_v50 = vcombine.high %v474_v43, %v478_v44 }
  0x76   :  { %3548 = vmatprep.subr.bf16.mxu0 %v12297_v54  ;;  %v517_v33 = vld [vmem:[#allocation7 + $0x8a0] sm:$0xff] }
  0x77   :  { %12254 = vmatmul.mubr.msk.bf16.vlgmr.msra.gmra.mrb[8].mxu1 %vm241_vm0, %v14271_v17  ;;  %v12345_v38 = vcombine.high %v513_v32, %v517_v33  ;;  %v521_v40 = vld [vmem:[#allocation7 + $0x900] sm:$0xff]  ;;  %v12344_v45 = vcombine.low %v513_v32, %v517_v33 }
  0x78   :  { %369 = vmatpush1.bf16.msra.mxu1 %v12242_v55  ;;  %400 = vmatprep.mubr.bf16.mxu1 %v14170_v0  ;;  %v12312_v0 = vcombine.low %v481_v1, %v485_v2  ;;  %v525_v41 = vld [vmem:[#allocation7 + $0x960] sm:$0xff]  ;;  %v12306_v55 = vcombine.low %v474_v43, %v478_v44  ;;  %v121_v43 = vlaneseq }
  0x79   :  { %370 = vmatprep.subr.bf16.mxu1 %v12251_v58  ;;  %3549 = vmatpush1.bf16.msra.mxu0 %v12296_v61  ;;  %v12353_v46 = vcombine.high %v521_v40, %v525_v41  ;;  %v529_v48 = vld [vmem:[#allocation7 + $0x9c0] sm:$0xff]  ;;  %v12352_v53 = vcombine.low %v521_v40, %v525_v41  ;;  %v494_v58 = vld [vmem:[#allocation7 + $0x668] sm:$0xff] }
  0x7a   :  { %3550 = vmatprep.subr.bf16.mxu0 %v12305_v62  ;;  %v533_v49 = vld [vmem:[#allocation7 + $0xa20] sm:$0xff]  ;;  %v12323_v61 = vcombine.high %v490_v57, %v494_v58  ;;  %v498_v62 = vld [vmem:[#allocation7 + $0x6c8] sm:$0xff]  ;;  %v12322_v1 = vcombine.low %v490_v57, %v494_v58  ;;  %v14284_v44 = vshrl.u32 %v121_v43, 7 }
  0x7b   :  { %v12361_v54 = vcombine.high %v529_v48, %v533_v49  ;;  %v12360_v59 = vcombine.low %v529_v48, %v533_v49  ;;  %v545_v27 = vld [vmem:[#allocation7 + $0xb40] sm:$0xff]  ;;  %v594_v43 = vld [vmem:[#allocation7 + $0xfc8] sm:$0xff] }
  0x7c   :  { %371 = vmatpush1.bf16.msra.mxu1 %v12250_v63  ;;  %v502_v63 = vld [vmem:[#allocation7 + $0x728] sm:$0xff]  ;;  %v549_v28 = vld [vmem:[#allocation7 + $0xba0] sm:$0xff]  ;;  %v14289_v48 = vsub.s32 0, %v14284_v44  ;;  %v14292_v49 = vsub.s32 1, %v14284_v44  ;;  %v14299_v57 = vsub.s32 3, %v14284_v44 }
  0x7d   :  { %3702 = vmatprep.subr.bf16.mxu1 %v12259_v3  ;;  %3551 = vmatpush1.bf16.msra.mxu0 %v12304_v6  ;;  %v12331_v2 = vcombine.high %v498_v62, %v502_v63  ;;  %v506_v3 = vld [vmem:[#allocation7 + $0x788] sm:$0xff]  ;;  %v12330_v5 = vcombine.low %v498_v62, %v502_v63  ;;  %v553_v35 = vld [vmem:[#allocation7 + $0xc00] sm:$0xff] }
  0x7e   :  { %3552 = vmatprep.subr.bf16.mxu0 %v12313_v7  ;;  %v12339_v6 = vcombine.high %v506_v3, %v510_v4  ;;  %v514_v7 = vld [vmem:[#allocation7 + $0x848] sm:$0xff]  ;;  %v12338_v9 = vcombine.low %v506_v3, %v510_v4  ;;  %v557_v36 = vld [vmem:[#allocation7 + $0xc60] sm:$0xff] }
  0x7f   :  { %12255 = vmatmul.mubr.msk.bf16.vlgmr.msra.gmra.mrb[12].mxu1 %vm241_vm0, %v14271_v17  ;;  %v12283_v17 = vcombine.high %v450_v20, %v454_v21  ;;  %v537_v20 = vld [vmem:[#allocation7 + $0xa80] sm:$0xff]  ;;  %v12384_v40 = vcombine.low %v553_v35, %v557_v36  ;;  %v562_v63 = vld [vmem:[#allocation7 + $0xcc8] sm:$0xff] }
  0x80   :  { %3703 = vmatpush1.bf16.msra.mxu1 %v12258_v8  ;;  %v518_v8 = vld [vmem:[#allocation7 + $0x8a8] sm:$0xff]  ;;  %v541_v21 = vld [vmem:[#allocation7 + $0xae0] sm:$0xff] }
  0x81   :  { %3704 = vmatprep.subr.bf16.mxu1 %v12267_v11  ;;  %3553 = vmatpush1.bf16.msra.mxu0 %v12312_v0  ;;  %v12347_v10 = vcombine.high %v514_v7, %v518_v8  ;;  %v522_v11 = vld [vmem:[#allocation7 + $0x908] sm:$0xff]  ;;  %v12346_v13 = vcombine.low %v514_v7, %v518_v8  ;;  %v565_v62 = vld [vmem:[#allocation7 + $0xd20] sm:$0xff] }
  0x82   :  { %3554 = vmatprep.subr.bf16.mxu0 %v12321_v14  ;;  %v12355_v0 = vcombine.high %v522_v11, %v526_v12  ;;  %v530_v14 = vld [vmem:[#allocation7 + $0x9c8] sm:$0xff]  ;;  %v12354_v16 = vcombine.low %v522_v11, %v526_v12  ;;  %v569_v7 = vld [vmem:[#allocation7 + $0xd80] sm:$0xff] }
  0x83   :  { %v573_v8 = vld [vmem:[#allocation7 + $0xde0] sm:$0xff] }
  0x84   :  { %3705 = vmatpush1.bf16.msra.mxu1 %v12266_v15  ;;  %v534_v15 = vld [vmem:[#allocation7 + $0xa28] sm:$0xff] }
  0x85   :  { %3706 = vmatprep.subr.bf16.mxu1 %v12275_v19  ;;  %3555 = vmatpush1.bf16.msra.mxu0 %v12320_v22  ;;  %v12363_v18 = vcombine.high %v530_v14, %v534_v15  ;;  %v12362_v19 = vcombine.low %v530_v14, %v534_v15  ;;  %v538_v22 = vld [vmem:[#allocation7 + $0xa88] sm:$0xff] }
  0x86   :  { %3556 = vmatprep.subr.bf16.mxu0 %v12329_v23  ;;  %v12369_v23 = vcombine.high %v537_v20, %v541_v21 }
  0x88   :  { %3707 = vmatpush1.bf16.msra.mxu1 %v12274_v24  ;;  %v542_v24 = vld [vmem:[#allocation7 + $0xae8] sm:$0xff] }
  0x89   :  { %3708 = vmatprep.subr.bf16.mxu1 %v12283_v17  ;;  %3557 = vmatpush1.bf16.msra.mxu0 %v12328_v29  ;;  %v12370_v25 = vcombine.low %v538_v22, %v542_v24  ;;  %v12371_v26 = vcombine.high %v538_v22, %v542_v24  ;;  %v12368_v17 = vcombine.low %v537_v20, %v541_v21  ;;  %v546_v29 = vld [vmem:[#allocation7 + $0xb48] sm:$0xff]  ;;  %v581_v21 = vld [vmem:[#allocation7 + $0xea0] sm:$0xff] }
  0x8a   :  { %3558 = vmatprep.subr.bf16.mxu0 %v12337_v30  ;;  %v12377_v30 = vcombine.high %v545_v27, %v549_v28  ;;  %v578_v22 = vld [vmem:[#allocation7 + $0xe48] sm:$0xff] }
  0x8c   :  { %3709 = vmatpush1.bf16.msra.mxu1 %v12282_v31  ;;  %v550_v31 = vld [vmem:[#allocation7 + $0xba8] sm:$0xff] }
  0x8d   :  { %3710 = vmatprep.subr.bf16.mxu1 %v12291_v34  ;;  %3559 = vmatpush1.bf16.msra.mxu0 %v12336_v37  ;;  %v12378_v32 = vcombine.low %v546_v29, %v550_v31  ;;  %v12379_v33 = vcombine.high %v546_v29, %v550_v31  ;;  %v12376_v34 = vcombine.low %v545_v27, %v549_v28  ;;  %v554_v37 = vld [vmem:[#allocation7 + $0xc08] sm:$0xff]  ;;  %v585_v29 = vld [vmem:[#allocation7 + $0xf00] sm:$0xff] }
  0x8e   :  { %3560 = vmatprep.subr.bf16.mxu0 %v12345_v38  ;;  %v12385_v38 = vcombine.high %v553_v35, %v557_v36  ;;  %v586_v31 = vld [vmem:[#allocation7 + $0xf08] sm:$0xff] }
  0x90   :  { %3711 = vmatpush1.bf16.msra.mxu1 %v12290_v39  ;;  %v558_v39 = vld [vmem:[#allocation7 + $0xc68] sm:$0xff] }
  0x91   :  { %3712 = vmatprep.subr.bf16.mxu1 %v12299_v42  ;;  %3561 = vmatpush1.bf16.msra.mxu0 %v12344_v45  ;;  %v12386_v41 = vcombine.low %v554_v37, %v558_v39  ;;  %v12387_v42 = vcombine.high %v554_v37, %v558_v39  ;;  %v86_v45 = vld [vmem:[#allocation10] ss:$8 sm:$0xf] }
  0x92   :  { %3562 = vmatprep.subr.bf16.mxu0 %v12353_v46  ;;  %v87_v46 = vld [vmem:[#allocation10] ss:$8 sm:$0xf0] }
  0x94   :  { %3713 = vmatpush1.bf16.msra.mxu1 %v12298_v47  ;;  %v14286_v47 = vor.u32 %v87_v46, %v86_v45  ;;  %v598_v45 = vld [vmem:[#allocation7 + $0x1028] sm:$0xff] }
  0x95   :  { %3714 = vmatprep.subr.bf16.mxu1 %v12307_v50  ;;  %3563 = vmatpush1.bf16.msra.mxu0 %v12352_v53 }
  0x96   :  { %3564 = vmatprep.subr.bf16.mxu0 %v12361_v54  ;;  %v124_v50 = vrot.slane %v14286_v47, %v14289_v48  ;;  %v128_v51 = vrot.slane %v14286_v47, %v14292_v49  ;;  %v136_v3 = vrot.slane %v14286_v47, %v14299_v57 }
  0x98   :  { %3715 = vmatpush1.bf16.msra.mxu1 %v12306_v55 }
  0x99   :  { %3716 = vmatprep.subr.bf16.mxu1 %v12315_v56  ;;  %3565 = vmatpush1.bf16.msra.mxu0 %v12360_v59 }
  0x9a   :  { %3566 = vmatprep.subr.bf16.mxu0 %v12369_v23  ;;  %v582_v23 = vld [vmem:[#allocation7 + $0xea8] sm:$0xff] }
  0x9b   :  { %v12411_v28 = vcombine.high %v578_v22, %v582_v23  ;;  %v12410_v36 = vcombine.low %v578_v22, %v582_v23 }
  0x9c   :  { %3717 = vmatpush1.bf16.msra.mxu1 %v12314_v60  ;;  %v561_v60 = vld [vmem:[#allocation7 + $0xcc0] sm:$0xff] }
  0x9d   :  { %3718 = vmatprep.subr.bf16.mxu1 %v12323_v61  ;;  %3567 = vmatpush1.bf16.msra.mxu0 %v12368_v17 }
  0x9e   :  { %3568 = vmatprep.subr.bf16.mxu0 %v12377_v30  ;;  %v589_v30 = vld [vmem:[#allocation7 + $0xf60] sm:$0xff] }
  0x9f   :  { %v12416_v46 = vcombine.low %v585_v29, %v589_v30 }
  0xa0   :  { %3719 = vmatpush1.bf16.msra.mxu1 %v12322_v1  ;;  %v566_v1 = vld [vmem:[#allocation7 + $0xd28] sm:$0xff] }
  0xa1   :  { %3720 = vmatprep.subr.bf16.mxu1 %v12331_v2  ;;  %3569 = vmatpush1.bf16.msra.mxu0 %v12376_v34 }
  0xa2   :  { %3579 = vmatprep.subr.bf16.mxu0 %v12385_v38  ;;  %v12417_v38 = vcombine.high %v585_v29, %v589_v30  ;;  %v638_v29 = vld [vmem:[#allocation7 + $0x13e8] sm:$0xff] }
  0xa4   :  { %3721 = vmatpush1.bf16.msra.mxu1 %v12330_v5  ;;  %v12393_v5 = vcombine.high %v561_v60, %v565_v62 }
  0xa5   :  { %3722 = vmatprep.subr.bf16.mxu1 %v12339_v6  ;;  %v12395_v6 = vcombine.high %v562_v63, %v566_v1 }
  0xa8   :  { %3723 = vmatpush1.bf16.msra.mxu1 %v12338_v9  ;;  %v570_v9 = vld [vmem:[#allocation7 + $0xd88] sm:$0xff] }
  0xa9   :  { %3724 = vmatprep.subr.bf16.mxu1 %v12347_v10  ;;  %v574_v10 = vld [vmem:[#allocation7 + $0xde8] sm:$0xff] }
  0xac   :  { %3725 = vmatpush1.bf16.msra.mxu1 %v12346_v13  ;;  %v12392_v13 = vcombine.low %v561_v60, %v565_v62  ;;  %v609_v62 = vld [vmem:[#allocation7 + $0x1140] sm:$0xff] }
  0xad   :  { %3726 = vmatprep.subr.bf16.mxu1 %v12355_v0  ;;  %v12394_v0 = vcombine.low %v562_v63, %v566_v1  ;;  %v613_v63 = vld [vmem:[#allocation7 + $0x11a0] sm:$0xff]  ;;  %v610_v1 = vld [vmem:[#allocation7 + $0x1148] sm:$0xff] }
  0xb0   :  { %3727 = vmatpush1.bf16.msra.mxu1 %v12354_v16  ;;  %v12401_v16 = vcombine.high %v569_v7, %v573_v8 }
  0xb1   :  { %3728 = vmatprep.subr.bf16.mxu1 %v12363_v18  ;;  %v12403_v18 = vcombine.high %v570_v9, %v574_v10 }
  0xb4   :  { %3729 = vmatpush1.bf16.msra.mxu1 %v12362_v19  ;;  %v577_v19 = vld [vmem:[#allocation7 + $0xe40] sm:$0xff] }
  0xb5   :  { %3730 = vmatprep.subr.bf16.mxu1 %v12371_v26  ;;  %v12402_v26 = vcombine.low %v570_v9, %v574_v10  ;;  %v12409_v27 = vcombine.high %v577_v19, %v581_v21  ;;  %v12408_v35 = vcombine.low %v577_v19, %v581_v21  ;;  %v617_v9 = vld [vmem:[#allocation7 + $0x1200] sm:$0xff]  ;;  %v630_v21 = vld [vmem:[#allocation7 + $0x1328] sm:$0xff] }
  0xb6   :  { %v621_v10 = vld [vmem:[#allocation7 + $0x1260] sm:$0xff] }
  0xb7   :  { %v629_v19 = vld [vmem:[#allocation7 + $0x1320] sm:$0xff]  ;;  %v12448_v22 = vcombine.low %v617_v9, %v621_v10 }
  0xb8   :  { %3731 = vmatpush1.bf16.msra.mxu1 %v12370_v25  ;;  %v12400_v25 = vcombine.low %v569_v7, %v573_v8  ;;  %v12441_v7 = vcombine.high %v609_v62, %v613_v63 }
  0xb9   :  { %3732 = vmatprep.subr.bf16.mxu1 %v12379_v33 }
  0xbc   :  { %3733 = vmatpush1.bf16.msra.mxu1 %v12378_v32  ;;  %v590_v32 = vld [vmem:[#allocation7 + $0xf68] sm:$0xff] }
  0xbd   :  { %3743 = vmatprep.subr.bf16.mxu1 %v12387_v42  ;;  %v12419_v39 = vcombine.high %v586_v31, %v590_v32  ;;  %v597_v42 = vld [vmem:[#allocation7 + $0x1020] sm:$0xff] }
 0x13a   :  { %v279_v52 = vpop.f32.mrb[0].mxu1 }
 0x13b   :  { %v280_v53 = vadd.f32 %v279_v52, %v124_v50  ;;  %v281_v54 = vpop.f32.mrb[1].mxu1  ;;  %v12418_v50 = vcombine.low %v586_v31, %v590_v32  ;;  %v12427_v52 = vcombine.high %v594_v43, %v598_v45 }
 0x13c   :  { %v282_v55 = vadd.f32 %v281_v54, %v128_v51  ;;  %v283_v56 = vpop.f32.mrb[2].mxu1  ;;  %v605_v54 = vld [vmem:[#allocation7 + $0x10e0] sm:$0xff] }
 0x13d   :  { %v409_v58 = vmax.f32 %v280_v53, 0.0  ;;  %v284_v59 = vpop.f32.mrb[3].mxu1  ;;  %v601_v53 = vld [vmem:[#allocation7 + $0x1080] sm:$0xff]  ;;  %v606_v56 = vld [vmem:[#allocation7 + $0x10e8] sm:$0xff] }
 0x13e   :  { %v410_v61 = vmax.f32 %v282_v55, 0.0  ;;  %v602_v55 = vld [vmem:[#allocation7 + $0x1088] sm:$0xff]  ;;  %v12426_v59 = vcombine.low %v594_v43, %v598_v45  ;;  %v12433_v60 = vcombine.high %v601_v53, %v605_v54  ;;  %v649_v45 = vld [vmem:[#allocation7 + $0x1500] sm:$0xff] }
 0x13f   :  { %v14305_v4 = vpack.c.bf16 %v409_v58, %v409_v58 }
 0x140   :  { %v14301_v2 = vpack.c.bf16 %v410_v61, %v410_v61  ;;  %v12435_v61 = vcombine.high %v602_v55, %v606_v56 }
 0x142   :  { %3570 = vmatprep.mubr.bf16.mxu0 %v14301_v2  ;;  %3734 = vmatprep.mubr.bf16.mxu1 %v14301_v2  ;;  %v14309_v11 = vpop.f32.mrb[4].mxu1 }
 0x143   :  { %3571 = vmatmul.mubr.bf16.vlgmr.msra.gmra.mrb[0].mxu0 %v14305_v4  ;;  %3735 = vmatmul.mubr.bf16.vlgmr.msra.gmra.mrb[16].mxu1 %v14305_v4  ;;  %v322_v12 = vpop.f32.mrb[5].mxu1 }
 0x144   :  { %3580 = vmatpush1.bf16.msra.mxu0 %v12384_v40  ;;  %3744 = vmatpush1.bf16.msra.mxu1 %v12386_v41  ;;  %v323_v14 = vadd.f32 %v322_v12, %v136_v3  ;;  %v324_v15 = vpop.f32.mrb[6].mxu1  ;;  %v593_v40 = vld [vmem:[#allocation7 + $0xfc0] sm:$0xff]  ;;  %v614_v3 = vld [vmem:[#allocation7 + $0x11a8] sm:$0xff] }
 0x145   :  { %3581 = vmatprep.subr.bf16.mxu0 %v12393_v5  ;;  %3745 = vmatprep.subr.bf16.mxu1 %v12395_v6  ;;  %v325_v20 = vpop.f32.mrb[7].mxu1  ;;  %v12425_v51 = vcombine.high %v593_v40, %v597_v42  ;;  %v12424_v58 = vcombine.low %v593_v40, %v597_v42  ;;  %v12432_v5 = vcombine.low %v601_v53, %v605_v54  ;;  %v618_v12 = vld [vmem:[#allocation7 + $0x1208] sm:$0xff] }
 0x146   :  { %v412_v24 = vmax.f32 %v323_v14, 0.0  ;;  %v12434_v6 = vcombine.low %v602_v55, %v606_v56  ;;  %v12443_v8 = vcombine.high %v610_v1, %v614_v3  ;;  %v12442_v14 = vcombine.low %v610_v1, %v614_v3  ;;  %v626_v20 = vld [vmem:[#allocation7 + $0x12c8] sm:$0xff]  ;;  %v657_v56 = vld [vmem:[#allocation7 + $0x15c0] sm:$0xff] }
 0x147   :  { %v12449_v15 = vcombine.high %v617_v9, %v621_v10  ;;  %v12458_v31 = vcombine.low %v626_v20, %v630_v21  ;;  %v14325_v9 = vsub.s32 5, %v14284_v44 }
 0x148   :  { %3582 = vmatpush1.bf16.msra.mxu0 %v12392_v13  ;;  %3746 = vmatpush1.bf16.msra.mxu1 %v12394_v0  ;;  %v14313_v17 = vpack.c.bf16 %v412_v24, %v412_v24  ;;  %v622_v13 = vld [vmem:[#allocation7 + $0x1268] sm:$0xff]  ;;  %v12440_v0 = vcombine.low %v609_v62, %v613_v63 }
 0x149   :  { %3583 = vmatprep.subr.bf16.mxu0 %v12401_v16  ;;  %3747 = vmatprep.subr.bf16.mxu1 %v12403_v18  ;;  %v12451_v16 = vcombine.high %v618_v12, %v622_v13  ;;  %v625_v18 = vld [vmem:[#allocation7 + $0x12c0] sm:$0xff]  ;;  %v12450_v23 = vcombine.low %v618_v12, %v622_v13 }
 0x14a   :  { %3611 = vmatprep.mubr.bf16.mxu0 %v14313_v17  ;;  %3775 = vmatprep.mubr.bf16.mxu1 %v14313_v17  ;;  %v14317_v33 = vpop.f32.mrb[8].mxu1  ;;  %v12457_v24 = vcombine.high %v625_v18, %v629_v19  ;;  %v12456_v30 = vcombine.low %v625_v18, %v629_v19  ;;  %v677_v18 = vld [vmem:[#allocation7 + $0x17a0] sm:$0xff]  ;;  %v674_v19 = vld [vmem:[#allocation7 + $0x1748] sm:$0xff] }
 0x14b   :  { %v14319_v34 = vpop.f32.mrb[9].mxu1 }
 0x14c   :  { %3584 = vmatpush1.bf16.msra.mxu0 %v12400_v25  ;;  %3748 = vmatpush1.bf16.msra.mxu1 %v12402_v26  ;;  %v365_v37 = vpop.f32.mrb[10].mxu1  ;;  %v12459_v25 = vcombine.high %v626_v20, %v630_v21  ;;  %v633_v26 = vld [vmem:[#allocation7 + $0x1380] sm:$0xff]  ;;  %v678_v20 = vld [vmem:[#allocation7 + $0x17a8] sm:$0xff]  ;;  %v144_v21 = vrot.slane %v14286_v47, %v14325_v9 }
 0x14d   :  { %3585 = vmatprep.subr.bf16.mxu0 %v12409_v27  ;;  %3749 = vmatprep.subr.bf16.mxu1 %v12411_v28  ;;  %v366_v41 = vpop.f32.mrb[11].mxu1  ;;  %v637_v27 = vld [vmem:[#allocation7 + $0x13e0] sm:$0xff]  ;;  %v634_v28 = vld [vmem:[#allocation7 + $0x1388] sm:$0xff] }
 0x14e   :  { %v12465_v32 = vcombine.high %v633_v26, %v637_v27  ;;  %v645_v37 = vld [vmem:[#allocation7 + $0x14a0] sm:$0xff]  ;;  %v12464_v40 = vcombine.low %v633_v26, %v637_v27  ;;  %v12466_v41 = vcombine.low %v634_v28, %v638_v29  ;;  %v12507_v27 = vcombine.high %v674_v19, %v678_v20 }
 0x150   :  { %3586 = vmatpush1.bf16.msra.mxu0 %v12408_v35  ;;  %3750 = vmatpush1.bf16.msra.mxu1 %v12410_v36  ;;  %v12467_v35 = vcombine.high %v634_v28, %v638_v29  ;;  %v641_v36 = vld [vmem:[#allocation7 + $0x1440] sm:$0xff] }
 0x151   :  { %3587 = vmatprep.subr.bf16.mxu0 %v12417_v38  ;;  %3751 = vmatprep.subr.bf16.mxu1 %v12419_v39  ;;  %v642_v38 = vld [vmem:[#allocation7 + $0x1448] sm:$0xff]  ;;  %v12473_v42 = vcombine.high %v641_v36, %v645_v37  ;;  %v681_v28 = vld [vmem:[#allocation7 + $0x1800] sm:$0xff] }
 0x152   :  { %v646_v39 = vld [vmem:[#allocation7 + $0x14a8] sm:$0xff] }
 0x153   :  { %v12475_v43 = vcombine.high %v642_v38, %v646_v39  ;;  %v12474_v53 = vcombine.low %v642_v38, %v646_v39  ;;  %v12506_v38 = vcombine.low %v674_v19, %v678_v20 }
 0x154   :  { %3588 = vmatpush1.bf16.msra.mxu0 %v12416_v46  ;;  %3752 = vmatpush1.bf16.msra.mxu1 %v12418_v50  ;;  %v653_v46 = vld [vmem:[#allocation7 + $0x1560] sm:$0xff]  ;;  %v650_v50 = vld [vmem:[#allocation7 + $0x1508] sm:$0xff] }
 0x155   :  { %3589 = vmatprep.subr.bf16.mxu0 %v12425_v51  ;;  %3753 = vmatprep.subr.bf16.mxu1 %v12427_v52  ;;  %v654_v51 = vld [vmem:[#allocation7 + $0x1568] sm:$0xff]  ;;  %v12472_v52 = vcombine.low %v641_v36, %v645_v37  ;;  %v12481_v54 = vcombine.high %v649_v45, %v653_v46  ;;  %v12480_v62 = vcombine.low %v649_v45, %v653_v46 }
 0x156   :  { %v12483_v55 = vcombine.high %v650_v50, %v654_v51  ;;  %v12482_v63 = vcombine.low %v650_v50, %v654_v51  ;;  %v694_v45 = vld [vmem:[#allocation7 + $0x1928] sm:$0xff] }
 0x158   :  { %3590 = vmatpush1.bf16.msra.mxu0 %v12424_v58  ;;  %3754 = vmatpush1.bf16.msra.mxu1 %v12426_v59  ;;  %v661_v58 = vld [vmem:[#allocation7 + $0x1620] sm:$0xff]  ;;  %v658_v59 = vld [vmem:[#allocation7 + $0x15c8] sm:$0xff] }
 0x159   :  { %3591 = vmatprep.subr.bf16.mxu0 %v12433_v60  ;;  %3755 = vmatprep.subr.bf16.mxu1 %v12435_v61  ;;  %v662_v60 = vld [vmem:[#allocation7 + $0x1628] sm:$0xff]  ;;  %v14322_v61 = vsub.s32 2, %v14284_v44  ;;  %v12489_v1 = vcombine.high %v657_v56, %v661_v58  ;;  %v12488_v12 = vcombine.low %v657_v56, %v661_v58 }
 0x15a   :  { %v12491_v3 = vcombine.high %v658_v59, %v662_v60  ;;  %v12490_v13 = vcombine.low %v658_v59, %v662_v60  ;;  %v698_v56 = vld [vmem:[#allocation7 + $0x1988] sm:$0xff] }
 0x15b   :  { %v132_v10 = vrot.slane %v14286_v47, %v14322_v61  ;;  %v702_v58 = vld [vmem:[#allocation7 + $0x19e8] sm:$0xff] }
 0x15c   :  { %3592 = vmatpush1.bf16.msra.mxu0 %v12432_v5  ;;  %3756 = vmatpush1.bf16.msra.mxu1 %v12434_v6  ;;  %v665_v5 = vld [vmem:[#allocation7 + $0x1680] sm:$0xff] }
 0x15d   :  { %3593 = vmatprep.subr.bf16.mxu0 %v12441_v7  ;;  %3757 = vmatprep.subr.bf16.mxu1 %v12443_v8  ;;  %v669_v6 = vld [vmem:[#allocation7 + $0x16e0] sm:$0xff]  ;;  %v666_v7 = vld [vmem:[#allocation7 + $0x1688] sm:$0xff] }
 0x15e   :  { %v670_v8 = vld [vmem:[#allocation7 + $0x16e8] sm:$0xff] }
 0x160   :  { %3594 = vmatpush1.bf16.msra.mxu0 %v12440_v0  ;;  %3758 = vmatpush1.bf16.msra.mxu1 %v12442_v14  ;;  %v12497_v0 = vcombine.high %v665_v5, %v669_v6  ;;  %v12499_v14 = vcombine.high %v666_v7, %v670_v8 }
 0x161   :  { %3595 = vmatprep.subr.bf16.mxu0 %v12449_v15  ;;  %3759 = vmatprep.subr.bf16.mxu1 %v12451_v16  ;;  %v673_v15 = vld [vmem:[#allocation7 + $0x1740] sm:$0xff]  ;;  %v14329_v16 = vpop.f32.mrb[12].mxu1 }
 0x162   :  { %v12505_v26 = vcombine.high %v673_v15, %v677_v18 }
 0x164   :  { %3596 = vmatpush1.bf16.msra.mxu0 %v12448_v22  ;;  %3760 = vmatpush1.bf16.msra.mxu1 %v12450_v23  ;;  %v321_v22 = vadd.f32 %v14309_v11, %v132_v10  ;;  %v12496_v23 = vcombine.low %v665_v5, %v669_v6  ;;  %v12504_v11 = vcombine.low %v673_v15, %v677_v18  ;;  %v709_v5 = vld [vmem:[#allocation7 + $0x1aa0] sm:$0xff]  ;;  %v706_v6 = vld [vmem:[#allocation7 + $0x1a48] sm:$0xff] }
 0x165   :  { %3597 = vmatprep.subr.bf16.mxu0 %v12457_v24  ;;  %3761 = vmatprep.subr.bf16.mxu1 %v12459_v25  ;;  %v12498_v24 = vcombine.low %v666_v7, %v670_v8  ;;  %v14334_v25 = vpop.f32.mrb[13].mxu1  ;;  %v710_v7 = vld [vmem:[#allocation7 + $0x1aa8] sm:$0xff]  ;;  %v12530_v10 = vcombine.low %v698_v56, %v702_v58 }
 0x166   :  { %v406_v29 = vpop.f32.mrb[14].mxu1  ;;  %v411_v37 = vmax.f32 %v321_v22, 0.0  ;;  %v714_v15 = vld [vmem:[#allocation7 + $0x1b08] sm:$0xff]  ;;  %v12538_v20 = vcombine.low %v706_v6, %v710_v7 }
 0x167   :  { %v407_v36 = vpop.f32.mrb[15].mxu1  ;;  %v718_v18 = vld [vmem:[#allocation7 + $0x1b68] sm:$0xff] }
 0x168   :  { %3598 = vmatpush1.bf16.msra.mxu0 %v12456_v30  ;;  %3762 = vmatpush1.bf16.msra.mxu1 %v12458_v31  ;;  %v685_v30 = vld [vmem:[#allocation7 + $0x1860] sm:$0xff]  ;;  %v682_v31 = vld [vmem:[#allocation7 + $0x1808] sm:$0xff]  ;;  %v14337_v50 = vpack.c.bf16 %v411_v37, %v411_v37  ;;  %v12547_v22 = vcombine.high %v714_v15, %v718_v18  ;;  %v12546_v29 = vcombine.low %v714_v15, %v718_v18 }
 0x169   :  { %3599 = vmatprep.subr.bf16.mxu0 %v12465_v32  ;;  %3763 = vmatprep.subr.bf16.mxu1 %v12467_v35  ;;  %v686_v32 = vld [vmem:[#allocation7 + $0x1868] sm:$0xff]  ;;  %v364_v35 = vadd.f32 %v14319_v34, %v144_v21  ;;  %v12513_v39 = vcombine.high %v681_v28, %v685_v30  ;;  %v12512_v34 = vcombine.low %v681_v28, %v685_v30 }
 0x16a   :  { %v12514_v51 = vcombine.low %v682_v31, %v686_v32  ;;  %v730_v36 = vld [vmem:[#allocation7 + $0x1c88] sm:$0xff] }
 0x16b   :  { %v414_v46 = vmax.f32 %v364_v35, 0.0  ;;  %v733_v35 = vld [vmem:[#allocation7 + $0x1ce0] sm:$0xff]  ;;  %v734_v37 = vld [vmem:[#allocation7 + $0x1ce8] sm:$0xff] }
 0x16c   :  { %3600 = vmatpush1.bf16.msra.mxu0 %v12464_v40  ;;  %3764 = vmatpush1.bf16.msra.mxu1 %v12466_v41  ;;  %v12515_v40 = vcombine.high %v682_v31, %v686_v32  ;;  %v689_v41 = vld [vmem:[#allocation7 + $0x18c0] sm:$0xff]  ;;  %v766_v15 = vld [vmem:[#allocation7 + $0x1fe8] sm:$0xff] }
 0x16d   :  { %3601 = vmatprep.subr.bf16.mxu0 %v12473_v42  ;;  %3765 = vmatprep.subr.bf16.mxu1 %v12475_v43  ;;  %v693_v42 = vld [vmem:[#allocation7 + $0x1920] sm:$0xff]  ;;  %v690_v43 = vld [vmem:[#allocation7 + $0x18c8] sm:$0xff]  ;;  %v14339_v59 = vpack.c.bf16 %v414_v46, %v414_v46 }
 0x16e   :  { %v12520_v60 = vcombine.low %v689_v41, %v693_v42  ;;  %v729_v32 = vld [vmem:[#allocation7 + $0x1c80] sm:$0xff] }
 0x16f   :  { %v12560_v46 = vcombine.low %v729_v32, %v733_v35 }
 0x170   :  { %3602 = vmatpush1.bf16.msra.mxu0 %v12472_v52  ;;  %3766 = vmatpush1.bf16.msra.mxu1 %v12474_v53  ;;  %v12521_v52 = vcombine.high %v689_v41, %v693_v42  ;;  %v12523_v53 = vcombine.high %v690_v43, %v694_v45  ;;  %v737_v41 = vld [vmem:[#allocation7 + $0x1d40] sm:$0xff] }
 0x171   :  { %3603 = vmatprep.subr.bf16.mxu0 %v12481_v54  ;;  %3767 = vmatprep.subr.bf16.mxu1 %v12483_v55  ;;  %v697_v54 = vld [vmem:[#allocation7 + $0x1980] sm:$0xff] }
 0x172   :  { %v701_v55 = vld [vmem:[#allocation7 + $0x19e0] sm:$0xff] }
 0x173   :  { %v12528_v8 = vcombine.low %v697_v54, %v701_v55  ;;  %v741_v42 = vld [vmem:[#allocation7 + $0x1da0] sm:$0xff] }
 0x174   :  { %3604 = vmatpush1.bf16.msra.mxu0 %v12480_v62  ;;  %3768 = vmatpush1.bf16.msra.mxu1 %v12482_v63  ;;  %v12522_v62 = vcombine.low %v690_v43, %v694_v45  ;;  %v12529_v63 = vcombine.high %v697_v54, %v701_v55  ;;  %v738_v43 = vld [vmem:[#allocation7 + $0x1d48] sm:$0xff]  ;;  %v749_v54 = vld [vmem:[#allocation7 + $0x1e60] sm:$0xff] }
 0x175   :  { %3605 = vmatprep.subr.bf16.mxu0 %v12489_v1  ;;  %3769 = vmatprep.subr.bf16.mxu1 %v12491_v3  ;;  %v12531_v1 = vcombine.high %v698_v56, %v702_v58  ;;  %v705_v3 = vld [vmem:[#allocation7 + $0x1a40] sm:$0xff]  ;;  %v742_v45 = vld [vmem:[#allocation7 + $0x1da8] sm:$0xff]  ;;  %v12568_v58 = vcombine.low %v737_v41, %v741_v42 }
 0x176   :  { %v12536_v19 = vcombine.low %v705_v3, %v709_v5  ;;  %v746_v55 = vld [vmem:[#allocation7 + $0x1e08] sm:$0xff] }
 0x177   :  { %v750_v56 = vld [vmem:[#allocation7 + $0x1e68] sm:$0xff] }
 0x178   :  { %3606 = vmatpush1.bf16.msra.mxu0 %v12488_v12  ;;  %3770 = vmatpush1.bf16.msra.mxu1 %v12490_v13  ;;  %v12537_v12 = vcombine.high %v705_v3, %v709_v5  ;;  %v12539_v13 = vcombine.high %v706_v6, %v710_v7  ;;  %v757_v3 = vld [vmem:[#allocation7 + $0x1f20] sm:$0xff]  ;;  %v754_v5 = vld [vmem:[#allocation7 + $0x1ec8] sm:$0xff] }
 0x179   :  { %3607 = vmatprep.subr.bf16.mxu0 %v12497_v0  ;;  %3771 = vmatprep.subr.bf16.mxu1 %v12499_v14  ;;  %v713_v0 = vld [vmem:[#allocation7 + $0x1b00] sm:$0xff]  ;;  %v758_v6 = vld [vmem:[#allocation7 + $0x1f28] sm:$0xff] }
 0x17a   :  { %v717_v14 = vld [vmem:[#allocation7 + $0x1b60] sm:$0xff] }
 0x17b   :  { %v12545_v21 = vcombine.high %v713_v0, %v717_v14  ;;  %v12544_v28 = vcombine.low %v713_v0, %v717_v14  ;;  %v765_v0 = vld [vmem:[#allocation7 + $0x1fe0] sm:$0xff]  ;;  %v762_v14 = vld [vmem:[#allocation7 + $0x1f88] sm:$0xff] }
 0x17c   :  { %3608 = vmatpush1.bf16.msra.mxu0 %v12496_v23  ;;  %3772 = vmatpush1.bf16.msra.mxu1 %v12498_v24  ;;  %v721_v23 = vld [vmem:[#allocation7 + $0x1bc0] sm:$0xff] }
 0x17d   :  { %3609 = vmatprep.subr.bf16.mxu0 %v12505_v26  ;;  %3773 = vmatprep.subr.bf16.mxu1 %v12507_v27  ;;  %v725_v24 = vld [vmem:[#allocation7 + $0x1c20] sm:$0xff]  ;;  %v722_v26 = vld [vmem:[#allocation7 + $0x1bc8] sm:$0xff] }
 0x17e   :  { %v726_v27 = vld [vmem:[#allocation7 + $0x1c28] sm:$0xff]  ;;  %v12553_v30 = vcombine.high %v721_v23, %v725_v24 }
 0x17f   :  { %v12555_v31 = vcombine.high %v722_v26, %v726_v27 }
 0x180   :  { %3610 = vmatpush1.bf16.msra.mxu0 %v12504_v11  ;;  %3774 = vmatpush1.bf16.msra.mxu1 %v12506_v38  ;;  %v12552_v11 = vcombine.low %v721_v23, %v725_v24  ;;  %v12554_v38 = vcombine.low %v722_v26, %v726_v27  ;;  %v773_v23 = vld [vmem:[#allocation7 + $0x20a0] sm:$0xff]  ;;  %v770_v24 = vld [vmem:[#allocation7 + $0x2048] sm:$0xff] }
 0x181   :  { %3620 = vmatprep.subr.bf16.mxu0 %v12513_v39  ;;  %3784 = vmatprep.subr.bf16.mxu1 %v12515_v40  ;;  %v12561_v39 = vcombine.high %v729_v32, %v733_v35  ;;  %v12563_v40 = vcombine.high %v730_v36, %v734_v37  ;;  %v774_v26 = vld [vmem:[#allocation7 + $0x20a8] sm:$0xff]  ;;  %v781_v32 = vld [vmem:[#allocation7 + $0x2160] sm:$0xff] }
 0x182   :  { %v778_v35 = vld [vmem:[#allocation7 + $0x2108] sm:$0xff] }
 0x183   :  { %3612 = vmatmul.mubr.bf16.vlgmr.msra.gmra.mrb[0].mxu0 %v14337_v50  ;;  %3776 = vmatmul.mubr.bf16.vlgmr.msra.gmra.mrb[16].mxu1 %v14337_v50 }
 0x184   :  { %3621 = vmatpush1.bf16.msra.mxu0 %v12512_v34  ;;  %3785 = vmatpush1.bf16.msra.mxu1 %v12514_v51  ;;  %v12562_v34 = vcombine.low %v730_v36, %v734_v37  ;;  %v12569_v51 = vcombine.high %v737_v41, %v741_v42  ;;  %v782_v36 = vld [vmem:[#allocation7 + $0x2168] sm:$0xff]  ;;  %v789_v41 = vld [vmem:[#allocation7 + $0x2220] sm:$0xff] }
 0x185   :  { %3622 = vmatprep.subr.bf16.mxu0 %v12521_v52  ;;  %3786 = vmatprep.subr.bf16.mxu1 %v12523_v53  ;;  %v12571_v52 = vcombine.high %v738_v43, %v742_v45  ;;  %v745_v53 = vld [vmem:[#allocation7 + $0x1e00] sm:$0xff]  ;;  %v786_v42 = vld [vmem:[#allocation7 + $0x21c8] sm:$0xff] }
 0x186   :  { %3652 = vmatprep.mubr.bf16.mxu0 %v14339_v59  ;;  %3816 = vmatprep.mubr.bf16.mxu1 %v14339_v59  ;;  %v12576_v7 = vcombine.low %v745_v53, %v749_v54 }
 0x188   :  { %3623 = vmatpush1.bf16.msra.mxu0 %v12520_v60  ;;  %3787 = vmatpush1.bf16.msra.mxu1 %v12522_v62  ;;  %v12570_v60 = vcombine.low %v738_v43, %v742_v45  ;;  %v12577_v62 = vcombine.high %v745_v53, %v749_v54  ;;  %v790_v43 = vld [vmem:[#allocation7 + $0x2228] sm:$0xff]  ;;  %v14346_v45 = vsub.s32 4, %v14284_v44  ;;  %v793_v53 = vld [vmem:[#allocation7 + $0x2280] sm:$0xff] }
 0x189   :  { %3624 = vmatprep.subr.bf16.mxu0 %v12529_v63  ;;  %3788 = vmatprep.subr.bf16.mxu1 %v12531_v1  ;;  %v12579_v63 = vcombine.high %v746_v55, %v750_v56  ;;  %v753_v1 = vld [vmem:[#allocation7 + $0x1ec0] sm:$0xff] }
 0x18a   :  { %v12584_v18 = vcombine.low %v753_v1, %v757_v3  ;;  %v797_v54 = vld [vmem:[#allocation7 + $0x22e0] sm:$0xff] }
 0x18c   :  { %3625 = vmatpush1.bf16.msra.mxu0 %v12528_v8  ;;  %3789 = vmatpush1.bf16.msra.mxu1 %v12530_v10  ;;  %v12578_v8 = vcombine.low %v746_v55, %v750_v56  ;;  %v12585_v10 = vcombine.high %v753_v1, %v757_v3  ;;  %v794_v55 = vld [vmem:[#allocation7 + $0x2288] sm:$0xff]  ;;  %v12625_v1 = vcombine.high %v793_v53, %v797_v54 }
 0x18d   :  { %3626 = vmatprep.subr.bf16.mxu0 %v12537_v12  ;;  %3790 = vmatprep.subr.bf16.mxu1 %v12539_v13  ;;  %v12587_v12 = vcombine.high %v754_v5, %v758_v6  ;;  %v761_v13 = vld [vmem:[#allocation7 + $0x1f80] sm:$0xff]  ;;  %v798_v56 = vld [vmem:[#allocation7 + $0x22e8] sm:$0xff] }
 0x18e   :  { %v12592_v27 = vcombine.low %v761_v13, %v765_v0  ;;  %v12627_v3 = vcombine.high %v794_v55, %v798_v56 }
 0x190   :  { %3627 = vmatpush1.bf16.msra.mxu0 %v12536_v19  ;;  %3791 = vmatpush1.bf16.msra.mxu1 %v12538_v20  ;;  %v12586_v19 = vcombine.low %v754_v5, %v758_v6  ;;  %v12593_v20 = vcombine.high %v761_v13, %v765_v0  ;;  %v801_v5 = vld [vmem:[#allocation7 + $0x2340] sm:$0xff]  ;;  %v12624_v13 = vcombine.low %v793_v53, %v797_v54  ;;  %v834_v54 = vld [vmem:[#allocation7 + $0x2648] sm:$0xff] }
 0x191   :  { %3628 = vmatprep.subr.bf16.mxu0 %v12545_v21  ;;  %3792 = vmatprep.subr.bf16.mxu1 %v12547_v22  ;;  %v12595_v21 = vcombine.high %v762_v14, %v766_v15  ;;  %v769_v22 = vld [vmem:[#allocation7 + $0x2040] sm:$0xff]  ;;  %v12626_v0 = vcombine.low %v794_v55, %v798_v56  ;;  %v838_v55 = vld [vmem:[#allocation7 + $0x26a8] sm:$0xff] }
 0x192   :  { %v12600_v37 = vcombine.low %v769_v22, %v773_v23  ;;  %v805_v6 = vld [vmem:[#allocation7 + $0x23a0] sm:$0xff] }
 0x193   :  { %v837_v53 = vld [vmem:[#allocation7 + $0x26a0] sm:$0xff] }
 0x194   :  { %3629 = vmatpush1.bf16.msra.mxu0 %v12544_v28  ;;  %3793 = vmatpush1.bf16.msra.mxu1 %v12546_v29  ;;  %v12594_v28 = vcombine.low %v762_v14, %v766_v15  ;;  %v12601_v29 = vcombine.high %v769_v22, %v773_v23  ;;  %v12633_v14 = vcombine.high %v801_v5, %v805_v6 }
 0x195   :  { %3630 = vmatprep.subr.bf16.mxu0 %v12553_v30  ;;  %3794 = vmatprep.subr.bf16.mxu1 %v12555_v31  ;;  %v12603_v30 = vcombine.high %v770_v24, %v774_v26  ;;  %v777_v31 = vld [vmem:[#allocation7 + $0x2100] sm:$0xff] }
 0x198   :  { %3631 = vmatpush1.bf16.msra.mxu0 %v12552_v11  ;;  %3795 = vmatpush1.bf16.msra.mxu1 %v12554_v38  ;;  %v12602_v11 = vcombine.low %v770_v24, %v774_v26  ;;  %v12609_v38 = vcombine.high %v777_v31, %v781_v32  ;;  %v12632_v24 = vcombine.low %v801_v5, %v805_v6  ;;  %v842_v5 = vld [vmem:[#allocation7 + $0x2708] sm:$0xff] }
 0x199   :  { %3632 = vmatprep.subr.bf16.mxu0 %v12561_v39  ;;  %3796 = vmatprep.subr.bf16.mxu1 %v12563_v40  ;;  %v12611_v39 = vcombine.high %v778_v35, %v782_v36  ;;  %v785_v40 = vld [vmem:[#allocation7 + $0x21c0] sm:$0xff]  ;;  %v846_v6 = vld [vmem:[#allocation7 + $0x2768] sm:$0xff] }
 0x19c   :  { %3633 = vmatpush1.bf16.msra.mxu0 %v12560_v46  ;;  %3797 = vmatpush1.bf16.msra.mxu1 %v12562_v34  ;;  %v12608_v46 = vcombine.low %v777_v31, %v781_v32  ;;  %v12610_v34 = vcombine.low %v778_v35, %v782_v36  ;;  %v822_v31 = vld [vmem:[#allocation7 + $0x2528] sm:$0xff] }
 0x19d   :  { %3634 = vmatprep.subr.bf16.mxu0 %v12569_v51  ;;  %3798 = vmatprep.subr.bf16.mxu1 %v12571_v52  ;;  %v12617_v51 = vcombine.high %v785_v40, %v789_v41  ;;  %v12619_v52 = vcombine.high %v786_v42, %v790_v43 }
 0x1a0   :  { %3635 = vmatpush1.bf16.msra.mxu0 %v12568_v58  ;;  %3799 = vmatpush1.bf16.msra.mxu1 %v12570_v60  ;;  %v14349_v58 = vsub.s32 7, %v14284_v44  ;;  %v140_v60 = vrot.slane %v14286_v47, %v14346_v45 }
 0x1a1   :  { %3636 = vmatprep.subr.bf16.mxu0 %v12577_v62  ;;  %3800 = vmatprep.subr.bf16.mxu1 %v12579_v63  ;;  %v12616_v62 = vcombine.low %v785_v40, %v789_v41  ;;  %v12618_v63 = vcombine.low %v786_v42, %v790_v43  ;;  %v826_v40 = vld [vmem:[#allocation7 + $0x2588] sm:$0xff] }
 0x1a2   :  { %v830_v41 = vld [vmem:[#allocation7 + $0x25e8] sm:$0xff] }
 0x1a4   :  { %3637 = vmatpush1.bf16.msra.mxu0 %v12576_v7  ;;  %3801 = vmatpush1.bf16.msra.mxu1 %v12578_v8  ;;  %v802_v7 = vld [vmem:[#allocation7 + $0x2348] sm:$0xff] }
 0x1a5   :  { %3638 = vmatprep.subr.bf16.mxu0 %v12585_v10  ;;  %3802 = vmatprep.subr.bf16.mxu1 %v12587_v12  ;;  %v806_v8 = vld [vmem:[#allocation7 + $0x23a8] sm:$0xff]  ;;  %v152_v10 = vrot.slane %v14286_v47, %v14349_v58  ;;  %v362_v12 = vadd.f32 %v14317_v33, %v140_v60  ;;  %v12658_v60 = vcombine.low %v826_v40, %v830_v41 }
 0x1a6   :  { %v12635_v15 = vcombine.high %v802_v7, %v806_v8  ;;  %v12634_v26 = vcombine.low %v802_v7, %v806_v8  ;;  %v12666_v8 = vcombine.low %v834_v54, %v838_v55 }
 0x1a7   :  { %v405_v22 = vadd.f32 %v14334_v25, %v152_v10  ;;  %v413_v23 = vmax.f32 %v362_v12, 0.0  ;;  %v12675_v12 = vcombine.high %v842_v5, %v846_v6 }
 0x1a8   :  { %3639 = vmatpush1.bf16.msra.mxu0 %v12584_v18  ;;  %3803 = vmatpush1.bf16.msra.mxu1 %v12586_v19  ;;  %v809_v18 = vld [vmem:[#allocation7 + $0x2400] sm:$0xff] }
 0x1a9   :  { %3640 = vmatprep.subr.bf16.mxu0 %v12593_v20  ;;  %3804 = vmatprep.subr.bf16.mxu1 %v12595_v21  ;;  %v813_v19 = vld [vmem:[#allocation7 + $0x2460] sm:$0xff]  ;;  %v810_v20 = vld [vmem:[#allocation7 + $0x2408] sm:$0xff]  ;;  %v416_v32 = vmax.f32 %v405_v22, 0.0  ;;  %v14357_v35 = vpack.c.bf16 %v413_v23, %v413_v23 }
 0x1aa   :  { %v814_v21 = vld [vmem:[#allocation7 + $0x2468] sm:$0xff]  ;;  %v12641_v33 = vcombine.high %v809_v18, %v813_v19  ;;  %v12640_v36 = vcombine.low %v809_v18, %v813_v19  ;;  %v12674_v19 = vcombine.low %v842_v5, %v846_v6  ;;  %v857_v22 = vld [vmem:[#allocation7 + $0x2880] sm:$0xff] }
 0x1ab   :  { %v12642_v25 = vcombine.low %v810_v20, %v814_v21  ;;  %v14359_v42 = vpack.c.bf16 %v416_v32, %v416_v32  ;;  %v861_v23 = vld [vmem:[#allocation7 + $0x28e0] sm:$0xff]  ;;  %v866_v32 = vld [vmem:[#allocation7 + $0x2948] sm:$0xff] }
 0x1ac   :  { %3641 = vmatpush1.bf16.msra.mxu0 %v12592_v27  ;;  %3805 = vmatpush1.bf16.msra.mxu1 %v12594_v28  ;;  %v12643_v27 = vcombine.high %v810_v20, %v814_v21  ;;  %v817_v28 = vld [vmem:[#allocation7 + $0x24c0] sm:$0xff]  ;;  %v890_v6 = vld [vmem:[#allocation7 + $0x2b88] sm:$0xff] }
 0x1ad   :  { %3642 = vmatprep.subr.bf16.mxu0 %v12601_v29  ;;  %3806 = vmatprep.subr.bf16.mxu1 %v12603_v30  ;;  %v821_v29 = vld [vmem:[#allocation7 + $0x2520] sm:$0xff]  ;;  %v818_v30 = vld [vmem:[#allocation7 + $0x24c8] sm:$0xff] }
 0x1ae   :  { %v12648_v43 = vcombine.low %v817_v28, %v821_v29  ;;  %v893_v5 = vld [vmem:[#allocation7 + $0x2be0] sm:$0xff] }
 0x1b0   :  { %3643 = vmatpush1.bf16.msra.mxu0 %v12600_v37  ;;  %3807 = vmatpush1.bf16.msra.mxu1 %v12602_v11  ;;  %v12649_v37 = vcombine.high %v817_v28, %v821_v29  ;;  %v12651_v11 = vcombine.high %v818_v30, %v822_v31  ;;  %v12689_v28 = vcombine.high %v857_v22, %v861_v23 }
 0x1b1   :  { %3644 = vmatprep.subr.bf16.mxu0 %v12609_v38  ;;  %3808 = vmatprep.subr.bf16.mxu1 %v12611_v39  ;;  %v825_v38 = vld [vmem:[#allocation7 + $0x2580] sm:$0xff] }
 0x1b2   :  { %v829_v39 = vld [vmem:[#allocation7 + $0x25e0] sm:$0xff] }
 0x1b3   :  { %v12656_v56 = vcombine.low %v825_v38, %v829_v39 }
 0x1b4   :  { %3645 = vmatpush1.bf16.msra.mxu0 %v12608_v46  ;;  %3809 = vmatpush1.bf16.msra.mxu1 %v12610_v34  ;;  %v12650_v46 = vcombine.low %v818_v30, %v822_v31  ;;  %v12657_v34 = vcombine.high %v825_v38, %v829_v39  ;;  %v865_v30 = vld [vmem:[#allocation7 + $0x2940] sm:$0xff] }
 0x1b5   :  { %3646 = vmatprep.subr.bf16.mxu0 %v12617_v51  ;;  %3810 = vmatprep.subr.bf16.mxu1 %v12619_v52  ;;  %v12659_v51 = vcombine.high %v826_v40, %v830_v41  ;;  %v833_v52 = vld [vmem:[#allocation7 + $0x2640] sm:$0xff]  ;;  %v874_v41 = vld [vmem:[#allocation7 + $0x2a08] sm:$0xff] }
 0x1b6   :  { %v12664_v7 = vcombine.low %v833_v52, %v837_v53  ;;  %v869_v31 = vld [vmem:[#allocation7 + $0x29a0] sm:$0xff] }
 0x1b7   :  { %v873_v39 = vld [vmem:[#allocation7 + $0x2a00] sm:$0xff] }
 0x1b8   :  { %3647 = vmatpush1.bf16.msra.mxu0 %v12616_v62  ;;  %3811 = vmatpush1.bf16.msra.mxu1 %v12618_v63  ;;  %v12665_v62 = vcombine.high %v833_v52, %v837_v53  ;;  %v12667_v63 = vcombine.high %v834_v54, %v838_v55  ;;  %v877_v40 = vld [vmem:[#allocation7 + $0x2a60] sm:$0xff]  ;;  %v882_v55 = vld [vmem:[#allocation7 + $0x2ac8] sm:$0xff] }
 0x1b9   :  { %3648 = vmatprep.subr.bf16.mxu0 %v12625_v1  ;;  %3812 = vmatprep.subr.bf16.mxu1 %v12627_v3  ;;  %v841_v1 = vld [vmem:[#allocation7 + $0x2700] sm:$0xff] }
 0x1ba   :  { %v845_v3 = vld [vmem:[#allocation7 + $0x2760] sm:$0xff] }
 0x1bb   :  { %v12673_v10 = vcombine.high %v841_v1, %v845_v3  ;;  %v12672_v18 = vcombine.low %v841_v1, %v845_v3  ;;  %v881_v53 = vld [vmem:[#allocation7 + $0x2ac0] sm:$0xff] }
 0x1bc   :  { %3649 = vmatpush1.bf16.msra.mxu0 %v12624_v13  ;;  %3813 = vmatpush1.bf16.msra.mxu1 %v12626_v0  ;;  %v849_v13 = vld [vmem:[#allocation7 + $0x27c0] sm:$0xff] }
 0x1bd   :  { %3650 = vmatprep.subr.bf16.mxu0 %v12633_v14  ;;  %3814 = vmatprep.subr.bf16.mxu1 %v12635_v15  ;;  %v853_v0 = vld [vmem:[#allocation7 + $0x2820] sm:$0xff]  ;;  %v850_v14 = vld [vmem:[#allocation7 + $0x27c8] sm:$0xff] }
 0x1be   :  { %v854_v15 = vld [vmem:[#allocation7 + $0x2828] sm:$0xff]  ;;  %v12681_v20 = vcombine.high %v849_v13, %v853_v0  ;;  %v885_v54 = vld [vmem:[#allocation7 + $0x2b20] sm:$0xff] }
 0x1bf   :  { %v12683_v21 = vcombine.high %v850_v14, %v854_v15  ;;  %v889_v3 = vld [vmem:[#allocation7 + $0x2b80] sm:$0xff] }
 0x1c0   :  { %3651 = vmatpush1.bf16.msra.mxu0 %v12632_v24  ;;  %3815 = vmatpush1.bf16.msra.mxu1 %v12634_v26  ;;  %v858_v24 = vld [vmem:[#allocation7 + $0x2888] sm:$0xff] }
 0x1c1   :  { %3661 = vmatprep.subr.bf16.mxu0 %v12641_v33  ;;  %3825 = vmatprep.subr.bf16.mxu1 %v12643_v27  ;;  %v862_v26 = vld [vmem:[#allocation7 + $0x28e8] sm:$0xff]  ;;  %v12680_v33 = vcombine.low %v849_v13, %v853_v0  ;;  %v12682_v27 = vcombine.low %v850_v14, %v854_v15  ;;  %v897_v0 = vld [vmem:[#allocation7 + $0x2c40] sm:$0xff] }
 0x1c2   :  { %v12691_v29 = vcombine.high %v858_v24, %v862_v26  ;;  %v901_v14 = vld [vmem:[#allocation7 + $0x2ca0] sm:$0xff]  ;;  %v898_v15 = vld [vmem:[#allocation7 + $0x2c48] sm:$0xff] }
 0x1c3   :  { %3653 = vmatmul.mubr.bf16.vlgmr.msra.gmra.mrb[0].mxu0 %v14357_v35  ;;  %3817 = vmatmul.mubr.bf16.vlgmr.msra.gmra.mrb[16].mxu1 %v14357_v35 }
 0x1c4   :  { %3662 = vmatpush1.bf16.msra.mxu0 %v12640_v36  ;;  %3826 = vmatpush1.bf16.msra.mxu1 %v12642_v25  ;;  %v870_v36 = vld [vmem:[#allocation7 + $0x29a8] sm:$0xff]  ;;  %v12688_v25 = vcombine.low %v857_v22, %v861_v23  ;;  %v905_v23 = vld [vmem:[#allocation7 + $0x2d00] sm:$0xff] }
 0x1c5   :  { %3663 = vmatprep.subr.bf16.mxu0 %v12649_v37  ;;  %3827 = vmatprep.subr.bf16.mxu1 %v12651_v11  ;;  %v12690_v37 = vcombine.low %v858_v24, %v862_v26  ;;  %v12697_v11 = vcombine.high %v865_v30, %v869_v31  ;;  %v12699_v38 = vcombine.high %v866_v32, %v870_v36  ;;  %v909_v24 = vld [vmem:[#allocation7 + $0x2d60] sm:$0xff]  ;;  %v906_v26 = vld [vmem:[#allocation7 + $0x2d08] sm:$0xff] }
 0x1c6   :  { %3693 = vmatprep.mubr.bf16.mxu0 %v14359_v42  ;;  %3857 = vmatprep.mubr.bf16.mxu1 %v14359_v42 }
 0x1c8   :  { %3664 = vmatpush1.bf16.msra.mxu0 %v12648_v43  ;;  %3828 = vmatpush1.bf16.msra.mxu1 %v12650_v46  ;;  %v878_v43 = vld [vmem:[#allocation7 + $0x2a68] sm:$0xff]  ;;  %v12696_v46 = vcombine.low %v865_v30, %v869_v31  ;;  %v913_v31 = vld [vmem:[#allocation7 + $0x2dc0] sm:$0xff] }
 0x1c9   :  { %3665 = vmatprep.subr.bf16.mxu0 %v12657_v34  ;;  %3829 = vmatprep.subr.bf16.mxu1 %v12659_v51  ;;  %v12698_v34 = vcombine.low %v866_v32, %v870_v36  ;;  %v12705_v51 = vcombine.high %v873_v39, %v877_v40  ;;  %v12707_v52 = vcombine.high %v874_v41, %v878_v43  ;;  %v917_v32 = vld [vmem:[#allocation7 + $0x2e20] sm:$0xff]  ;;  %v914_v36 = vld [vmem:[#allocation7 + $0x2dc8] sm:$0xff] }
 0x1cc   :  { %3666 = vmatpush1.bf16.msra.mxu0 %v12656_v56  ;;  %3830 = vmatpush1.bf16.msra.mxu1 %v12658_v60  ;;  %v886_v56 = vld [vmem:[#allocation7 + $0x2b28] sm:$0xff]  ;;  %v12704_v60 = vcombine.low %v873_v39, %v877_v40  ;;  %v12745_v39 = vcombine.high %v913_v31, %v917_v32 }
 0x1cd   :  { %3667 = vmatprep.subr.bf16.mxu0 %v12665_v62  ;;  %3831 = vmatprep.subr.bf16.mxu1 %v12667_v63  ;;  %v12706_v62 = vcombine.low %v874_v41, %v878_v43  ;;  %v12713_v63 = vcombine.high %v881_v53, %v885_v54  ;;  %v12715_v1 = vcombine.high %v882_v55, %v886_v56  ;;  %v921_v41 = vld [vmem:[#allocation7 + $0x2e80] sm:$0xff] }
 0x1ce   :  { %v925_v43 = vld [vmem:[#allocation7 + $0x2ee0] sm:$0xff] }
 0x1d0   :  { %3668 = vmatpush1.bf16.msra.mxu0 %v12664_v7  ;;  %3832 = vmatpush1.bf16.msra.mxu1 %v12666_v8  ;;  %v894_v7 = vld [vmem:[#allocation7 + $0x2be8] sm:$0xff]  ;;  %v12712_v8 = vcombine.low %v881_v53, %v885_v54  ;;  %v12753_v53 = vcombine.high %v921_v41, %v925_v43 }
 0x1d1   :  { %3669 = vmatprep.subr.bf16.mxu0 %v12673_v10  ;;  %3833 = vmatprep.subr.bf16.mxu1 %v12675_v12  ;;  %v12714_v10 = vcombine.low %v882_v55, %v886_v56  ;;  %v12721_v12 = vcombine.high %v889_v3, %v893_v5  ;;  %v12723_v13 = vcombine.high %v890_v6, %v894_v7  ;;  %v929_v55 = vld [vmem:[#allocation7 + $0x2f40] sm:$0xff] }
 0x1d2   :  { %v933_v56 = vld [vmem:[#allocation7 + $0x2fa0] sm:$0xff] }
 0x1d4   :  { %3670 = vmatpush1.bf16.msra.mxu0 %v12672_v18  ;;  %3834 = vmatpush1.bf16.msra.mxu1 %v12674_v19  ;;  %v902_v18 = vld [vmem:[#allocation7 + $0x2ca8] sm:$0xff]  ;;  %v12720_v19 = vcombine.low %v889_v3, %v893_v5 }
 0x1d5   :  { %3671 = vmatprep.subr.bf16.mxu0 %v12681_v20  ;;  %3835 = vmatprep.subr.bf16.mxu1 %v12683_v21  ;;  %v12722_v20 = vcombine.low %v890_v6, %v894_v7  ;;  %v12729_v21 = vcombine.high %v897_v0, %v901_v14  ;;  %v12731_v22 = vcombine.high %v898_v15, %v902_v18  ;;  %v427_v6 = vld [vmem:[#allocation7 + $0x10] sm:$0xff] }
 0x1d6   :  { %v431_v7 = vld [vmem:[#allocation7 + $0x70] sm:$0xff] }
 0x1d8   :  { %3672 = vmatpush1.bf16.msra.mxu0 %v12680_v33  ;;  %3836 = vmatpush1.bf16.msra.mxu1 %v12682_v27  ;;  %v910_v33 = vld [vmem:[#allocation7 + $0x2d68] sm:$0xff]  ;;  %v12728_v27 = vcombine.low %v897_v0, %v901_v14 }
 0x1d9   :  { %3673 = vmatprep.subr.bf16.mxu0 %v12689_v28  ;;  %3837 = vmatprep.subr.bf16.mxu1 %v12691_v29  ;;  %v12730_v28 = vcombine.low %v898_v15, %v902_v18  ;;  %v12737_v29 = vcombine.high %v905_v23, %v909_v24  ;;  %v12739_v30 = vcombine.high %v906_v26, %v910_v33  ;;  %v435_v15 = vld [vmem:[#allocation7 + $0xd0] sm:$0xff] }
 0x1dc   :  { %3674 = vmatpush1.bf16.msra.mxu0 %v12688_v25  ;;  %3838 = vmatpush1.bf16.msra.mxu1 %v12690_v37  ;;  %v918_v25 = vld [vmem:[#allocation7 + $0x2e28] sm:$0xff]  ;;  %v14366_v37 = vsub.s32 6, %v14284_v44 }
 0x1dd   :  { %3675 = vmatprep.subr.bf16.mxu0 %v12697_v11  ;;  %3839 = vmatprep.subr.bf16.mxu1 %v12699_v38  ;;  %v12736_v11 = vcombine.low %v905_v23, %v909_v24  ;;  %v12738_v38 = vcombine.low %v906_v26, %v910_v33  ;;  %v12747_v40 = vcombine.high %v914_v36, %v918_v25  ;;  %v443_v33 = vld [vmem:[#allocation7 + $0x190] sm:$0xff] }
 0x1de   :  { %v12746_v44 = vcombine.low %v914_v36, %v918_v25  ;;  %v451_v25 = vld [vmem:[#allocation7 + $0x250] sm:$0xff] }
 0x1e0   :  { %3676 = vmatpush1.bf16.msra.mxu0 %v12696_v46  ;;  %3840 = vmatpush1.bf16.msra.mxu1 %v12698_v34  ;;  %v922_v46 = vld [vmem:[#allocation7 + $0x2e88] sm:$0xff] }
 0x1e1   :  { %3677 = vmatprep.subr.bf16.mxu0 %v12705_v51  ;;  %3841 = vmatprep.subr.bf16.mxu1 %v12707_v52  ;;  %v926_v34 = vld [vmem:[#allocation7 + $0x2ee8] sm:$0xff]  ;;  %v148_v51 = vrot.slane %v14286_v47, %v14366_v37  ;;  %v12744_v52 = vcombine.low %v913_v31, %v917_v32  ;;  %v12761_v47 = vcombine.high %v929_v55, %v933_v56 }
 0x1e2   :  { %v12755_v54 = vcombine.high %v922_v46, %v926_v34  ;;  %v12754_v3 = vcombine.low %v922_v46, %v926_v34  ;;  %v459_v34 = vld [vmem:[#allocation7 + $0x310] sm:$0xff] }
 0x1e4   :  { %3678 = vmatpush1.bf16.msra.mxu0 %v12704_v60  ;;  %3842 = vmatpush1.bf16.msra.mxu1 %v12706_v62  ;;  %v930_v60 = vld [vmem:[#allocation7 + $0x2f48] sm:$0xff] }
 0x1e5   :  { %3679 = vmatprep.subr.bf16.mxu0 %v12713_v63  ;;  %3843 = vmatprep.subr.bf16.mxu1 %v12715_v1  ;;  %v934_v62 = vld [vmem:[#allocation7 + $0x2fa8] sm:$0xff]  ;;  %v403_v63 = vadd.f32 %v14329_v16, %v148_v51  ;;  %v12752_v1 = vcombine.low %v921_v41, %v925_v43  ;;  %v12261_v16 = vcombine.high %v427_v6, %v431_v7  ;;  %v463_v51 = vld [vmem:[#allocation7 + $0x370] sm:$0xff] }
 0x1e6   :  { %v12763_v5 = vcombine.high %v930_v60, %v934_v62  ;;  %v12762_v0 = vcombine.low %v930_v60, %v934_v62  ;;  %v471_v60 = vld [vmem:[#allocation7 + $0x430] sm:$0xff]  ;;  %v468_v62 = vld [vmem:[#allocation7 + $0x3d8] sm:$0xff] }
 0x1e8   :  { %3680 = vmatpush1.bf16.msra.mxu0 %v12712_v8  ;;  %3844 = vmatpush1.bf16.msra.mxu1 %v12714_v10  ;;  %v428_v8 = vld [vmem:[#allocation7 + $0x18] sm:$0xff] }
 0x1e9   :  { %3681 = vmatprep.subr.bf16.mxu0 %v12721_v12  ;;  %3845 = vmatprep.subr.bf16.mxu1 %v12723_v13  ;;  %v432_v10 = vld [vmem:[#allocation7 + $0x78] sm:$0xff]  ;;  %v415_v12 = vmax.f32 %v403_v63, 0.0  ;;  %v12760_v13 = vcombine.low %v929_v55, %v933_v56  ;;  %v467_v56 = vld [vmem:[#allocation7 + $0x3d0] sm:$0xff] }
 0x1ea   :  { %v12263_v14 = vcombine.high %v428_v8, %v432_v10  ;;  %v12262_v23 = vcombine.low %v428_v8, %v432_v10  ;;  %v472_v63 = vld [vmem:[#allocation7 + $0x438] sm:$0xff] }
 0x1eb   :  { %v14371_v18 = vpack.c.bf16 %v415_v12, %v415_v12  ;;  %v476_v8 = vld [vmem:[#allocation7 + $0x498] sm:$0xff]  ;;  %v12300_v12 = vcombine.low %v467_v56, %v471_v60 }
 0x1ec   :  { %3682 = vmatpush1.bf16.msra.mxu0 %v12720_v19  ;;  %3846 = vmatpush1.bf16.msra.mxu1 %v12722_v20  ;;  %v439_v19 = vld [vmem:[#allocation7 + $0x130] sm:$0xff]  ;;  %v436_v20 = vld [vmem:[#allocation7 + $0xd8] sm:$0xff] }
 0x1ed   :  { %3683 = vmatprep.subr.bf16.mxu0 %v12729_v21  ;;  %3847 = vmatprep.subr.bf16.mxu1 %v12731_v22  ;;  %v440_v21 = vld [vmem:[#allocation7 + $0x138] sm:$0xff]  ;;  %v12260_v22 = vcombine.low %v427_v6, %v431_v7  ;;  %v12269_v24 = vcombine.high %v435_v15, %v439_v19  ;;  %v475_v6 = vld [vmem:[#allocation7 + $0x490] sm:$0xff] }
 0x1ee   :  { %v12271_v26 = vcombine.high %v436_v20, %v440_v21  ;;  %v12270_v31 = vcombine.low %v436_v20, %v440_v21  ;;  %v479_v7 = vld [vmem:[#allocation7 + $0x4f0] sm:$0xff]  ;;  %v480_v10 = vld [vmem:[#allocation7 + $0x4f8] sm:$0xff] }
 0x1ef   :  { %v488_v20 = vld [vmem:[#allocation7 + $0x5b8] sm:$0xff]  ;;  %v12308_v21 = vcombine.low %v475_v6, %v479_v7 }
 0x1f0   :  { %3684 = vmatpush1.bf16.msra.mxu0 %v12728_v27  ;;  %3848 = vmatpush1.bf16.msra.mxu1 %v12730_v28  ;;  %v447_v27 = vld [vmem:[#allocation7 + $0x1f0] sm:$0xff]  ;;  %v444_v28 = vld [vmem:[#allocation7 + $0x198] sm:$0xff] }
 0x1f1   :  { %3685 = vmatprep.subr.bf16.mxu0 %v12737_v29  ;;  %3849 = vmatprep.subr.bf16.mxu1 %v12739_v30  ;;  %v448_v29 = vld [vmem:[#allocation7 + $0x1f8] sm:$0xff]  ;;  %v12268_v30 = vcombine.low %v435_v15, %v439_v19  ;;  %v12277_v32 = vcombine.high %v443_v33, %v447_v27  ;;  %v487_v15 = vld [vmem:[#allocation7 + $0x5b0] sm:$0xff] }
 0x1f2   :  { %v12279_v36 = vcombine.high %v444_v28, %v448_v29  ;;  %v12278_v41 = vcombine.low %v444_v28, %v448_v29  ;;  %v484_v19 = vld [vmem:[#allocation7 + $0x558] sm:$0xff] }
 0x1f3   :  { %v496_v28 = vld [vmem:[#allocation7 + $0x678] sm:$0xff] }
 0x1f4   :  { %3686 = vmatpush1.bf16.msra.mxu0 %v12736_v11  ;;  %3850 = vmatpush1.bf16.msra.mxu1 %v12738_v38  ;;  %v455_v11 = vld [vmem:[#allocation7 + $0x2b0] sm:$0xff]  ;;  %v452_v38 = vld [vmem:[#allocation7 + $0x258] sm:$0xff] }
 0x1f5   :  { %3687 = vmatprep.subr.bf16.mxu0 %v12745_v39  ;;  %3851 = vmatprep.subr.bf16.mxu1 %v12747_v40  ;;  %v456_v39 = vld [vmem:[#allocation7 + $0x2b8] sm:$0xff]  ;;  %v12276_v40 = vcombine.low %v443_v33, %v447_v27  ;;  %v12285_v43 = vcombine.high %v451_v25, %v455_v11  ;;  %v495_v33 = vld [vmem:[#allocation7 + $0x670] sm:$0xff] }
 0x1f6   :  { %v12287_v46 = vcombine.high %v452_v38, %v456_v39  ;;  %v492_v27 = vld [vmem:[#allocation7 + $0x618] sm:$0xff] }
 0x1f8   :  { %3688 = vmatpush1.bf16.msra.mxu0 %v12744_v52  ;;  %3852 = vmatpush1.bf16.msra.mxu1 %v12746_v44  ;;  %v464_v52 = vld [vmem:[#allocation7 + $0x378] sm:$0xff]  ;;  %v12284_v44 = vcombine.low %v451_v25, %v455_v11  ;;  %v503_v25 = vld [vmem:[#allocation7 + $0x730] sm:$0xff] }
 0x1f9   :  { %3689 = vmatprep.subr.bf16.mxu0 %v12753_v53  ;;  %3853 = vmatprep.subr.bf16.mxu1 %v12755_v54  ;;  %v12286_v53 = vcombine.low %v452_v38, %v456_v39  ;;  %v12293_v54 = vcombine.high %v459_v34, %v463_v51  ;;  %v500_v11 = vld [vmem:[#allocation7 + $0x6d8] sm:$0xff] }
 0x1fa   :  { %v504_v38 = vld [vmem:[#allocation7 + $0x738] sm:$0xff] }
 0x1fc   :  { %3690 = vmatpush1.bf16.msra.mxu0 %v12752_v1  ;;  %3854 = vmatpush1.bf16.msra.mxu1 %v12754_v3  ;;  %v12292_v1 = vcombine.low %v459_v34, %v463_v51  ;;  %v511_v34 = vld [vmem:[#allocation7 + $0x7f0] sm:$0xff]  ;;  %v508_v51 = vld [vmem:[#allocation7 + $0x798] sm:$0xff] }
 0x1fd   :  { %3691 = vmatprep.subr.bf16.mxu0 %v12761_v47  ;;  %3855 = vmatprep.subr.bf16.mxu1 %v12763_v5  ;;  %v12301_v47 = vcombine.high %v467_v56, %v471_v60  ;;  %v12303_v5 = vcombine.high %v468_v62, %v472_v63  ;;  %v519_v56 = vld [vmem:[#allocation7 + $0x8b0] sm:$0xff]  ;;  %v516_v60 = vld [vmem:[#allocation7 + $0x858] sm:$0xff] }
 0x200   :  { %3692 = vmatpush1.bf16.msra.mxu0 %v12760_v13  ;;  %3856 = vmatpush1.bf16.msra.mxu1 %v12762_v0  ;;  %v12302_v13 = vcombine.low %v468_v62, %v472_v63  ;;  %v12309_v0 = vcombine.high %v475_v6, %v479_v7  ;;  %v520_v62 = vld [vmem:[#allocation7 + $0x8b8] sm:$0xff]  ;;  %v527_v6 = vld [vmem:[#allocation7 + $0x970] sm:$0xff] }
 0x201   :  { %3866 = vmatprep.subr.bf16.mxu0 %v12261_v16  ;;  %4030 = vmatprep.subr.bf16.mxu1 %v12263_v14  ;;  %v12311_v16 = vcombine.high %v476_v8, %v480_v10  ;;  %v483_v14 = vld [vmem:[#allocation7 + $0x550] sm:$0xff]  ;;  %v524_v7 = vld [vmem:[#allocation7 + $0x918] sm:$0xff] }
 0x202   :  { %v12316_v29 = vcombine.low %v483_v14, %v487_v15 }
 0x203   :  { %3694 = vmatmul.mubr.bf16.vlgmr.msra.gmra.mrb[0].mxu0 %v14371_v18  ;;  %3858 = vmatmul.mubr.bf16.vlgmr.msra.gmra.mrb[16].mxu1 %v14371_v18 }
 0x204   :  { %3867 = vmatpush1.bf16.msra.mxu0 %v12260_v22  ;;  %3898 = vmatprep.mubr.bf16.mxu0 %v14301_v2  ;;  %v12310_v22 = vcombine.low %v476_v8, %v480_v10  ;;  %v528_v8 = vld [vmem:[#allocation7 + $0x978] sm:$0xff] }
 0x205   :  { %4031 = vmatpush1.bf16.msra.mxu1 %v12262_v23  ;;  %4062 = vmatprep.mubr.bf16.mxu1 %v14301_v2  ;;  %v460_v2 = vld [vmem:[#allocation7 + $0x318] sm:$0xff]  ;;  %v12317_v23 = vcombine.high %v483_v14, %v487_v15  ;;  %v535_v14 = vld [vmem:[#allocation7 + $0xa30] sm:$0xff] }
 0x206   :  { %3868 = vmatprep.subr.bf16.mxu0 %v12269_v24  ;;  %4032 = vmatprep.subr.bf16.mxu1 %v12271_v26  ;;  %v12295_v55 = vcombine.high %v460_v2, %v464_v52  ;;  %v12294_v3 = vcombine.low %v460_v2, %v464_v52  ;;  %v12319_v24 = vcombine.high %v484_v19, %v488_v20  ;;  %v491_v26 = vld [vmem:[#allocation7 + $0x610] sm:$0xff]  ;;  %v512_v2 = vld [vmem:[#allocation7 + $0x7f8] sm:$0xff] }
 0x207   :  { %v12324_v39 = vcombine.low %v491_v26, %v495_v33  ;;  %v532_v15 = vld [vmem:[#allocation7 + $0x9d8] sm:$0xff] }
 0x208   :  { %3869 = vmatpush1.bf16.msra.mxu0 %v12268_v30  ;;  %v12318_v30 = vcombine.low %v484_v19, %v488_v20  ;;  %v536_v19 = vld [vmem:[#allocation7 + $0xa38] sm:$0xff] }
 0x209   :  { %4033 = vmatpush1.bf16.msra.mxu1 %v12270_v31  ;;  %3870 = vmatprep.subr.bf16.mxu0 %v12277_v32  ;;  %v12325_v31 = vcombine.high %v491_v26, %v495_v33  ;;  %v12327_v32 = vcombine.high %v492_v27, %v496_v28  ;;  %v543_v26 = vld [vmem:[#allocation7 + $0xaf0] sm:$0xff]  ;;  %v540_v33 = vld [vmem:[#allocation7 + $0xa98] sm:$0xff] }
 0x20a   :  { %4034 = vmatprep.subr.bf16.mxu1 %v12279_v36  ;;  %v499_v36 = vld [vmem:[#allocation7 + $0x6d0] sm:$0xff] }
 0x20b   :  { %v12332_v52 = vcombine.low %v499_v36, %v503_v25 }
 0x20c   :  { %3871 = vmatpush1.bf16.msra.mxu0 %v12276_v40  ;;  %v12326_v40 = vcombine.low %v492_v27, %v496_v28  ;;  %v544_v27 = vld [vmem:[#allocation7 + $0xaf8] sm:$0xff] }
 0x20d   :  { %4035 = vmatpush1.bf16.msra.mxu1 %v12278_v41  ;;  %3872 = vmatprep.subr.bf16.mxu0 %v12285_v43  ;;  %v12333_v41 = vcombine.high %v499_v36, %v503_v25  ;;  %v12335_v43 = vcombine.high %v500_v11, %v504_v38  ;;  %v551_v36 = vld [vmem:[#allocation7 + $0xbb0] sm:$0xff]  ;;  %v548_v25 = vld [vmem:[#allocation7 + $0xb58] sm:$0xff] }
 0x20e   :  { %4036 = vmatprep.subr.bf16.mxu1 %v12287_v46  ;;  %v507_v46 = vld [vmem:[#allocation7 + $0x790] sm:$0xff] }
 0x20f   :  { %v12340_v63 = vcombine.low %v507_v46, %v511_v34 }
 0x210   :  { %3873 = vmatpush1.bf16.msra.mxu0 %v12284_v44  ;;  %v12334_v44 = vcombine.low %v500_v11, %v504_v38  ;;  %v552_v11 = vld [vmem:[#allocation7 + $0xbb8] sm:$0xff] }
 0x211   :  { %4037 = vmatpush1.bf16.msra.mxu1 %v12286_v53  ;;  %3874 = vmatprep.subr.bf16.mxu0 %v12293_v54  ;;  %v12341_v53 = vcombine.high %v507_v46, %v511_v34  ;;  %v12343_v54 = vcombine.high %v508_v51, %v512_v2  ;;  %v559_v46 = vld [vmem:[#allocation7 + $0xc70] sm:$0xff]  ;;  %v556_v34 = vld [vmem:[#allocation7 + $0xc18] sm:$0xff] }
 0x212   :  { %4038 = vmatprep.subr.bf16.mxu1 %v12295_v55  ;;  %v515_v55 = vld [vmem:[#allocation7 + $0x850] sm:$0xff] }
 0x213   :  { %v12348_v10 = vcombine.low %v515_v55, %v519_v56 }
 0x214   :  { %3875 = vmatpush1.bf16.msra.mxu0 %v12292_v1  ;;  %v12342_v1 = vcombine.low %v508_v51, %v512_v2  ;;  %v560_v51 = vld [vmem:[#allocation7 + $0xc78] sm:$0xff] }
 0x215   :  { %4039 = vmatpush1.bf16.msra.mxu1 %v12294_v3  ;;  %3876 = vmatprep.subr.bf16.mxu0 %v12301_v47  ;;  %v12349_v3 = vcombine.high %v515_v55, %v519_v56  ;;  %v12351_v47 = vcombine.high %v516_v60, %v520_v62  ;;  %v567_v55 = vld [vmem:[#allocation7 + $0xd30] sm:$0xff] }
 0x216   :  { %4040 = vmatprep.subr.bf16.mxu1 %v12303_v5  ;;  %v523_v5 = vld [vmem:[#allocation7 + $0x910] sm:$0xff] }
 0x217   :  { %v12356_v20 = vcombine.low %v523_v5, %v527_v6 }
 0x218   :  { %3877 = vmatpush1.bf16.msra.mxu0 %v12300_v12  ;;  %v12350_v12 = vcombine.low %v516_v60, %v520_v62  ;;  %v564_v60 = vld [vmem:[#allocation7 + $0xcd8] sm:$0xff] }
 0x219   :  { %4041 = vmatpush1.bf16.msra.mxu1 %v12302_v13  ;;  %3878 = vmatprep.subr.bf16.mxu0 %v12309_v0  ;;  %v12357_v13 = vcombine.high %v523_v5, %v527_v6  ;;  %v12359_v0 = vcombine.high %v524_v7, %v528_v8  ;;  %v568_v62 = vld [vmem:[#allocation7 + $0xd38] sm:$0xff] }
 0x21a   :  { %4042 = vmatprep.subr.bf16.mxu1 %v12311_v16  ;;  %v531_v16 = vld [vmem:[#allocation7 + $0x9d0] sm:$0xff]  ;;  %v12399_v5 = vcombine.high %v564_v60, %v568_v62  ;;  %v572_v6 = vld [vmem:[#allocation7 + $0xd98] sm:$0xff] }
 0x21b   :  { %v12364_v28 = vcombine.low %v531_v16, %v535_v14 }
 0x21c   :  { %3879 = vmatpush1.bf16.msra.mxu0 %v12308_v21  ;;  %v12358_v21 = vcombine.low %v524_v7, %v528_v8  ;;  %v576_v7 = vld [vmem:[#allocation7 + $0xdf8] sm:$0xff] }
 0x21d   :  { %4043 = vmatpush1.bf16.msra.mxu1 %v12310_v22  ;;  %3880 = vmatprep.subr.bf16.mxu0 %v12317_v23  ;;  %v12365_v22 = vcombine.high %v531_v16, %v535_v14  ;;  %v12367_v23 = vcombine.high %v532_v15, %v536_v19  ;;  %v583_v16 = vld [vmem:[#allocation7 + $0xeb0] sm:$0xff]  ;;  %v580_v14 = vld [vmem:[#allocation7 + $0xe58] sm:$0xff] }
 0x21e   :  { %4044 = vmatprep.subr.bf16.mxu1 %v12319_v24  ;;  %v539_v24 = vld [vmem:[#allocation7 + $0xa90] sm:$0xff] }
 0x21f   :  { %v12372_v38 = vcombine.low %v539_v24, %v543_v26 }
 0x220   :  { %3881 = vmatpush1.bf16.msra.mxu0 %v12316_v29  ;;  %v12366_v29 = vcombine.low %v532_v15, %v536_v19  ;;  %v584_v15 = vld [vmem:[#allocation7 + $0xeb8] sm:$0xff] }
 0x221   :  { %4045 = vmatpush1.bf16.msra.mxu1 %v12318_v30  ;;  %3882 = vmatprep.subr.bf16.mxu0 %v12325_v31  ;;  %v12373_v30 = vcombine.high %v539_v24, %v543_v26  ;;  %v12375_v31 = vcombine.high %v540_v33, %v544_v27  ;;  %v588_v24 = vld [vmem:[#allocation7 + $0xf18] sm:$0xff] }
 0x222   :  { %4046 = vmatprep.subr.bf16.mxu1 %v12327_v32  ;;  %v547_v32 = vld [vmem:[#allocation7 + $0xb50] sm:$0xff]  ;;  %v592_v26 = vld [vmem:[#allocation7 + $0xf78] sm:$0xff] }
 0x223   :  { %v12380_v2 = vcombine.low %v547_v32, %v551_v36 }
 0x224   :  { %3883 = vmatpush1.bf16.msra.mxu0 %v12324_v39  ;;  %v12374_v39 = vcombine.low %v540_v33, %v544_v27  ;;  %v12414_v33 = vcombine.low %v580_v14, %v584_v15 }
 0x225   :  { %4047 = vmatpush1.bf16.msra.mxu1 %v12326_v40  ;;  %3884 = vmatprep.subr.bf16.mxu0 %v12333_v41  ;;  %v12381_v40 = vcombine.high %v547_v32, %v551_v36  ;;  %v12383_v41 = vcombine.high %v548_v25, %v552_v11  ;;  %v600_v32 = vld [vmem:[#allocation7 + $0x1038] sm:$0xff] }
 0x226   :  { %4048 = vmatprep.subr.bf16.mxu1 %v12335_v43  ;;  %v555_v43 = vld [vmem:[#allocation7 + $0xc10] sm:$0xff] }
 0x227   :  { %v12388_v56 = vcombine.low %v555_v43, %v559_v46 }
 0x228   :  { %3885 = vmatpush1.bf16.msra.mxu0 %v12332_v52  ;;  %v12382_v52 = vcombine.low %v548_v25, %v552_v11  ;;  %v12422_v25 = vcombine.low %v588_v24, %v592_v26 }
 0x229   :  { %4049 = vmatpush1.bf16.msra.mxu1 %v12334_v44  ;;  %3886 = vmatprep.subr.bf16.mxu0 %v12341_v53  ;;  %v12389_v44 = vcombine.high %v555_v43, %v559_v46  ;;  %v12391_v53 = vcombine.high %v556_v34, %v560_v51  ;;  %v608_v43 = vld [vmem:[#allocation7 + $0x10f8] sm:$0xff] }
 0x22a   :  { %4050 = vmatprep.subr.bf16.mxu1 %v12343_v54  ;;  %v563_v54 = vld [vmem:[#allocation7 + $0xcd0] sm:$0xff] }
 0x22b   :  { %v12396_v8 = vcombine.low %v563_v54, %v567_v55 }
 0x22c   :  { %3887 = vmatpush1.bf16.msra.mxu0 %v12340_v63  ;;  %v12390_v63 = vcombine.low %v556_v34, %v560_v51 }
 0x22d   :  { %4051 = vmatpush1.bf16.msra.mxu1 %v12342_v1  ;;  %3888 = vmatprep.subr.bf16.mxu0 %v12349_v3  ;;  %v12397_v1 = vcombine.high %v563_v54, %v567_v55  ;;  %v571_v3 = vld [vmem:[#allocation7 + $0xd90] sm:$0xff]  ;;  %v616_v54 = vld [vmem:[#allocation7 + $0x11b8] sm:$0xff] }
 0x22e   :  { %4052 = vmatprep.subr.bf16.mxu1 %v12351_v47  ;;  %v575_v47 = vld [vmem:[#allocation7 + $0xdf0] sm:$0xff] }
 0x22f   :  { %v12404_v19 = vcombine.low %v571_v3, %v575_v47 }
 0x230   :  { %3889 = vmatpush1.bf16.msra.mxu0 %v12348_v10  ;;  %v12398_v10 = vcombine.low %v564_v60, %v568_v62 }
 0x231   :  { %4053 = vmatpush1.bf16.msra.mxu1 %v12350_v12  ;;  %3890 = vmatprep.subr.bf16.mxu0 %v12357_v13  ;;  %v12405_v12 = vcombine.high %v571_v3, %v575_v47  ;;  %v12407_v13 = vcombine.high %v572_v6, %v576_v7  ;;  %v620_v3 = vld [vmem:[#allocation7 + $0x1218] sm:$0xff] }
 0x232   :  { %4054 = vmatprep.subr.bf16.mxu1 %v12359_v0  ;;  %v579_v0 = vld [vmem:[#allocation7 + $0xe50] sm:$0xff]  ;;  %v624_v47 = vld [vmem:[#allocation7 + $0x1278] sm:$0xff] }
 0x234   :  { %3891 = vmatpush1.bf16.msra.mxu0 %v12356_v20  ;;  %v12413_v20 = vcombine.high %v579_v0, %v583_v16 }
 0x235   :  { %4055 = vmatpush1.bf16.msra.mxu1 %v12358_v21  ;;  %3892 = vmatprep.subr.bf16.mxu0 %v12365_v22  ;;  %v12415_v21 = vcombine.high %v580_v14, %v584_v15  ;;  %v587_v22 = vld [vmem:[#allocation7 + $0xf10] sm:$0xff]  ;;  %v12454_v14 = vcombine.low %v620_v3, %v624_v47 }
 0x236   :  { %4056 = vmatprep.subr.bf16.mxu1 %v12367_v23  ;;  %v591_v23 = vld [vmem:[#allocation7 + $0xf70] sm:$0xff] }
 0x237   :  { %v12421_v27 = vcombine.high %v587_v22, %v591_v23  ;;  %v12420_v36 = vcombine.low %v587_v22, %v591_v23  ;;  %v640_v22 = vld [vmem:[#allocation7 + $0x13f8] sm:$0xff] }
 0x238   :  { %3893 = vmatpush1.bf16.msra.mxu0 %v12364_v28  ;;  %v12423_v28 = vcombine.high %v588_v24, %v592_v26 }
 0x239   :  { %4057 = vmatpush1.bf16.msra.mxu1 %v12366_v29  ;;  %3894 = vmatprep.subr.bf16.mxu0 %v12373_v30  ;;  %v595_v29 = vld [vmem:[#allocation7 + $0xfd0] sm:$0xff] }
 0x23a   :  { %4058 = vmatprep.subr.bf16.mxu1 %v12375_v31  ;;  %v599_v30 = vld [vmem:[#allocation7 + $0x1030] sm:$0xff]  ;;  %v596_v31 = vld [vmem:[#allocation7 + $0xfd8] sm:$0xff] }
 0x23b   :  { %v12429_v11 = vcombine.high %v595_v29, %v599_v30  ;;  %v12428_v46 = vcombine.low %v595_v29, %v599_v30  ;;  %v12430_v34 = vcombine.low %v596_v31, %v600_v32  ;;  %v648_v29 = vld [vmem:[#allocation7 + $0x14b8] sm:$0xff] }
 0x23c   :  { %3895 = vmatpush1.bf16.msra.mxu0 %v12372_v38  ;;  %v12431_v38 = vcombine.high %v596_v31, %v600_v32 }
 0x23d   :  { %4059 = vmatpush1.bf16.msra.mxu1 %v12374_v39  ;;  %3896 = vmatprep.subr.bf16.mxu0 %v12381_v40  ;;  %v603_v39 = vld [vmem:[#allocation7 + $0x1090] sm:$0xff] }
 0x23e   :  { %4060 = vmatprep.subr.bf16.mxu1 %v12383_v41  ;;  %v607_v40 = vld [vmem:[#allocation7 + $0x10f0] sm:$0xff]  ;;  %v604_v41 = vld [vmem:[#allocation7 + $0x1098] sm:$0xff] }
 0x23f   :  { %v12437_v51 = vcombine.high %v603_v39, %v607_v40  ;;  %v12436_v55 = vcombine.low %v603_v39, %v607_v40  ;;  %v656_v39 = vld [vmem:[#allocation7 + $0x1578] sm:$0xff] }
 0x240   :  { %3897 = vmatpush1.bf16.msra.mxu0 %v12380_v2  ;;  %v12439_v2 = vcombine.high %v604_v41, %v608_v43 }
 0x241   :  { %4061 = vmatpush1.bf16.msra.mxu1 %v12382_v52  ;;  %3907 = vmatprep.subr.bf16.mxu0 %v12389_v44  ;;  %v611_v52 = vld [vmem:[#allocation7 + $0x1150] sm:$0xff] }
 0x242   :  { %4071 = vmatprep.subr.bf16.mxu1 %v12391_v53  ;;  %v615_v44 = vld [vmem:[#allocation7 + $0x11b0] sm:$0xff]  ;;  %v612_v53 = vld [vmem:[#allocation7 + $0x1158] sm:$0xff] }
 0x243   :  { %3899 = vmatmul.mubr.bf16.vlgmr.msra.gmra.mrb[4].mxu0 %v14305_v4  ;;  %v12445_v60 = vcombine.high %v611_v52, %v615_v44  ;;  %v12447_v62 = vcombine.high %v612_v53, %v616_v54 }
 0x244   :  { %4063 = vmatmul.mubr.bf16.vlgmr.msra.gmra.mrb[20].mxu1 %v14305_v4  ;;  %3908 = vmatpush1.bf16.msra.mxu0 %v12388_v56  ;;  %v12406_v4 = vcombine.low %v572_v6, %v576_v7  ;;  %v12438_v56 = vcombine.low %v604_v41, %v608_v43  ;;  %v12446_v6 = vcombine.low %v612_v53, %v616_v54 }
 0x245   :  { %3939 = vmatprep.mubr.bf16.mxu0 %v14313_v17  ;;  %4072 = vmatpush1.bf16.msra.mxu1 %v12390_v63  ;;  %v619_v63 = vld [vmem:[#allocation7 + $0x1210] sm:$0xff] }
 0x246   :  { %4103 = vmatprep.mubr.bf16.mxu1 %v14313_v17  ;;  %3909 = vmatprep.subr.bf16.mxu0 %v12397_v1  ;;  %v12412_v17 = vcombine.low %v579_v0, %v583_v16  ;;  %v623_v1 = vld [vmem:[#allocation7 + $0x1270] sm:$0xff]  ;;  %v632_v0 = vld [vmem:[#allocation7 + $0x1338] sm:$0xff] }
 0x247   :  { %4073 = vmatprep.subr.bf16.mxu1 %v12399_v5  ;;  %v12444_v5 = vcombine.low %v611_v52, %v615_v44  ;;  %v12453_v7 = vcombine.high %v619_v63, %v623_v1  ;;  %v12452_v16 = vcombine.low %v619_v63, %v623_v1  ;;  %v664_v52 = vld [vmem:[#allocation7 + $0x1638] sm:$0xff] }
 0x248   :  { %3910 = vmatpush1.bf16.msra.mxu0 %v12396_v8  ;;  %v12455_v8 = vcombine.high %v620_v3, %v624_v47  ;;  %v672_v63 = vld [vmem:[#allocation7 + $0x16f8] sm:$0xff] }
 0x249   :  { %4074 = vmatpush1.bf16.msra.mxu1 %v12398_v10  ;;  %3911 = vmatprep.subr.bf16.mxu0 %v12405_v12  ;;  %v627_v10 = vld [vmem:[#allocation7 + $0x12d0] sm:$0xff] }
 0x24a   :  { %4075 = vmatprep.subr.bf16.mxu1 %v12407_v13  ;;  %v631_v12 = vld [vmem:[#allocation7 + $0x1330] sm:$0xff]  ;;  %v628_v13 = vld [vmem:[#allocation7 + $0x12d8] sm:$0xff] }
 0x24b   :  { %v12461_v15 = vcombine.high %v627_v10, %v631_v12  ;;  %v12460_v23 = vcombine.low %v627_v10, %v631_v12  ;;  %v12462_v24 = vcombine.low %v628_v13, %v632_v0  ;;  %v680_v10 = vld [vmem:[#allocation7 + $0x17b8] sm:$0xff] }
 0x24c   :  { %3912 = vmatpush1.bf16.msra.mxu0 %v12404_v19  ;;  %v12463_v19 = vcombine.high %v628_v13, %v632_v0 }
 0x24d   :  { %4076 = vmatpush1.bf16.msra.mxu1 %v12406_v4  ;;  %3913 = vmatprep.subr.bf16.mxu0 %v12413_v20  ;;  %v635_v4 = vld [vmem:[#allocation7 + $0x1390] sm:$0xff] }
 0x24e   :  { %4077 = vmatprep.subr.bf16.mxu1 %v12415_v21  ;;  %v639_v20 = vld [vmem:[#allocation7 + $0x13f0] sm:$0xff]  ;;  %v636_v21 = vld [vmem:[#allocation7 + $0x1398] sm:$0xff] }
 0x24f   :  { %v12469_v26 = vcombine.high %v635_v4, %v639_v20  ;;  %v12468_v30 = vcombine.low %v635_v4, %v639_v20  ;;  %v12470_v31 = vcombine.low %v636_v21, %v640_v22  ;;  %v688_v4 = vld [vmem:[#allocation7 + $0x1878] sm:$0xff] }
 0x250   :  { %3914 = vmatpush1.bf16.msra.mxu0 %v12412_v17  ;;  %v12471_v17 = vcombine.high %v636_v21, %v640_v22 }
 0x251   :  { %4078 = vmatpush1.bf16.msra.mxu1 %v12414_v33  ;;  %3915 = vmatprep.subr.bf16.mxu0 %v12421_v27  ;;  %v643_v33 = vld [vmem:[#allocation7 + $0x1450] sm:$0xff] }
 0x252   :  { %4079 = vmatprep.subr.bf16.mxu1 %v12423_v28  ;;  %v647_v27 = vld [vmem:[#allocation7 + $0x14b0] sm:$0xff]  ;;  %v644_v28 = vld [vmem:[#allocation7 + $0x1458] sm:$0xff] }
 0x253   :  { %v12477_v32 = vcombine.high %v643_v33, %v647_v27  ;;  %v12476_v40 = vcombine.low %v643_v33, %v647_v27  ;;  %v12478_v41 = vcombine.low %v644_v28, %v648_v29  ;;  %v692_v33 = vld [vmem:[#allocation7 + $0x18d8] sm:$0xff] }
 0x254   :  { %3916 = vmatpush1.bf16.msra.mxu0 %v12420_v36  ;;  %v12479_v36 = vcombine.high %v644_v28, %v648_v29  ;;  %v696_v27 = vld [vmem:[#allocation7 + $0x1938] sm:$0xff] }
 0x255   :  { %4080 = vmatpush1.bf16.msra.mxu1 %v12422_v25  ;;  %3917 = vmatprep.subr.bf16.mxu0 %v12429_v11  ;;  %v651_v25 = vld [vmem:[#allocation7 + $0x1510] sm:$0xff] }
 0x256   :  { %4081 = vmatprep.subr.bf16.mxu1 %v12431_v38  ;;  %v655_v11 = vld [vmem:[#allocation7 + $0x1570] sm:$0xff]  ;;  %v652_v38 = vld [vmem:[#allocation7 + $0x1518] sm:$0xff] }
 0x257   :  { %v12485_v43 = vcombine.high %v651_v25, %v655_v11  ;;  %v12484_v44 = vcombine.low %v651_v25, %v655_v11  ;;  %v12486_v53 = vcombine.low %v652_v38, %v656_v39  ;;  %v704_v25 = vld [vmem:[#allocation7 + $0x19f8] sm:$0xff] }
 0x258   :  { %3918 = vmatpush1.bf16.msra.mxu0 %v12428_v46  ;;  %v12487_v46 = vcombine.high %v652_v38, %v656_v39  ;;  %v12526_v38 = vcombine.low %v692_v33, %v696_v27 }
 0x259   :  { %4082 = vmatpush1.bf16.msra.mxu1 %v12430_v34  ;;  %3919 = vmatprep.subr.bf16.mxu0 %v12437_v51  ;;  %v659_v34 = vld [vmem:[#allocation7 + $0x15d0] sm:$0xff] }
 0x25a   :  { %4083 = vmatprep.subr.bf16.mxu1 %v12439_v2  ;;  %v663_v51 = vld [vmem:[#allocation7 + $0x1630] sm:$0xff]  ;;  %v660_v2 = vld [vmem:[#allocation7 + $0x15d8] sm:$0xff] }
 0x25b   :  { %v12493_v54 = vcombine.high %v659_v34, %v663_v51  ;;  %v12492_v1 = vcombine.low %v659_v34, %v663_v51  ;;  %v12494_v3 = vcombine.low %v660_v2, %v664_v52  ;;  %v712_v34 = vld [vmem:[#allocation7 + $0x1ab8] sm:$0xff] }
 0x25c   :  { %3920 = vmatpush1.bf16.msra.mxu0 %v12436_v55  ;;  %v12495_v55 = vcombine.high %v660_v2, %v664_v52 }
 0x25d   :  { %4084 = vmatpush1.bf16.msra.mxu1 %v12438_v56  ;;  %3921 = vmatprep.subr.bf16.mxu0 %v12445_v60  ;;  %v667_v56 = vld [vmem:[#allocation7 + $0x1690] sm:$0xff] }
 0x25e   :  { %4085 = vmatprep.subr.bf16.mxu1 %v12447_v62  ;;  %v671_v60 = vld [vmem:[#allocation7 + $0x16f0] sm:$0xff]  ;;  %v668_v62 = vld [vmem:[#allocation7 + $0x1698] sm:$0xff] }
 0x25f   :  { %v12501_v47 = vcombine.high %v667_v56, %v671_v60  ;;  %v12500_v12 = vcombine.low %v667_v56, %v671_v60  ;;  %v12502_v13 = vcombine.low %v668_v62, %v672_v63 }
 0x260   :  { %3922 = vmatpush1.bf16.msra.mxu0 %v12444_v5  ;;  %v12503_v5 = vcombine.high %v668_v62, %v672_v63  ;;  %v723_v63 = vld [vmem:[#allocation7 + $0x1bd0] sm:$0xff] }
 0x261   :  { %4086 = vmatpush1.bf16.msra.mxu1 %v12446_v6  ;;  %3923 = vmatprep.subr.bf16.mxu0 %v12453_v7  ;;  %v675_v6 = vld [vmem:[#allocation7 + $0x1750] sm:$0xff] }
 0x262   :  { %4087 = vmatprep.subr.bf16.mxu1 %v12455_v8  ;;  %v679_v7 = vld [vmem:[#allocation7 + $0x17b0] sm:$0xff]  ;;  %v676_v8 = vld [vmem:[#allocation7 + $0x1758] sm:$0xff] }
 0x263   :  { %v12509_v0 = vcombine.high %v675_v6, %v679_v7  ;;  %v12508_v20 = vcombine.low %v675_v6, %v679_v7  ;;  %v12510_v21 = vcombine.low %v676_v8, %v680_v10 }
 0x264   :  { %3924 = vmatpush1.bf16.msra.mxu0 %v12452_v16  ;;  %v12511_v16 = vcombine.high %v676_v8, %v680_v10  ;;  %v731_v10 = vld [vmem:[#allocation7 + $0x1c90] sm:$0xff] }
 0x265   :  { %4088 = vmatpush1.bf16.msra.mxu1 %v12454_v14  ;;  %3925 = vmatprep.subr.bf16.mxu0 %v12461_v15  ;;  %v683_v14 = vld [vmem:[#allocation7 + $0x1810] sm:$0xff] }
 0x266   :  { %4089 = vmatprep.subr.bf16.mxu1 %v12463_v19  ;;  %v687_v15 = vld [vmem:[#allocation7 + $0x1870] sm:$0xff]  ;;  %v684_v19 = vld [vmem:[#allocation7 + $0x1818] sm:$0xff] }
 0x267   :  { %v12517_v22 = vcombine.high %v683_v14, %v687_v15  ;;  %v12518_v28 = vcombine.low %v684_v19, %v688_v4 }
 0x268   :  { %3926 = vmatpush1.bf16.msra.mxu0 %v12460_v23  ;;  %v12519_v23 = vcombine.high %v684_v19, %v688_v4  ;;  %v739_v4 = vld [vmem:[#allocation7 + $0x1d50] sm:$0xff] }
 0x269   :  { %4090 = vmatpush1.bf16.msra.mxu1 %v12462_v24  ;;  %3927 = vmatprep.subr.bf16.mxu0 %v12469_v26  ;;  %v691_v24 = vld [vmem:[#allocation7 + $0x18d0] sm:$0xff] }
 0x26a   :  { %4091 = vmatprep.subr.bf16.mxu1 %v12471_v17  ;;  %v695_v26 = vld [vmem:[#allocation7 + $0x1930] sm:$0xff]  ;;  %v12516_v17 = vcombine.low %v683_v14, %v687_v15 }
 0x26b   :  { %v12525_v29 = vcombine.high %v691_v24, %v695_v26  ;;  %v12524_v11 = vcombine.low %v691_v24, %v695_v26 }
 0x26c   :  { %3928 = vmatpush1.bf16.msra.mxu0 %v12468_v30  ;;  %v699_v30 = vld [vmem:[#allocation7 + $0x1990] sm:$0xff] }
 0x26d   :  { %4092 = vmatpush1.bf16.msra.mxu1 %v12470_v31  ;;  %3929 = vmatprep.subr.bf16.mxu0 %v12477_v32  ;;  %v703_v31 = vld [vmem:[#allocation7 + $0x19f0] sm:$0xff]  ;;  %v12527_v32 = vcombine.high %v692_v33, %v696_v27 }
 0x26e   :  { %4093 = vmatprep.subr.bf16.mxu1 %v12479_v36  ;;  %v700_v36 = vld [vmem:[#allocation7 + $0x1998] sm:$0xff]  ;;  %v12533_v39 = vcombine.high %v699_v30, %v703_v31  ;;  %v12532_v51 = vcombine.low %v699_v30, %v703_v31  ;;  %v747_v33 = vld [vmem:[#allocation7 + $0x1e10] sm:$0xff] }
 0x26f   :  { %v751_v27 = vld [vmem:[#allocation7 + $0x1e70] sm:$0xff] }
 0x270   :  { %3930 = vmatpush1.bf16.msra.mxu0 %v12476_v40  ;;  %v12535_v40 = vcombine.high %v700_v36, %v704_v25 }
 0x271   :  { %4094 = vmatpush1.bf16.msra.mxu1 %v12478_v41  ;;  %3931 = vmatprep.subr.bf16.mxu0 %v12485_v43  ;;  %v707_v41 = vld [vmem:[#allocation7 + $0x1a50] sm:$0xff] }
 0x272   :  { %4095 = vmatprep.subr.bf16.mxu1 %v12487_v46  ;;  %v711_v43 = vld [vmem:[#allocation7 + $0x1ab0] sm:$0xff]  ;;  %v708_v46 = vld [vmem:[#allocation7 + $0x1a58] sm:$0xff] }
 0x273   :  { %v12541_v2 = vcombine.high %v707_v41, %v711_v43  ;;  %v12543_v52 = vcombine.high %v708_v46, %v712_v34  ;;  %v12542_v56 = vcombine.low %v708_v46, %v712_v34  ;;  %v763_v34 = vld [vmem:[#allocation7 + $0x1f90] sm:$0xff] }
 0x274   :  { %3932 = vmatpush1.bf16.msra.mxu0 %v12484_v44  ;;  %v715_v44 = vld [vmem:[#allocation7 + $0x1b10] sm:$0xff] }
 0x275   :  { %4096 = vmatpush1.bf16.msra.mxu1 %v12486_v53  ;;  %3933 = vmatprep.subr.bf16.mxu0 %v12493_v54  ;;  %v719_v53 = vld [vmem:[#allocation7 + $0x1b70] sm:$0xff]  ;;  %v716_v54 = vld [vmem:[#allocation7 + $0x1b18] sm:$0xff] }
 0x276   :  { %4097 = vmatprep.subr.bf16.mxu1 %v12495_v55  ;;  %v720_v55 = vld [vmem:[#allocation7 + $0x1b78] sm:$0xff]  ;;  %v12549_v60 = vcombine.high %v715_v44, %v719_v53 }
 0x277   :  { %v12551_v62 = vcombine.high %v716_v54, %v720_v55  ;;  %v12550_v6 = vcombine.low %v716_v54, %v720_v55  ;;  %v771_v55 = vld [vmem:[#allocation7 + $0x2050] sm:$0xff] }
 0x278   :  { %3934 = vmatpush1.bf16.msra.mxu0 %v12492_v1  ;;  %v727_v1 = vld [vmem:[#allocation7 + $0x1c30] sm:$0xff] }
 0x279   :  { %4098 = vmatpush1.bf16.msra.mxu1 %v12494_v3  ;;  %3935 = vmatprep.subr.bf16.mxu0 %v12501_v47  ;;  %v724_v3 = vld [vmem:[#allocation7 + $0x1bd8] sm:$0xff]  ;;  %v12557_v7 = vcombine.high %v723_v63, %v727_v1 }
 0x27a   :  { %4099 = vmatprep.subr.bf16.mxu1 %v12503_v5  ;;  %v728_v47 = vld [vmem:[#allocation7 + $0x1c38] sm:$0xff]  ;;  %v12548_v5 = vcombine.low %v715_v44, %v719_v53 }
 0x27b   :  { %v12559_v8 = vcombine.high %v724_v3, %v728_v47  ;;  %v12558_v14 = vcombine.low %v724_v3, %v728_v47  ;;  %v779_v47 = vld [vmem:[#allocation7 + $0x2110] sm:$0xff] }
 0x27c   :  { %3936 = vmatpush1.bf16.msra.mxu0 %v12500_v12  ;;  %v735_v12 = vld [vmem:[#allocation7 + $0x1cf0] sm:$0xff] }
 0x27d   :  { %4100 = vmatpush1.bf16.msra.mxu1 %v12502_v13  ;;  %3937 = vmatprep.subr.bf16.mxu0 %v12509_v0  ;;  %v732_v13 = vld [vmem:[#allocation7 + $0x1c98] sm:$0xff]  ;;  %v12565_v15 = vcombine.high %v731_v10, %v735_v12 }
 0x27e   :  { %4101 = vmatprep.subr.bf16.mxu1 %v12511_v16  ;;  %v736_v0 = vld [vmem:[#allocation7 + $0x1cf8] sm:$0xff]  ;;  %v12556_v16 = vcombine.low %v723_v63, %v727_v1 }
 0x27f   :  { %v12567_v19 = vcombine.high %v732_v13, %v736_v0  ;;  %v12566_v24 = vcombine.low %v732_v13, %v736_v0  ;;  %v787_v0 = vld [vmem:[#allocation7 + $0x21d0] sm:$0xff] }
 0x280   :  { %3938 = vmatpush1.bf16.msra.mxu0 %v12508_v20  ;;  %v743_v20 = vld [vmem:[#allocation7 + $0x1db0] sm:$0xff] }
 0x281   :  { %4102 = vmatpush1.bf16.msra.mxu1 %v12510_v21  ;;  %3948 = vmatprep.subr.bf16.mxu0 %v12517_v22  ;;  %v740_v21 = vld [vmem:[#allocation7 + $0x1d58] sm:$0xff]  ;;  %v12573_v26 = vcombine.high %v739_v4, %v743_v20  ;;  %v12572_v30 = vcombine.low %v739_v4, %v743_v20 }
 0x282   :  { %4112 = vmatprep.subr.bf16.mxu1 %v12519_v23  ;;  %v744_v22 = vld [vmem:[#allocation7 + $0x1db8] sm:$0xff]  ;;  %v12564_v23 = vcombine.low %v731_v10, %v735_v12 }
 0x283   :  { %3940 = vmatmul.mubr.bf16.vlgmr.msra.gmra.mrb[4].mxu0 %v14337_v50  ;;  %v12574_v31 = vcombine.low %v740_v21, %v744_v22 }
 0x284   :  { %4104 = vmatmul.mubr.bf16.vlgmr.msra.gmra.mrb[20].mxu1 %v14337_v50  ;;  %3949 = vmatpush1.bf16.msra.mxu0 %v12516_v17  ;;  %v12534_v50 = vcombine.low %v700_v36, %v704_v25  ;;  %v12575_v17 = vcombine.high %v740_v21, %v744_v22  ;;  %v755_v25 = vld [vmem:[#allocation7 + $0x1ed0] sm:$0xff] }
 0x285   :  { %3980 = vmatprep.mubr.bf16.mxu0 %v14339_v59  ;;  %4113 = vmatpush1.bf16.msra.mxu1 %v12518_v28  ;;  %v748_v28 = vld [vmem:[#allocation7 + $0x1e18] sm:$0xff]  ;;  %v795_v22 = vld [vmem:[#allocation7 + $0x2290] sm:$0xff] }
 0x286   :  { %4144 = vmatprep.mubr.bf16.mxu1 %v14339_v59  ;;  %3950 = vmatprep.subr.bf16.mxu0 %v12525_v29  ;;  %v12540_v59 = vcombine.low %v707_v41, %v711_v43  ;;  %v752_v29 = vld [vmem:[#allocation7 + $0x1e78] sm:$0xff] }
 0x287   :  { %4114 = vmatprep.subr.bf16.mxu1 %v12527_v32  ;;  %v12581_v32 = vcombine.high %v747_v33, %v751_v27  ;;  %v12583_v36 = vcombine.high %v748_v28, %v752_v29  ;;  %v12582_v41 = vcombine.low %v748_v28, %v752_v29  ;;  %v803_v29 = vld [vmem:[#allocation7 + $0x2350] sm:$0xff] }
 0x288   :  { %3951 = vmatpush1.bf16.msra.mxu0 %v12524_v11  ;;  %v759_v11 = vld [vmem:[#allocation7 + $0x1f30] sm:$0xff] }
 0x289   :  { %4115 = vmatpush1.bf16.msra.mxu1 %v12526_v38  ;;  %3952 = vmatprep.subr.bf16.mxu0 %v12533_v39  ;;  %v756_v38 = vld [vmem:[#allocation7 + $0x1ed8] sm:$0xff]  ;;  %v12589_v43 = vcombine.high %v755_v25, %v759_v11 }
 0x28a   :  { %4116 = vmatprep.subr.bf16.mxu1 %v12535_v40  ;;  %v760_v39 = vld [vmem:[#allocation7 + $0x1f38] sm:$0xff]  ;;  %v12580_v40 = vcombine.low %v747_v33, %v751_v27 }
 0x28b   :  { %v12591_v46 = vcombine.high %v756_v38, %v760_v39  ;;  %v12590_v44 = vcombine.low %v756_v38, %v760_v39  ;;  %v811_v39 = vld [vmem:[#allocation7 + $0x2410] sm:$0xff] }
 0x28c   :  { %3953 = vmatpush1.bf16.msra.mxu0 %v12532_v51  ;;  %v767_v51 = vld [vmem:[#allocation7 + $0x1ff0] sm:$0xff] }
 0x28d   :  { %4117 = vmatpush1.bf16.msra.mxu1 %v12534_v50  ;;  %3954 = vmatprep.subr.bf16.mxu0 %v12541_v2  ;;  %v764_v50 = vld [vmem:[#allocation7 + $0x1f98] sm:$0xff]  ;;  %v12597_v53 = vcombine.high %v763_v34, %v767_v51 }
 0x28e   :  { %4118 = vmatprep.subr.bf16.mxu1 %v12543_v52  ;;  %v768_v2 = vld [vmem:[#allocation7 + $0x1ff8] sm:$0xff]  ;;  %v12588_v52 = vcombine.low %v755_v25, %v759_v11 }
 0x28f   :  { %v12599_v54 = vcombine.high %v764_v50, %v768_v2  ;;  %v12598_v63 = vcombine.low %v764_v50, %v768_v2  ;;  %v819_v2 = vld [vmem:[#allocation7 + $0x24d0] sm:$0xff] }
 0x290   :  { %3955 = vmatpush1.bf16.msra.mxu0 %v12540_v59  ;;  %v775_v59 = vld [vmem:[#allocation7 + $0x20b0] sm:$0xff] }
 0x291   :  { %4119 = vmatpush1.bf16.msra.mxu1 %v12542_v56  ;;  %3956 = vmatprep.subr.bf16.mxu0 %v12549_v60  ;;  %v772_v56 = vld [vmem:[#allocation7 + $0x2058] sm:$0xff]  ;;  %v12605_v1 = vcombine.high %v771_v55, %v775_v59 }
 0x292   :  { %4120 = vmatprep.subr.bf16.mxu1 %v12551_v62  ;;  %v776_v60 = vld [vmem:[#allocation7 + $0x20b8] sm:$0xff]  ;;  %v12596_v62 = vcombine.low %v763_v34, %v767_v51 }
 0x293   :  { %v12607_v3 = vcombine.high %v772_v56, %v776_v60  ;;  %v12606_v10 = vcombine.low %v772_v56, %v776_v60  ;;  %v827_v56 = vld [vmem:[#allocation7 + $0x2590] sm:$0xff] }
 0x294   :  { %3957 = vmatpush1.bf16.msra.mxu0 %v12548_v5  ;;  %v783_v5 = vld [vmem:[#allocation7 + $0x2170] sm:$0xff] }
 0x295   :  { %4121 = vmatpush1.bf16.msra.mxu1 %v12550_v6  ;;  %3958 = vmatprep.subr.bf16.mxu0 %v12557_v7  ;;  %v780_v6 = vld [vmem:[#allocation7 + $0x2118] sm:$0xff]  ;;  %v12613_v12 = vcombine.high %v779_v47, %v783_v5  ;;  %v831_v60 = vld [vmem:[#allocation7 + $0x25f0] sm:$0xff] }
 0x296   :  { %4122 = vmatprep.subr.bf16.mxu1 %v12559_v8  ;;  %v784_v7 = vld [vmem:[#allocation7 + $0x2178] sm:$0xff]  ;;  %v12604_v8 = vcombine.low %v771_v55, %v775_v59 }
 0x297   :  { %v12615_v13 = vcombine.high %v780_v6, %v784_v7  ;;  %v12614_v4 = vcombine.low %v780_v6, %v784_v7  ;;  %v835_v7 = vld [vmem:[#allocation7 + $0x2650] sm:$0xff] }
 0x298   :  { %3959 = vmatpush1.bf16.msra.mxu0 %v12556_v16  ;;  %v791_v16 = vld [vmem:[#allocation7 + $0x2230] sm:$0xff] }
 0x299   :  { %4123 = vmatpush1.bf16.msra.mxu1 %v12558_v14  ;;  %3960 = vmatprep.subr.bf16.mxu0 %v12565_v15  ;;  %v788_v14 = vld [vmem:[#allocation7 + $0x21d8] sm:$0xff]  ;;  %v12621_v20 = vcombine.high %v787_v0, %v791_v16 }
 0x29a   :  { %4124 = vmatprep.subr.bf16.mxu1 %v12567_v19  ;;  %v792_v15 = vld [vmem:[#allocation7 + $0x2238] sm:$0xff]  ;;  %v12612_v19 = vcombine.low %v779_v47, %v783_v5  ;;  %v12661_v5 = vcombine.high %v827_v56, %v831_v60 }
 0x29b   :  { %v12623_v21 = vcombine.high %v788_v14, %v792_v15  ;;  %v12622_v33 = vcombine.low %v788_v14, %v792_v15  ;;  %v843_v14 = vld [vmem:[#allocation7 + $0x2710] sm:$0xff] }
 0x29c   :  { %3961 = vmatpush1.bf16.msra.mxu0 %v12564_v23  ;;  %v799_v23 = vld [vmem:[#allocation7 + $0x22f0] sm:$0xff] }
 0x29d   :  { %4125 = vmatpush1.bf16.msra.mxu1 %v12566_v24  ;;  %3962 = vmatprep.subr.bf16.mxu0 %v12573_v26  ;;  %v796_v24 = vld [vmem:[#allocation7 + $0x2298] sm:$0xff]  ;;  %v12629_v27 = vcombine.high %v795_v22, %v799_v23  ;;  %v847_v15 = vld [vmem:[#allocation7 + $0x2770] sm:$0xff] }
 0x29e   :  { %4126 = vmatprep.subr.bf16.mxu1 %v12575_v17  ;;  %v800_v26 = vld [vmem:[#allocation7 + $0x22f8] sm:$0xff]  ;;  %v12620_v17 = vcombine.low %v787_v0, %v791_v16 }
 0x29f   :  { %v12631_v28 = vcombine.high %v796_v24, %v800_v26  ;;  %v12630_v25 = vcombine.low %v796_v24, %v800_v26  ;;  %v855_v24 = vld [vmem:[#allocation7 + $0x2830] sm:$0xff]  ;;  %v852_v26 = vld [vmem:[#allocation7 + $0x27d8] sm:$0xff] }
 0x2a0   :  { %3963 = vmatpush1.bf16.msra.mxu0 %v12572_v30  ;;  %v807_v30 = vld [vmem:[#allocation7 + $0x23b0] sm:$0xff] }
 0x2a1   :  { %4127 = vmatpush1.bf16.msra.mxu1 %v12574_v31  ;;  %3964 = vmatprep.subr.bf16.mxu0 %v12581_v32  ;;  %v804_v31 = vld [vmem:[#allocation7 + $0x2358] sm:$0xff]  ;;  %v12637_v11 = vcombine.high %v803_v29, %v807_v30 }
 0x2a2   :  { %4128 = vmatprep.subr.bf16.mxu1 %v12583_v36  ;;  %v808_v32 = vld [vmem:[#allocation7 + $0x23b8] sm:$0xff]  ;;  %v12628_v36 = vcombine.low %v795_v22, %v799_v23  ;;  %v851_v23 = vld [vmem:[#allocation7 + $0x27d0] sm:$0xff] }
 0x2a3   :  { %v12639_v38 = vcombine.high %v804_v31, %v808_v32  ;;  %v12638_v34 = vcombine.low %v804_v31, %v808_v32  ;;  %v863_v31 = vld [vmem:[#allocation7 + $0x28f0] sm:$0xff]  ;;  %v860_v32 = vld [vmem:[#allocation7 + $0x2898] sm:$0xff] }
 0x2a4   :  { %3965 = vmatpush1.bf16.msra.mxu0 %v12580_v40  ;;  %v815_v40 = vld [vmem:[#allocation7 + $0x2470] sm:$0xff] }
 0x2a5   :  { %4129 = vmatpush1.bf16.msra.mxu1 %v12582_v41  ;;  %3966 = vmatprep.subr.bf16.mxu0 %v12589_v43  ;;  %v812_v41 = vld [vmem:[#allocation7 + $0x2418] sm:$0xff]  ;;  %v12645_v51 = vcombine.high %v811_v39, %v815_v40 }
 0x2a6   :  { %4130 = vmatprep.subr.bf16.mxu1 %v12591_v46  ;;  %v816_v43 = vld [vmem:[#allocation7 + $0x2478] sm:$0xff]  ;;  %v12636_v46 = vcombine.low %v803_v29, %v807_v30  ;;  %v859_v30 = vld [vmem:[#allocation7 + $0x2890] sm:$0xff] }
 0x2a7   :  { %v12647_v50 = vcombine.high %v812_v41, %v816_v43  ;;  %v12646_v55 = vcombine.low %v812_v41, %v816_v43  ;;  %v867_v43 = vld [vmem:[#allocation7 + $0x2950] sm:$0xff] }
 0x2a8   :  { %3967 = vmatpush1.bf16.msra.mxu0 %v12588_v52  ;;  %v823_v52 = vld [vmem:[#allocation7 + $0x2530] sm:$0xff] }
 0x2a9   :  { %4131 = vmatpush1.bf16.msra.mxu1 %v12590_v44  ;;  %3968 = vmatprep.subr.bf16.mxu0 %v12597_v53  ;;  %v12644_v44 = vcombine.low %v811_v39, %v815_v40  ;;  %v820_v53 = vld [vmem:[#allocation7 + $0x24d8] sm:$0xff]  ;;  %v12653_v59 = vcombine.high %v819_v2, %v823_v52 }
 0x2aa   :  { %4132 = vmatprep.subr.bf16.mxu1 %v12599_v54  ;;  %v824_v54 = vld [vmem:[#allocation7 + $0x2538] sm:$0xff] }
 0x2ab   :  { %v12654_v47 = vcombine.low %v820_v53, %v824_v54 }
 0x2ac   :  { %3969 = vmatpush1.bf16.msra.mxu0 %v12596_v62  ;;  %v12655_v62 = vcombine.high %v820_v53, %v824_v54  ;;  %v12692_v53 = vcombine.low %v859_v30, %v863_v31 }
 0x2ad   :  { %4133 = vmatpush1.bf16.msra.mxu1 %v12598_v63  ;;  %3970 = vmatprep.subr.bf16.mxu0 %v12605_v1  ;;  %v828_v63 = vld [vmem:[#allocation7 + $0x2598] sm:$0xff] }
 0x2ae   :  { %4134 = vmatprep.subr.bf16.mxu1 %v12607_v3  ;;  %v832_v1 = vld [vmem:[#allocation7 + $0x25f8] sm:$0xff]  ;;  %v12652_v3 = vcombine.low %v819_v2, %v823_v52 }
 0x2af   :  { %v12663_v6 = vcombine.high %v828_v63, %v832_v1  ;;  %v872_v2 = vld [vmem:[#allocation7 + $0x29b8] sm:$0xff] }
 0x2b0   :  { %3971 = vmatpush1.bf16.msra.mxu0 %v12604_v8  ;;  %v839_v8 = vld [vmem:[#allocation7 + $0x26b0] sm:$0xff] }
 0x2b1   :  { %4135 = vmatpush1.bf16.msra.mxu1 %v12606_v10  ;;  %3972 = vmatprep.subr.bf16.mxu0 %v12613_v12  ;;  %v836_v10 = vld [vmem:[#allocation7 + $0x2658] sm:$0xff]  ;;  %v12669_v0 = vcombine.high %v835_v7, %v839_v8 }
 0x2b2   :  { %4136 = vmatprep.subr.bf16.mxu1 %v12615_v13  ;;  %v840_v12 = vld [vmem:[#allocation7 + $0x26b8] sm:$0xff]  ;;  %v12660_v13 = vcombine.low %v827_v56, %v831_v60 }
 0x2b3   :  { %v12671_v16 = vcombine.high %v836_v10, %v840_v12 }
 0x2b4   :  { %3973 = vmatpush1.bf16.msra.mxu0 %v12612_v19  ;;  %v844_v19 = vld [vmem:[#allocation7 + $0x2718] sm:$0xff] }
 0x2b5   :  { %4137 = vmatpush1.bf16.msra.mxu1 %v12614_v4  ;;  %3974 = vmatprep.subr.bf16.mxu0 %v12621_v20  ;;  %v848_v4 = vld [vmem:[#allocation7 + $0x2778] sm:$0xff]  ;;  %v12670_v20 = vcombine.low %v836_v10, %v840_v12  ;;  %v887_v10 = vld [vmem:[#allocation7 + $0x2b30] sm:$0xff] }
 0x2b6   :  { %4138 = vmatprep.subr.bf16.mxu1 %v12623_v21  ;;  %v12677_v21 = vcombine.high %v843_v14, %v847_v15  ;;  %v12679_v22 = vcombine.high %v844_v19, %v848_v4  ;;  %v884_v12 = vld [vmem:[#allocation7 + $0x2ad8] sm:$0xff] }
 0x2b8   :  { %3975 = vmatpush1.bf16.msra.mxu0 %v12620_v17  ;;  %v856_v17 = vld [vmem:[#allocation7 + $0x2838] sm:$0xff] }
 0x2b9   :  { %4139 = vmatpush1.bf16.msra.mxu1 %v12622_v33  ;;  %3976 = vmatprep.subr.bf16.mxu0 %v12629_v27  ;;  %v12676_v33 = vcombine.low %v843_v14, %v847_v15  ;;  %v12678_v27 = vcombine.low %v844_v19, %v848_v4  ;;  %v12687_v29 = vcombine.high %v852_v26, %v856_v17  ;;  %v891_v15 = vld [vmem:[#allocation7 + $0x2b90] sm:$0xff]  ;;  %v892_v4 = vld [vmem:[#allocation7 + $0x2b98] sm:$0xff] }
 0x2ba   :  { %4140 = vmatprep.subr.bf16.mxu1 %v12631_v28  ;;  %v12685_v28 = vcombine.high %v851_v23, %v855_v24  ;;  %v895_v19 = vld [vmem:[#allocation7 + $0x2bf0] sm:$0xff] }
 0x2bc   :  { %3977 = vmatpush1.bf16.msra.mxu0 %v12628_v36  ;;  %v864_v36 = vld [vmem:[#allocation7 + $0x28f8] sm:$0xff] }
 0x2bd   :  { %4141 = vmatpush1.bf16.msra.mxu1 %v12630_v25  ;;  %3978 = vmatprep.subr.bf16.mxu0 %v12637_v11  ;;  %v12684_v25 = vcombine.low %v851_v23, %v855_v24  ;;  %v12686_v11 = vcombine.low %v852_v26, %v856_v17  ;;  %v12695_v41 = vcombine.high %v860_v32, %v864_v36  ;;  %v899_v24 = vld [vmem:[#allocation7 + $0x2c50] sm:$0xff]  ;;  %v900_v17 = vld [vmem:[#allocation7 + $0x2c58] sm:$0xff] }
 0x2be   :  { %4142 = vmatprep.subr.bf16.mxu1 %v12639_v38  ;;  %v12693_v38 = vcombine.high %v859_v30, %v863_v31  ;;  %v903_v26 = vld [vmem:[#allocation7 + $0x2cb0] sm:$0xff] }
 0x2bf   :  { %v907_v31 = vld [vmem:[#allocation7 + $0x2d10] sm:$0xff] }
 0x2c0   :  { %3979 = vmatpush1.bf16.msra.mxu0 %v12636_v46  ;;  %v871_v46 = vld [vmem:[#allocation7 + $0x29b0] sm:$0xff] }
 0x2c1   :  { %4143 = vmatpush1.bf16.msra.mxu1 %v12638_v34  ;;  %3989 = vmatprep.subr.bf16.mxu0 %v12645_v51  ;;  %v12701_v56 = vcombine.high %v867_v43, %v871_v46 }
 0x2c2   :  { %4153 = vmatprep.subr.bf16.mxu1 %v12647_v50  ;;  %v868_v50 = vld [vmem:[#allocation7 + $0x2958] sm:$0xff] }
 0x2c3   :  { %3981 = vmatmul.mubr.bf16.vlgmr.msra.gmra.mrb[4].mxu0 %v14357_v35  ;;  %v12703_v60 = vcombine.high %v868_v50, %v872_v2 }
 0x2c4   :  { %4145 = vmatmul.mubr.bf16.vlgmr.msra.gmra.mrb[20].mxu1 %v14357_v35  ;;  %3990 = vmatpush1.bf16.msra.mxu0 %v12644_v44  ;;  %v12662_v35 = vcombine.low %v828_v63, %v832_v1  ;;  %v879_v63 = vld [vmem:[#allocation7 + $0x2a70] sm:$0xff]  ;;  %v876_v1 = vld [vmem:[#allocation7 + $0x2a18] sm:$0xff] }
 0x2c5   :  { %4021 = vmatprep.mubr.bf16.mxu0 %v14359_v42  ;;  %4154 = vmatpush1.bf16.msra.mxu1 %v12646_v55 }
 0x2c6   :  { %4185 = vmatprep.mubr.bf16.mxu1 %v14359_v42  ;;  %3991 = vmatprep.subr.bf16.mxu0 %v12653_v59  ;;  %v12668_v42 = vcombine.low %v835_v7, %v839_v8  ;;  %v12694_v59 = vcombine.low %v860_v32, %v864_v36  ;;  %v883_v8 = vld [vmem:[#allocation7 + $0x2ad0] sm:$0xff]  ;;  %v908_v36 = vld [vmem:[#allocation7 + $0x2d18] sm:$0xff] }
 0x2c7   :  { %4155 = vmatprep.subr.bf16.mxu1 %v12655_v62  ;;  %v875_v62 = vld [vmem:[#allocation7 + $0x2a10] sm:$0xff] }
 0x2c8   :  { %3992 = vmatpush1.bf16.msra.mxu0 %v12652_v3  ;;  %v880_v3 = vld [vmem:[#allocation7 + $0x2a78] sm:$0xff]  ;;  %v911_v32 = vld [vmem:[#allocation7 + $0x2d70] sm:$0xff] }
 0x2c9   :  { %4156 = vmatpush1.bf16.msra.mxu1 %v12654_v47  ;;  %3993 = vmatprep.subr.bf16.mxu0 %v12661_v5  ;;  %v12700_v47 = vcombine.low %v867_v43, %v871_v46  ;;  %v12702_v5 = vcombine.low %v868_v50, %v872_v2  ;;  %v12711_v7 = vcombine.high %v876_v1, %v880_v3  ;;  %v915_v46 = vld [vmem:[#allocation7 + $0x2dd0] sm:$0xff]  ;;  %v916_v2 = vld [vmem:[#allocation7 + $0x2dd8] sm:$0xff] }
 0x2ca   :  { %4157 = vmatprep.subr.bf16.mxu1 %v12663_v6  ;;  %v12709_v6 = vcombine.high %v875_v62, %v879_v63  ;;  %v919_v50 = vld [vmem:[#allocation7 + $0x2e30] sm:$0xff] }
 0x2cc   :  { %3994 = vmatpush1.bf16.msra.mxu0 %v12660_v13  ;;  %v888_v13 = vld [vmem:[#allocation7 + $0x2b38] sm:$0xff] }
 0x2cd   :  { %4158 = vmatpush1.bf16.msra.mxu1 %v12662_v35  ;;  %3995 = vmatprep.subr.bf16.mxu0 %v12669_v0  ;;  %v12708_v35 = vcombine.low %v875_v62, %v879_v63  ;;  %v12710_v0 = vcombine.low %v876_v1, %v880_v3  ;;  %v12719_v14 = vcombine.high %v884_v12, %v888_v13  ;;  %v927_v62 = vld [vmem:[#allocation7 + $0x2ef0] sm:$0xff]  ;;  %v924_v1 = vld [vmem:[#allocation7 + $0x2e98] sm:$0xff] }
 0x2ce   :  { %4159 = vmatprep.subr.bf16.mxu1 %v12671_v16  ;;  %v12717_v16 = vcombine.high %v883_v8, %v887_v10  ;;  %v928_v3 = vld [vmem:[#allocation7 + $0x2ef8] sm:$0xff] }
 0x2d0   :  { %3996 = vmatpush1.bf16.msra.mxu0 %v12668_v42  ;;  %v896_v42 = vld [vmem:[#allocation7 + $0x2bf8] sm:$0xff] }
 0x2d1   :  { %4160 = vmatpush1.bf16.msra.mxu1 %v12670_v20  ;;  %3997 = vmatprep.subr.bf16.mxu0 %v12677_v21  ;;  %v12716_v20 = vcombine.low %v883_v8, %v887_v10  ;;  %v12718_v21 = vcombine.low %v884_v12, %v888_v13  ;;  %v12727_v23 = vcombine.high %v892_v4, %v896_v42  ;;  %v931_v8 = vld [vmem:[#allocation7 + $0x2f50] sm:$0xff]  ;;  %v932_v13 = vld [vmem:[#allocation7 + $0x2f58] sm:$0xff] }
 0x2d2   :  { %4161 = vmatprep.subr.bf16.mxu1 %v12679_v22  ;;  %v12725_v22 = vcombine.high %v891_v15, %v895_v19  ;;  %v935_v10 = vld [vmem:[#allocation7 + $0x2fb0] sm:$0xff] }
 0x2d4   :  { %3998 = vmatpush1.bf16.msra.mxu0 %v12676_v33  ;;  %v904_v33 = vld [vmem:[#allocation7 + $0x2cb8] sm:$0xff] }
 0x2d5   :  { %4162 = vmatpush1.bf16.msra.mxu1 %v12678_v27  ;;  %3999 = vmatprep.subr.bf16.mxu0 %v12685_v28  ;;  %v12724_v27 = vcombine.low %v891_v15, %v895_v19  ;;  %v12726_v28 = vcombine.low %v892_v4, %v896_v42  ;;  %v12735_v30 = vcombine.high %v900_v17, %v904_v33  ;;  %v4210_v19 = vld [vmem:[#allocation7 + $0x20] sm:$0xff] }
 0x2d6   :  { %v14389_v39 = vpop.f32.mrb[0].mxu0  ;;  %v14391_v40 = vpop.f32.mrb[16].mxu1  ;;  %4163 = vmatprep.subr.bf16.mxu1 %v12687_v29  ;;  %v12733_v29 = vcombine.high %v899_v24, %v903_v26  ;;  %v4218_v4 = vld [vmem:[#allocation7 + $0x80] sm:$0xff] }
 0x2d7   :  { %v14393_v34 = vpop.f32.mrb[1].mxu0  ;;  %v14395_v51 = vpop.f32.mrb[17].mxu1 }
 0x2d8   :  { %v3699_v52 = vpop.f32.mrb[2].mxu0  ;;  %v3863_v44 = vpop.f32.mrb[18].mxu1  ;;  %4000 = vmatpush1.bf16.msra.mxu0 %v12684_v25  ;;  %v912_v25 = vld [vmem:[#allocation7 + $0x2d78] sm:$0xff] }
 0x2d9   :  { %4164 = vmatpush1.bf16.msra.mxu1 %v12686_v11  ;;  %v3700_v54 = vpop.f32.mrb[3].mxu0  ;;  %v3864_v55 = vpop.f32.mrb[19].mxu1  ;;  %4001 = vmatprep.subr.bf16.mxu0 %v12693_v38  ;;  %v12732_v11 = vcombine.low %v899_v24, %v903_v26  ;;  %v12734_v38 = vcombine.low %v900_v17, %v904_v33  ;;  %v12743_v43 = vcombine.high %v908_v36, %v912_v25  ;;  %v920_v52 = vld [vmem:[#allocation7 + $0x2e38] sm:$0xff]  ;;  %v4226_v33 = vld [vmem:[#allocation7 + $0xe0] sm:$0xff] }
 0x2da   :  { %4165 = vmatprep.subr.bf16.mxu1 %v12695_v41  ;;  %v12741_v41 = vcombine.high %v907_v31, %v911_v32  ;;  %v90_v44 = vld [vmem:[#allocation10 + $0x40] ss:$8 sm:$0xf]  ;;  %v12740_v54 = vcombine.low %v907_v31, %v911_v32  ;;  %v12742_v55 = vcombine.low %v908_v36, %v912_v25  ;;  %v12769_v24 = vcombine.high %v4210_v19, %v4218_v4 }
 0x2db   :  { %v4242_v32 = vld [vmem:[#allocation7 + $0x1a0] sm:$0xff] }
 0x2dc   :  { %4002 = vmatpush1.bf16.msra.mxu0 %v12692_v53  ;;  %v91_v53 = vld [vmem:[#allocation10 + $0x40] ss:$8 sm:$0xf0] }
 0x2dd   :  { %4166 = vmatpush1.bf16.msra.mxu1 %v12694_v59  ;;  %4003 = vmatprep.subr.bf16.mxu0 %v12701_v56  ;;  %v12749_v59 = vcombine.high %v915_v46, %v919_v50  ;;  %v12751_v56 = vcombine.high %v916_v2, %v920_v52  ;;  %v14397_v63 = vor.u32 %v91_v53, %v90_v44  ;;  %v4250_v36 = vld [vmem:[#allocation7 + $0x200] sm:$0xff]  ;;  %v4259_v53 = vld [vmem:[#allocation7 + $0x268] sm:$0xff] }
 0x2de   :  { %4167 = vmatprep.subr.bf16.mxu1 %v12703_v60  ;;  %v923_v60 = vld [vmem:[#allocation7 + $0x2e90] sm:$0xff]  ;;  %v4266_v44 = vld [vmem:[#allocation7 + $0x2c0] sm:$0xff] }
 0x2df   :  { %v945_v12 = vrot.slane %v14397_v63, %v14292_v49 }
 0x2e0   :  { %4004 = vmatpush1.bf16.msra.mxu0 %v12700_v47  ;;  %v12748_v47 = vcombine.low %v915_v46, %v919_v50  ;;  %v12801_v50 = vcombine.high %v4242_v32, %v4250_v36 }
 0x2e1   :  { %4168 = vmatpush1.bf16.msra.mxu1 %v12702_v5  ;;  %4005 = vmatprep.subr.bf16.mxu0 %v12709_v6  ;;  %v12750_v5 = vcombine.low %v916_v2, %v920_v52  ;;  %v12757_v6 = vcombine.high %v923_v60, %v927_v62  ;;  %v13809_v42 = vadd.f32 %v14393_v34, %v945_v12  ;;  %v4258_v52 = vld [vmem:[#allocation7 + $0x260] sm:$0xff]  ;;  %v4291_v12 = vld [vmem:[#allocation7 + $0x3e8] sm:$0xff] }
 0x2e2   :  { %4169 = vmatprep.subr.bf16.mxu1 %v12711_v7  ;;  %v12759_v7 = vcombine.high %v924_v1, %v928_v3 }
 0x2e3   :  { %v4195_v17 = vmax.f32 %v13809_v42, 0.0  ;;  %v4315_v42 = vld [vmem:[#allocation7 + $0x508] sm:$0xff] }
 0x2e4   :  { %4006 = vmatpush1.bf16.msra.mxu0 %v12708_v35  ;;  %v936_v35 = vld [vmem:[#allocation7 + $0x2fb8] sm:$0xff] }
 0x2e5   :  { %4170 = vmatpush1.bf16.msra.mxu1 %v12710_v0  ;;  %4007 = vmatprep.subr.bf16.mxu0 %v12717_v16  ;;  %v12756_v0 = vcombine.low %v923_v60, %v927_v62  ;;  %v12758_v16 = vcombine.low %v924_v1, %v928_v3  ;;  %v12767_v15 = vcombine.high %v932_v13, %v936_v35  ;;  %v4274_v60 = vld [vmem:[#allocation7 + $0x320] sm:$0xff]  ;;  %v4275_v1 = vld [vmem:[#allocation7 + $0x328] sm:$0xff] }
 0x2e6   :  { %4171 = vmatprep.subr.bf16.mxu1 %v12719_v14  ;;  %v12765_v14 = vcombine.high %v931_v8, %v935_v10  ;;  %v14402_v25 = vpack.c.bf16 %v4195_v17, %v4195_v17  ;;  %v4282_v62 = vld [vmem:[#allocation7 + $0x380] sm:$0xff]  ;;  %v4283_v3 = vld [vmem:[#allocation7 + $0x388] sm:$0xff] }
 0x2e7   :  { %v4323_v17 = vld [vmem:[#allocation7 + $0x568] sm:$0xff] }
 0x2e8   :  { %4008 = vmatpush1.bf16.msra.mxu0 %v12716_v20  ;;  %v4211_v20 = vld [vmem:[#allocation7 + $0x28] sm:$0xff] }
 0x2e9   :  { %4172 = vmatpush1.bf16.msra.mxu1 %v12718_v21  ;;  %4009 = vmatprep.subr.bf16.mxu0 %v12725_v22  ;;  %v4219_v21 = vld [vmem:[#allocation7 + $0x88] sm:$0xff]  ;;  %v12764_v22 = vcombine.low %v931_v8, %v935_v10  ;;  %v4290_v8 = vld [vmem:[#allocation7 + $0x3e0] sm:$0xff] }
 0x2ea   :  { %4173 = vmatprep.subr.bf16.mxu1 %v12727_v23  ;;  %v12766_v23 = vcombine.low %v932_v13, %v936_v35  ;;  %v12771_v26 = vcombine.high %v4211_v20, %v4219_v21  ;;  %v12770_v34 = vcombine.low %v4211_v20, %v4219_v21  ;;  %v4298_v10 = vld [vmem:[#allocation7 + $0x440] sm:$0xff]  ;;  %v4299_v13 = vld [vmem:[#allocation7 + $0x448] sm:$0xff]  ;;  %v12832_v35 = vcombine.low %v4274_v60, %v4282_v62 }
 0x2eb   :  { %v12848_v20 = vcombine.low %v4290_v8, %v4298_v10  ;;  %v12850_v21 = vcombine.low %v4291_v12, %v4299_v13 }
 0x2ec   :  { %4010 = vmatpush1.bf16.msra.mxu0 %v12724_v27  ;;  %v4234_v27 = vld [vmem:[#allocation7 + $0x140] sm:$0xff] }
 0x2ed   :  { %4174 = vmatpush1.bf16.msra.mxu1 %v12726_v28  ;;  %4011 = vmatprep.subr.bf16.mxu0 %v12733_v29  ;;  %v12768_v28 = vcombine.low %v4210_v19, %v4218_v4  ;;  %v4227_v29 = vld [vmem:[#allocation7 + $0xe8] sm:$0xff]  ;;  %v12785_v31 = vcombine.high %v4226_v33, %v4234_v27  ;;  %v4314_v19 = vld [vmem:[#allocation7 + $0x500] sm:$0xff] }
 0x2ee   :  { %4175 = vmatprep.subr.bf16.mxu1 %v12735_v30  ;;  %v4235_v30 = vld [vmem:[#allocation7 + $0x148] sm:$0xff] }
 0x2ef   :  { %v12786_v46 = vcombine.low %v4227_v29, %v4235_v30  ;;  %v4307_v4 = vld [vmem:[#allocation7 + $0x4a8] sm:$0xff] }
 0x2f0   :  { %4012 = vmatpush1.bf16.msra.mxu0 %v12732_v11  ;;  %v12787_v11 = vcombine.high %v4227_v29, %v4235_v30 }
 0x2f1   :  { %4176 = vmatpush1.bf16.msra.mxu1 %v12734_v38  ;;  %4013 = vmatprep.subr.bf16.mxu0 %v12741_v41  ;;  %v4243_v38 = vld [vmem:[#allocation7 + $0x1a8] sm:$0xff] }
 0x2f2   :  { %4177 = vmatprep.subr.bf16.mxu1 %v12743_v43  ;;  %v4251_v41 = vld [vmem:[#allocation7 + $0x208] sm:$0xff]  ;;  %v12784_v43 = vcombine.low %v4226_v33, %v4234_v27 }
 0x2f3   :  { %v12803_v2 = vcombine.high %v4243_v38, %v4251_v41  ;;  %v4331_v33 = vld [vmem:[#allocation7 + $0x5c8] sm:$0xff] }
 0x2f4   :  { %4014 = vmatpush1.bf16.msra.mxu0 %v12740_v54  ;;  %v4267_v54 = vld [vmem:[#allocation7 + $0x2c8] sm:$0xff]  ;;  %v12883_v30 = vcombine.high %v4323_v17, %v4331_v33 }
 0x2f5   :  { %4178 = vmatpush1.bf16.msra.mxu1 %v12742_v55  ;;  %4015 = vmatprep.subr.bf16.mxu0 %v12749_v59  ;;  %v12800_v55 = vcombine.low %v4242_v32, %v4250_v36  ;;  %v12817_v59 = vcombine.high %v4258_v52, %v4266_v44  ;;  %v4339_v32 = vld [vmem:[#allocation7 + $0x628] sm:$0xff] }
 0x2f6   :  { %4179 = vmatprep.subr.bf16.mxu1 %v12751_v56  ;;  %v12819_v56 = vcombine.high %v4259_v53, %v4267_v54  ;;  %v4347_v36 = vld [vmem:[#allocation7 + $0x688] sm:$0xff] }
 0x2f8   :  { %4016 = vmatpush1.bf16.msra.mxu0 %v12748_v47  ;;  %v12816_v47 = vcombine.low %v4258_v52, %v4266_v44  ;;  %v4363_v52 = vld [vmem:[#allocation7 + $0x748] sm:$0xff] }
 0x2f9   :  { %4180 = vmatpush1.bf16.msra.mxu1 %v12750_v5  ;;  %4017 = vmatprep.subr.bf16.mxu0 %v12757_v6  ;;  %v12818_v5 = vcombine.low %v4259_v53, %v4267_v54  ;;  %v12833_v6 = vcombine.high %v4274_v60, %v4282_v62  ;;  %v12898_v53 = vcombine.low %v4339_v32, %v4347_v36  ;;  %v4379_v60 = vld [vmem:[#allocation7 + $0x808] sm:$0xff] }
 0x2fa   :  { %4181 = vmatprep.subr.bf16.mxu1 %v12759_v7  ;;  %v12835_v7 = vcombine.high %v4275_v1, %v4283_v3 }
 0x2fc   :  { %4018 = vmatpush1.bf16.msra.mxu0 %v12756_v0  ;;  %v12834_v0 = vcombine.low %v4275_v1, %v4283_v3 }
 0x2fd   :  { %4182 = vmatpush1.bf16.msra.mxu1 %v12758_v16  ;;  %4019 = vmatprep.subr.bf16.mxu0 %v12765_v14  ;;  %v12849_v16 = vcombine.high %v4290_v8, %v4298_v10  ;;  %v12851_v14 = vcombine.high %v4291_v12, %v4299_v13  ;;  %v4395_v8 = vld [vmem:[#allocation7 + $0x8c8] sm:$0xff] }
 0x2fe   :  { %4183 = vmatprep.subr.bf16.mxu1 %v12767_v15  ;;  %v4306_v15 = vld [vmem:[#allocation7 + $0x4a0] sm:$0xff] }
 0x2ff   :  { %v12864_v27 = vcombine.low %v4306_v15, %v4314_v19 }
 0x300   :  { %4020 = vmatpush1.bf16.msra.mxu0 %v12764_v22  ;;  %v12865_v22 = vcombine.high %v4306_v15, %v4314_v19  ;;  %v4411_v15 = vld [vmem:[#allocation7 + $0x988] sm:$0xff] }
 0x301   :  { %4184 = vmatpush1.bf16.msra.mxu1 %v12766_v23  ;;  %10436 = vmatprep.subr.bf16.mxu0 %v12769_v24  ;;  %v12867_v23 = vcombine.high %v4307_v4, %v4315_v42  ;;  %v4322_v24 = vld [vmem:[#allocation7 + $0x560] sm:$0xff] }
 0x302   :  { %10600 = vmatprep.subr.bf16.mxu1 %v12771_v26  ;;  %v4330_v26 = vld [vmem:[#allocation7 + $0x5c0] sm:$0xff] }
 0x303   :  { %4022 = vmatmul.mubr.bf16.vlgmr.msra.gmra.mrb[4].mxu0 %v14371_v18  ;;  %v12881_v29 = vcombine.high %v4322_v24, %v4330_v26 }
 0x304   :  { %4186 = vmatmul.mubr.bf16.vlgmr.msra.gmra.mrb[20].mxu1 %v14371_v18  ;;  %10437 = vmatpush1.bf16.msra.mxu0 %v12768_v28  ;;  %v12802_v18 = vcombine.low %v4243_v38, %v4251_v41  ;;  %v12866_v28 = vcombine.low %v4307_v4, %v4315_v42  ;;  %v12882_v38 = vcombine.low %v4323_v17, %v4331_v33 }
 0x305   :  { %10468 = vmatprep.mubr.bf16.mxu0 %v14402_v25  ;;  %10601 = vmatpush1.bf16.msra.mxu1 %v12770_v34  ;;  %v4338_v34 = vld [vmem:[#allocation7 + $0x620] sm:$0xff] }
 0x306   :  { %10632 = vmatprep.mubr.bf16.mxu1 %v14402_v25  ;;  %10438 = vmatprep.subr.bf16.mxu0 %v12785_v31  ;;  %v4346_v31 = vld [vmem:[#allocation7 + $0x680] sm:$0xff] }
 0x307   :  { %10602 = vmatprep.subr.bf16.mxu1 %v12787_v11  ;;  %v12880_v11 = vcombine.low %v4322_v24, %v4330_v26  ;;  %v12897_v41 = vcombine.high %v4338_v34, %v4346_v31  ;;  %v12896_v44 = vcombine.low %v4338_v34, %v4346_v31  ;;  %v4427_v24 = vld [vmem:[#allocation7 + $0xa48] sm:$0xff] }
 0x308   :  { %10439 = vmatpush1.bf16.msra.mxu0 %v12784_v43  ;;  %v12899_v43 = vcombine.high %v4339_v32, %v4347_v36  ;;  %v4443_v34 = vld [vmem:[#allocation7 + $0xb08] sm:$0xff]  ;;  %v941_v32 = vrot.slane %v14397_v63, %v14289_v48 }
 0x309   :  { %10603 = vmatpush1.bf16.msra.mxu1 %v12786_v46  ;;  %10440 = vmatprep.subr.bf16.mxu0 %v12801_v50  ;;  %v4354_v46 = vld [vmem:[#allocation7 + $0x6e0] sm:$0xff] }
 0x30a   :  { %10604 = vmatprep.subr.bf16.mxu1 %v12803_v2  ;;  %v4362_v50 = vld [vmem:[#allocation7 + $0x740] sm:$0xff]  ;;  %v4355_v2 = vld [vmem:[#allocation7 + $0x6e8] sm:$0xff] }
 0x30b   :  { %v12913_v54 = vcombine.high %v4354_v46, %v4362_v50  ;;  %v12912_v62 = vcombine.low %v4354_v46, %v4362_v50  ;;  %v12914_v1 = vcombine.low %v4355_v2, %v4363_v52  ;;  %v953_v46 = vrot.slane %v14397_v63, %v14299_v57  ;;  %v4451_v50 = vld [vmem:[#allocation7 + $0xb68] sm:$0xff] }
 0x30c   :  { %10441 = vmatpush1.bf16.msra.mxu0 %v12800_v55  ;;  %v12915_v55 = vcombine.high %v4355_v2, %v4363_v52  ;;  %v4459_v2 = vld [vmem:[#allocation7 + $0xbc8] sm:$0xff] }
 0x30d   :  { %10605 = vmatpush1.bf16.msra.mxu1 %v12802_v18  ;;  %10442 = vmatprep.subr.bf16.mxu0 %v12817_v59  ;;  %v4370_v18 = vld [vmem:[#allocation7 + $0x7a0] sm:$0xff] }
 0x30e   :  { %10606 = vmatprep.subr.bf16.mxu1 %v12819_v56  ;;  %v4378_v59 = vld [vmem:[#allocation7 + $0x800] sm:$0xff]  ;;  %v4371_v56 = vld [vmem:[#allocation7 + $0x7a8] sm:$0xff] }
 0x30f   :  { %v12929_v3 = vcombine.high %v4370_v18, %v4378_v59  ;;  %v12928_v10 = vcombine.low %v4370_v18, %v4378_v59  ;;  %v12930_v12 = vcombine.low %v4371_v56, %v4379_v60  ;;  %v4466_v18 = vld [vmem:[#allocation7 + $0xc20] sm:$0xff] }
 0x310   :  { %10443 = vmatpush1.bf16.msra.mxu0 %v12816_v47  ;;  %v12931_v47 = vcombine.high %v4371_v56, %v4379_v60  ;;  %v4474_v59 = vld [vmem:[#allocation7 + $0xc80] sm:$0xff]  ;;  %v13811_v56 = vadd.f32 %v14395_v51, %v953_v46  ;;  %v4467_v60 = vld [vmem:[#allocation7 + $0xc28] sm:$0xff] }
 0x311   :  { %10607 = vmatpush1.bf16.msra.mxu1 %v12818_v5  ;;  %10444 = vmatprep.subr.bf16.mxu0 %v12833_v6  ;;  %v4386_v5 = vld [vmem:[#allocation7 + $0x860] sm:$0xff] }
 0x312   :  { %10608 = vmatprep.subr.bf16.mxu1 %v12835_v7  ;;  %v4394_v6 = vld [vmem:[#allocation7 + $0x8c0] sm:$0xff]  ;;  %v4387_v7 = vld [vmem:[#allocation7 + $0x868] sm:$0xff] }
 0x313   :  { %v12945_v13 = vcombine.high %v4386_v5, %v4394_v6  ;;  %v12944_v19 = vcombine.low %v4386_v5, %v4394_v6  ;;  %v12946_v4 = vcombine.low %v4387_v7, %v4395_v8  ;;  %v13025_v5 = vcombine.high %v4466_v18, %v4474_v59  ;;  %v4546_v46 = vld [vmem:[#allocation7 + $0xfe0] sm:$0xff] }
 0x314   :  { %10445 = vmatpush1.bf16.msra.mxu0 %v12832_v35  ;;  %v12947_v35 = vcombine.high %v4387_v7, %v4395_v8  ;;  %v4197_v6 = vmax.f32 %v13811_v56, 0.0  ;;  %v4482_v7 = vld [vmem:[#allocation7 + $0xce0] sm:$0xff]  ;;  %v4563_v56 = vld [vmem:[#allocation7 + $0x10a8] sm:$0xff] }
 0x315   :  { %10609 = vmatpush1.bf16.msra.mxu1 %v12834_v0  ;;  %10446 = vmatprep.subr.bf16.mxu0 %v12849_v16  ;;  %v4402_v0 = vld [vmem:[#allocation7 + $0x920] sm:$0xff] }
 0x316   :  { %10610 = vmatprep.subr.bf16.mxu1 %v12851_v14  ;;  %v4410_v16 = vld [vmem:[#allocation7 + $0x980] sm:$0xff]  ;;  %v4403_v14 = vld [vmem:[#allocation7 + $0x928] sm:$0xff] }
 0x317   :  { %v12961_v42 = vcombine.high %v4402_v0, %v4410_v16  ;;  %v12960_v26 = vcombine.low %v4402_v0, %v4410_v16  ;;  %v12962_v17 = vcombine.low %v4403_v14, %v4411_v15  ;;  %v4490_v8 = vld [vmem:[#allocation7 + $0xd40] sm:$0xff] }
 0x318   :  { %10447 = vmatpush1.bf16.msra.mxu0 %v12848_v20  ;;  %v12963_v20 = vcombine.high %v4403_v14, %v4411_v15  ;;  %v13041_v0 = vcombine.high %v4482_v7, %v4490_v8  ;;  %v4498_v16 = vld [vmem:[#allocation7 + $0xda0] sm:$0xff]  ;;  %v14416_v15 = vpack.c.bf16 %v4197_v6, %v4197_v6  ;;  %v4579_v6 = vld [vmem:[#allocation7 + $0x1168] sm:$0xff] }
 0x319   :  { %10611 = vmatpush1.bf16.msra.mxu1 %v12850_v21  ;;  %10448 = vmatprep.subr.bf16.mxu0 %v12865_v22  ;;  %v4418_v21 = vld [vmem:[#allocation7 + $0x9e0] sm:$0xff] }
 0x31a   :  { %10612 = vmatprep.subr.bf16.mxu1 %v12867_v23  ;;  %v4426_v22 = vld [vmem:[#allocation7 + $0xa40] sm:$0xff]  ;;  %v4419_v23 = vld [vmem:[#allocation7 + $0x9e8] sm:$0xff] }
 0x31b   :  { %v12977_v33 = vcombine.high %v4418_v21, %v4426_v22  ;;  %v12976_v31 = vcombine.low %v4418_v21, %v4426_v22  ;;  %v12978_v36 = vcombine.low %v4419_v23, %v4427_v24  ;;  %v4506_v14 = vld [vmem:[#allocation7 + $0xe00] sm:$0xff] }
 0x31c   :  { %10449 = vmatpush1.bf16.msra.mxu0 %v12864_v27  ;;  %v12979_v27 = vcombine.high %v4419_v23, %v4427_v24  ;;  %v13057_v22 = vcombine.high %v4498_v16, %v4506_v14  ;;  %v4514_v24 = vld [vmem:[#allocation7 + $0xe60] sm:$0xff] }
 0x31d   :  { %10613 = vmatpush1.bf16.msra.mxu1 %v12866_v28  ;;  %10450 = vmatprep.subr.bf16.mxu0 %v12881_v29  ;;  %v4434_v28 = vld [vmem:[#allocation7 + $0xaa0] sm:$0xff] }
 0x31e   :  { %10614 = vmatprep.subr.bf16.mxu1 %v12883_v30  ;;  %v4442_v29 = vld [vmem:[#allocation7 + $0xb00] sm:$0xff]  ;;  %v4435_v30 = vld [vmem:[#allocation7 + $0xaa8] sm:$0xff] }
 0x31f   :  { %v12992_v52 = vcombine.low %v4434_v28, %v4442_v29 }
 0x320   :  { %10451 = vmatpush1.bf16.msra.mxu0 %v12880_v11  ;;  %v12993_v11 = vcombine.high %v4434_v28, %v4442_v29 }
 0x321   :  { %10615 = vmatpush1.bf16.msra.mxu1 %v12882_v38  ;;  %10452 = vmatprep.subr.bf16.mxu0 %v12897_v41  ;;  %v12995_v38 = vcombine.high %v4435_v30, %v4443_v34  ;;  %v4450_v41 = vld [vmem:[#allocation7 + $0xb60] sm:$0xff] }
 0x322   :  { %10616 = vmatprep.subr.bf16.mxu1 %v12899_v43  ;;  %v4458_v43 = vld [vmem:[#allocation7 + $0xbc0] sm:$0xff] }
 0x324   :  { %10453 = vmatpush1.bf16.msra.mxu0 %v12896_v44  ;;  %v13808_v44 = vadd.f32 %v14389_v39, %v941_v32  ;;  %v4531_v32 = vld [vmem:[#allocation7 + $0xf28] sm:$0xff] }
 0x325   :  { %10617 = vmatpush1.bf16.msra.mxu1 %v12898_v53  ;;  %10454 = vmatprep.subr.bf16.mxu0 %v12913_v54  ;;  %v12994_v53 = vcombine.low %v4435_v30, %v4443_v34  ;;  %v13009_v54 = vcombine.high %v4450_v41, %v4458_v43  ;;  %v4530_v34 = vld [vmem:[#allocation7 + $0xf20] sm:$0xff] }
 0x326   :  { %10618 = vmatprep.subr.bf16.mxu1 %v12915_v55  ;;  %v13011_v55 = vcombine.high %v4451_v50, %v4459_v2 }
 0x328   :  { %10455 = vmatpush1.bf16.msra.mxu0 %v12912_v62  ;;  %v4475_v62 = vld [vmem:[#allocation7 + $0xc88] sm:$0xff] }
 0x329   :  { %10619 = vmatpush1.bf16.msra.mxu1 %v12914_v1  ;;  %10456 = vmatprep.subr.bf16.mxu0 %v12929_v3  ;;  %v13008_v1 = vcombine.low %v4450_v41, %v4458_v43  ;;  %v4194_v3 = vmax.f32 %v13808_v44, 0.0  ;;  %v13027_v39 = vcombine.high %v4467_v60, %v4475_v62  ;;  %v13026_v51 = vcombine.low %v4467_v60, %v4475_v62  ;;  %v4571_v60 = vld [vmem:[#allocation7 + $0x1108] sm:$0xff] }
 0x32a   :  { %10620 = vmatprep.subr.bf16.mxu1 %v12931_v47  ;;  %v13010_v47 = vcombine.low %v4451_v50, %v4459_v2  ;;  %v4554_v50 = vld [vmem:[#allocation7 + $0x1040] sm:$0xff]  ;;  %v4547_v2 = vld [vmem:[#allocation7 + $0xfe8] sm:$0xff] }
 0x32b   :  { %v13104_v62 = vcombine.low %v4546_v46, %v4554_v50 }
 0x32c   :  { %10457 = vmatpush1.bf16.msra.mxu0 %v12928_v10  ;;  %v13024_v10 = vcombine.low %v4466_v18, %v4474_v59  ;;  %v4562_v18 = vld [vmem:[#allocation7 + $0x10a0] sm:$0xff] }
 0x32d   :  { %10621 = vmatpush1.bf16.msra.mxu1 %v12930_v12  ;;  %10458 = vmatprep.subr.bf16.mxu0 %v12945_v13  ;;  %v4483_v12 = vld [vmem:[#allocation7 + $0xce8] sm:$0xff]  ;;  %v4570_v59 = vld [vmem:[#allocation7 + $0x1100] sm:$0xff] }
 0x32e   :  { %10622 = vmatprep.subr.bf16.mxu1 %v12947_v35  ;;  %v4491_v13 = vld [vmem:[#allocation7 + $0xd48] sm:$0xff]  ;;  %v14414_v35 = vpack.c.bf16 %v4194_v3, %v4194_v3  ;;  %v13121_v3 = vcombine.high %v4562_v18, %v4570_v59 }
 0x32f   :  { %v13042_v21 = vcombine.low %v4483_v12, %v4491_v13 }
 0x330   :  { %10459 = vmatpush1.bf16.msra.mxu0 %v12944_v19  ;;  %v13043_v19 = vcombine.high %v4483_v12, %v4491_v13 }
 0x331   :  { %10623 = vmatpush1.bf16.msra.mxu1 %v12946_v4  ;;  %10460 = vmatprep.subr.bf16.mxu0 %v12961_v42  ;;  %v4499_v4 = vld [vmem:[#allocation7 + $0xda8] sm:$0xff] }
 0x332   :  { %10624 = vmatprep.subr.bf16.mxu1 %v12963_v20  ;;  %v4507_v42 = vld [vmem:[#allocation7 + $0xe08] sm:$0xff]  ;;  %v13040_v20 = vcombine.low %v4482_v7, %v4490_v8  ;;  %v13120_v8 = vcombine.low %v4562_v18, %v4570_v59 }
 0x333   :  { %v13059_v23 = vcombine.high %v4499_v4, %v4507_v42  ;;  %v13058_v28 = vcombine.low %v4499_v4, %v4507_v42  ;;  %v4587_v7 = vld [vmem:[#allocation7 + $0x11c8] sm:$0xff] }
 0x334   :  { %10461 = vmatpush1.bf16.msra.mxu0 %v12960_v26  ;;  %v4522_v26 = vld [vmem:[#allocation7 + $0xec0] sm:$0xff]  ;;  %v13139_v13 = vcombine.high %v4579_v6, %v4587_v7  ;;  %v13138_v4 = vcombine.low %v4579_v6, %v4587_v7  ;;  %v4667_v18 = vld [vmem:[#allocation7 + $0x1588] sm:$0xff] }
 0x335   :  { %10625 = vmatpush1.bf16.msra.mxu1 %v12962_v17  ;;  %10462 = vmatprep.subr.bf16.mxu0 %v12977_v33  ;;  %v4515_v17 = vld [vmem:[#allocation7 + $0xe68] sm:$0xff]  ;;  %v13073_v29 = vcombine.high %v4514_v24, %v4522_v26 }
 0x336   :  { %10626 = vmatprep.subr.bf16.mxu1 %v12979_v27  ;;  %v4523_v33 = vld [vmem:[#allocation7 + $0xec8] sm:$0xff]  ;;  %v13056_v27 = vcombine.low %v4498_v16, %v4506_v14 }
 0x337   :  { %v13075_v30 = vcombine.high %v4515_v17, %v4523_v33  ;;  %v4595_v16 = vld [vmem:[#allocation7 + $0x1228] sm:$0xff] }
 0x338   :  { %10463 = vmatpush1.bf16.msra.mxu0 %v12976_v31  ;;  %v4538_v31 = vld [vmem:[#allocation7 + $0xf80] sm:$0xff]  ;;  %v4603_v14 = vld [vmem:[#allocation7 + $0x1288] sm:$0xff] }
 0x339   :  { %10627 = vmatpush1.bf16.msra.mxu1 %v12978_v36  ;;  %10464 = vmatprep.subr.bf16.mxu0 %v12993_v11  ;;  %v4539_v36 = vld [vmem:[#allocation7 + $0xf88] sm:$0xff]  ;;  %v13072_v11 = vcombine.low %v4514_v24, %v4522_v26  ;;  %v13089_v41 = vcombine.high %v4530_v34, %v4538_v31  ;;  %v13088_v44 = vcombine.low %v4530_v34, %v4538_v31 }
 0x33a   :  { %10628 = vmatprep.subr.bf16.mxu1 %v12995_v38  ;;  %v13074_v38 = vcombine.low %v4515_v17, %v4523_v33  ;;  %v13091_v43 = vcombine.high %v4531_v32, %v4539_v36  ;;  %v4619_v24 = vld [vmem:[#allocation7 + $0x1348] sm:$0xff]  ;;  %v13154_v17 = vcombine.low %v4595_v16, %v4603_v14 }
 0x33b   :  { %v4635_v34 = vld [vmem:[#allocation7 + $0x1408] sm:$0xff] }
 0x33c   :  { %10465 = vmatpush1.bf16.msra.mxu0 %v12992_v52  ;;  %v4555_v52 = vld [vmem:[#allocation7 + $0x1048] sm:$0xff] }
 0x33d   :  { %10629 = vmatpush1.bf16.msra.mxu1 %v12994_v53  ;;  %10466 = vmatprep.subr.bf16.mxu0 %v13009_v54  ;;  %v13090_v53 = vcombine.low %v4531_v32, %v4539_v36  ;;  %v13105_v54 = vcombine.high %v4546_v46, %v4554_v50  ;;  %v4651_v46 = vld [vmem:[#allocation7 + $0x14c8] sm:$0xff] }
 0x33e   :  { %10630 = vmatprep.subr.bf16.mxu1 %v13011_v55  ;;  %v13107_v55 = vcombine.high %v4547_v2, %v4555_v52 }
 0x340   :  { %10467 = vmatpush1.bf16.msra.mxu0 %v13008_v1  ;;  %v13106_v1 = vcombine.low %v4547_v2, %v4555_v52 }
 0x341   :  { %10631 = vmatpush1.bf16.msra.mxu1 %v13010_v47  ;;  %10477 = vmatprep.subr.bf16.mxu0 %v13025_v5  ;;  %v13123_v47 = vcombine.high %v4563_v56, %v4571_v60  ;;  %v4578_v5 = vld [vmem:[#allocation7 + $0x1160] sm:$0xff] }
 0x342   :  { %10641 = vmatprep.subr.bf16.mxu1 %v13027_v39  ;;  %v4586_v39 = vld [vmem:[#allocation7 + $0x11c0] sm:$0xff] }
 0x343   :  { %10469 = vmatmul.mubr.bf16.vlgmr.msra.gmra.mrb[8].mxu0 %v14414_v35  ;;  %v13137_v12 = vcombine.high %v4578_v5, %v4586_v39 }
 0x344   :  { %10633 = vmatmul.mubr.bf16.vlgmr.msra.gmra.mrb[24].mxu1 %v14414_v35  ;;  %10478 = vmatpush1.bf16.msra.mxu0 %v13024_v10  ;;  %v13122_v10 = vcombine.low %v4563_v56, %v4571_v60 }
 0x345   :  { %10509 = vmatprep.mubr.bf16.mxu0 %v14416_v15  ;;  %10642 = vmatpush1.bf16.msra.mxu1 %v13026_v51  ;;  %v4594_v51 = vld [vmem:[#allocation7 + $0x1220] sm:$0xff] }
 0x346   :  { %10673 = vmatprep.mubr.bf16.mxu1 %v14416_v15  ;;  %10479 = vmatprep.subr.bf16.mxu0 %v13041_v0  ;;  %v4602_v0 = vld [vmem:[#allocation7 + $0x1280] sm:$0xff] }
 0x347   :  { %10643 = vmatprep.subr.bf16.mxu1 %v13043_v19  ;;  %v13136_v19 = vcombine.low %v4578_v5, %v4586_v39  ;;  %v13153_v42 = vcombine.high %v4594_v51, %v4602_v0  ;;  %v13152_v26 = vcombine.low %v4594_v51, %v4602_v0  ;;  %v4683_v5 = vld [vmem:[#allocation7 + $0x1648] sm:$0xff] }
 0x348   :  { %10480 = vmatpush1.bf16.msra.mxu0 %v13040_v20  ;;  %v13155_v20 = vcombine.high %v4595_v16, %v4603_v14  ;;  %v4699_v51 = vld [vmem:[#allocation7 + $0x1708] sm:$0xff]  ;;  %v949_v16 = vrot.slane %v14397_v63, %v14322_v61 }
 0x349   :  { %10644 = vmatpush1.bf16.msra.mxu1 %v13042_v21  ;;  %10481 = vmatprep.subr.bf16.mxu0 %v13057_v22  ;;  %v4610_v21 = vld [vmem:[#allocation7 + $0x12e0] sm:$0xff] }
 0x34a   :  { %10645 = vmatprep.subr.bf16.mxu1 %v13059_v23  ;;  %v4618_v22 = vld [vmem:[#allocation7 + $0x1340] sm:$0xff]  ;;  %v4611_v23 = vld [vmem:[#allocation7 + $0x12e8] sm:$0xff] }
 0x34b   :  { %v13169_v33 = vcombine.high %v4610_v21, %v4618_v22  ;;  %v13168_v31 = vcombine.low %v4610_v21, %v4618_v22  ;;  %v13170_v32 = vcombine.low %v4611_v23, %v4619_v24  ;;  %v4707_v21 = vld [vmem:[#allocation7 + $0x1768] sm:$0xff] }
 0x34c   :  { %10482 = vmatpush1.bf16.msra.mxu0 %v13056_v27  ;;  %v13171_v27 = vcombine.high %v4611_v23, %v4619_v24  ;;  %v4715_v22 = vld [vmem:[#allocation7 + $0x17c8] sm:$0xff]  ;;  %v13810_v24 = vadd.f32 %v14391_v40, %v949_v16  ;;  %v4738_v40 = vld [vmem:[#allocation7 + $0x18e0] sm:$0xff] }
 0x34d   :  { %10646 = vmatpush1.bf16.msra.mxu1 %v13058_v28  ;;  %10483 = vmatprep.subr.bf16.mxu0 %v13073_v29  ;;  %v4626_v28 = vld [vmem:[#allocation7 + $0x13a0] sm:$0xff] }
 0x34e   :  { %10647 = vmatprep.subr.bf16.mxu1 %v13075_v30  ;;  %v4634_v29 = vld [vmem:[#allocation7 + $0x1400] sm:$0xff]  ;;  %v4627_v30 = vld [vmem:[#allocation7 + $0x13a8] sm:$0xff] }
 0x34f   :  { %v13185_v36 = vcombine.high %v4626_v28, %v4634_v29  ;;  %v13184_v50 = vcombine.low %v4626_v28, %v4634_v29  ;;  %v13186_v2 = vcombine.low %v4627_v30, %v4635_v34  ;;  %v4730_v28 = vld [vmem:[#allocation7 + $0x1880] sm:$0xff]  ;;  %v4723_v29 = vld [vmem:[#allocation7 + $0x1828] sm:$0xff] }
 0x350   :  { %10484 = vmatpush1.bf16.msra.mxu0 %v13072_v11  ;;  %v13187_v11 = vcombine.high %v4627_v30, %v4635_v34  ;;  %v4731_v30 = vld [vmem:[#allocation7 + $0x1888] sm:$0xff] }
 0x351   :  { %10648 = vmatpush1.bf16.msra.mxu1 %v13074_v38  ;;  %10485 = vmatprep.subr.bf16.mxu0 %v13089_v41  ;;  %v4642_v38 = vld [vmem:[#allocation7 + $0x1460] sm:$0xff] }
 0x352   :  { %10649 = vmatprep.subr.bf16.mxu1 %v13091_v43  ;;  %v4650_v41 = vld [vmem:[#allocation7 + $0x14c0] sm:$0xff]  ;;  %v4643_v43 = vld [vmem:[#allocation7 + $0x1468] sm:$0xff] }
 0x353   :  { %v13201_v52 = vcombine.high %v4642_v38, %v4650_v41  ;;  %v13200_v59 = vcombine.low %v4642_v38, %v4650_v41  ;;  %v13202_v56 = vcombine.low %v4643_v43, %v4651_v46  ;;  %v4746_v38 = vld [vmem:[#allocation7 + $0x1940] sm:$0xff]  ;;  %v4739_v41 = vld [vmem:[#allocation7 + $0x18e8] sm:$0xff] }
 0x354   :  { %10486 = vmatpush1.bf16.msra.mxu0 %v13088_v44  ;;  %v13203_v44 = vcombine.high %v4643_v43, %v4651_v46  ;;  %v4747_v43 = vld [vmem:[#allocation7 + $0x1948] sm:$0xff] }
 0x355   :  { %10650 = vmatpush1.bf16.msra.mxu1 %v13090_v53  ;;  %10487 = vmatprep.subr.bf16.mxu0 %v13105_v54  ;;  %v4658_v53 = vld [vmem:[#allocation7 + $0x1520] sm:$0xff] }
 0x356   :  { %10651 = vmatprep.subr.bf16.mxu1 %v13107_v55  ;;  %v4666_v54 = vld [vmem:[#allocation7 + $0x1580] sm:$0xff]  ;;  %v4659_v55 = vld [vmem:[#allocation7 + $0x1528] sm:$0xff] }
 0x357   :  { %v13217_v60 = vcombine.high %v4658_v53, %v4666_v54  ;;  %v13216_v39 = vcombine.low %v4658_v53, %v4666_v54  ;;  %v13218_v6 = vcombine.low %v4659_v55, %v4667_v18  ;;  %v4754_v53 = vld [vmem:[#allocation7 + $0x19a0] sm:$0xff] }
 0x358   :  { %10488 = vmatpush1.bf16.msra.mxu0 %v13104_v62  ;;  %v13219_v62 = vcombine.high %v4659_v55, %v4667_v18  ;;  %v4762_v54 = vld [vmem:[#allocation7 + $0x1a00] sm:$0xff]  ;;  %v4755_v55 = vld [vmem:[#allocation7 + $0x19a8] sm:$0xff] }
 0x359   :  { %10652 = vmatpush1.bf16.msra.mxu1 %v13106_v1  ;;  %10489 = vmatprep.subr.bf16.mxu0 %v13121_v3  ;;  %v4674_v1 = vld [vmem:[#allocation7 + $0x15e0] sm:$0xff]  ;;  %v4763_v18 = vld [vmem:[#allocation7 + $0x1a08] sm:$0xff] }
 0x35a   :  { %10653 = vmatprep.subr.bf16.mxu1 %v13123_v47  ;;  %v4682_v3 = vld [vmem:[#allocation7 + $0x1640] sm:$0xff]  ;;  %v4675_v47 = vld [vmem:[#allocation7 + $0x15e8] sm:$0xff] }
 0x35b   :  { %v13233_v7 = vcombine.high %v4674_v1, %v4682_v3  ;;  %v13232_v0 = vcombine.low %v4674_v1, %v4682_v3  ;;  %v13234_v14 = vcombine.low %v4675_v47, %v4683_v5  ;;  %v4770_v1 = vld [vmem:[#allocation7 + $0x1a60] sm:$0xff] }
 0x35c   :  { %10490 = vmatpush1.bf16.msra.mxu0 %v13120_v8  ;;  %v13235_v8 = vcombine.high %v4675_v47, %v4683_v5  ;;  %v4778_v3 = vld [vmem:[#allocation7 + $0x1ac0] sm:$0xff]  ;;  %v4771_v47 = vld [vmem:[#allocation7 + $0x1a68] sm:$0xff] }
 0x35d   :  { %10654 = vmatpush1.bf16.msra.mxu1 %v13122_v10  ;;  %10491 = vmatprep.subr.bf16.mxu0 %v13137_v12  ;;  %v4690_v10 = vld [vmem:[#allocation7 + $0x16a0] sm:$0xff]  ;;  %v4779_v5 = vld [vmem:[#allocation7 + $0x1ac8] sm:$0xff] }
 0x35e   :  { %10655 = vmatprep.subr.bf16.mxu1 %v13139_v13  ;;  %v4698_v12 = vld [vmem:[#allocation7 + $0x1700] sm:$0xff]  ;;  %v4691_v13 = vld [vmem:[#allocation7 + $0x16a8] sm:$0xff]  ;;  %v13330_v16 = vcombine.low %v4771_v47, %v4779_v5 }
 0x35f   :  { %v13248_v23 = vcombine.low %v4690_v10, %v4698_v12 }
 0x360   :  { %10492 = vmatpush1.bf16.msra.mxu0 %v13136_v19  ;;  %v13249_v19 = vcombine.high %v4690_v10, %v4698_v12  ;;  %v4786_v10 = vld [vmem:[#allocation7 + $0x1b20] sm:$0xff] }
 0x361   :  { %10656 = vmatpush1.bf16.msra.mxu1 %v13138_v4  ;;  %10493 = vmatprep.subr.bf16.mxu0 %v13153_v42  ;;  %v13251_v4 = vcombine.high %v4691_v13, %v4699_v51  ;;  %v4706_v42 = vld [vmem:[#allocation7 + $0x1760] sm:$0xff] }
 0x362   :  { %10657 = vmatprep.subr.bf16.mxu1 %v13155_v20  ;;  %v4714_v20 = vld [vmem:[#allocation7 + $0x17c0] sm:$0xff] }
 0x363   :  { %v13264_v34 = vcombine.low %v4706_v42, %v4714_v20  ;;  %v4794_v12 = vld [vmem:[#allocation7 + $0x1b80] sm:$0xff] }
 0x364   :  { %10494 = vmatpush1.bf16.msra.mxu0 %v13152_v26  ;;  %v13250_v26 = vcombine.low %v4691_v13, %v4699_v51  ;;  %v4787_v13 = vld [vmem:[#allocation7 + $0x1b28] sm:$0xff] }
 0x365   :  { %10658 = vmatpush1.bf16.msra.mxu1 %v13154_v17  ;;  %10495 = vmatprep.subr.bf16.mxu0 %v13169_v33  ;;  %v13265_v17 = vcombine.high %v4706_v42, %v4714_v20  ;;  %v13267_v33 = vcombine.high %v4707_v21, %v4715_v22  ;;  %v4795_v51 = vld [vmem:[#allocation7 + $0x1b88] sm:$0xff]  ;;  %v4810_v42 = vld [vmem:[#allocation7 + $0x1c40] sm:$0xff] }
 0x366   :  { %10659 = vmatprep.subr.bf16.mxu1 %v13171_v27  ;;  %v4722_v27 = vld [vmem:[#allocation7 + $0x1820] sm:$0xff]  ;;  %v4803_v20 = vld [vmem:[#allocation7 + $0x1be8] sm:$0xff] }
 0x367   :  { %v13280_v46 = vcombine.low %v4722_v27, %v4730_v28 }
 0x368   :  { %10496 = vmatpush1.bf16.msra.mxu0 %v13168_v31  ;;  %v4196_v31 = vmax.f32 %v13810_v24, 0.0 }
 0x369   :  { %10660 = vmatpush1.bf16.msra.mxu1 %v13170_v32  ;;  %10497 = vmatprep.subr.bf16.mxu0 %v13185_v36  ;;  %v13266_v32 = vcombine.low %v4707_v21, %v4715_v22  ;;  %v13281_v36 = vcombine.high %v4722_v27, %v4730_v28  ;;  %v4811_v21 = vld [vmem:[#allocation7 + $0x1c48] sm:$0xff]  ;;  %v13344_v22 = vcombine.low %v4786_v10, %v4794_v12 }
 0x36a   :  { %10661 = vmatprep.subr.bf16.mxu1 %v13187_v11  ;;  %v13283_v11 = vcombine.high %v4723_v29, %v4731_v30  ;;  %v4819_v27 = vld [vmem:[#allocation7 + $0x1ca8] sm:$0xff] }
 0x36b   :  { %v4827_v28 = vld [vmem:[#allocation7 + $0x1d08] sm:$0xff] }
 0x36c   :  { %10498 = vmatpush1.bf16.msra.mxu0 %v13184_v50  ;;  %v14425_v50 = vpack.c.bf16 %v4196_v31, %v4196_v31  ;;  %v13379_v31 = vcombine.high %v4819_v27, %v4827_v28 }
 0x36d   :  { %10662 = vmatpush1.bf16.msra.mxu1 %v13186_v2  ;;  %10499 = vmatprep.subr.bf16.mxu0 %v13201_v52  ;;  %v13282_v2 = vcombine.low %v4723_v29, %v4731_v30  ;;  %v13297_v52 = vcombine.high %v4738_v40, %v4746_v38  ;;  %v13362_v30 = vcombine.low %v4803_v20, %v4811_v21 }
 0x36e   :  { %10663 = vmatprep.subr.bf16.mxu1 %v13203_v44  ;;  %v13299_v44 = vcombine.high %v4739_v41, %v4747_v43 }
 0x370   :  { %10500 = vmatpush1.bf16.msra.mxu0 %v13200_v59  ;;  %v13296_v59 = vcombine.low %v4738_v40, %v4746_v38  ;;  %v4843_v40 = vld [vmem:[#allocation7 + $0x1dc8] sm:$0xff] }
 0x371   :  { %10664 = vmatpush1.bf16.msra.mxu1 %v13202_v56  ;;  %10501 = vmatprep.subr.bf16.mxu0 %v13217_v60  ;;  %v13298_v56 = vcombine.low %v4739_v41, %v4747_v43  ;;  %v13313_v60 = vcombine.high %v4754_v53, %v4762_v54  ;;  %v13378_v41 = vcombine.low %v4819_v27, %v4827_v28 }
 0x372   :  { %10665 = vmatprep.subr.bf16.mxu1 %v13219_v62  ;;  %v13315_v62 = vcombine.high %v4755_v55, %v4763_v18 }
 0x374   :  { %10502 = vmatpush1.bf16.msra.mxu0 %v13216_v39  ;;  %v13312_v39 = vcombine.low %v4754_v53, %v4762_v54  ;;  %v4859_v53 = vld [vmem:[#allocation7 + $0x1e88] sm:$0xff] }
 0x375   :  { %10666 = vmatpush1.bf16.msra.mxu1 %v13218_v6  ;;  %10503 = vmatprep.subr.bf16.mxu0 %v13233_v7  ;;  %v13314_v6 = vcombine.low %v4755_v55, %v4763_v18  ;;  %v13329_v7 = vcombine.high %v4770_v1, %v4778_v3 }
 0x376   :  { %10667 = vmatprep.subr.bf16.mxu1 %v13235_v8  ;;  %v13331_v8 = vcombine.high %v4771_v47, %v4779_v5 }
 0x378   :  { %10504 = vmatpush1.bf16.msra.mxu0 %v13232_v0  ;;  %v13328_v0 = vcombine.low %v4770_v1, %v4778_v3  ;;  %v4875_v1 = vld [vmem:[#allocation7 + $0x1f48] sm:$0xff] }
 0x379   :  { %10668 = vmatpush1.bf16.msra.mxu1 %v13234_v14  ;;  %10505 = vmatprep.subr.bf16.mxu0 %v13249_v19  ;;  %v13345_v14 = vcombine.high %v4786_v10, %v4794_v12  ;;  %v13347_v19 = vcombine.high %v4787_v13, %v4795_v51  ;;  %v4891_v10 = vld [vmem:[#allocation7 + $0x2008] sm:$0xff] }
 0x37a   :  { %10669 = vmatprep.subr.bf16.mxu1 %v13251_v4  ;;  %v4802_v4 = vld [vmem:[#allocation7 + $0x1be0] sm:$0xff] }
 0x37b   :  { %v13361_v24 = vcombine.high %v4802_v4, %v4810_v42  ;;  %v13360_v29 = vcombine.low %v4802_v4, %v4810_v42  ;;  %v4907_v4 = vld [vmem:[#allocation7 + $0x20c8] sm:$0xff] }
 0x37c   :  { %10506 = vmatpush1.bf16.msra.mxu0 %v13248_v23  ;;  %v13346_v23 = vcombine.low %v4787_v13, %v4795_v51 }
 0x37d   :  { %10670 = vmatpush1.bf16.msra.mxu1 %v13250_v26  ;;  %10507 = vmatprep.subr.bf16.mxu0 %v13265_v17  ;;  %v13363_v26 = vcombine.high %v4803_v20, %v4811_v21  ;;  %v4818_v17 = vld [vmem:[#allocation7 + $0x1ca0] sm:$0xff] }
 0x37e   :  { %10671 = vmatprep.subr.bf16.mxu1 %v13267_v33  ;;  %v4826_v33 = vld [vmem:[#allocation7 + $0x1d00] sm:$0xff] }
 0x37f   :  { %v13376_v38 = vcombine.low %v4818_v17, %v4826_v33 }
 0x380   :  { %10508 = vmatpush1.bf16.msra.mxu0 %v13264_v34  ;;  %v13377_v34 = vcombine.high %v4818_v17, %v4826_v33  ;;  %v4923_v17 = vld [vmem:[#allocation7 + $0x2188] sm:$0xff] }
 0x381   :  { %10672 = vmatpush1.bf16.msra.mxu1 %v13266_v32  ;;  %10518 = vmatprep.subr.bf16.mxu0 %v13281_v36  ;;  %v4834_v32 = vld [vmem:[#allocation7 + $0x1d60] sm:$0xff] }
 0x382   :  { %10682 = vmatprep.subr.bf16.mxu1 %v13283_v11  ;;  %v4842_v36 = vld [vmem:[#allocation7 + $0x1dc0] sm:$0xff]  ;;  %v4835_v11 = vld [vmem:[#allocation7 + $0x1d68] sm:$0xff] }
 0x383   :  { %10510 = vmatmul.mubr.bf16.vlgmr.msra.gmra.mrb[8].mxu0 %v14425_v50  ;;  %v13393_v43 = vcombine.high %v4834_v32, %v4842_v36  ;;  %v13392_v54 = vcombine.low %v4834_v32, %v4842_v36  ;;  %v13394_v55 = vcombine.low %v4835_v11, %v4843_v40  ;;  %v4939_v32 = vld [vmem:[#allocation7 + $0x2248] sm:$0xff] }
 0x384   :  { %10674 = vmatmul.mubr.bf16.vlgmr.msra.gmra.mrb[24].mxu1 %v14425_v50  ;;  %10519 = vmatpush1.bf16.msra.mxu0 %v13280_v46  ;;  %v13395_v46 = vcombine.high %v4835_v11, %v4843_v40 }
 0x385   :  { %10683 = vmatpush1.bf16.msra.mxu1 %v13282_v2  ;;  %10520 = vmatprep.subr.bf16.mxu0 %v13297_v52  ;;  %v4850_v2 = vld [vmem:[#allocation7 + $0x1e20] sm:$0xff] }
 0x386   :  { %10684 = vmatprep.subr.bf16.mxu1 %v13299_v44  ;;  %v4858_v52 = vld [vmem:[#allocation7 + $0x1e80] sm:$0xff]  ;;  %v4851_v44 = vld [vmem:[#allocation7 + $0x1e28] sm:$0xff] }
 0x387   :  { %v13409_v18 = vcombine.high %v4850_v2, %v4858_v52  ;;  %v13408_v3 = vcombine.low %v4850_v2, %v4858_v52  ;;  %v13410_v47 = vcombine.low %v4851_v44, %v4859_v53  ;;  %v4955_v2 = vld [vmem:[#allocation7 + $0x2308] sm:$0xff] }
 0x388   :  { %10521 = vmatpush1.bf16.msra.mxu0 %v13296_v59  ;;  %v13411_v59 = vcombine.high %v4851_v44, %v4859_v53 }
 0x389   :  { %10685 = vmatpush1.bf16.msra.mxu1 %v13298_v56  ;;  %10522 = vmatprep.subr.bf16.mxu0 %v13313_v60  ;;  %v4866_v56 = vld [vmem:[#allocation7 + $0x1ee0] sm:$0xff] }
 0x38a   :  { %10686 = vmatprep.subr.bf16.mxu1 %v13315_v62  ;;  %v4874_v60 = vld [vmem:[#allocation7 + $0x1f40] sm:$0xff]  ;;  %v4867_v62 = vld [vmem:[#allocation7 + $0x1ee8] sm:$0xff] }
 0x38b   :  { %v13425_v5 = vcombine.high %v4866_v56, %v4874_v60  ;;  %v13424_v12 = vcombine.low %v4866_v56, %v4874_v60  ;;  %v13426_v13 = vcombine.low %v4867_v62, %v4875_v1  ;;  %v4971_v56 = vld [vmem:[#allocation7 + $0x23c8] sm:$0xff] }
 0x38c   :  { %10523 = vmatpush1.bf16.msra.mxu0 %v13312_v39  ;;  %v13427_v39 = vcombine.high %v4867_v62, %v4875_v1 }
 0x38d   :  { %10687 = vmatpush1.bf16.msra.mxu1 %v13314_v6  ;;  %10524 = vmatprep.subr.bf16.mxu0 %v13329_v7  ;;  %v4882_v6 = vld [vmem:[#allocation7 + $0x1fa0] sm:$0xff] }
 0x38e   :  { %10688 = vmatprep.subr.bf16.mxu1 %v13331_v8  ;;  %v4890_v7 = vld [vmem:[#allocation7 + $0x2000] sm:$0xff]  ;;  %v4883_v8 = vld [vmem:[#allocation7 + $0x1fa8] sm:$0xff] }
 0x38f   :  { %v13441_v51 = vcombine.high %v4882_v6, %v4890_v7  ;;  %v13440_v42 = vcombine.low %v4882_v6, %v4890_v7  ;;  %v13442_v20 = vcombine.low %v4883_v8, %v4891_v10  ;;  %v4987_v6 = vld [vmem:[#allocation7 + $0x2488] sm:$0xff] }
 0x390   :  { %10525 = vmatpush1.bf16.msra.mxu0 %v13328_v0  ;;  %v13443_v0 = vcombine.high %v4883_v8, %v4891_v10 }
 0x391   :  { %10689 = vmatpush1.bf16.msra.mxu1 %v13330_v16  ;;  %10526 = vmatprep.subr.bf16.mxu0 %v13345_v14  ;;  %v4898_v16 = vld [vmem:[#allocation7 + $0x2060] sm:$0xff] }
 0x392   :  { %10690 = vmatprep.subr.bf16.mxu1 %v13347_v19  ;;  %v4906_v14 = vld [vmem:[#allocation7 + $0x20c0] sm:$0xff]  ;;  %v4899_v19 = vld [vmem:[#allocation7 + $0x2068] sm:$0xff] }
 0x393   :  { %v13457_v21 = vcombine.high %v4898_v16, %v4906_v14  ;;  %v13456_v33 = vcombine.low %v4898_v16, %v4906_v14  ;;  %v13458_v27 = vcombine.low %v4899_v19, %v4907_v4 }
 0x394   :  { %10527 = vmatpush1.bf16.msra.mxu0 %v13344_v22  ;;  %v13459_v22 = vcombine.high %v4899_v19, %v4907_v4 }
 0x395   :  { %10691 = vmatpush1.bf16.msra.mxu1 %v13346_v23  ;;  %10528 = vmatprep.subr.bf16.mxu0 %v13361_v24  ;;  %v4914_v23 = vld [vmem:[#allocation7 + $0x2120] sm:$0xff] }
 0x396   :  { %10692 = vmatprep.subr.bf16.mxu1 %v13363_v26  ;;  %v4922_v24 = vld [vmem:[#allocation7 + $0x2180] sm:$0xff]  ;;  %v4915_v26 = vld [vmem:[#allocation7 + $0x2128] sm:$0xff] }
 0x397   :  { %v13473_v28 = vcombine.high %v4914_v23, %v4922_v24  ;;  %v13472_v36 = vcombine.low %v4914_v23, %v4922_v24  ;;  %v13474_v11 = vcombine.low %v4915_v26, %v4923_v17 }
 0x398   :  { %10529 = vmatpush1.bf16.msra.mxu0 %v13360_v29  ;;  %v13475_v29 = vcombine.high %v4915_v26, %v4923_v17 }
 0x399   :  { %10693 = vmatpush1.bf16.msra.mxu1 %v13362_v30  ;;  %10530 = vmatprep.subr.bf16.mxu0 %v13377_v34  ;;  %v4930_v30 = vld [vmem:[#allocation7 + $0x21e0] sm:$0xff] }
 0x39a   :  { %10694 = vmatprep.subr.bf16.mxu1 %v13379_v31  ;;  %v4938_v34 = vld [vmem:[#allocation7 + $0x2240] sm:$0xff]  ;;  %v4931_v31 = vld [vmem:[#allocation7 + $0x21e8] sm:$0xff] }
 0x39b   :  { %v13489_v40 = vcombine.high %v4930_v30, %v4938_v34  ;;  %v13488_v52 = vcombine.low %v4930_v30, %v4938_v34  ;;  %v13490_v44 = vcombine.low %v4931_v31, %v4939_v32  ;;  %v4995_v30 = vld [vmem:[#allocation7 + $0x24e8] sm:$0xff] }
 0x39c   :  { %10531 = vmatpush1.bf16.msra.mxu0 %v13376_v38  ;;  %v13491_v38 = vcombine.high %v4931_v31, %v4939_v32  ;;  %v5003_v34 = vld [vmem:[#allocation7 + $0x2548] sm:$0xff] }
 0x39d   :  { %10695 = vmatpush1.bf16.msra.mxu1 %v13378_v41  ;;  %10532 = vmatprep.subr.bf16.mxu0 %v13393_v43  ;;  %v4946_v41 = vld [vmem:[#allocation7 + $0x22a0] sm:$0xff] }
 0x39e   :  { %10696 = vmatprep.subr.bf16.mxu1 %v13395_v46  ;;  %v4954_v43 = vld [vmem:[#allocation7 + $0x2300] sm:$0xff]  ;;  %v4947_v46 = vld [vmem:[#allocation7 + $0x22a8] sm:$0xff] }
 0x39f   :  { %v13505_v53 = vcombine.high %v4946_v41, %v4954_v43  ;;  %v13504_v60 = vcombine.low %v4946_v41, %v4954_v43  ;;  %v13506_v62 = vcombine.low %v4947_v46, %v4955_v2  ;;  %v13555_v41 = vcombine.high %v4995_v30, %v5003_v34  ;;  %v5018_v43 = vld [vmem:[#allocation7 + $0x2600] sm:$0xff] }
 0x3a0   :  { %10533 = vmatpush1.bf16.msra.mxu0 %v13392_v54  ;;  %v13507_v54 = vcombine.high %v4947_v46, %v4955_v2  ;;  %v5011_v46 = vld [vmem:[#allocation7 + $0x25a8] sm:$0xff] }
 0x3a1   :  { %10697 = vmatpush1.bf16.msra.mxu1 %v13394_v55  ;;  %10534 = vmatprep.subr.bf16.mxu0 %v13409_v18  ;;  %v4962_v55 = vld [vmem:[#allocation7 + $0x2360] sm:$0xff]  ;;  %v5019_v2 = vld [vmem:[#allocation7 + $0x2608] sm:$0xff] }
 0x3a2   :  { %10698 = vmatprep.subr.bf16.mxu1 %v13411_v59  ;;  %v4970_v18 = vld [vmem:[#allocation7 + $0x23c0] sm:$0xff]  ;;  %v4963_v59 = vld [vmem:[#allocation7 + $0x2368] sm:$0xff] }
 0x3a3   :  { %v13521_v1 = vcombine.high %v4962_v55, %v4970_v18  ;;  %v13520_v7 = vcombine.low %v4962_v55, %v4970_v18  ;;  %v13522_v8 = vcombine.low %v4963_v59, %v4971_v56  ;;  %v13571_v55 = vcombine.high %v5011_v46, %v5019_v2  ;;  %v5026_v18 = vld [vmem:[#allocation7 + $0x2660] sm:$0xff] }
 0x3a4   :  { %10535 = vmatpush1.bf16.msra.mxu0 %v13408_v3  ;;  %v13523_v3 = vcombine.high %v4963_v59, %v4971_v56  ;;  %v5034_v59 = vld [vmem:[#allocation7 + $0x26c0] sm:$0xff]  ;;  %v5027_v56 = vld [vmem:[#allocation7 + $0x2668] sm:$0xff] }
 0x3a5   :  { %10699 = vmatpush1.bf16.msra.mxu1 %v13410_v47  ;;  %10536 = vmatprep.subr.bf16.mxu0 %v13425_v5  ;;  %v4978_v47 = vld [vmem:[#allocation7 + $0x2420] sm:$0xff] }
 0x3a6   :  { %10700 = vmatprep.subr.bf16.mxu1 %v13427_v39  ;;  %v4986_v5 = vld [vmem:[#allocation7 + $0x2480] sm:$0xff]  ;;  %v4979_v39 = vld [vmem:[#allocation7 + $0x2428] sm:$0xff] }
 0x3a7   :  { %v13537_v10 = vcombine.high %v4978_v47, %v4986_v5  ;;  %v13536_v32 = vcombine.low %v4978_v47, %v4986_v5  ;;  %v5042_v5 = vld [vmem:[#allocation7 + $0x2720] sm:$0xff] }
 0x3a8   :  { %10537 = vmatpush1.bf16.msra.mxu0 %v13424_v12  ;;  %v13539_v12 = vcombine.high %v4979_v39, %v4987_v6 }
 0x3a9   :  { %10701 = vmatpush1.bf16.msra.mxu1 %v13426_v13  ;;  %10538 = vmatprep.subr.bf16.mxu0 %v13441_v51  ;;  %v957_v13 = vrot.slane %v14397_v63, %v14346_v45  ;;  %v961_v51 = vrot.slane %v14397_v63, %v14325_v9 }
 0x3aa   :  { %10702 = vmatprep.subr.bf16.mxu1 %v13443_v0  ;;  %v969_v0 = vrot.slane %v14397_v63, %v14349_v58 }
 0x3ac   :  { %10539 = vmatpush1.bf16.msra.mxu0 %v13440_v42 }
 0x3ad   :  { %10703 = vmatpush1.bf16.msra.mxu1 %v13442_v20  ;;  %10540 = vmatprep.subr.bf16.mxu0 %v13457_v21 }
 0x3ae   :  { %10704 = vmatprep.subr.bf16.mxu1 %v13459_v22 }
 0x3b0   :  { %10541 = vmatpush1.bf16.msra.mxu0 %v13456_v33 }
 0x3b1   :  { %10705 = vmatpush1.bf16.msra.mxu1 %v13458_v27  ;;  %10542 = vmatprep.subr.bf16.mxu0 %v13473_v28  ;;  %v4994_v27 = vld [vmem:[#allocation7 + $0x24e0] sm:$0xff] }
 0x3b2   :  { %10706 = vmatprep.subr.bf16.mxu1 %v13475_v29  ;;  %v5002_v29 = vld [vmem:[#allocation7 + $0x2540] sm:$0xff] }
 0x3b4   :  { %10543 = vmatpush1.bf16.msra.mxu0 %v13472_v36  ;;  %v13538_v36 = vcombine.low %v4979_v39, %v4987_v6  ;;  %v5050_v39 = vld [vmem:[#allocation7 + $0x2780] sm:$0xff]  ;;  %v5043_v6 = vld [vmem:[#allocation7 + $0x2728] sm:$0xff] }
 0x3b5   :  { %10707 = vmatpush1.bf16.msra.mxu1 %v13474_v11  ;;  %10544 = vmatprep.subr.bf16.mxu0 %v13489_v40  ;;  %v5010_v40 = vld [vmem:[#allocation7 + $0x25a0] sm:$0xff] }
 0x3b6   :  { %10708 = vmatprep.subr.bf16.mxu1 %v13491_v38  ;;  %v13553_v38 = vcombine.high %v4994_v27, %v5002_v29 }
 0x3b8   :  { %10545 = vmatpush1.bf16.msra.mxu0 %v13488_v52 }
 0x3b9   :  { %10709 = vmatpush1.bf16.msra.mxu1 %v13490_v44  ;;  %10546 = vmatprep.subr.bf16.mxu0 %v13505_v53  ;;  %v13552_v44 = vcombine.low %v4994_v27, %v5002_v29  ;;  %v13554_v53 = vcombine.low %v4995_v30, %v5003_v34  ;;  %v5090_v29 = vld [vmem:[#allocation7 + $0x2960] sm:$0xff]  ;;  %v5091_v34 = vld [vmem:[#allocation7 + $0x2968] sm:$0xff] }
 0x3ba   :  { %10710 = vmatprep.subr.bf16.mxu1 %v13507_v54  ;;  %v13569_v54 = vcombine.high %v5010_v40, %v5018_v43  ;;  %v5098_v30 = vld [vmem:[#allocation7 + $0x29c0] sm:$0xff] }
 0x3bc   :  { %10547 = vmatpush1.bf16.msra.mxu0 %v13504_v60  ;;  %v5035_v60 = vld [vmem:[#allocation7 + $0x26c8] sm:$0xff] }
 0x3bd   :  { %10711 = vmatpush1.bf16.msra.mxu1 %v13506_v62  ;;  %10548 = vmatprep.subr.bf16.mxu0 %v13521_v1  ;;  %v13568_v62 = vcombine.low %v5010_v40, %v5018_v43  ;;  %v13570_v1 = vcombine.low %v5011_v46, %v5019_v2  ;;  %v13587_v47 = vcombine.high %v5027_v56, %v5035_v60  ;;  %v5106_v43 = vld [vmem:[#allocation7 + $0x2a20] sm:$0xff]  ;;  %v5107_v2 = vld [vmem:[#allocation7 + $0x2a28] sm:$0xff] }
 0x3be   :  { %10712 = vmatprep.subr.bf16.mxu1 %v13523_v3  ;;  %v13585_v3 = vcombine.high %v5026_v18, %v5034_v59  ;;  %v5114_v46 = vld [vmem:[#allocation7 + $0x2a80] sm:$0xff] }
 0x3c0   :  { %10549 = vmatpush1.bf16.msra.mxu0 %v13520_v7  ;;  %v5051_v7 = vld [vmem:[#allocation7 + $0x2788] sm:$0xff] }
 0x3c1   :  { %10713 = vmatpush1.bf16.msra.mxu1 %v13522_v8  ;;  %10559 = vmatprep.subr.bf16.mxu0 %v13537_v10  ;;  %v13584_v8 = vcombine.low %v5026_v18, %v5034_v59  ;;  %v13586_v10 = vcombine.low %v5027_v56, %v5035_v60  ;;  %v5122_v59 = vld [vmem:[#allocation7 + $0x2ae0] sm:$0xff]  ;;  %v5123_v60 = vld [vmem:[#allocation7 + $0x2ae8] sm:$0xff] }
 0x3c2   :  { %10723 = vmatprep.subr.bf16.mxu1 %v13539_v12  ;;  %v13601_v12 = vcombine.high %v5042_v5, %v5050_v39  ;;  %v5130_v56 = vld [vmem:[#allocation7 + $0x2b40] sm:$0xff] }
 0x3d6   :  { %v4023_v16 = vpop.f32.mrb[4].mxu0 }
 0x3d7   :  { %v13812_v14 = vadd.f32 %v4023_v16, %v957_v13  ;;  %v14435_v19 = vpop.f32.mrb[20].mxu1  ;;  %v4025_v4 = vpop.f32.mrb[5].mxu0  ;;  %v13603_v13 = vcombine.high %v5043_v6, %v5051_v7  ;;  %v5059_v16 = vld [vmem:[#allocation7 + $0x27e8] sm:$0xff] }
 0x3d8   :  { %v13813_v42 = vadd.f32 %v4025_v4, %v961_v51  ;;  %v4189_v20 = vpop.f32.mrb[21].mxu1  ;;  %v4027_v21 = vpop.f32.mrb[6].mxu0  ;;  %v5058_v51 = vld [vmem:[#allocation7 + $0x27e0] sm:$0xff]  ;;  %v13600_v4 = vcombine.low %v5042_v5, %v5050_v39 }
 0x3d9   :  { %v4198_v22 = vmax.f32 %v13812_v14, 0.0  ;;  %v13815_v23 = vadd.f32 %v4189_v20, %v969_v0  ;;  %v4191_v24 = vpop.f32.mrb[22].mxu1  ;;  %v4028_v26 = vpop.f32.mrb[7].mxu0  ;;  %v5066_v0 = vld [vmem:[#allocation7 + $0x2840] sm:$0xff]  ;;  %v5067_v14 = vld [vmem:[#allocation7 + $0x2848] sm:$0xff] }
 0x3da   :  { %v4199_v17 = vmax.f32 %v13813_v42, 0.0  ;;  %v4192_v33 = vpop.f32.mrb[23].mxu1  ;;  %v13602_v42 = vcombine.low %v5043_v6, %v5051_v7  ;;  %v13617_v20 = vcombine.high %v5058_v51, %v5066_v0  ;;  %v13619_v21 = vcombine.high %v5059_v16, %v5067_v14  ;;  %v5075_v24 = vld [vmem:[#allocation7 + $0x28a8] sm:$0xff]  ;;  %v5138_v39 = vld [vmem:[#allocation7 + $0x2ba0] sm:$0xff] }
 0x3db   :  { %v4201_v28 = vmax.f32 %v13815_v23, 0.0  ;;  %v14439_v11 = vpack.c.bf16 %v4198_v22, %v4198_v22  ;;  %v5074_v22 = vld [vmem:[#allocation7 + $0x28a0] sm:$0xff]  ;;  %v5083_v26 = vld [vmem:[#allocation7 + $0x2908] sm:$0xff]  ;;  %v13618_v33 = vcombine.low %v5059_v16, %v5067_v14 }
 0x3dc   :  { %v14437_v31 = vpack.c.bf16 %v4199_v17, %v4199_v17  ;;  %v5082_v23 = vld [vmem:[#allocation7 + $0x2900] sm:$0xff]  ;;  %v13616_v17 = vcombine.low %v5058_v51, %v5066_v0  ;;  %v13634_v40 = vcombine.low %v5075_v24, %v5083_v26  ;;  %v5139_v7 = vld [vmem:[#allocation7 + $0x2ba8] sm:$0xff] }
 0x3dd   :  { %v14443_v52 = vpack.c.bf16 %v4201_v28, %v4201_v28  ;;  %v13633_v27 = vcombine.high %v5074_v22, %v5082_v23  ;;  %v13635_v28 = vcombine.high %v5075_v24, %v5083_v26  ;;  %v5146_v6 = vld [vmem:[#allocation7 + $0x2c00] sm:$0xff]  ;;  %v5155_v14 = vld [vmem:[#allocation7 + $0x2c68] sm:$0xff] }
 0x3de   :  { %10550 = vmatprep.mubr.bf16.mxu0 %v14437_v31  ;;  %10714 = vmatprep.mubr.bf16.mxu1 %v14437_v31  ;;  %v5154_v0 = vld [vmem:[#allocation7 + $0x2c60] sm:$0xff]  ;;  %v5171_v26 = vld [vmem:[#allocation7 + $0x2d28] sm:$0xff] }
 0x3df   :  { %10551 = vmatmul.mubr.bf16.vlgmr.msra.gmra.mrb[8].mxu0 %v14439_v11  ;;  %10715 = vmatmul.mubr.bf16.vlgmr.msra.gmra.mrb[24].mxu1 %v14439_v11  ;;  %v5162_v16 = vld [vmem:[#allocation7 + $0x2cc0] sm:$0xff] }
 0x3e0   :  { %10560 = vmatpush1.bf16.msra.mxu0 %v13536_v32  ;;  %10724 = vmatpush1.bf16.msra.mxu1 %v13538_v36  ;;  %v5099_v32 = vld [vmem:[#allocation7 + $0x29c8] sm:$0xff]  ;;  %v13632_v36 = vcombine.low %v5074_v22, %v5082_v23  ;;  %v5170_v23 = vld [vmem:[#allocation7 + $0x2d20] sm:$0xff] }
 0x3e1   :  { %10591 = vmatprep.mubr.bf16.mxu0 %v14443_v52  ;;  %10755 = vmatprep.mubr.bf16.mxu1 %v14443_v52  ;;  %v5178_v24 = vld [vmem:[#allocation7 + $0x2d80] sm:$0xff] }
 0x3e2   :  { %10561 = vmatprep.subr.bf16.mxu0 %v13553_v38  ;;  %10725 = vmatprep.subr.bf16.mxu1 %v13555_v41  ;;  %v13649_v38 = vcombine.high %v5090_v29, %v5098_v30  ;;  %v13651_v41 = vcombine.high %v5091_v34, %v5099_v32 }
 0x3e4   :  { %10562 = vmatpush1.bf16.msra.mxu0 %v13552_v44  ;;  %10726 = vmatpush1.bf16.msra.mxu1 %v13554_v53  ;;  %v5115_v44 = vld [vmem:[#allocation7 + $0x2a88] sm:$0xff]  ;;  %v13648_v53 = vcombine.low %v5090_v29, %v5098_v30  ;;  %v5186_v30 = vld [vmem:[#allocation7 + $0x2de0] sm:$0xff] }
 0x3e5   :  { %10563 = vmatprep.subr.bf16.mxu0 %v13569_v54  ;;  %10727 = vmatprep.subr.bf16.mxu1 %v13571_v55  ;;  %v13650_v54 = vcombine.low %v5091_v34, %v5099_v32  ;;  %v13665_v55 = vcombine.high %v5106_v43, %v5114_v46  ;;  %v13667_v18 = vcombine.high %v5107_v2, %v5115_v44  ;;  %v5194_v34 = vld [vmem:[#allocation7 + $0x2e40] sm:$0xff]  ;;  %v5187_v32 = vld [vmem:[#allocation7 + $0x2de8] sm:$0xff] }
 0x3e8   :  { %10564 = vmatpush1.bf16.msra.mxu0 %v13568_v62  ;;  %10728 = vmatpush1.bf16.msra.mxu1 %v13570_v1  ;;  %v5131_v62 = vld [vmem:[#allocation7 + $0x2b48] sm:$0xff]  ;;  %v13664_v1 = vcombine.low %v5106_v43, %v5114_v46  ;;  %v5202_v46 = vld [vmem:[#allocation7 + $0x2ea0] sm:$0xff] }
 0x3e9   :  { %10565 = vmatprep.subr.bf16.mxu0 %v13585_v3  ;;  %10729 = vmatprep.subr.bf16.mxu1 %v13587_v47  ;;  %v13666_v3 = vcombine.low %v5107_v2, %v5115_v44  ;;  %v13681_v47 = vcombine.high %v5122_v59, %v5130_v56  ;;  %v13683_v5 = vcombine.high %v5123_v60, %v5131_v62  ;;  %v5210_v2 = vld [vmem:[#allocation7 + $0x2f00] sm:$0xff]  ;;  %v5203_v44 = vld [vmem:[#allocation7 + $0x2ea8] sm:$0xff] }
 0x3ec   :  { %10566 = vmatpush1.bf16.msra.mxu0 %v13584_v8  ;;  %10730 = vmatpush1.bf16.msra.mxu1 %v13586_v10  ;;  %v5147_v8 = vld [vmem:[#allocation7 + $0x2c08] sm:$0xff]  ;;  %v13680_v10 = vcombine.low %v5122_v59, %v5130_v56  ;;  %v13761_v59 = vcombine.high %v5202_v46, %v5210_v2 }
 0x3ed   :  { %10567 = vmatprep.subr.bf16.mxu0 %v13601_v12  ;;  %10731 = vmatprep.subr.bf16.mxu1 %v13603_v13  ;;  %v13682_v12 = vcombine.low %v5123_v60, %v5131_v62  ;;  %v13697_v13 = vcombine.high %v5138_v39, %v5146_v6  ;;  %v13699_v51 = vcombine.high %v5139_v7, %v5147_v8  ;;  %v5218_v60 = vld [vmem:[#allocation7 + $0x2f60] sm:$0xff] }
 0x3ee   :  { %v5226_v62 = vld [vmem:[#allocation7 + $0x2fc0] sm:$0xff] }
 0x3f0   :  { %10568 = vmatpush1.bf16.msra.mxu0 %v13600_v4  ;;  %10732 = vmatpush1.bf16.msra.mxu1 %v13602_v42  ;;  %v5163_v4 = vld [vmem:[#allocation7 + $0x2cc8] sm:$0xff]  ;;  %v13696_v42 = vcombine.low %v5138_v39, %v5146_v6  ;;  %v13777_v6 = vcombine.high %v5218_v60, %v5226_v62 }
 0x3f1   :  { %10569 = vmatprep.subr.bf16.mxu0 %v13617_v20  ;;  %10733 = vmatprep.subr.bf16.mxu1 %v13619_v21  ;;  %v13698_v20 = vcombine.low %v5139_v7, %v5147_v8  ;;  %v13713_v21 = vcombine.high %v5154_v0, %v5162_v16  ;;  %v13715_v22 = vcombine.high %v5155_v14, %v5163_v4  ;;  %v4212_v8 = vld [vmem:[#allocation7 + $0x30] sm:$0xff] }
 0x3f4   :  { %10570 = vmatpush1.bf16.msra.mxu0 %v13616_v17  ;;  %10734 = vmatpush1.bf16.msra.mxu1 %v13618_v33  ;;  %v5179_v17 = vld [vmem:[#allocation7 + $0x2d88] sm:$0xff]  ;;  %v13712_v33 = vcombine.low %v5154_v0, %v5162_v16 }
 0x3f5   :  { %10571 = vmatprep.subr.bf16.mxu0 %v13633_v27  ;;  %10735 = vmatprep.subr.bf16.mxu1 %v13635_v28  ;;  %v13714_v27 = vcombine.low %v5155_v14, %v5163_v4  ;;  %v13729_v28 = vcombine.high %v5170_v23, %v5178_v24  ;;  %v13731_v29 = vcombine.high %v5171_v26, %v5179_v17  ;;  %v4228_v4 = vld [vmem:[#allocation7 + $0xf0] sm:$0xff] }
 0x3f8   :  { %10572 = vmatpush1.bf16.msra.mxu0 %v13632_v36  ;;  %10736 = vmatpush1.bf16.msra.mxu1 %v13634_v40  ;;  %v5195_v36 = vld [vmem:[#allocation7 + $0x2e48] sm:$0xff]  ;;  %v13728_v40 = vcombine.low %v5170_v23, %v5178_v24 }
 0x3f9   :  { %10573 = vmatprep.subr.bf16.mxu0 %v13649_v38  ;;  %10737 = vmatprep.subr.bf16.mxu1 %v13651_v41  ;;  %v13730_v38 = vcombine.low %v5171_v26, %v5179_v17  ;;  %v13745_v41 = vcombine.high %v5186_v30, %v5194_v34  ;;  %v13747_v43 = vcombine.high %v5187_v32, %v5195_v36  ;;  %v4244_v17 = vld [vmem:[#allocation7 + $0x1b0] sm:$0xff] }
 0x3fc   :  { %10574 = vmatpush1.bf16.msra.mxu0 %v13648_v53  ;;  %10738 = vmatpush1.bf16.msra.mxu1 %v13650_v54  ;;  %v5211_v53 = vld [vmem:[#allocation7 + $0x2f08] sm:$0xff]  ;;  %v13744_v54 = vcombine.low %v5186_v30, %v5194_v34 }
 0x3fd   :  { %10575 = vmatprep.subr.bf16.mxu0 %v13665_v55  ;;  %10739 = vmatprep.subr.bf16.mxu1 %v13667_v18  ;;  %v13746_v55 = vcombine.low %v5187_v32, %v5195_v36  ;;  %v965_v18 = vrot.slane %v14397_v63, %v14366_v37  ;;  %v13763_v56 = vcombine.high %v5203_v44, %v5211_v53  ;;  %v4220_v63 = vld [vmem:[#allocation7 + $0x90] sm:$0xff] }
 0x3fe   :  { %v12773_v16 = vcombine.high %v4212_v8, %v4220_v63  ;;  %v4260_v36 = vld [vmem:[#allocation7 + $0x270] sm:$0xff] }
 0x3ff   :  { %v13814_v39 = vadd.f32 %v14435_v19, %v965_v18  ;;  %v4229_v19 = vld [vmem:[#allocation7 + $0xf8] sm:$0xff] }
 0x400   :  { %10576 = vmatpush1.bf16.msra.mxu0 %v13664_v1  ;;  %10740 = vmatpush1.bf16.msra.mxu1 %v13666_v3  ;;  %v5219_v1 = vld [vmem:[#allocation7 + $0x2f68] sm:$0xff]  ;;  %v4285_v18 = vld [vmem:[#allocation7 + $0x398] sm:$0xff] }
 0x401   :  { %10577 = vmatprep.subr.bf16.mxu0 %v13681_v47  ;;  %10741 = vmatprep.subr.bf16.mxu1 %v13683_v5  ;;  %v5227_v3 = vld [vmem:[#allocation7 + $0x2fc8] sm:$0xff]  ;;  %v13760_v47 = vcombine.low %v5202_v46, %v5210_v2  ;;  %v13762_v5 = vcombine.low %v5203_v44, %v5211_v53  ;;  %v4200_v0 = vmax.f32 %v13814_v39, 0.0  ;;  %v4276_v53 = vld [vmem:[#allocation7 + $0x330] sm:$0xff] }
 0x402   :  { %v13779_v7 = vcombine.high %v5219_v1, %v5227_v3 }
 0x404   :  { %10578 = vmatpush1.bf16.msra.mxu0 %v13680_v10  ;;  %10742 = vmatpush1.bf16.msra.mxu1 %v13682_v12  ;;  %v4213_v10 = vld [vmem:[#allocation7 + $0x38] sm:$0xff] }
 0x405   :  { %10579 = vmatprep.subr.bf16.mxu0 %v13697_v13  ;;  %10743 = vmatprep.subr.bf16.mxu1 %v13699_v51  ;;  %v4221_v12 = vld [vmem:[#allocation7 + $0x98] sm:$0xff]  ;;  %v13776_v13 = vcombine.low %v5218_v60, %v5226_v62  ;;  %v13778_v51 = vcombine.low %v5219_v1, %v5227_v3  ;;  %v4292_v1 = vld [vmem:[#allocation7 + $0x3f0] sm:$0xff] }
 0x406   :  { %v12775_v14 = vcombine.high %v4213_v10, %v4221_v12  ;;  %v12774_v23 = vcombine.low %v4213_v10, %v4221_v12  ;;  %v4300_v3 = vld [vmem:[#allocation7 + $0x450] sm:$0xff]  ;;  %v4309_v12 = vld [vmem:[#allocation7 + $0x4b8] sm:$0xff] }
 0x407   :  { %v4316_v10 = vld [vmem:[#allocation7 + $0x510] sm:$0xff] }
 0x408   :  { %10580 = vmatpush1.bf16.msra.mxu0 %v13696_v42  ;;  %10744 = vmatpush1.bf16.msra.mxu1 %v13698_v20  ;;  %v4236_v42 = vld [vmem:[#allocation7 + $0x150] sm:$0xff]  ;;  %v4237_v20 = vld [vmem:[#allocation7 + $0x158] sm:$0xff] }
 0x409   :  { %10581 = vmatprep.subr.bf16.mxu0 %v13713_v21  ;;  %10745 = vmatprep.subr.bf16.mxu1 %v13715_v22  ;;  %v12772_v21 = vcombine.low %v4212_v8, %v4220_v63  ;;  %v14452_v22 = vpack.c.bf16 %v4200_v0, %v4200_v0  ;;  %v12789_v24 = vcombine.high %v4228_v4, %v4236_v42  ;;  %v4308_v63 = vld [vmem:[#allocation7 + $0x4b0] sm:$0xff] }
 0x40a   :  { %v12791_v26 = vcombine.high %v4229_v19, %v4237_v20  ;;  %v12790_v30 = vcombine.low %v4229_v19, %v4237_v20  ;;  %v4325_v19 = vld [vmem:[#allocation7 + $0x578] sm:$0xff] }
 0x40b   :  { %v4333_v20 = vld [vmem:[#allocation7 + $0x5d8] sm:$0xff] }
 0x40c   :  { %10582 = vmatpush1.bf16.msra.mxu0 %v13712_v33  ;;  %10746 = vmatpush1.bf16.msra.mxu1 %v13714_v27  ;;  %v4252_v33 = vld [vmem:[#allocation7 + $0x210] sm:$0xff]  ;;  %v4245_v27 = vld [vmem:[#allocation7 + $0x1b8] sm:$0xff] }
 0x40d   :  { %10583 = vmatprep.subr.bf16.mxu0 %v13729_v28  ;;  %10747 = vmatprep.subr.bf16.mxu1 %v13731_v29  ;;  %v4253_v28 = vld [vmem:[#allocation7 + $0x218] sm:$0xff]  ;;  %v12788_v29 = vcombine.low %v4228_v4, %v4236_v42  ;;  %v12805_v34 = vcombine.high %v4244_v17, %v4252_v33  ;;  %v4324_v4 = vld [vmem:[#allocation7 + $0x570] sm:$0xff] }
 0x40e   :  { %v12807_v32 = vcombine.high %v4245_v27, %v4253_v28  ;;  %v12806_v46 = vcombine.low %v4245_v27, %v4253_v28  ;;  %v4332_v42 = vld [vmem:[#allocation7 + $0x5d0] sm:$0xff]  ;;  %v4341_v27 = vld [vmem:[#allocation7 + $0x638] sm:$0xff] }
 0x40f   :  { %v4349_v28 = vld [vmem:[#allocation7 + $0x698] sm:$0xff] }
 0x410   :  { %10584 = vmatpush1.bf16.msra.mxu0 %v13728_v40  ;;  %10748 = vmatpush1.bf16.msra.mxu1 %v13730_v38  ;;  %v4268_v40 = vld [vmem:[#allocation7 + $0x2d0] sm:$0xff]  ;;  %v4261_v38 = vld [vmem:[#allocation7 + $0x278] sm:$0xff] }
 0x411   :  { %10585 = vmatprep.subr.bf16.mxu0 %v13745_v41  ;;  %10749 = vmatprep.subr.bf16.mxu1 %v13747_v43  ;;  %v4269_v41 = vld [vmem:[#allocation7 + $0x2d8] sm:$0xff]  ;;  %v12804_v43 = vcombine.low %v4244_v17, %v4252_v33  ;;  %v12821_v2 = vcombine.high %v4260_v36, %v4268_v40  ;;  %v4340_v17 = vld [vmem:[#allocation7 + $0x630] sm:$0xff] }
 0x412   :  { %v12823_v44 = vcombine.high %v4261_v38, %v4269_v41  ;;  %v4348_v33 = vld [vmem:[#allocation7 + $0x690] sm:$0xff] }
 0x414   :  { %10586 = vmatpush1.bf16.msra.mxu0 %v13744_v54  ;;  %10750 = vmatpush1.bf16.msra.mxu1 %v13746_v55  ;;  %v4284_v54 = vld [vmem:[#allocation7 + $0x390] sm:$0xff]  ;;  %v4277_v55 = vld [vmem:[#allocation7 + $0x338] sm:$0xff] }
 0x415   :  { %10587 = vmatprep.subr.bf16.mxu0 %v13761_v59  ;;  %10751 = vmatprep.subr.bf16.mxu1 %v13763_v56  ;;  %v12820_v59 = vcombine.low %v4260_v36, %v4268_v40  ;;  %v12822_v56 = vcombine.low %v4261_v38, %v4269_v41  ;;  %v12837_v60 = vcombine.high %v4276_v53, %v4284_v54  ;;  %v4356_v36 = vld [vmem:[#allocation7 + $0x6f0] sm:$0xff]  ;;  %v4357_v38 = vld [vmem:[#allocation7 + $0x6f8] sm:$0xff] }
 0x416   :  { %v12839_v62 = vcombine.high %v4277_v55, %v4285_v18  ;;  %v12836_v39 = vcombine.low %v4276_v53, %v4284_v54  ;;  %v4364_v40 = vld [vmem:[#allocation7 + $0x750] sm:$0xff]  ;;  %v4365_v41 = vld [vmem:[#allocation7 + $0x758] sm:$0xff] }
 0x417   :  { %v4372_v53 = vld [vmem:[#allocation7 + $0x7b0] sm:$0xff] }
 0x418   :  { %10588 = vmatpush1.bf16.msra.mxu0 %v13760_v47  ;;  %10752 = vmatpush1.bf16.msra.mxu1 %v13762_v5  ;;  %v4293_v47 = vld [vmem:[#allocation7 + $0x3f8] sm:$0xff]  ;;  %v4380_v54 = vld [vmem:[#allocation7 + $0x810] sm:$0xff] }
 0x419   :  { %10589 = vmatprep.subr.bf16.mxu0 %v13777_v6  ;;  %10753 = vmatprep.subr.bf16.mxu1 %v13779_v7  ;;  %v4301_v5 = vld [vmem:[#allocation7 + $0x458] sm:$0xff]  ;;  %v12838_v6 = vcombine.low %v4277_v55, %v4285_v18  ;;  %v12853_v7 = vcombine.high %v4292_v1, %v4300_v3 }
 0x41a   :  { %v12855_v8 = vcombine.high %v4293_v47, %v4301_v5  ;;  %v12854_v0 = vcombine.low %v4293_v47, %v4301_v5  ;;  %v4373_v55 = vld [vmem:[#allocation7 + $0x7b8] sm:$0xff] }
 0x41b   :  { %v4381_v18 = vld [vmem:[#allocation7 + $0x818] sm:$0xff] }
 0x41c   :  { %10590 = vmatpush1.bf16.msra.mxu0 %v13776_v13  ;;  %10754 = vmatpush1.bf16.msra.mxu1 %v13778_v51  ;;  %v4317_v13 = vld [vmem:[#allocation7 + $0x518] sm:$0xff]  ;;  %v12852_v51 = vcombine.low %v4292_v1, %v4300_v3  ;;  %v4388_v1 = vld [vmem:[#allocation7 + $0x870] sm:$0xff] }
 0x41d   :  { %10764 = vmatprep.subr.bf16.mxu0 %v12773_v16  ;;  %10928 = vmatprep.subr.bf16.mxu1 %v12775_v14  ;;  %v12869_v16 = vcombine.high %v4308_v63, %v4316_v10  ;;  %v12871_v14 = vcombine.high %v4309_v12, %v4317_v13  ;;  %v4396_v3 = vld [vmem:[#allocation7 + $0x8d0] sm:$0xff]  ;;  %v4389_v47 = vld [vmem:[#allocation7 + $0x878] sm:$0xff] }
 0x41e   :  { %v4397_v5 = vld [vmem:[#allocation7 + $0x8d8] sm:$0xff] }
 0x41f   :  { %10592 = vmatmul.mubr.bf16.vlgmr.msra.gmra.mrb[8].mxu0 %v14452_v22  ;;  %10756 = vmatmul.mubr.bf16.vlgmr.msra.gmra.mrb[24].mxu1 %v14452_v22 }
 0x420   :  { %10765 = vmatpush1.bf16.msra.mxu0 %v12772_v21  ;;  %10796 = vmatprep.mubr.bf16.mxu0 %v14402_v25  ;;  %v12868_v21 = vcombine.low %v4308_v63, %v4316_v10  ;;  %v4404_v63 = vld [vmem:[#allocation7 + $0x930] sm:$0xff] }
 0x421   :  { %10929 = vmatpush1.bf16.msra.mxu1 %v12774_v23  ;;  %10960 = vmatprep.mubr.bf16.mxu1 %v14402_v25  ;;  %v12870_v23 = vcombine.low %v4309_v12, %v4317_v13  ;;  %v4412_v10 = vld [vmem:[#allocation7 + $0x990] sm:$0xff]  ;;  %v4405_v12 = vld [vmem:[#allocation7 + $0x938] sm:$0xff] }
 0x422   :  { %10766 = vmatprep.subr.bf16.mxu0 %v12789_v24  ;;  %10930 = vmatprep.subr.bf16.mxu1 %v12791_v26  ;;  %v12885_v24 = vcombine.high %v4324_v4, %v4332_v42  ;;  %v12887_v26 = vcombine.high %v4325_v19, %v4333_v20  ;;  %v4413_v13 = vld [vmem:[#allocation7 + $0x998] sm:$0xff] }
 0x424   :  { %10767 = vmatpush1.bf16.msra.mxu0 %v12788_v29  ;;  %v12884_v29 = vcombine.low %v4324_v4, %v4332_v42  ;;  %v4420_v4 = vld [vmem:[#allocation7 + $0x9f0] sm:$0xff] }
 0x425   :  { %10931 = vmatpush1.bf16.msra.mxu1 %v12790_v30  ;;  %10768 = vmatprep.subr.bf16.mxu0 %v12805_v34  ;;  %v12886_v30 = vcombine.low %v4325_v19, %v4333_v20  ;;  %v12901_v34 = vcombine.high %v4340_v17, %v4348_v33  ;;  %v4428_v42 = vld [vmem:[#allocation7 + $0xa50] sm:$0xff]  ;;  %v4421_v19 = vld [vmem:[#allocation7 + $0x9f8] sm:$0xff] }
 0x426   :  { %10932 = vmatprep.subr.bf16.mxu1 %v12807_v32  ;;  %v12903_v32 = vcombine.high %v4341_v27, %v4349_v28  ;;  %v4429_v20 = vld [vmem:[#allocation7 + $0xa58] sm:$0xff] }
 0x428   :  { %10769 = vmatpush1.bf16.msra.mxu0 %v12804_v43  ;;  %v12900_v43 = vcombine.low %v4340_v17, %v4348_v33  ;;  %v4436_v17 = vld [vmem:[#allocation7 + $0xab0] sm:$0xff] }
 0x429   :  { %10933 = vmatpush1.bf16.msra.mxu1 %v12806_v46  ;;  %10770 = vmatprep.subr.bf16.mxu0 %v12821_v2  ;;  %v12902_v46 = vcombine.low %v4341_v27, %v4349_v28  ;;  %v12917_v2 = vcombine.high %v4356_v36, %v4364_v40  ;;  %v4444_v33 = vld [vmem:[#allocation7 + $0xb10] sm:$0xff]  ;;  %v4437_v27 = vld [vmem:[#allocation7 + $0xab8] sm:$0xff] }
 0x42a   :  { %10934 = vmatprep.subr.bf16.mxu1 %v12823_v44  ;;  %v12919_v44 = vcombine.high %v4357_v38, %v4365_v41  ;;  %v4445_v28 = vld [vmem:[#allocation7 + $0xb18] sm:$0xff] }
 0x42c   :  { %10771 = vmatpush1.bf16.msra.mxu0 %v12820_v59  ;;  %v12916_v59 = vcombine.low %v4356_v36, %v4364_v40  ;;  %v4452_v36 = vld [vmem:[#allocation7 + $0xb70] sm:$0xff] }
 0x42d   :  { %10935 = vmatpush1.bf16.msra.mxu1 %v12822_v56  ;;  %10772 = vmatprep.subr.bf16.mxu0 %v12837_v60  ;;  %v12918_v56 = vcombine.low %v4357_v38, %v4365_v41  ;;  %v12933_v60 = vcombine.high %v4372_v53, %v4380_v54  ;;  %v4460_v40 = vld [vmem:[#allocation7 + $0xbd0] sm:$0xff]  ;;  %v4453_v38 = vld [vmem:[#allocation7 + $0xb78] sm:$0xff] }
 0x42e   :  { %10936 = vmatprep.subr.bf16.mxu1 %v12839_v62  ;;  %v12935_v62 = vcombine.high %v4373_v55, %v4381_v18  ;;  %v4461_v41 = vld [vmem:[#allocation7 + $0xbd8] sm:$0xff] }
 0x430   :  { %10773 = vmatpush1.bf16.msra.mxu0 %v12836_v39  ;;  %v12932_v39 = vcombine.low %v4372_v53, %v4380_v54  ;;  %v4468_v53 = vld [vmem:[#allocation7 + $0xc30] sm:$0xff] }
 0x431   :  { %10937 = vmatpush1.bf16.msra.mxu1 %v12838_v6  ;;  %10774 = vmatprep.subr.bf16.mxu0 %v12853_v7  ;;  %v12934_v6 = vcombine.low %v4373_v55, %v4381_v18  ;;  %v12949_v7 = vcombine.high %v4388_v1, %v4396_v3  ;;  %v4476_v54 = vld [vmem:[#allocation7 + $0xc90] sm:$0xff]  ;;  %v4469_v55 = vld [vmem:[#allocation7 + $0xc38] sm:$0xff] }
 0x432   :  { %10938 = vmatprep.subr.bf16.mxu1 %v12855_v8  ;;  %v12951_v8 = vcombine.high %v4389_v47, %v4397_v5  ;;  %v4477_v18 = vld [vmem:[#allocation7 + $0xc98] sm:$0xff] }
 0x434   :  { %10775 = vmatpush1.bf16.msra.mxu0 %v12852_v51  ;;  %v12948_v51 = vcombine.low %v4388_v1, %v4396_v3  ;;  %v4484_v1 = vld [vmem:[#allocation7 + $0xcf0] sm:$0xff] }
 0x435   :  { %10939 = vmatpush1.bf16.msra.mxu1 %v12854_v0  ;;  %10776 = vmatprep.subr.bf16.mxu0 %v12869_v16  ;;  %v12950_v0 = vcombine.low %v4389_v47, %v4397_v5  ;;  %v12965_v16 = vcombine.high %v4404_v63, %v4412_v10  ;;  %v4492_v3 = vld [vmem:[#allocation7 + $0xd50] sm:$0xff]  ;;  %v13028_v47 = vcombine.low %v4468_v53, %v4476_v54  ;;  %v4485_v5 = vld [vmem:[#allocation7 + $0xcf8] sm:$0xff] }
 0x436   :  { %10940 = vmatprep.subr.bf16.mxu1 %v12871_v14  ;;  %v12967_v14 = vcombine.high %v4405_v12, %v4413_v13 }
 0x438   :  { %10777 = vmatpush1.bf16.msra.mxu0 %v12868_v21  ;;  %v12964_v21 = vcombine.low %v4404_v63, %v4412_v10  ;;  %v4508_v63 = vld [vmem:[#allocation7 + $0xe10] sm:$0xff] }
 0x439   :  { %10941 = vmatpush1.bf16.msra.mxu1 %v12870_v23  ;;  %10778 = vmatprep.subr.bf16.mxu0 %v12885_v24  ;;  %v12966_v23 = vcombine.low %v4405_v12, %v4413_v13  ;;  %v12981_v24 = vcombine.high %v4420_v4, %v4428_v42  ;;  %v4501_v12 = vld [vmem:[#allocation7 + $0xdb8] sm:$0xff] }
 0x43a   :  { %10942 = vmatprep.subr.bf16.mxu1 %v12887_v26  ;;  %v12983_v26 = vcombine.high %v4421_v19, %v4429_v20  ;;  %v4509_v13 = vld [vmem:[#allocation7 + $0xe18] sm:$0xff] }
 0x43c   :  { %10779 = vmatpush1.bf16.msra.mxu0 %v12884_v29  ;;  %v12980_v29 = vcombine.low %v4420_v4, %v4428_v42  ;;  %v4516_v4 = vld [vmem:[#allocation7 + $0xe70] sm:$0xff] }
 0x43d   :  { %10943 = vmatpush1.bf16.msra.mxu1 %v12886_v30  ;;  %10780 = vmatprep.subr.bf16.mxu0 %v12901_v34  ;;  %v12982_v30 = vcombine.low %v4421_v19, %v4429_v20  ;;  %v12997_v34 = vcombine.high %v4436_v17, %v4444_v33  ;;  %v4524_v42 = vld [vmem:[#allocation7 + $0xed0] sm:$0xff]  ;;  %v4517_v19 = vld [vmem:[#allocation7 + $0xe78] sm:$0xff] }
 0x43e   :  { %10944 = vmatprep.subr.bf16.mxu1 %v12903_v32  ;;  %v12999_v32 = vcombine.high %v4437_v27, %v4445_v28  ;;  %v4525_v20 = vld [vmem:[#allocation7 + $0xed8] sm:$0xff] }
 0x440   :  { %10781 = vmatpush1.bf16.msra.mxu0 %v12900_v43  ;;  %v12996_v43 = vcombine.low %v4436_v17, %v4444_v33  ;;  %v4532_v17 = vld [vmem:[#allocation7 + $0xf30] sm:$0xff] }
 0x441   :  { %10945 = vmatpush1.bf16.msra.mxu1 %v12902_v46  ;;  %10782 = vmatprep.subr.bf16.mxu0 %v12917_v2  ;;  %v12998_v46 = vcombine.low %v4437_v27, %v4445_v28  ;;  %v13013_v2 = vcombine.high %v4452_v36, %v4460_v40  ;;  %v4540_v33 = vld [vmem:[#allocation7 + $0xf90] sm:$0xff]  ;;  %v4533_v27 = vld [vmem:[#allocation7 + $0xf38] sm:$0xff] }
 0x442   :  { %10946 = vmatprep.subr.bf16.mxu1 %v12919_v44  ;;  %v13015_v44 = vcombine.high %v4453_v38, %v4461_v41  ;;  %v4541_v28 = vld [vmem:[#allocation7 + $0xf98] sm:$0xff] }
 0x444   :  { %10783 = vmatpush1.bf16.msra.mxu0 %v12916_v59  ;;  %v13012_v59 = vcombine.low %v4452_v36, %v4460_v40  ;;  %v4548_v36 = vld [vmem:[#allocation7 + $0xff0] sm:$0xff] }
 0x445   :  { %10947 = vmatpush1.bf16.msra.mxu1 %v12918_v56  ;;  %10784 = vmatprep.subr.bf16.mxu0 %v12933_v60  ;;  %v13014_v56 = vcombine.low %v4453_v38, %v4461_v41  ;;  %v13029_v60 = vcombine.high %v4468_v53, %v4476_v54  ;;  %v4556_v40 = vld [vmem:[#allocation7 + $0x1050] sm:$0xff]  ;;  %v4549_v38 = vld [vmem:[#allocation7 + $0xff8] sm:$0xff] }
 0x446   :  { %10948 = vmatprep.subr.bf16.mxu1 %v12935_v62  ;;  %v13031_v62 = vcombine.high %v4469_v55, %v4477_v18  ;;  %v4557_v41 = vld [vmem:[#allocation7 + $0x1058] sm:$0xff]  ;;  %v4564_v53 = vld [vmem:[#allocation7 + $0x10b0] sm:$0xff] }
 0x447   :  { %v4572_v54 = vld [vmem:[#allocation7 + $0x1110] sm:$0xff] }
 0x448   :  { %10785 = vmatpush1.bf16.msra.mxu0 %v12932_v39  ;;  %v4493_v39 = vld [vmem:[#allocation7 + $0xd58] sm:$0xff] }
 0x449   :  { %10949 = vmatpush1.bf16.msra.mxu1 %v12934_v6  ;;  %10786 = vmatprep.subr.bf16.mxu0 %v12949_v7  ;;  %v13030_v6 = vcombine.low %v4469_v55, %v4477_v18  ;;  %v13045_v7 = vcombine.high %v4484_v1, %v4492_v3  ;;  %v13047_v10 = vcombine.high %v4485_v5, %v4493_v39  ;;  %v4565_v55 = vld [vmem:[#allocation7 + $0x10b8] sm:$0xff] }
 0x44a   :  { %10950 = vmatprep.subr.bf16.mxu1 %v12951_v8  ;;  %v4500_v8 = vld [vmem:[#allocation7 + $0xdb0] sm:$0xff]  ;;  %v4573_v18 = vld [vmem:[#allocation7 + $0x1118] sm:$0xff] }
 0x44c   :  { %10787 = vmatpush1.bf16.msra.mxu0 %v12948_v51  ;;  %v13044_v51 = vcombine.low %v4484_v1, %v4492_v3  ;;  %v4580_v1 = vld [vmem:[#allocation7 + $0x1170] sm:$0xff] }
 0x44d   :  { %10951 = vmatpush1.bf16.msra.mxu1 %v12950_v0  ;;  %10788 = vmatprep.subr.bf16.mxu0 %v12965_v16  ;;  %v13046_v0 = vcombine.low %v4485_v5, %v4493_v39  ;;  %v13061_v16 = vcombine.high %v4500_v8, %v4508_v63  ;;  %v4588_v3 = vld [vmem:[#allocation7 + $0x11d0] sm:$0xff]  ;;  %v4589_v5 = vld [vmem:[#allocation7 + $0x11d8] sm:$0xff]  ;;  %v13124_v39 = vcombine.low %v4564_v53, %v4572_v54 }
 0x44e   :  { %10952 = vmatprep.subr.bf16.mxu1 %v12967_v14  ;;  %v13063_v14 = vcombine.high %v4501_v12, %v4509_v13 }
 0x450   :  { %10789 = vmatpush1.bf16.msra.mxu0 %v12964_v21  ;;  %v13060_v21 = vcombine.low %v4500_v8, %v4508_v63  ;;  %v4596_v63 = vld [vmem:[#allocation7 + $0x1230] sm:$0xff] }
 0x451   :  { %10953 = vmatpush1.bf16.msra.mxu1 %v12966_v23  ;;  %10790 = vmatprep.subr.bf16.mxu0 %v12981_v24  ;;  %v13062_v23 = vcombine.low %v4501_v12, %v4509_v13  ;;  %v13077_v24 = vcombine.high %v4516_v4, %v4524_v42  ;;  %v4597_v12 = vld [vmem:[#allocation7 + $0x1238] sm:$0xff] }
 0x452   :  { %10954 = vmatprep.subr.bf16.mxu1 %v12983_v26  ;;  %v13079_v26 = vcombine.high %v4517_v19, %v4525_v20  ;;  %v4605_v13 = vld [vmem:[#allocation7 + $0x1298] sm:$0xff] }
 0x454   :  { %10791 = vmatpush1.bf16.msra.mxu0 %v12980_v29  ;;  %v13076_v29 = vcombine.low %v4516_v4, %v4524_v42  ;;  %v4612_v4 = vld [vmem:[#allocation7 + $0x12f0] sm:$0xff] }
 0x455   :  { %10955 = vmatpush1.bf16.msra.mxu1 %v12982_v30  ;;  %10792 = vmatprep.subr.bf16.mxu0 %v12997_v34  ;;  %v13078_v30 = vcombine.low %v4517_v19, %v4525_v20  ;;  %v13093_v34 = vcombine.high %v4532_v17, %v4540_v33  ;;  %v4620_v42 = vld [vmem:[#allocation7 + $0x1350] sm:$0xff]  ;;  %v4613_v19 = vld [vmem:[#allocation7 + $0x12f8] sm:$0xff] }
 0x456   :  { %10956 = vmatprep.subr.bf16.mxu1 %v12999_v32  ;;  %v13095_v32 = vcombine.high %v4533_v27, %v4541_v28  ;;  %v4621_v20 = vld [vmem:[#allocation7 + $0x1358] sm:$0xff] }
 0x458   :  { %10793 = vmatpush1.bf16.msra.mxu0 %v12996_v43  ;;  %v13092_v43 = vcombine.low %v4532_v17, %v4540_v33  ;;  %v4628_v17 = vld [vmem:[#allocation7 + $0x13b0] sm:$0xff] }
 0x459   :  { %10957 = vmatpush1.bf16.msra.mxu1 %v12998_v46  ;;  %10794 = vmatprep.subr.bf16.mxu0 %v13013_v2  ;;  %v13094_v46 = vcombine.low %v4533_v27, %v4541_v28  ;;  %v13109_v2 = vcombine.high %v4548_v36, %v4556_v40  ;;  %v4636_v33 = vld [vmem:[#allocation7 + $0x1410] sm:$0xff]  ;;  %v4629_v27 = vld [vmem:[#allocation7 + $0x13b8] sm:$0xff] }
 0x45a   :  { %10958 = vmatprep.subr.bf16.mxu1 %v13015_v44  ;;  %v13111_v44 = vcombine.high %v4549_v38, %v4557_v41  ;;  %v4637_v28 = vld [vmem:[#allocation7 + $0x1418] sm:$0xff] }
 0x45c   :  { %10795 = vmatpush1.bf16.msra.mxu0 %v13012_v59  ;;  %v13108_v59 = vcombine.low %v4548_v36, %v4556_v40  ;;  %v4644_v36 = vld [vmem:[#allocation7 + $0x1470] sm:$0xff] }
 0x45d   :  { %10959 = vmatpush1.bf16.msra.mxu1 %v13014_v56  ;;  %10805 = vmatprep.subr.bf16.mxu0 %v13029_v60  ;;  %v13110_v56 = vcombine.low %v4549_v38, %v4557_v41  ;;  %v13125_v60 = vcombine.high %v4564_v53, %v4572_v54  ;;  %v4652_v40 = vld [vmem:[#allocation7 + $0x14d0] sm:$0xff]  ;;  %v4645_v38 = vld [vmem:[#allocation7 + $0x1478] sm:$0xff] }
 0x45e   :  { %10969 = vmatprep.subr.bf16.mxu1 %v13031_v62  ;;  %v13127_v62 = vcombine.high %v4565_v55, %v4573_v18  ;;  %v4653_v41 = vld [vmem:[#allocation7 + $0x14d8] sm:$0xff]  ;;  %v4660_v53 = vld [vmem:[#allocation7 + $0x1530] sm:$0xff] }
 0x45f   :  { %10797 = vmatmul.mubr.bf16.vlgmr.msra.gmra.mrb[12].mxu0 %v14414_v35  ;;  %v4668_v54 = vld [vmem:[#allocation7 + $0x1590] sm:$0xff] }
 0x460   :  { %10961 = vmatmul.mubr.bf16.vlgmr.msra.gmra.mrb[28].mxu1 %v14414_v35  ;;  %10806 = vmatpush1.bf16.msra.mxu0 %v13028_v47  ;;  %v4581_v47 = vld [vmem:[#allocation7 + $0x1178] sm:$0xff] }
 0x461   :  { %10837 = vmatprep.mubr.bf16.mxu0 %v14416_v15  ;;  %10970 = vmatpush1.bf16.msra.mxu1 %v13030_v6  ;;  %v13126_v6 = vcombine.low %v4565_v55, %v4573_v18  ;;  %v13143_v8 = vcombine.high %v4581_v47, %v4589_v5  ;;  %v4661_v55 = vld [vmem:[#allocation7 + $0x1538] sm:$0xff] }
 0x462   :  { %11001 = vmatprep.mubr.bf16.mxu1 %v14416_v15  ;;  %10807 = vmatprep.subr.bf16.mxu0 %v13045_v7  ;;  %v13141_v7 = vcombine.high %v4580_v1, %v4588_v3  ;;  %v4669_v18 = vld [vmem:[#allocation7 + $0x1598] sm:$0xff] }
 0x463   :  { %10971 = vmatprep.subr.bf16.mxu1 %v13047_v10  ;;  %v4604_v10 = vld [vmem:[#allocation7 + $0x1290] sm:$0xff] }
 0x464   :  { %10808 = vmatpush1.bf16.msra.mxu0 %v13044_v51  ;;  %v13140_v51 = vcombine.low %v4580_v1, %v4588_v3  ;;  %v4676_v1 = vld [vmem:[#allocation7 + $0x15f0] sm:$0xff] }
 0x465   :  { %10972 = vmatpush1.bf16.msra.mxu1 %v13046_v0  ;;  %10809 = vmatprep.subr.bf16.mxu0 %v13061_v16  ;;  %v13142_v0 = vcombine.low %v4581_v47, %v4589_v5  ;;  %v13157_v16 = vcombine.high %v4596_v63, %v4604_v10  ;;  %v4684_v3 = vld [vmem:[#allocation7 + $0x1650] sm:$0xff]  ;;  %v4677_v47 = vld [vmem:[#allocation7 + $0x15f8] sm:$0xff] }
 0x466   :  { %10973 = vmatprep.subr.bf16.mxu1 %v13063_v14  ;;  %v13159_v14 = vcombine.high %v4597_v12, %v4605_v13  ;;  %v4685_v5 = vld [vmem:[#allocation7 + $0x1658] sm:$0xff] }
 0x468   :  { %10810 = vmatpush1.bf16.msra.mxu0 %v13060_v21  ;;  %v13156_v21 = vcombine.low %v4596_v63, %v4604_v10  ;;  %v4692_v63 = vld [vmem:[#allocation7 + $0x16b0] sm:$0xff] }
 0x469   :  { %10974 = vmatpush1.bf16.msra.mxu1 %v13062_v23  ;;  %10811 = vmatprep.subr.bf16.mxu0 %v13077_v24  ;;  %v13158_v23 = vcombine.low %v4597_v12, %v4605_v13  ;;  %v13173_v24 = vcombine.high %v4612_v4, %v4620_v42  ;;  %v4700_v10 = vld [vmem:[#allocation7 + $0x1710] sm:$0xff]  ;;  %v4693_v12 = vld [vmem:[#allocation7 + $0x16b8] sm:$0xff] }
 0x46a   :  { %10975 = vmatprep.subr.bf16.mxu1 %v13079_v26  ;;  %v13175_v26 = vcombine.high %v4613_v19, %v4621_v20  ;;  %v4701_v13 = vld [vmem:[#allocation7 + $0x1718] sm:$0xff] }
 0x46c   :  { %10812 = vmatpush1.bf16.msra.mxu0 %v13076_v29  ;;  %v13172_v29 = vcombine.low %v4612_v4, %v4620_v42  ;;  %v4708_v4 = vld [vmem:[#allocation7 + $0x1770] sm:$0xff] }
 0x46d   :  { %10976 = vmatpush1.bf16.msra.mxu1 %v13078_v30  ;;  %10813 = vmatprep.subr.bf16.mxu0 %v13093_v34  ;;  %v13174_v30 = vcombine.low %v4613_v19, %v4621_v20  ;;  %v13189_v34 = vcombine.high %v4628_v17, %v4636_v33  ;;  %v4716_v42 = vld [vmem:[#allocation7 + $0x17d0] sm:$0xff]  ;;  %v4709_v19 = vld [vmem:[#allocation7 + $0x1778] sm:$0xff] }
 0x46e   :  { %10977 = vmatprep.subr.bf16.mxu1 %v13095_v32  ;;  %v13191_v32 = vcombine.high %v4629_v27, %v4637_v28  ;;  %v4717_v20 = vld [vmem:[#allocation7 + $0x17d8] sm:$0xff] }
 0x470   :  { %10814 = vmatpush1.bf16.msra.mxu0 %v13092_v43  ;;  %v13188_v43 = vcombine.low %v4628_v17, %v4636_v33  ;;  %v4724_v17 = vld [vmem:[#allocation7 + $0x1830] sm:$0xff] }
 0x471   :  { %10978 = vmatpush1.bf16.msra.mxu1 %v13094_v46  ;;  %10815 = vmatprep.subr.bf16.mxu0 %v13109_v2  ;;  %v13190_v46 = vcombine.low %v4629_v27, %v4637_v28  ;;  %v13205_v2 = vcombine.high %v4644_v36, %v4652_v40  ;;  %v4732_v33 = vld [vmem:[#allocation7 + $0x1890] sm:$0xff]  ;;  %v4725_v27 = vld [vmem:[#allocation7 + $0x1838] sm:$0xff] }
 0x472   :  { %10979 = vmatprep.subr.bf16.mxu1 %v13111_v44  ;;  %v13207_v44 = vcombine.high %v4645_v38, %v4653_v41  ;;  %v4733_v28 = vld [vmem:[#allocation7 + $0x1898] sm:$0xff] }
 0x474   :  { %10816 = vmatpush1.bf16.msra.mxu0 %v13108_v59  ;;  %v13204_v59 = vcombine.low %v4644_v36, %v4652_v40  ;;  %v4740_v36 = vld [vmem:[#allocation7 + $0x18f0] sm:$0xff] }
 0x475   :  { %10980 = vmatpush1.bf16.msra.mxu1 %v13110_v56  ;;  %10817 = vmatprep.subr.bf16.mxu0 %v13125_v60  ;;  %v13206_v56 = vcombine.low %v4645_v38, %v4653_v41  ;;  %v13221_v60 = vcombine.high %v4660_v53, %v4668_v54  ;;  %v4748_v40 = vld [vmem:[#allocation7 + $0x1950] sm:$0xff]  ;;  %v13284_v38 = vcombine.low %v4724_v17, %v4732_v33  ;;  %v4741_v41 = vld [vmem:[#allocation7 + $0x18f8] sm:$0xff] }
 0x476   :  { %10981 = vmatprep.subr.bf16.mxu1 %v13127_v62  ;;  %v13223_v62 = vcombine.high %v4661_v55, %v4669_v18 }
 0x478   :  { %10818 = vmatpush1.bf16.msra.mxu0 %v13124_v39  ;;  %v13220_v39 = vcombine.low %v4660_v53, %v4668_v54  ;;  %v4764_v53 = vld [vmem:[#allocation7 + $0x1a10] sm:$0xff] }
 0x479   :  { %10982 = vmatpush1.bf16.msra.mxu1 %v13126_v6  ;;  %10819 = vmatprep.subr.bf16.mxu0 %v13141_v7  ;;  %v13222_v6 = vcombine.low %v4661_v55, %v4669_v18  ;;  %v13237_v7 = vcombine.high %v4676_v1, %v4684_v3  ;;  %v4757_v55 = vld [vmem:[#allocation7 + $0x19b8] sm:$0xff] }
 0x47a   :  { %10983 = vmatprep.subr.bf16.mxu1 %v13143_v8  ;;  %v13239_v8 = vcombine.high %v4677_v47, %v4685_v5  ;;  %v4765_v18 = vld [vmem:[#allocation7 + $0x1a18] sm:$0xff] }
 0x47c   :  { %10820 = vmatpush1.bf16.msra.mxu0 %v13140_v51  ;;  %v13236_v51 = vcombine.low %v4676_v1, %v4684_v3  ;;  %v4772_v1 = vld [vmem:[#allocation7 + $0x1a70] sm:$0xff] }
 0x47d   :  { %10984 = vmatpush1.bf16.msra.mxu1 %v13142_v0  ;;  %10821 = vmatprep.subr.bf16.mxu0 %v13157_v16  ;;  %v13238_v0 = vcombine.low %v4677_v47, %v4685_v5  ;;  %v13253_v16 = vcombine.high %v4692_v63, %v4700_v10  ;;  %v4780_v3 = vld [vmem:[#allocation7 + $0x1ad0] sm:$0xff]  ;;  %v4773_v47 = vld [vmem:[#allocation7 + $0x1a78] sm:$0xff] }
 0x47e   :  { %10985 = vmatprep.subr.bf16.mxu1 %v13159_v14  ;;  %v13255_v14 = vcombine.high %v4693_v12, %v4701_v13  ;;  %v4781_v5 = vld [vmem:[#allocation7 + $0x1ad8] sm:$0xff] }
 0x480   :  { %10822 = vmatpush1.bf16.msra.mxu0 %v13156_v21  ;;  %v13252_v21 = vcombine.low %v4692_v63, %v4700_v10  ;;  %v4788_v63 = vld [vmem:[#allocation7 + $0x1b30] sm:$0xff] }
 0x481   :  { %10986 = vmatpush1.bf16.msra.mxu1 %v13158_v23  ;;  %10823 = vmatprep.subr.bf16.mxu0 %v13173_v24  ;;  %v13254_v23 = vcombine.low %v4693_v12, %v4701_v13  ;;  %v13269_v24 = vcombine.high %v4708_v4, %v4716_v42  ;;  %v4796_v10 = vld [vmem:[#allocation7 + $0x1b90] sm:$0xff]  ;;  %v4789_v12 = vld [vmem:[#allocation7 + $0x1b38] sm:$0xff] }
 0x482   :  { %10987 = vmatprep.subr.bf16.mxu1 %v13175_v26  ;;  %v13271_v26 = vcombine.high %v4709_v19, %v4717_v20  ;;  %v4797_v13 = vld [vmem:[#allocation7 + $0x1b98] sm:$0xff] }
 0x484   :  { %10824 = vmatpush1.bf16.msra.mxu0 %v13172_v29  ;;  %v13268_v29 = vcombine.low %v4708_v4, %v4716_v42  ;;  %v4804_v4 = vld [vmem:[#allocation7 + $0x1bf0] sm:$0xff] }
 0x485   :  { %10988 = vmatpush1.bf16.msra.mxu1 %v13174_v30  ;;  %10825 = vmatprep.subr.bf16.mxu0 %v13189_v34  ;;  %v13270_v30 = vcombine.low %v4709_v19, %v4717_v20  ;;  %v13285_v34 = vcombine.high %v4724_v17, %v4732_v33  ;;  %v4812_v42 = vld [vmem:[#allocation7 + $0x1c50] sm:$0xff]  ;;  %v4805_v19 = vld [vmem:[#allocation7 + $0x1bf8] sm:$0xff] }
 0x486   :  { %10989 = vmatprep.subr.bf16.mxu1 %v13191_v32  ;;  %v13287_v32 = vcombine.high %v4725_v27, %v4733_v28  ;;  %v4813_v20 = vld [vmem:[#allocation7 + $0x1c58] sm:$0xff]  ;;  %v4820_v17 = vld [vmem:[#allocation7 + $0x1cb0] sm:$0xff] }
 0x487   :  { %v4828_v33 = vld [vmem:[#allocation7 + $0x1d10] sm:$0xff] }
 0x488   :  { %10826 = vmatpush1.bf16.msra.mxu0 %v13188_v43  ;;  %v4749_v43 = vld [vmem:[#allocation7 + $0x1958] sm:$0xff] }
 0x489   :  { %10990 = vmatpush1.bf16.msra.mxu1 %v13190_v46  ;;  %10827 = vmatprep.subr.bf16.mxu0 %v13205_v2  ;;  %v13286_v46 = vcombine.low %v4725_v27, %v4733_v28  ;;  %v13301_v2 = vcombine.high %v4740_v36, %v4748_v40  ;;  %v13303_v54 = vcombine.high %v4741_v41, %v4749_v43  ;;  %v4821_v27 = vld [vmem:[#allocation7 + $0x1cb8] sm:$0xff] }
 0x48a   :  { %10991 = vmatprep.subr.bf16.mxu1 %v13207_v44  ;;  %v4756_v44 = vld [vmem:[#allocation7 + $0x19b0] sm:$0xff]  ;;  %v4829_v28 = vld [vmem:[#allocation7 + $0x1d18] sm:$0xff] }
 0x48c   :  { %10828 = vmatpush1.bf16.msra.mxu0 %v13204_v59  ;;  %v13300_v59 = vcombine.low %v4740_v36, %v4748_v40  ;;  %v4836_v36 = vld [vmem:[#allocation7 + $0x1d70] sm:$0xff] }
 0x48d   :  { %10992 = vmatpush1.bf16.msra.mxu1 %v13206_v56  ;;  %10829 = vmatprep.subr.bf16.mxu0 %v13221_v60  ;;  %v13302_v56 = vcombine.low %v4741_v41, %v4749_v43  ;;  %v13317_v60 = vcombine.high %v4756_v44, %v4764_v53  ;;  %v4844_v40 = vld [vmem:[#allocation7 + $0x1dd0] sm:$0xff]  ;;  %v4845_v41 = vld [vmem:[#allocation7 + $0x1dd8] sm:$0xff]  ;;  %v13380_v43 = vcombine.low %v4820_v17, %v4828_v33 }
 0x48e   :  { %10993 = vmatprep.subr.bf16.mxu1 %v13223_v62  ;;  %v13319_v62 = vcombine.high %v4757_v55, %v4765_v18 }
 0x490   :  { %10830 = vmatpush1.bf16.msra.mxu0 %v13220_v39  ;;  %v13316_v39 = vcombine.low %v4756_v44, %v4764_v53  ;;  %v4852_v53 = vld [vmem:[#allocation7 + $0x1e30] sm:$0xff] }
 0x491   :  { %10994 = vmatpush1.bf16.msra.mxu1 %v13222_v6  ;;  %10831 = vmatprep.subr.bf16.mxu0 %v13237_v7  ;;  %v13318_v6 = vcombine.low %v4757_v55, %v4765_v18  ;;  %v13333_v7 = vcombine.high %v4772_v1, %v4780_v3  ;;  %v4853_v55 = vld [vmem:[#allocation7 + $0x1e38] sm:$0xff] }
 0x492   :  { %10995 = vmatprep.subr.bf16.mxu1 %v13239_v8  ;;  %v13335_v8 = vcombine.high %v4773_v47, %v4781_v5  ;;  %v4861_v18 = vld [vmem:[#allocation7 + $0x1e98] sm:$0xff] }
 0x494   :  { %10832 = vmatpush1.bf16.msra.mxu0 %v13236_v51  ;;  %v13332_v51 = vcombine.low %v4772_v1, %v4780_v3  ;;  %v4868_v1 = vld [vmem:[#allocation7 + $0x1ef0] sm:$0xff] }
 0x495   :  { %10996 = vmatpush1.bf16.msra.mxu1 %v13238_v0  ;;  %10833 = vmatprep.subr.bf16.mxu0 %v13253_v16  ;;  %v13334_v0 = vcombine.low %v4773_v47, %v4781_v5  ;;  %v13349_v16 = vcombine.high %v4788_v63, %v4796_v10  ;;  %v4876_v3 = vld [vmem:[#allocation7 + $0x1f50] sm:$0xff]  ;;  %v4869_v47 = vld [vmem:[#allocation7 + $0x1ef8] sm:$0xff] }
 0x496   :  { %10997 = vmatprep.subr.bf16.mxu1 %v13255_v14  ;;  %v13351_v14 = vcombine.high %v4789_v12, %v4797_v13  ;;  %v4877_v5 = vld [vmem:[#allocation7 + $0x1f58] sm:$0xff] }
 0x498   :  { %10834 = vmatpush1.bf16.msra.mxu0 %v13252_v21  ;;  %v13348_v21 = vcombine.low %v4788_v63, %v4796_v10  ;;  %v4884_v63 = vld [vmem:[#allocation7 + $0x1fb0] sm:$0xff] }
 0x499   :  { %10998 = vmatpush1.bf16.msra.mxu1 %v13254_v23  ;;  %10835 = vmatprep.subr.bf16.mxu0 %v13269_v24  ;;  %v13350_v23 = vcombine.low %v4789_v12, %v4797_v13  ;;  %v13365_v24 = vcombine.high %v4804_v4, %v4812_v42  ;;  %v4892_v10 = vld [vmem:[#allocation7 + $0x2010] sm:$0xff]  ;;  %v4885_v12 = vld [vmem:[#allocation7 + $0x1fb8] sm:$0xff] }
 0x49a   :  { %10999 = vmatprep.subr.bf16.mxu1 %v13271_v26  ;;  %v13367_v26 = vcombine.high %v4805_v19, %v4813_v20  ;;  %v4893_v13 = vld [vmem:[#allocation7 + $0x2018] sm:$0xff] }
 0x49c   :  { %10836 = vmatpush1.bf16.msra.mxu0 %v13268_v29  ;;  %v13364_v29 = vcombine.low %v4804_v4, %v4812_v42  ;;  %v4900_v4 = vld [vmem:[#allocation7 + $0x2070] sm:$0xff] }
 0x49d   :  { %11000 = vmatpush1.bf16.msra.mxu1 %v13270_v30  ;;  %10846 = vmatprep.subr.bf16.mxu0 %v13285_v34  ;;  %v13366_v30 = vcombine.low %v4805_v19, %v4813_v20  ;;  %v13381_v34 = vcombine.high %v4820_v17, %v4828_v33  ;;  %v4908_v42 = vld [vmem:[#allocation7 + $0x20d0] sm:$0xff]  ;;  %v4901_v19 = vld [vmem:[#allocation7 + $0x2078] sm:$0xff] }
 0x49e   :  { %11010 = vmatprep.subr.bf16.mxu1 %v13287_v32  ;;  %v13383_v32 = vcombine.high %v4821_v27, %v4829_v28  ;;  %v4909_v20 = vld [vmem:[#allocation7 + $0x20d8] sm:$0xff]  ;;  %v4916_v17 = vld [vmem:[#allocation7 + $0x2130] sm:$0xff] }
 0x49f   :  { %10838 = vmatmul.mubr.bf16.vlgmr.msra.gmra.mrb[12].mxu0 %v14425_v50  ;;  %v4924_v33 = vld [vmem:[#allocation7 + $0x2190] sm:$0xff] }
 0x4a0   :  { %11002 = vmatmul.mubr.bf16.vlgmr.msra.gmra.mrb[28].mxu1 %v14425_v50  ;;  %10847 = vmatpush1.bf16.msra.mxu0 %v13284_v38  ;;  %v4837_v38 = vld [vmem:[#allocation7 + $0x1d78] sm:$0xff] }
 0x4a1   :  { %10878 = vmatprep.mubr.bf16.mxu0 %v14437_v31  ;;  %11011 = vmatpush1.bf16.msra.mxu1 %v13286_v46  ;;  %v13382_v46 = vcombine.low %v4821_v27, %v4829_v28  ;;  %v13399_v44 = vcombine.high %v4837_v38, %v4845_v41  ;;  %v4917_v27 = vld [vmem:[#allocation7 + $0x2138] sm:$0xff] }
 0x4a2   :  { %11042 = vmatprep.mubr.bf16.mxu1 %v14437_v31  ;;  %10848 = vmatprep.subr.bf16.mxu0 %v13301_v2  ;;  %v13397_v2 = vcombine.high %v4836_v36, %v4844_v40  ;;  %v4925_v28 = vld [vmem:[#allocation7 + $0x2198] sm:$0xff] }
 0x4a3   :  { %11012 = vmatprep.subr.bf16.mxu1 %v13303_v54  ;;  %v4860_v54 = vld [vmem:[#allocation7 + $0x1e90] sm:$0xff] }
 0x4a4   :  { %10849 = vmatpush1.bf16.msra.mxu0 %v13300_v59  ;;  %v13396_v59 = vcombine.low %v4836_v36, %v4844_v40  ;;  %v4932_v36 = vld [vmem:[#allocation7 + $0x21f0] sm:$0xff] }
 0x4a5   :  { %11013 = vmatpush1.bf16.msra.mxu1 %v13302_v56  ;;  %10850 = vmatprep.subr.bf16.mxu0 %v13317_v60  ;;  %v13398_v56 = vcombine.low %v4837_v38, %v4845_v41  ;;  %v13413_v60 = vcombine.high %v4852_v53, %v4860_v54  ;;  %v4940_v40 = vld [vmem:[#allocation7 + $0x2250] sm:$0xff]  ;;  %v4933_v38 = vld [vmem:[#allocation7 + $0x21f8] sm:$0xff] }
 0x4a6   :  { %11014 = vmatprep.subr.bf16.mxu1 %v13319_v62  ;;  %v13415_v62 = vcombine.high %v4853_v55, %v4861_v18  ;;  %v4941_v41 = vld [vmem:[#allocation7 + $0x2258] sm:$0xff] }
 0x4a8   :  { %10851 = vmatpush1.bf16.msra.mxu0 %v13316_v39  ;;  %v13412_v39 = vcombine.low %v4852_v53, %v4860_v54  ;;  %v4948_v53 = vld [vmem:[#allocation7 + $0x22b0] sm:$0xff] }
 0x4a9   :  { %11015 = vmatpush1.bf16.msra.mxu1 %v13318_v6  ;;  %10852 = vmatprep.subr.bf16.mxu0 %v13333_v7  ;;  %v13414_v6 = vcombine.low %v4853_v55, %v4861_v18  ;;  %v13429_v7 = vcombine.high %v4868_v1, %v4876_v3  ;;  %v4956_v54 = vld [vmem:[#allocation7 + $0x2310] sm:$0xff]  ;;  %v4949_v55 = vld [vmem:[#allocation7 + $0x22b8] sm:$0xff] }
 0x4aa   :  { %11016 = vmatprep.subr.bf16.mxu1 %v13335_v8  ;;  %v13431_v8 = vcombine.high %v4869_v47, %v4877_v5  ;;  %v4957_v18 = vld [vmem:[#allocation7 + $0x2318] sm:$0xff] }
 0x4ac   :  { %10853 = vmatpush1.bf16.msra.mxu0 %v13332_v51  ;;  %v13428_v51 = vcombine.low %v4868_v1, %v4876_v3  ;;  %v4964_v1 = vld [vmem:[#allocation7 + $0x2370] sm:$0xff] }
 0x4ad   :  { %11017 = vmatpush1.bf16.msra.mxu1 %v13334_v0  ;;  %10854 = vmatprep.subr.bf16.mxu0 %v13349_v16  ;;  %v13430_v0 = vcombine.low %v4869_v47, %v4877_v5  ;;  %v13445_v16 = vcombine.high %v4884_v63, %v4892_v10  ;;  %v4972_v3 = vld [vmem:[#allocation7 + $0x23d0] sm:$0xff]  ;;  %v4965_v47 = vld [vmem:[#allocation7 + $0x2378] sm:$0xff] }
 0x4ae   :  { %11018 = vmatprep.subr.bf16.mxu1 %v13351_v14  ;;  %v13447_v14 = vcombine.high %v4885_v12, %v4893_v13  ;;  %v4973_v5 = vld [vmem:[#allocation7 + $0x23d8] sm:$0xff] }
 0x4b0   :  { %10855 = vmatpush1.bf16.msra.mxu0 %v13348_v21  ;;  %v13444_v21 = vcombine.low %v4884_v63, %v4892_v10  ;;  %v4980_v63 = vld [vmem:[#allocation7 + $0x2430] sm:$0xff] }
 0x4b1   :  { %11019 = vmatpush1.bf16.msra.mxu1 %v13350_v23  ;;  %10856 = vmatprep.subr.bf16.mxu0 %v13365_v24  ;;  %v13446_v23 = vcombine.low %v4885_v12, %v4893_v13  ;;  %v13461_v24 = vcombine.high %v4900_v4, %v4908_v42  ;;  %v4988_v10 = vld [vmem:[#allocation7 + $0x2490] sm:$0xff]  ;;  %v4981_v12 = vld [vmem:[#allocation7 + $0x2438] sm:$0xff] }
 0x4b2   :  { %11020 = vmatprep.subr.bf16.mxu1 %v13367_v26  ;;  %v13463_v26 = vcombine.high %v4901_v19, %v4909_v20  ;;  %v4989_v13 = vld [vmem:[#allocation7 + $0x2498] sm:$0xff] }
 0x4b4   :  { %10857 = vmatpush1.bf16.msra.mxu0 %v13364_v29  ;;  %v13460_v29 = vcombine.low %v4900_v4, %v4908_v42  ;;  %v4996_v4 = vld [vmem:[#allocation7 + $0x24f0] sm:$0xff] }
 0x4b5   :  { %11021 = vmatpush1.bf16.msra.mxu1 %v13366_v30  ;;  %10858 = vmatprep.subr.bf16.mxu0 %v13381_v34  ;;  %v13462_v30 = vcombine.low %v4901_v19, %v4909_v20  ;;  %v13477_v34 = vcombine.high %v4916_v17, %v4924_v33  ;;  %v5004_v42 = vld [vmem:[#allocation7 + $0x2550] sm:$0xff]  ;;  %v13540_v19 = vcombine.low %v4980_v63, %v4988_v10  ;;  %v4997_v20 = vld [vmem:[#allocation7 + $0x24f8] sm:$0xff] }
 0x4b6   :  { %11022 = vmatprep.subr.bf16.mxu1 %v13383_v32  ;;  %v13479_v32 = vcombine.high %v4917_v27, %v4925_v28 }
 0x4b8   :  { %10859 = vmatpush1.bf16.msra.mxu0 %v13380_v43  ;;  %v13476_v43 = vcombine.low %v4916_v17, %v4924_v33  ;;  %v5020_v17 = vld [vmem:[#allocation7 + $0x2610] sm:$0xff] }
 0x4b9   :  { %11023 = vmatpush1.bf16.msra.mxu1 %v13382_v46  ;;  %10860 = vmatprep.subr.bf16.mxu0 %v13397_v2  ;;  %v13478_v46 = vcombine.low %v4917_v27, %v4925_v28  ;;  %v13493_v2 = vcombine.high %v4932_v36, %v4940_v40  ;;  %v5013_v27 = vld [vmem:[#allocation7 + $0x25b8] sm:$0xff] }
 0x4ba   :  { %11024 = vmatprep.subr.bf16.mxu1 %v13399_v44  ;;  %v13495_v44 = vcombine.high %v4933_v38, %v4941_v41  ;;  %v5021_v28 = vld [vmem:[#allocation7 + $0x2618] sm:$0xff] }
 0x4bc   :  { %10861 = vmatpush1.bf16.msra.mxu0 %v13396_v59  ;;  %v13492_v59 = vcombine.low %v4932_v36, %v4940_v40  ;;  %v5028_v36 = vld [vmem:[#allocation7 + $0x2670] sm:$0xff] }
 0x4bd   :  { %11025 = vmatpush1.bf16.msra.mxu1 %v13398_v56  ;;  %10862 = vmatprep.subr.bf16.mxu0 %v13413_v60  ;;  %v13494_v56 = vcombine.low %v4933_v38, %v4941_v41  ;;  %v13509_v60 = vcombine.high %v4948_v53, %v4956_v54  ;;  %v5036_v40 = vld [vmem:[#allocation7 + $0x26d0] sm:$0xff]  ;;  %v5029_v38 = vld [vmem:[#allocation7 + $0x2678] sm:$0xff] }
 0x4be   :  { %11026 = vmatprep.subr.bf16.mxu1 %v13415_v62  ;;  %v13511_v62 = vcombine.high %v4949_v55, %v4957_v18  ;;  %v5037_v41 = vld [vmem:[#allocation7 + $0x26d8] sm:$0xff] }
 0x4c0   :  { %10863 = vmatpush1.bf16.msra.mxu0 %v13412_v39  ;;  %v13508_v39 = vcombine.low %v4948_v53, %v4956_v54  ;;  %v5044_v53 = vld [vmem:[#allocation7 + $0x2730] sm:$0xff] }
 0x4c1   :  { %11027 = vmatpush1.bf16.msra.mxu1 %v13414_v6  ;;  %10864 = vmatprep.subr.bf16.mxu0 %v13429_v7  ;;  %v13510_v6 = vcombine.low %v4949_v55, %v4957_v18  ;;  %v13525_v7 = vcombine.high %v4964_v1, %v4972_v3  ;;  %v5052_v54 = vld [vmem:[#allocation7 + $0x2790] sm:$0xff]  ;;  %v5045_v55 = vld [vmem:[#allocation7 + $0x2738] sm:$0xff] }
 0x4c2   :  { %11028 = vmatprep.subr.bf16.mxu1 %v13431_v8  ;;  %v13527_v8 = vcombine.high %v4965_v47, %v4973_v5  ;;  %v5053_v18 = vld [vmem:[#allocation7 + $0x2798] sm:$0xff] }
 0x4c4   :  { %10865 = vmatpush1.bf16.msra.mxu0 %v13428_v51  ;;  %v13524_v51 = vcombine.low %v4964_v1, %v4972_v3  ;;  %v5060_v1 = vld [vmem:[#allocation7 + $0x27f0] sm:$0xff] }
 0x4c5   :  { %11029 = vmatpush1.bf16.msra.mxu1 %v13430_v0  ;;  %10866 = vmatprep.subr.bf16.mxu0 %v13445_v16  ;;  %v13526_v0 = vcombine.low %v4965_v47, %v4973_v5  ;;  %v13541_v16 = vcombine.high %v4980_v63, %v4988_v10  ;;  %v5068_v3 = vld [vmem:[#allocation7 + $0x2850] sm:$0xff]  ;;  %v5061_v47 = vld [vmem:[#allocation7 + $0x27f8] sm:$0xff] }
 0x4c6   :  { %11030 = vmatprep.subr.bf16.mxu1 %v13447_v14  ;;  %v13543_v14 = vcombine.high %v4981_v12, %v4989_v13  ;;  %v5069_v5 = vld [vmem:[#allocation7 + $0x2858] sm:$0xff]  ;;  %v5076_v63 = vld [vmem:[#allocation7 + $0x28b0] sm:$0xff] }
 0x4c7   :  { %v5084_v10 = vld [vmem:[#allocation7 + $0x2910] sm:$0xff] }
 0x4c8   :  { %10867 = vmatpush1.bf16.msra.mxu0 %v13444_v21  ;;  %v5005_v21 = vld [vmem:[#allocation7 + $0x2558] sm:$0xff] }
 0x4c9   :  { %11031 = vmatpush1.bf16.msra.mxu1 %v13446_v23  ;;  %10868 = vmatprep.subr.bf16.mxu0 %v13461_v24  ;;  %v13542_v23 = vcombine.low %v4981_v12, %v4989_v13  ;;  %v13557_v24 = vcombine.high %v4996_v4, %v5004_v42  ;;  %v13559_v33 = vcombine.high %v4997_v20, %v5005_v21  ;;  %v5077_v12 = vld [vmem:[#allocation7 + $0x28b8] sm:$0xff] }
 0x4ca   :  { %11032 = vmatprep.subr.bf16.mxu1 %v13463_v26  ;;  %v5012_v26 = vld [vmem:[#allocation7 + $0x25b0] sm:$0xff]  ;;  %v5085_v13 = vld [vmem:[#allocation7 + $0x2918] sm:$0xff] }
 0x4cc   :  { %10869 = vmatpush1.bf16.msra.mxu0 %v13460_v29  ;;  %v13556_v29 = vcombine.low %v4996_v4, %v5004_v42  ;;  %v13639_v42 = vcombine.high %v5077_v12, %v5085_v13 }
 0x4cd   :  { %11033 = vmatpush1.bf16.msra.mxu1 %v13462_v30  ;;  %10870 = vmatprep.subr.bf16.mxu0 %v13477_v34  ;;  %v13558_v30 = vcombine.low %v4997_v20, %v5005_v21  ;;  %v13573_v34 = vcombine.high %v5012_v26, %v5020_v17  ;;  %v5100_v20 = vld [vmem:[#allocation7 + $0x29d0] sm:$0xff] }
 0x4ce   :  { %11034 = vmatprep.subr.bf16.mxu1 %v13479_v32  ;;  %v13575_v32 = vcombine.high %v5013_v27, %v5021_v28 }
 0x4d0   :  { %10871 = vmatpush1.bf16.msra.mxu0 %v13476_v43  ;;  %v13572_v43 = vcombine.low %v5012_v26, %v5020_v17  ;;  %v5101_v26 = vld [vmem:[#allocation7 + $0x29d8] sm:$0xff] }
 0x4d1   :  { %11035 = vmatpush1.bf16.msra.mxu1 %v13478_v46  ;;  %10872 = vmatprep.subr.bf16.mxu0 %v13493_v2  ;;  %v13574_v46 = vcombine.low %v5013_v27, %v5021_v28  ;;  %v13589_v2 = vcombine.high %v5028_v36, %v5036_v40  ;;  %v13636_v27 = vcombine.low %v5076_v63, %v5084_v10 }
 0x4d2   :  { %11036 = vmatprep.subr.bf16.mxu1 %v13495_v44  ;;  %v13591_v44 = vcombine.high %v5029_v38, %v5037_v41 }
 0x4d4   :  { %10873 = vmatpush1.bf16.msra.mxu0 %v13492_v59  ;;  %v13588_v59 = vcombine.low %v5028_v36, %v5036_v40  ;;  %v5108_v36 = vld [vmem:[#allocation7 + $0x2a30] sm:$0xff] }
 0x4d5   :  { %11037 = vmatpush1.bf16.msra.mxu1 %v13494_v56  ;;  %10874 = vmatprep.subr.bf16.mxu0 %v13509_v60  ;;  %v13590_v56 = vcombine.low %v5029_v38, %v5037_v41  ;;  %v13605_v60 = vcombine.high %v5044_v53, %v5052_v54  ;;  %v5116_v40 = vld [vmem:[#allocation7 + $0x2a90] sm:$0xff]  ;;  %v5109_v38 = vld [vmem:[#allocation7 + $0x2a38] sm:$0xff] }
 0x4d6   :  { %11038 = vmatprep.subr.bf16.mxu1 %v13511_v62  ;;  %v13607_v62 = vcombine.high %v5045_v55, %v5053_v18  ;;  %v5117_v41 = vld [vmem:[#allocation7 + $0x2a98] sm:$0xff] }
 0x4d8   :  { %10875 = vmatpush1.bf16.msra.mxu0 %v13508_v39  ;;  %v13604_v39 = vcombine.low %v5044_v53, %v5052_v54  ;;  %v5124_v53 = vld [vmem:[#allocation7 + $0x2af0] sm:$0xff] }
 0x4d9   :  { %11039 = vmatpush1.bf16.msra.mxu1 %v13510_v6  ;;  %10876 = vmatprep.subr.bf16.mxu0 %v13525_v7  ;;  %v13606_v6 = vcombine.low %v5045_v55, %v5053_v18  ;;  %v13621_v7 = vcombine.high %v5060_v1, %v5068_v3  ;;  %v5132_v54 = vld [vmem:[#allocation7 + $0x2b50] sm:$0xff]  ;;  %v5125_v55 = vld [vmem:[#allocation7 + $0x2af8] sm:$0xff] }
 0x4da   :  { %11040 = vmatprep.subr.bf16.mxu1 %v13527_v8  ;;  %v13623_v8 = vcombine.high %v5061_v47, %v5069_v5  ;;  %v5133_v18 = vld [vmem:[#allocation7 + $0x2b58] sm:$0xff] }
 0x4dc   :  { %10877 = vmatpush1.bf16.msra.mxu0 %v13524_v51  ;;  %v13620_v51 = vcombine.low %v5060_v1, %v5068_v3  ;;  %v5140_v1 = vld [vmem:[#allocation7 + $0x2bb0] sm:$0xff] }
 0x4dd   :  { %11041 = vmatpush1.bf16.msra.mxu1 %v13526_v0  ;;  %10887 = vmatprep.subr.bf16.mxu0 %v13541_v16  ;;  %v13622_v0 = vcombine.low %v5061_v47, %v5069_v5  ;;  %v13637_v16 = vcombine.high %v5076_v63, %v5084_v10  ;;  %v5148_v3 = vld [vmem:[#allocation7 + $0x2c10] sm:$0xff]  ;;  %v5141_v47 = vld [vmem:[#allocation7 + $0x2bb8] sm:$0xff] }
 0x4de   :  { %11051 = vmatprep.subr.bf16.mxu1 %v13543_v14  ;;  %v5149_v5 = vld [vmem:[#allocation7 + $0x2c18] sm:$0xff]  ;;  %v5156_v63 = vld [vmem:[#allocation7 + $0x2c70] sm:$0xff] }
 0x4df   :  { %10879 = vmatmul.mubr.bf16.vlgmr.msra.gmra.mrb[12].mxu0 %v14439_v11  ;;  %v5164_v10 = vld [vmem:[#allocation7 + $0x2cd0] sm:$0xff] }
 0x4e0   :  { %11043 = vmatmul.mubr.bf16.vlgmr.msra.gmra.mrb[28].mxu1 %v14439_v11  ;;  %10888 = vmatpush1.bf16.msra.mxu0 %v13540_v19  ;;  %v5092_v19 = vld [vmem:[#allocation7 + $0x2970] sm:$0xff] }
 0x4e1   :  { %10919 = vmatprep.mubr.bf16.mxu0 %v14443_v52  ;;  %11052 = vmatpush1.bf16.msra.mxu1 %v13542_v23 }
 0x4e2   :  { %11083 = vmatprep.mubr.bf16.mxu1 %v14443_v52  ;;  %10889 = vmatprep.subr.bf16.mxu0 %v13557_v24  ;;  %v5093_v24 = vld [vmem:[#allocation7 + $0x2978] sm:$0xff] }
 0x4e3   :  { %11053 = vmatprep.subr.bf16.mxu1 %v13559_v33 }
 0x4e4   :  { %10890 = vmatpush1.bf16.msra.mxu0 %v13556_v29 }
 0x4e5   :  { %11054 = vmatpush1.bf16.msra.mxu1 %v13558_v30  ;;  %10891 = vmatprep.subr.bf16.mxu0 %v13573_v34  ;;  %v13638_v30 = vcombine.low %v5077_v12, %v5085_v13  ;;  %v13653_v34 = vcombine.high %v5092_v19, %v5100_v20  ;;  %v5157_v12 = vld [vmem:[#allocation7 + $0x2c78] sm:$0xff] }
 0x4e6   :  { %11055 = vmatprep.subr.bf16.mxu1 %v13575_v32  ;;  %v13655_v32 = vcombine.high %v5093_v24, %v5101_v26  ;;  %v5165_v13 = vld [vmem:[#allocation7 + $0x2cd8] sm:$0xff] }
 0x4e8   :  { %10892 = vmatpush1.bf16.msra.mxu0 %v13572_v43  ;;  %v13652_v43 = vcombine.low %v5092_v19, %v5100_v20  ;;  %v5172_v19 = vld [vmem:[#allocation7 + $0x2d30] sm:$0xff] }
 0x4e9   :  { %11056 = vmatpush1.bf16.msra.mxu1 %v13574_v46  ;;  %10893 = vmatprep.subr.bf16.mxu0 %v13589_v2  ;;  %v13654_v46 = vcombine.low %v5093_v24, %v5101_v26  ;;  %v13669_v2 = vcombine.high %v5108_v36, %v5116_v40  ;;  %v5180_v20 = vld [vmem:[#allocation7 + $0x2d90] sm:$0xff]  ;;  %v5173_v24 = vld [vmem:[#allocation7 + $0x2d38] sm:$0xff] }
 0x4ea   :  { %11057 = vmatprep.subr.bf16.mxu1 %v13591_v44  ;;  %v13671_v44 = vcombine.high %v5109_v38, %v5117_v41  ;;  %v5181_v26 = vld [vmem:[#allocation7 + $0x2d98] sm:$0xff] }
 0x4ec   :  { %10894 = vmatpush1.bf16.msra.mxu0 %v13588_v59  ;;  %v13668_v59 = vcombine.low %v5108_v36, %v5116_v40  ;;  %v13732_v36 = vcombine.low %v5172_v19, %v5180_v20  ;;  %v13734_v40 = vcombine.low %v5173_v24, %v5181_v26 }
 0x4ed   :  { %11058 = vmatpush1.bf16.msra.mxu1 %v13590_v56  ;;  %10895 = vmatprep.subr.bf16.mxu0 %v13605_v60  ;;  %v13670_v56 = vcombine.low %v5109_v38, %v5117_v41  ;;  %v13685_v60 = vcombine.high %v5124_v53, %v5132_v54 }
 0x4ee   :  { %11059 = vmatprep.subr.bf16.mxu1 %v13607_v62  ;;  %v13687_v62 = vcombine.high %v5125_v55, %v5133_v18 }
 0x4f0   :  { %10896 = vmatpush1.bf16.msra.mxu0 %v13604_v39  ;;  %v13684_v39 = vcombine.low %v5124_v53, %v5132_v54 }
 0x4f1   :  { %11060 = vmatpush1.bf16.msra.mxu1 %v13606_v6  ;;  %10897 = vmatprep.subr.bf16.mxu0 %v13621_v7  ;;  %v13686_v6 = vcombine.low %v5125_v55, %v5133_v18  ;;  %v13701_v7 = vcombine.high %v5140_v1, %v5148_v3 }
 0x4f2   :  { %v14470_v14 = vpop.f32.mrb[8].mxu0  ;;  %v14472_v4 = vpop.f32.mrb[24].mxu1  ;;  %11061 = vmatprep.subr.bf16.mxu1 %v13623_v8  ;;  %v13703_v8 = vcombine.high %v5141_v47, %v5149_v5 }
 0x4f3   :  { %v14474_v21 = vpop.f32.mrb[9].mxu0  ;;  %v14476_v23 = vpop.f32.mrb[25].mxu1 }
 0x4f4   :  { %v10597_v17 = vpop.f32.mrb[10].mxu0  ;;  %v10761_v33 = vpop.f32.mrb[26].mxu1  ;;  %10898 = vmatpush1.bf16.msra.mxu0 %v13620_v51  ;;  %v13700_v51 = vcombine.low %v5140_v1, %v5148_v3 }
 0x4f5   :  { %11062 = vmatpush1.bf16.msra.mxu1 %v13622_v0  ;;  %v10598_v28 = vpop.f32.mrb[11].mxu0  ;;  %v10762_v29 = vpop.f32.mrb[27].mxu1  ;;  %10899 = vmatprep.subr.bf16.mxu0 %v13637_v16  ;;  %v13702_v0 = vcombine.low %v5141_v47, %v5149_v5  ;;  %v13717_v16 = vcombine.high %v5156_v63, %v5164_v10  ;;  %v13716_v17 = vcombine.low %v5156_v63, %v5164_v10 }
 0x4f6   :  { %11063 = vmatprep.subr.bf16.mxu1 %v13639_v42  ;;  %v13719_v42 = vcombine.high %v5157_v12, %v5165_v13  ;;  %v13718_v33 = vcombine.low %v5157_v12, %v5165_v13  ;;  %v13735_v28 = vcombine.high %v5173_v24, %v5181_v26  ;;  %v5188_v29 = vld [vmem:[#allocation7 + $0x2df0] sm:$0xff]  ;;  %v4246_v26 = vld [vmem:[#allocation7 + $0x1c0] sm:$0xff] }
 0x4f8   :  { %10900 = vmatpush1.bf16.msra.mxu0 %v13636_v27  ;;  %v13733_v27 = vcombine.high %v5172_v19, %v5180_v20  ;;  %v4239_v19 = vld [vmem:[#allocation7 + $0x168] sm:$0xff] }
 0x4f9   :  { %11064 = vmatpush1.bf16.msra.mxu1 %v13638_v30  ;;  %10901 = vmatprep.subr.bf16.mxu0 %v13653_v34  ;;  %v5196_v30 = vld [vmem:[#allocation7 + $0x2e50] sm:$0xff]  ;;  %v5189_v34 = vld [vmem:[#allocation7 + $0x2df8] sm:$0xff] }
 0x4fa   :  { %11065 = vmatprep.subr.bf16.mxu1 %v13655_v32  ;;  %v5197_v32 = vld [vmem:[#allocation7 + $0x2e58] sm:$0xff]  ;;  %v13749_v38 = vcombine.high %v5188_v29, %v5196_v30  ;;  %v13748_v53 = vcombine.low %v5188_v29, %v5196_v30 }
 0x4fb   :  { %v13751_v41 = vcombine.high %v5189_v34, %v5197_v32  ;;  %v13750_v54 = vcombine.low %v5189_v34, %v5197_v32 }
 0x4fc   :  { %10902 = vmatpush1.bf16.msra.mxu0 %v13652_v43  ;;  %v5204_v43 = vld [vmem:[#allocation7 + $0x2eb0] sm:$0xff] }
 0x4fd   :  { %11066 = vmatpush1.bf16.msra.mxu1 %v13654_v46  ;;  %10903 = vmatprep.subr.bf16.mxu0 %v13669_v2  ;;  %v5212_v46 = vld [vmem:[#allocation7 + $0x2f10] sm:$0xff]  ;;  %v5205_v2 = vld [vmem:[#allocation7 + $0x2eb8] sm:$0xff] }
 0x4fe   :  { %11067 = vmatprep.subr.bf16.mxu1 %v13671_v44  ;;  %v5213_v44 = vld [vmem:[#allocation7 + $0x2f18] sm:$0xff]  ;;  %v13765_v55 = vcombine.high %v5204_v43, %v5212_v46  ;;  %v13764_v1 = vcombine.low %v5204_v43, %v5212_v46 }
 0x4ff   :  { %v13767_v18 = vcombine.high %v5205_v2, %v5213_v44  ;;  %v13766_v3 = vcombine.low %v5205_v2, %v5213_v44 }
 0x500   :  { %10904 = vmatpush1.bf16.msra.mxu0 %v13668_v59  ;;  %v5220_v59 = vld [vmem:[#allocation7 + $0x2f70] sm:$0xff] }
 0x501   :  { %11068 = vmatpush1.bf16.msra.mxu1 %v13670_v56  ;;  %10905 = vmatprep.subr.bf16.mxu0 %v13685_v60  ;;  %v5228_v56 = vld [vmem:[#allocation7 + $0x2fd0] sm:$0xff]  ;;  %v5221_v60 = vld [vmem:[#allocation7 + $0x2f78] sm:$0xff] }
 0x502   :  { %11069 = vmatprep.subr.bf16.mxu1 %v13687_v62  ;;  %v5229_v62 = vld [vmem:[#allocation7 + $0x2fd8] sm:$0xff]  ;;  %v13781_v47 = vcombine.high %v5220_v59, %v5228_v56  ;;  %v13780_v63 = vcombine.low %v5220_v59, %v5228_v56 }
 0x503   :  { %v13783_v5 = vcombine.high %v5221_v60, %v5229_v62  ;;  %v13782_v10 = vcombine.low %v5221_v60, %v5229_v62 }
 0x504   :  { %10906 = vmatpush1.bf16.msra.mxu0 %v13684_v39  ;;  %v4214_v39 = vld [vmem:[#allocation7 + $0x40] sm:$0xff] }
 0x505   :  { %11070 = vmatpush1.bf16.msra.mxu1 %v13686_v6  ;;  %10907 = vmatprep.subr.bf16.mxu0 %v13701_v7  ;;  %v4222_v6 = vld [vmem:[#allocation7 + $0xa0] sm:$0xff]  ;;  %v4215_v7 = vld [vmem:[#allocation7 + $0x48] sm:$0xff] }
 0x506   :  { %11071 = vmatprep.subr.bf16.mxu1 %v13703_v8  ;;  %v4223_v8 = vld [vmem:[#allocation7 + $0xa8] sm:$0xff]  ;;  %v12777_v12 = vcombine.high %v4214_v39, %v4222_v6 }
 0x507   :  { %v12779_v13 = vcombine.high %v4215_v7, %v4223_v8  ;;  %v12778_v20 = vcombine.low %v4215_v7, %v4223_v8 }
 0x508   :  { %10908 = vmatpush1.bf16.msra.mxu0 %v13700_v51  ;;  %v4230_v51 = vld [vmem:[#allocation7 + $0x100] sm:$0xff] }
 0x509   :  { %11072 = vmatpush1.bf16.msra.mxu1 %v13702_v0  ;;  %10909 = vmatprep.subr.bf16.mxu0 %v13717_v16  ;;  %v4238_v0 = vld [vmem:[#allocation7 + $0x160] sm:$0xff]  ;;  %v12776_v16 = vcombine.low %v4214_v39, %v4222_v6 }
 0x50a   :  { %11073 = vmatprep.subr.bf16.mxu1 %v13719_v42  ;;  %v4231_v42 = vld [vmem:[#allocation7 + $0x108] sm:$0xff]  ;;  %v12793_v24 = vcombine.high %v4230_v51, %v4238_v0  ;;  %v12792_v29 = vcombine.low %v4230_v51, %v4238_v0 }
 0x50b   :  { %v12794_v30 = vcombine.low %v4231_v42, %v4239_v19 }
 0x50c   :  { %10910 = vmatpush1.bf16.msra.mxu0 %v13716_v17  ;;  %v4254_v17 = vld [vmem:[#allocation7 + $0x220] sm:$0xff] }
 0x50d   :  { %11074 = vmatpush1.bf16.msra.mxu1 %v13718_v33  ;;  %10911 = vmatprep.subr.bf16.mxu0 %v13733_v27  ;;  %v12795_v33 = vcombine.high %v4231_v42, %v4239_v19  ;;  %v4247_v27 = vld [vmem:[#allocation7 + $0x1c8] sm:$0xff]  ;;  %v12809_v34 = vcombine.high %v4246_v26, %v4254_v17  ;;  %v12808_v43 = vcombine.low %v4246_v26, %v4254_v17  ;;  %v4326_v19 = vld [vmem:[#allocation7 + $0x580] sm:$0xff] }
 0x50e   :  { %11075 = vmatprep.subr.bf16.mxu1 %v13735_v28  ;;  %v4255_v28 = vld [vmem:[#allocation7 + $0x228] sm:$0xff] }
 0x50f   :  { %v12811_v32 = vcombine.high %v4247_v27, %v4255_v28  ;;  %v12810_v46 = vcombine.low %v4247_v27, %v4255_v28  ;;  %v4335_v26 = vld [vmem:[#allocation7 + $0x5e8] sm:$0xff] }
 0x510   :  { %10912 = vmatpush1.bf16.msra.mxu0 %v13732_v36  ;;  %v4262_v36 = vld [vmem:[#allocation7 + $0x280] sm:$0xff] }
 0x511   :  { %11076 = vmatpush1.bf16.msra.mxu1 %v13734_v40  ;;  %10913 = vmatprep.subr.bf16.mxu0 %v13749_v38  ;;  %v4270_v40 = vld [vmem:[#allocation7 + $0x2e0] sm:$0xff]  ;;  %v4263_v38 = vld [vmem:[#allocation7 + $0x288] sm:$0xff] }
 0x512   :  { %11077 = vmatprep.subr.bf16.mxu1 %v13751_v41  ;;  %v4271_v41 = vld [vmem:[#allocation7 + $0x2e8] sm:$0xff]  ;;  %v12825_v2 = vcombine.high %v4262_v36, %v4270_v40  ;;  %v12824_v59 = vcombine.low %v4262_v36, %v4270_v40 }
 0x513   :  { %v12827_v44 = vcombine.high %v4263_v38, %v4271_v41  ;;  %v12826_v56 = vcombine.low %v4263_v38, %v4271_v41 }
 0x514   :  { %10914 = vmatpush1.bf16.msra.mxu0 %v13748_v53  ;;  %v4278_v53 = vld [vmem:[#allocation7 + $0x340] sm:$0xff] }
 0x515   :  { %11078 = vmatpush1.bf16.msra.mxu1 %v13750_v54  ;;  %10915 = vmatprep.subr.bf16.mxu0 %v13765_v55  ;;  %v4286_v54 = vld [vmem:[#allocation7 + $0x3a0] sm:$0xff]  ;;  %v4279_v55 = vld [vmem:[#allocation7 + $0x348] sm:$0xff] }
 0x516   :  { %11079 = vmatprep.subr.bf16.mxu1 %v13767_v18  ;;  %v4287_v18 = vld [vmem:[#allocation7 + $0x3a8] sm:$0xff]  ;;  %v12841_v60 = vcombine.high %v4278_v53, %v4286_v54  ;;  %v12840_v39 = vcombine.low %v4278_v53, %v4286_v54 }
 0x517   :  { %v12843_v62 = vcombine.high %v4279_v55, %v4287_v18  ;;  %v12842_v6 = vcombine.low %v4279_v55, %v4287_v18 }
 0x518   :  { %10916 = vmatpush1.bf16.msra.mxu0 %v13764_v1  ;;  %v4294_v1 = vld [vmem:[#allocation7 + $0x400] sm:$0xff] }
 0x519   :  { %11080 = vmatpush1.bf16.msra.mxu1 %v13766_v3  ;;  %10917 = vmatprep.subr.bf16.mxu0 %v13781_v47  ;;  %v4302_v3 = vld [vmem:[#allocation7 + $0x460] sm:$0xff]  ;;  %v4295_v47 = vld [vmem:[#allocation7 + $0x408] sm:$0xff] }
 0x51a   :  { %11081 = vmatprep.subr.bf16.mxu1 %v13783_v5  ;;  %v4303_v5 = vld [vmem:[#allocation7 + $0x468] sm:$0xff]  ;;  %v12857_v7 = vcombine.high %v4294_v1, %v4302_v3  ;;  %v12856_v51 = vcombine.low %v4294_v1, %v4302_v3 }
 0x51b   :  { %v12859_v8 = vcombine.high %v4295_v47, %v4303_v5  ;;  %v12858_v0 = vcombine.low %v4295_v47, %v4303_v5 }
 0x51c   :  { %10918 = vmatpush1.bf16.msra.mxu0 %v13780_v63  ;;  %v4310_v63 = vld [vmem:[#allocation7 + $0x4c0] sm:$0xff] }
 0x51d   :  { %11082 = vmatpush1.bf16.msra.mxu1 %v13782_v10  ;;  %11092 = vmatprep.subr.bf16.mxu0 %v12777_v12  ;;  %v4318_v10 = vld [vmem:[#allocation7 + $0x520] sm:$0xff]  ;;  %v4311_v12 = vld [vmem:[#allocation7 + $0x4c8] sm:$0xff] }
 0x51e   :  { %11256 = vmatprep.subr.bf16.mxu1 %v12779_v13  ;;  %v4319_v13 = vld [vmem:[#allocation7 + $0x528] sm:$0xff]  ;;  %v12872_v17 = vcombine.low %v4310_v63, %v4318_v10 }
 0x51f   :  { %10920 = vmatmul.mubr.bf16.vlgmr.msra.gmra.mrb[12].mxu0 %v14452_v22  ;;  %v12875_v42 = vcombine.high %v4311_v12, %v4319_v13 }
 0x520   :  { %11084 = vmatmul.mubr.bf16.vlgmr.msra.gmra.mrb[28].mxu1 %v14452_v22  ;;  %11093 = vmatpush1.bf16.msra.mxu0 %v12776_v16  ;;  %v12873_v16 = vcombine.high %v4310_v63, %v4318_v10 }
 0x521   :  { %11124 = vmatprep.mubr.bf16.mxu0 %v14402_v25  ;;  %11257 = vmatpush1.bf16.msra.mxu1 %v12778_v20  ;;  %v4334_v20 = vld [vmem:[#allocation7 + $0x5e0] sm:$0xff] }
 0x522   :  { %11288 = vmatprep.mubr.bf16.mxu1 %v14402_v25  ;;  %11094 = vmatprep.subr.bf16.mxu0 %v12793_v24  ;;  %v4327_v24 = vld [vmem:[#allocation7 + $0x588] sm:$0xff]  ;;  %v12889_v27 = vcombine.high %v4326_v19, %v4334_v20  ;;  %v12888_v36 = vcombine.low %v4326_v19, %v4334_v20 }
 0x523   :  { %11258 = vmatprep.subr.bf16.mxu1 %v12795_v33  ;;  %v12874_v33 = vcombine.low %v4311_v12, %v4319_v13  ;;  %v12891_v28 = vcombine.high %v4327_v24, %v4335_v26  ;;  %v12890_v40 = vcombine.low %v4327_v24, %v4335_v26 }
 0x524   :  { %11095 = vmatpush1.bf16.msra.mxu0 %v12792_v29  ;;  %v4342_v29 = vld [vmem:[#allocation7 + $0x640] sm:$0xff] }
 0x525   :  { %11259 = vmatpush1.bf16.msra.mxu1 %v12794_v30  ;;  %11096 = vmatprep.subr.bf16.mxu0 %v12809_v34  ;;  %v4350_v30 = vld [vmem:[#allocation7 + $0x6a0] sm:$0xff]  ;;  %v4343_v34 = vld [vmem:[#allocation7 + $0x648] sm:$0xff] }
 0x526   :  { %11260 = vmatprep.subr.bf16.mxu1 %v12811_v32  ;;  %v4351_v32 = vld [vmem:[#allocation7 + $0x6a8] sm:$0xff]  ;;  %v12905_v38 = vcombine.high %v4342_v29, %v4350_v30  ;;  %v12904_v53 = vcombine.low %v4342_v29, %v4350_v30 }
 0x527   :  { %v12907_v41 = vcombine.high %v4343_v34, %v4351_v32  ;;  %v12906_v54 = vcombine.low %v4343_v34, %v4351_v32 }
 0x528   :  { %11097 = vmatpush1.bf16.msra.mxu0 %v12808_v43  ;;  %v4358_v43 = vld [vmem:[#allocation7 + $0x700] sm:$0xff] }
 0x529   :  { %11261 = vmatpush1.bf16.msra.mxu1 %v12810_v46  ;;  %11098 = vmatprep.subr.bf16.mxu0 %v12825_v2  ;;  %v4366_v46 = vld [vmem:[#allocation7 + $0x760] sm:$0xff]  ;;  %v4359_v2 = vld [vmem:[#allocation7 + $0x708] sm:$0xff] }
 0x52a   :  { %11262 = vmatprep.subr.bf16.mxu1 %v12827_v44  ;;  %v4367_v44 = vld [vmem:[#allocation7 + $0x768] sm:$0xff]  ;;  %v12921_v55 = vcombine.high %v4358_v43, %v4366_v46  ;;  %v12920_v1 = vcombine.low %v4358_v43, %v4366_v46 }
 0x52b   :  { %v12923_v18 = vcombine.high %v4359_v2, %v4367_v44  ;;  %v12922_v3 = vcombine.low %v4359_v2, %v4367_v44 }
 0x52c   :  { %11099 = vmatpush1.bf16.msra.mxu0 %v12824_v59  ;;  %v4374_v59 = vld [vmem:[#allocation7 + $0x7c0] sm:$0xff] }
 0x52d   :  { %11263 = vmatpush1.bf16.msra.mxu1 %v12826_v56  ;;  %11100 = vmatprep.subr.bf16.mxu0 %v12841_v60  ;;  %v4382_v56 = vld [vmem:[#allocation7 + $0x820] sm:$0xff]  ;;  %v4375_v60 = vld [vmem:[#allocation7 + $0x7c8] sm:$0xff] }
 0x52e   :  { %11264 = vmatprep.subr.bf16.mxu1 %v12843_v62  ;;  %v4383_v62 = vld [vmem:[#allocation7 + $0x828] sm:$0xff]  ;;  %v12937_v47 = vcombine.high %v4374_v59, %v4382_v56  ;;  %v12936_v63 = vcombine.low %v4374_v59, %v4382_v56 }
 0x52f   :  { %v12939_v5 = vcombine.high %v4375_v60, %v4383_v62  ;;  %v12938_v10 = vcombine.low %v4375_v60, %v4383_v62 }
 0x530   :  { %11101 = vmatpush1.bf16.msra.mxu0 %v12840_v39  ;;  %v4390_v39 = vld [vmem:[#allocation7 + $0x880] sm:$0xff] }
 0x531   :  { %11265 = vmatpush1.bf16.msra.mxu1 %v12842_v6  ;;  %11102 = vmatprep.subr.bf16.mxu0 %v12857_v7  ;;  %v4398_v6 = vld [vmem:[#allocation7 + $0x8e0] sm:$0xff]  ;;  %v4391_v7 = vld [vmem:[#allocation7 + $0x888] sm:$0xff] }
 0x532   :  { %11266 = vmatprep.subr.bf16.mxu1 %v12859_v8  ;;  %v4399_v8 = vld [vmem:[#allocation7 + $0x8e8] sm:$0xff]  ;;  %v12953_v12 = vcombine.high %v4390_v39, %v4398_v6  ;;  %v12952_v19 = vcombine.low %v4390_v39, %v4398_v6 }
 0x533   :  { %v12955_v13 = vcombine.high %v4391_v7, %v4399_v8  ;;  %v12954_v20 = vcombine.low %v4391_v7, %v4399_v8 }
 0x534   :  { %11103 = vmatpush1.bf16.msra.mxu0 %v12856_v51  ;;  %v4406_v51 = vld [vmem:[#allocation7 + $0x940] sm:$0xff] }
 0x535   :  { %11267 = vmatpush1.bf16.msra.mxu1 %v12858_v0  ;;  %11104 = vmatprep.subr.bf16.mxu0 %v12873_v16  ;;  %v4414_v0 = vld [vmem:[#allocation7 + $0x9a0] sm:$0xff]  ;;  %v4407_v16 = vld [vmem:[#allocation7 + $0x948] sm:$0xff] }
 0x536   :  { %11268 = vmatprep.subr.bf16.mxu1 %v12875_v42  ;;  %v4415_v42 = vld [vmem:[#allocation7 + $0x9a8] sm:$0xff]  ;;  %v12969_v24 = vcombine.high %v4406_v51, %v4414_v0  ;;  %v12968_v29 = vcombine.low %v4406_v51, %v4414_v0 }
 0x537   :  { %v12971_v26 = vcombine.high %v4407_v16, %v4415_v42  ;;  %v12970_v30 = vcombine.low %v4407_v16, %v4415_v42  ;;  %v4495_v51 = vld [vmem:[#allocation7 + $0xd68] sm:$0xff]  ;;  %v4502_v42 = vld [vmem:[#allocation7 + $0xdc0] sm:$0xff] }
 0x538   :  { %11105 = vmatpush1.bf16.msra.mxu0 %v12872_v17  ;;  %v4422_v17 = vld [vmem:[#allocation7 + $0xa00] sm:$0xff] }
 0x539   :  { %11269 = vmatpush1.bf16.msra.mxu1 %v12874_v33  ;;  %11106 = vmatprep.subr.bf16.mxu0 %v12889_v27  ;;  %v4430_v33 = vld [vmem:[#allocation7 + $0xa60] sm:$0xff]  ;;  %v4423_v27 = vld [vmem:[#allocation7 + $0xa08] sm:$0xff] }
 0x53a   :  { %11270 = vmatprep.subr.bf16.mxu1 %v12891_v28  ;;  %v4431_v28 = vld [vmem:[#allocation7 + $0xa68] sm:$0xff]  ;;  %v12985_v34 = vcombine.high %v4422_v17, %v4430_v33  ;;  %v12984_v43 = vcombine.low %v4422_v17, %v4430_v33 }
 0x53b   :  { %v12987_v32 = vcombine.high %v4423_v27, %v4431_v28  ;;  %v12986_v46 = vcombine.low %v4423_v27, %v4431_v28 }
 0x53c   :  { %11107 = vmatpush1.bf16.msra.mxu0 %v12888_v36  ;;  %v4438_v36 = vld [vmem:[#allocation7 + $0xac0] sm:$0xff] }
 0x53d   :  { %11271 = vmatpush1.bf16.msra.mxu1 %v12890_v40  ;;  %11108 = vmatprep.subr.bf16.mxu0 %v12905_v38  ;;  %v4446_v40 = vld [vmem:[#allocation7 + $0xb20] sm:$0xff]  ;;  %v4439_v38 = vld [vmem:[#allocation7 + $0xac8] sm:$0xff] }
 0x53e   :  { %11272 = vmatprep.subr.bf16.mxu1 %v12907_v41  ;;  %v4447_v41 = vld [vmem:[#allocation7 + $0xb28] sm:$0xff]  ;;  %v13001_v2 = vcombine.high %v4438_v36, %v4446_v40  ;;  %v13000_v59 = vcombine.low %v4438_v36, %v4446_v40 }
 0x53f   :  { %v13003_v44 = vcombine.high %v4439_v38, %v4447_v41  ;;  %v13002_v56 = vcombine.low %v4439_v38, %v4447_v41 }
 0x540   :  { %11109 = vmatpush1.bf16.msra.mxu0 %v12904_v53  ;;  %v4454_v53 = vld [vmem:[#allocation7 + $0xb80] sm:$0xff] }
 0x541   :  { %11273 = vmatpush1.bf16.msra.mxu1 %v12906_v54  ;;  %11110 = vmatprep.subr.bf16.mxu0 %v12921_v55  ;;  %v4462_v54 = vld [vmem:[#allocation7 + $0xbe0] sm:$0xff]  ;;  %v4455_v55 = vld [vmem:[#allocation7 + $0xb88] sm:$0xff] }
 0x542   :  { %11274 = vmatprep.subr.bf16.mxu1 %v12923_v18  ;;  %v4463_v18 = vld [vmem:[#allocation7 + $0xbe8] sm:$0xff]  ;;  %v13017_v60 = vcombine.high %v4454_v53, %v4462_v54  ;;  %v13016_v39 = vcombine.low %v4454_v53, %v4462_v54 }
 0x543   :  { %v13019_v62 = vcombine.high %v4455_v55, %v4463_v18  ;;  %v13018_v6 = vcombine.low %v4455_v55, %v4463_v18 }
 0x544   :  { %11111 = vmatpush1.bf16.msra.mxu0 %v12920_v1  ;;  %v4470_v1 = vld [vmem:[#allocation7 + $0xc40] sm:$0xff] }
 0x545   :  { %11275 = vmatpush1.bf16.msra.mxu1 %v12922_v3  ;;  %11112 = vmatprep.subr.bf16.mxu0 %v12937_v47  ;;  %v4478_v3 = vld [vmem:[#allocation7 + $0xca0] sm:$0xff]  ;;  %v4471_v47 = vld [vmem:[#allocation7 + $0xc48] sm:$0xff] }
 0x546   :  { %11276 = vmatprep.subr.bf16.mxu1 %v12939_v5  ;;  %v4479_v5 = vld [vmem:[#allocation7 + $0xca8] sm:$0xff]  ;;  %v13033_v7 = vcombine.high %v4470_v1, %v4478_v3 }
 0x547   :  { %v13035_v8 = vcombine.high %v4471_v47, %v4479_v5  ;;  %v13034_v0 = vcombine.low %v4471_v47, %v4479_v5 }
 0x548   :  { %11113 = vmatpush1.bf16.msra.mxu0 %v12936_v63  ;;  %v4486_v63 = vld [vmem:[#allocation7 + $0xd00] sm:$0xff] }
 0x549   :  { %11277 = vmatpush1.bf16.msra.mxu1 %v12938_v10  ;;  %11114 = vmatprep.subr.bf16.mxu0 %v12953_v12  ;;  %v4494_v10 = vld [vmem:[#allocation7 + $0xd60] sm:$0xff]  ;;  %v13032_v12 = vcombine.low %v4470_v1, %v4478_v3 }
 0x54a   :  { %11278 = vmatprep.subr.bf16.mxu1 %v12955_v13  ;;  %v4487_v13 = vld [vmem:[#allocation7 + $0xd08] sm:$0xff]  ;;  %v13049_v16 = vcombine.high %v4486_v63, %v4494_v10  ;;  %v13048_v17 = vcombine.low %v4486_v63, %v4494_v10 }
 0x54b   :  { %v13050_v33 = vcombine.low %v4487_v13, %v4495_v51 }
 0x54c   :  { %11115 = vmatpush1.bf16.msra.mxu0 %v12952_v19  ;;  %v4510_v19 = vld [vmem:[#allocation7 + $0xe20] sm:$0xff] }
 0x54d   :  { %11279 = vmatpush1.bf16.msra.mxu1 %v12954_v20  ;;  %11116 = vmatprep.subr.bf16.mxu0 %v12969_v24  ;;  %v13051_v20 = vcombine.high %v4487_v13, %v4495_v51  ;;  %v4503_v24 = vld [vmem:[#allocation7 + $0xdc8] sm:$0xff]  ;;  %v13065_v27 = vcombine.high %v4502_v42, %v4510_v19  ;;  %v13064_v36 = vcombine.low %v4502_v42, %v4510_v19  ;;  %v4582_v51 = vld [vmem:[#allocation7 + $0x1180] sm:$0xff] }
 0x54e   :  { %11280 = vmatprep.subr.bf16.mxu1 %v12971_v26  ;;  %v4511_v26 = vld [vmem:[#allocation7 + $0xe28] sm:$0xff] }
 0x54f   :  { %v13067_v28 = vcombine.high %v4503_v24, %v4511_v26  ;;  %v13066_v40 = vcombine.low %v4503_v24, %v4511_v26  ;;  %v4591_v42 = vld [vmem:[#allocation7 + $0x11e8] sm:$0xff] }
 0x550   :  { %11117 = vmatpush1.bf16.msra.mxu0 %v12968_v29  ;;  %v4518_v29 = vld [vmem:[#allocation7 + $0xe80] sm:$0xff] }
 0x551   :  { %11281 = vmatpush1.bf16.msra.mxu1 %v12970_v30  ;;  %11118 = vmatprep.subr.bf16.mxu0 %v12985_v34  ;;  %v4526_v30 = vld [vmem:[#allocation7 + $0xee0] sm:$0xff]  ;;  %v4519_v34 = vld [vmem:[#allocation7 + $0xe88] sm:$0xff] }
 0x552   :  { %11282 = vmatprep.subr.bf16.mxu1 %v12987_v32  ;;  %v4527_v32 = vld [vmem:[#allocation7 + $0xee8] sm:$0xff]  ;;  %v13081_v38 = vcombine.high %v4518_v29, %v4526_v30  ;;  %v13080_v53 = vcombine.low %v4518_v29, %v4526_v30 }
 0x553   :  { %v13083_v41 = vcombine.high %v4519_v34, %v4527_v32  ;;  %v13082_v54 = vcombine.low %v4519_v34, %v4527_v32 }
 0x554   :  { %11119 = vmatpush1.bf16.msra.mxu0 %v12984_v43  ;;  %v4534_v43 = vld [vmem:[#allocation7 + $0xf40] sm:$0xff] }
 0x555   :  { %11283 = vmatpush1.bf16.msra.mxu1 %v12986_v46  ;;  %11120 = vmatprep.subr.bf16.mxu0 %v13001_v2  ;;  %v4542_v46 = vld [vmem:[#allocation7 + $0xfa0] sm:$0xff]  ;;  %v4535_v2 = vld [vmem:[#allocation7 + $0xf48] sm:$0xff] }
 0x556   :  { %11284 = vmatprep.subr.bf16.mxu1 %v13003_v44  ;;  %v4543_v44 = vld [vmem:[#allocation7 + $0xfa8] sm:$0xff]  ;;  %v13097_v55 = vcombine.high %v4534_v43, %v4542_v46  ;;  %v13096_v1 = vcombine.low %v4534_v43, %v4542_v46 }
 0x557   :  { %v13099_v18 = vcombine.high %v4535_v2, %v4543_v44  ;;  %v13098_v3 = vcombine.low %v4535_v2, %v4543_v44 }
 0x558   :  { %11121 = vmatpush1.bf16.msra.mxu0 %v13000_v59  ;;  %v4550_v59 = vld [vmem:[#allocation7 + $0x1000] sm:$0xff] }
 0x559   :  { %11285 = vmatpush1.bf16.msra.mxu1 %v13002_v56  ;;  %11122 = vmatprep.subr.bf16.mxu0 %v13017_v60  ;;  %v4558_v56 = vld [vmem:[#allocation7 + $0x1060] sm:$0xff]  ;;  %v4551_v60 = vld [vmem:[#allocation7 + $0x1008] sm:$0xff] }
 0x55a   :  { %11286 = vmatprep.subr.bf16.mxu1 %v13019_v62  ;;  %v4559_v62 = vld [vmem:[#allocation7 + $0x1068] sm:$0xff]  ;;  %v13113_v47 = vcombine.high %v4550_v59, %v4558_v56  ;;  %v13112_v63 = vcombine.low %v4550_v59, %v4558_v56 }
 0x55b   :  { %v13115_v5 = vcombine.high %v4551_v60, %v4559_v62  ;;  %v13114_v10 = vcombine.low %v4551_v60, %v4559_v62 }
 0x55c   :  { %11123 = vmatpush1.bf16.msra.mxu0 %v13016_v39  ;;  %v4566_v39 = vld [vmem:[#allocation7 + $0x10c0] sm:$0xff] }
 0x55d   :  { %11287 = vmatpush1.bf16.msra.mxu1 %v13018_v6  ;;  %11133 = vmatprep.subr.bf16.mxu0 %v13033_v7  ;;  %v4574_v6 = vld [vmem:[#allocation7 + $0x1120] sm:$0xff]  ;;  %v4567_v7 = vld [vmem:[#allocation7 + $0x10c8] sm:$0xff] }
 0x55e   :  { %11297 = vmatprep.subr.bf16.mxu1 %v13035_v8  ;;  %v4575_v8 = vld [vmem:[#allocation7 + $0x1128] sm:$0xff]  ;;  %v13128_v19 = vcombine.low %v4566_v39, %v4574_v6 }
 0x55f   :  { %11125 = vmatmul.mubr.bf16.vlgmr.msra.gmra.mrb[16].mxu0 %v14414_v35  ;;  %v13131_v13 = vcombine.high %v4567_v7, %v4575_v8 }
 0x560   :  { %11289 = vmatmul.mubr.bf16.vlgmr.msra.gmra.mrb[32].mxu1 %v14414_v35  ;;  %11134 = vmatpush1.bf16.msra.mxu0 %v13032_v12  ;;  %v13129_v12 = vcombine.high %v4566_v39, %v4574_v6 }
 0x561   :  { %11165 = vmatprep.mubr.bf16.mxu0 %v14416_v15  ;;  %11298 = vmatpush1.bf16.msra.mxu1 %v13034_v0  ;;  %v4590_v0 = vld [vmem:[#allocation7 + $0x11e0] sm:$0xff] }
 0x562   :  { %11329 = vmatprep.mubr.bf16.mxu1 %v14416_v15  ;;  %11135 = vmatprep.subr.bf16.mxu0 %v13049_v16  ;;  %v4583_v16 = vld [vmem:[#allocation7 + $0x1188] sm:$0xff]  ;;  %v13145_v24 = vcombine.high %v4582_v51, %v4590_v0  ;;  %v13144_v29 = vcombine.low %v4582_v51, %v4590_v0 }
 0x563   :  { %11299 = vmatprep.subr.bf16.mxu1 %v13051_v20  ;;  %v13130_v20 = vcombine.low %v4567_v7, %v4575_v8  ;;  %v13147_v26 = vcombine.high %v4583_v16, %v4591_v42  ;;  %v13146_v30 = vcombine.low %v4583_v16, %v4591_v42 }
 0x564   :  { %11136 = vmatpush1.bf16.msra.mxu0 %v13048_v17  ;;  %v4598_v17 = vld [vmem:[#allocation7 + $0x1240] sm:$0xff] }
 0x565   :  { %11300 = vmatpush1.bf16.msra.mxu1 %v13050_v33  ;;  %11137 = vmatprep.subr.bf16.mxu0 %v13065_v27  ;;  %v4606_v33 = vld [vmem:[#allocation7 + $0x12a0] sm:$0xff]  ;;  %v4599_v27 = vld [vmem:[#allocation7 + $0x1248] sm:$0xff] }
 0x566   :  { %11301 = vmatprep.subr.bf16.mxu1 %v13067_v28  ;;  %v4607_v28 = vld [vmem:[#allocation7 + $0x12a8] sm:$0xff]  ;;  %v13161_v34 = vcombine.high %v4598_v17, %v4606_v33  ;;  %v13160_v43 = vcombine.low %v4598_v17, %v4606_v33 }
 0x567   :  { %v13163_v32 = vcombine.high %v4599_v27, %v4607_v28  ;;  %v13162_v46 = vcombine.low %v4599_v27, %v4607_v28 }
 0x568   :  { %11138 = vmatpush1.bf16.msra.mxu0 %v13064_v36  ;;  %v4614_v36 = vld [vmem:[#allocation7 + $0x1300] sm:$0xff] }
 0x569   :  { %11302 = vmatpush1.bf16.msra.mxu1 %v13066_v40  ;;  %11139 = vmatprep.subr.bf16.mxu0 %v13081_v38  ;;  %v4622_v40 = vld [vmem:[#allocation7 + $0x1360] sm:$0xff]  ;;  %v4615_v38 = vld [vmem:[#allocation7 + $0x1308] sm:$0xff] }
 0x56a   :  { %11303 = vmatprep.subr.bf16.mxu1 %v13083_v41  ;;  %v4623_v41 = vld [vmem:[#allocation7 + $0x1368] sm:$0xff]  ;;  %v13177_v2 = vcombine.high %v4614_v36, %v4622_v40  ;;  %v13176_v59 = vcombine.low %v4614_v36, %v4622_v40 }
 0x56b   :  { %v13179_v44 = vcombine.high %v4615_v38, %v4623_v41  ;;  %v13178_v56 = vcombine.low %v4615_v38, %v4623_v41 }
 0x56c   :  { %11140 = vmatpush1.bf16.msra.mxu0 %v13080_v53  ;;  %v4630_v53 = vld [vmem:[#allocation7 + $0x13c0] sm:$0xff] }
 0x56d   :  { %11304 = vmatpush1.bf16.msra.mxu1 %v13082_v54  ;;  %11141 = vmatprep.subr.bf16.mxu0 %v13097_v55  ;;  %v4638_v54 = vld [vmem:[#allocation7 + $0x1420] sm:$0xff]  ;;  %v4631_v55 = vld [vmem:[#allocation7 + $0x13c8] sm:$0xff] }
 0x56e   :  { %11305 = vmatprep.subr.bf16.mxu1 %v13099_v18  ;;  %v4639_v18 = vld [vmem:[#allocation7 + $0x1428] sm:$0xff]  ;;  %v13193_v60 = vcombine.high %v4630_v53, %v4638_v54  ;;  %v13192_v39 = vcombine.low %v4630_v53, %v4638_v54 }
 0x56f   :  { %v13195_v62 = vcombine.high %v4631_v55, %v4639_v18  ;;  %v13194_v6 = vcombine.low %v4631_v55, %v4639_v18 }
 0x570   :  { %11142 = vmatpush1.bf16.msra.mxu0 %v13096_v1  ;;  %v4646_v1 = vld [vmem:[#allocation7 + $0x1480] sm:$0xff] }
 0x571   :  { %11306 = vmatpush1.bf16.msra.mxu1 %v13098_v3  ;;  %11143 = vmatprep.subr.bf16.mxu0 %v13113_v47  ;;  %v4654_v3 = vld [vmem:[#allocation7 + $0x14e0] sm:$0xff]  ;;  %v4647_v47 = vld [vmem:[#allocation7 + $0x1488] sm:$0xff] }
 0x572   :  { %11307 = vmatprep.subr.bf16.mxu1 %v13115_v5  ;;  %v4655_v5 = vld [vmem:[#allocation7 + $0x14e8] sm:$0xff]  ;;  %v13209_v7 = vcombine.high %v4646_v1, %v4654_v3  ;;  %v13208_v51 = vcombine.low %v4646_v1, %v4654_v3 }
 0x573   :  { %v13211_v8 = vcombine.high %v4647_v47, %v4655_v5  ;;  %v13210_v0 = vcombine.low %v4647_v47, %v4655_v5 }
 0x574   :  { %11144 = vmatpush1.bf16.msra.mxu0 %v13112_v63  ;;  %v4662_v63 = vld [vmem:[#allocation7 + $0x1540] sm:$0xff] }
 0x575   :  { %11308 = vmatpush1.bf16.msra.mxu1 %v13114_v10  ;;  %11145 = vmatprep.subr.bf16.mxu0 %v13129_v12  ;;  %v4670_v10 = vld [vmem:[#allocation7 + $0x15a0] sm:$0xff]  ;;  %v4663_v12 = vld [vmem:[#allocation7 + $0x1548] sm:$0xff] }
 0x576   :  { %11309 = vmatprep.subr.bf16.mxu1 %v13131_v13  ;;  %v4671_v13 = vld [vmem:[#allocation7 + $0x15a8] sm:$0xff]  ;;  %v13225_v16 = vcombine.high %v4662_v63, %v4670_v10  ;;  %v13224_v17 = vcombine.low %v4662_v63, %v4670_v10 }
 0x577   :  { %v13227_v42 = vcombine.high %v4663_v12, %v4671_v13  ;;  %v13226_v33 = vcombine.low %v4663_v12, %v4671_v13  ;;  %v4751_v63 = vld [vmem:[#allocation7 + $0x1968] sm:$0xff]  ;;  %v4758_v13 = vld [vmem:[#allocation7 + $0x19c0] sm:$0xff] }
 0x578   :  { %11146 = vmatpush1.bf16.msra.mxu0 %v13128_v19  ;;  %v4678_v19 = vld [vmem:[#allocation7 + $0x1600] sm:$0xff] }
 0x579   :  { %11310 = vmatpush1.bf16.msra.mxu1 %v13130_v20  ;;  %11147 = vmatprep.subr.bf16.mxu0 %v13145_v24  ;;  %v4686_v20 = vld [vmem:[#allocation7 + $0x1660] sm:$0xff]  ;;  %v4679_v24 = vld [vmem:[#allocation7 + $0x1608] sm:$0xff] }
 0x57a   :  { %11311 = vmatprep.subr.bf16.mxu1 %v13147_v26  ;;  %v4687_v26 = vld [vmem:[#allocation7 + $0x1668] sm:$0xff]  ;;  %v13241_v27 = vcombine.high %v4678_v19, %v4686_v20  ;;  %v13240_v36 = vcombine.low %v4678_v19, %v4686_v20 }
 0x57b   :  { %v13243_v28 = vcombine.high %v4679_v24, %v4687_v26  ;;  %v13242_v40 = vcombine.low %v4679_v24, %v4687_v26 }
 0x57c   :  { %11148 = vmatpush1.bf16.msra.mxu0 %v13144_v29  ;;  %v4694_v29 = vld [vmem:[#allocation7 + $0x16c0] sm:$0xff] }
 0x57d   :  { %11312 = vmatpush1.bf16.msra.mxu1 %v13146_v30  ;;  %11149 = vmatprep.subr.bf16.mxu0 %v13161_v34  ;;  %v4702_v30 = vld [vmem:[#allocation7 + $0x1720] sm:$0xff]  ;;  %v4695_v34 = vld [vmem:[#allocation7 + $0x16c8] sm:$0xff] }
 0x57e   :  { %11313 = vmatprep.subr.bf16.mxu1 %v13163_v32  ;;  %v4703_v32 = vld [vmem:[#allocation7 + $0x1728] sm:$0xff]  ;;  %v13257_v38 = vcombine.high %v4694_v29, %v4702_v30  ;;  %v13256_v53 = vcombine.low %v4694_v29, %v4702_v30 }
 0x57f   :  { %v13259_v41 = vcombine.high %v4695_v34, %v4703_v32  ;;  %v13258_v54 = vcombine.low %v4695_v34, %v4703_v32 }
 0x580   :  { %11150 = vmatpush1.bf16.msra.mxu0 %v13160_v43  ;;  %v4710_v43 = vld [vmem:[#allocation7 + $0x1780] sm:$0xff] }
 0x581   :  { %11314 = vmatpush1.bf16.msra.mxu1 %v13162_v46  ;;  %11151 = vmatprep.subr.bf16.mxu0 %v13177_v2  ;;  %v4718_v46 = vld [vmem:[#allocation7 + $0x17e0] sm:$0xff]  ;;  %v4711_v2 = vld [vmem:[#allocation7 + $0x1788] sm:$0xff] }
 0x582   :  { %11315 = vmatprep.subr.bf16.mxu1 %v13179_v44  ;;  %v4719_v44 = vld [vmem:[#allocation7 + $0x17e8] sm:$0xff]  ;;  %v13273_v55 = vcombine.high %v4710_v43, %v4718_v46  ;;  %v13272_v1 = vcombine.low %v4710_v43, %v4718_v46 }
 0x583   :  { %v13275_v18 = vcombine.high %v4711_v2, %v4719_v44  ;;  %v13274_v3 = vcombine.low %v4711_v2, %v4719_v44 }
 0x584   :  { %11152 = vmatpush1.bf16.msra.mxu0 %v13176_v59  ;;  %v4726_v59 = vld [vmem:[#allocation7 + $0x1840] sm:$0xff] }
 0x585   :  { %11316 = vmatpush1.bf16.msra.mxu1 %v13178_v56  ;;  %11153 = vmatprep.subr.bf16.mxu0 %v13193_v60  ;;  %v4734_v56 = vld [vmem:[#allocation7 + $0x18a0] sm:$0xff]  ;;  %v4727_v60 = vld [vmem:[#allocation7 + $0x1848] sm:$0xff] }
 0x586   :  { %11317 = vmatprep.subr.bf16.mxu1 %v13195_v62  ;;  %v4735_v62 = vld [vmem:[#allocation7 + $0x18a8] sm:$0xff]  ;;  %v13289_v47 = vcombine.high %v4726_v59, %v4734_v56 }
 0x587   :  { %v13291_v5 = vcombine.high %v4727_v60, %v4735_v62  ;;  %v13290_v10 = vcombine.low %v4727_v60, %v4735_v62 }
 0x588   :  { %11154 = vmatpush1.bf16.msra.mxu0 %v13192_v39  ;;  %v4742_v39 = vld [vmem:[#allocation7 + $0x1900] sm:$0xff] }
 0x589   :  { %11318 = vmatpush1.bf16.msra.mxu1 %v13194_v6  ;;  %11155 = vmatprep.subr.bf16.mxu0 %v13209_v7  ;;  %v4750_v6 = vld [vmem:[#allocation7 + $0x1960] sm:$0xff]  ;;  %v13288_v7 = vcombine.low %v4726_v59, %v4734_v56 }
 0x58a   :  { %11319 = vmatprep.subr.bf16.mxu1 %v13211_v8  ;;  %v4743_v8 = vld [vmem:[#allocation7 + $0x1908] sm:$0xff]  ;;  %v13305_v12 = vcombine.high %v4742_v39, %v4750_v6  ;;  %v13304_v19 = vcombine.low %v4742_v39, %v4750_v6 }
 0x58b   :  { %v13306_v20 = vcombine.low %v4743_v8, %v4751_v63 }
 0x58c   :  { %11156 = vmatpush1.bf16.msra.mxu0 %v13208_v51  ;;  %v4766_v51 = vld [vmem:[#allocation7 + $0x1a20] sm:$0xff] }
 0x58d   :  { %11320 = vmatpush1.bf16.msra.mxu1 %v13210_v0  ;;  %11157 = vmatprep.subr.bf16.mxu0 %v13225_v16  ;;  %v13307_v0 = vcombine.high %v4743_v8, %v4751_v63  ;;  %v4759_v16 = vld [vmem:[#allocation7 + $0x19c8] sm:$0xff]  ;;  %v13321_v24 = vcombine.high %v4758_v13, %v4766_v51  ;;  %v13320_v29 = vcombine.low %v4758_v13, %v4766_v51  ;;  %v4838_v63 = vld [vmem:[#allocation7 + $0x1d80] sm:$0xff] }
 0x58e   :  { %11321 = vmatprep.subr.bf16.mxu1 %v13227_v42  ;;  %v4767_v42 = vld [vmem:[#allocation7 + $0x1a28] sm:$0xff] }
 0x58f   :  { %v13323_v26 = vcombine.high %v4759_v16, %v4767_v42  ;;  %v13322_v30 = vcombine.low %v4759_v16, %v4767_v42  ;;  %v4847_v13 = vld [vmem:[#allocation7 + $0x1de8] sm:$0xff] }
 0x590   :  { %11158 = vmatpush1.bf16.msra.mxu0 %v13224_v17  ;;  %v4774_v17 = vld [vmem:[#allocation7 + $0x1a80] sm:$0xff] }
 0x591   :  { %11322 = vmatpush1.bf16.msra.mxu1 %v13226_v33  ;;  %11159 = vmatprep.subr.bf16.mxu0 %v13241_v27  ;;  %v4782_v33 = vld [vmem:[#allocation7 + $0x1ae0] sm:$0xff]  ;;  %v4775_v27 = vld [vmem:[#allocation7 + $0x1a88] sm:$0xff] }
 0x592   :  { %11323 = vmatprep.subr.bf16.mxu1 %v13243_v28  ;;  %v4783_v28 = vld [vmem:[#allocation7 + $0x1ae8] sm:$0xff]  ;;  %v13337_v34 = vcombine.high %v4774_v17, %v4782_v33  ;;  %v13336_v43 = vcombine.low %v4774_v17, %v4782_v33 }
 0x593   :  { %v13339_v32 = vcombine.high %v4775_v27, %v4783_v28  ;;  %v13338_v46 = vcombine.low %v4775_v27, %v4783_v28 }
 0x594   :  { %11160 = vmatpush1.bf16.msra.mxu0 %v13240_v36  ;;  %v4790_v36 = vld [vmem:[#allocation7 + $0x1b40] sm:$0xff] }
 0x595   :  { %11324 = vmatpush1.bf16.msra.mxu1 %v13242_v40  ;;  %11161 = vmatprep.subr.bf16.mxu0 %v13257_v38  ;;  %v4798_v40 = vld [vmem:[#allocation7 + $0x1ba0] sm:$0xff]  ;;  %v4791_v38 = vld [vmem:[#allocation7 + $0x1b48] sm:$0xff] }
 0x596   :  { %11325 = vmatprep.subr.bf16.mxu1 %v13259_v41  ;;  %v4799_v41 = vld [vmem:[#allocation7 + $0x1ba8] sm:$0xff]  ;;  %v13353_v2 = vcombine.high %v4790_v36, %v4798_v40  ;;  %v13352_v59 = vcombine.low %v4790_v36, %v4798_v40 }
 0x597   :  { %v13355_v44 = vcombine.high %v4791_v38, %v4799_v41  ;;  %v13354_v56 = vcombine.low %v4791_v38, %v4799_v41 }
 0x598   :  { %11162 = vmatpush1.bf16.msra.mxu0 %v13256_v53  ;;  %v4806_v53 = vld [vmem:[#allocation7 + $0x1c00] sm:$0xff] }
 0x599   :  { %11326 = vmatpush1.bf16.msra.mxu1 %v13258_v54  ;;  %11163 = vmatprep.subr.bf16.mxu0 %v13273_v55  ;;  %v4814_v54 = vld [vmem:[#allocation7 + $0x1c60] sm:$0xff]  ;;  %v4807_v55 = vld [vmem:[#allocation7 + $0x1c08] sm:$0xff] }
 0x59a   :  { %11327 = vmatprep.subr.bf16.mxu1 %v13275_v18  ;;  %v4815_v18 = vld [vmem:[#allocation7 + $0x1c68] sm:$0xff]  ;;  %v13369_v60 = vcombine.high %v4806_v53, %v4814_v54  ;;  %v13368_v39 = vcombine.low %v4806_v53, %v4814_v54 }
 0x59b   :  { %v13371_v62 = vcombine.high %v4807_v55, %v4815_v18  ;;  %v13370_v6 = vcombine.low %v4807_v55, %v4815_v18 }
 0x59c   :  { %11164 = vmatpush1.bf16.msra.mxu0 %v13272_v1  ;;  %v4822_v1 = vld [vmem:[#allocation7 + $0x1cc0] sm:$0xff] }
 0x59d   :  { %11328 = vmatpush1.bf16.msra.mxu1 %v13274_v3  ;;  %11174 = vmatprep.subr.bf16.mxu0 %v13289_v47  ;;  %v4830_v3 = vld [vmem:[#allocation7 + $0x1d20] sm:$0xff]  ;;  %v4823_v47 = vld [vmem:[#allocation7 + $0x1cc8] sm:$0xff] }
 0x59e   :  { %11338 = vmatprep.subr.bf16.mxu1 %v13291_v5  ;;  %v4831_v5 = vld [vmem:[#allocation7 + $0x1d28] sm:$0xff]  ;;  %v13384_v51 = vcombine.low %v4822_v1, %v4830_v3 }
 0x59f   :  { %11166 = vmatmul.mubr.bf16.vlgmr.msra.gmra.mrb[16].mxu0 %v14425_v50  ;;  %v13387_v8 = vcombine.high %v4823_v47, %v4831_v5 }
 0x5a0   :  { %11330 = vmatmul.mubr.bf16.vlgmr.msra.gmra.mrb[32].mxu1 %v14425_v50  ;;  %11175 = vmatpush1.bf16.msra.mxu0 %v13288_v7  ;;  %v13385_v7 = vcombine.high %v4822_v1, %v4830_v3 }
 0x5a1   :  { %11206 = vmatprep.mubr.bf16.mxu0 %v14437_v31  ;;  %11339 = vmatpush1.bf16.msra.mxu1 %v13290_v10  ;;  %v4846_v10 = vld [vmem:[#allocation7 + $0x1de0] sm:$0xff] }
 0x5a2   :  { %11370 = vmatprep.mubr.bf16.mxu1 %v14437_v31  ;;  %11176 = vmatprep.subr.bf16.mxu0 %v13305_v12  ;;  %v4839_v12 = vld [vmem:[#allocation7 + $0x1d88] sm:$0xff]  ;;  %v13401_v16 = vcombine.high %v4838_v63, %v4846_v10  ;;  %v13400_v17 = vcombine.low %v4838_v63, %v4846_v10 }
 0x5a3   :  { %11340 = vmatprep.subr.bf16.mxu1 %v13307_v0  ;;  %v13386_v0 = vcombine.low %v4823_v47, %v4831_v5  ;;  %v13403_v42 = vcombine.high %v4839_v12, %v4847_v13  ;;  %v13402_v33 = vcombine.low %v4839_v12, %v4847_v13 }
 0x5a4   :  { %11177 = vmatpush1.bf16.msra.mxu0 %v13304_v19  ;;  %v4854_v19 = vld [vmem:[#allocation7 + $0x1e40] sm:$0xff] }
 0x5a5   :  { %11341 = vmatpush1.bf16.msra.mxu1 %v13306_v20  ;;  %11178 = vmatprep.subr.bf16.mxu0 %v13321_v24  ;;  %v4862_v20 = vld [vmem:[#allocation7 + $0x1ea0] sm:$0xff]  ;;  %v4855_v24 = vld [vmem:[#allocation7 + $0x1e48] sm:$0xff] }
 0x5a6   :  { %11342 = vmatprep.subr.bf16.mxu1 %v13323_v26  ;;  %v4863_v26 = vld [vmem:[#allocation7 + $0x1ea8] sm:$0xff]  ;;  %v13417_v27 = vcombine.high %v4854_v19, %v4862_v20  ;;  %v13416_v36 = vcombine.low %v4854_v19, %v4862_v20 }
 0x5a7   :  { %v13419_v28 = vcombine.high %v4855_v24, %v4863_v26  ;;  %v13418_v40 = vcombine.low %v4855_v24, %v4863_v26 }
 0x5a8   :  { %11179 = vmatpush1.bf16.msra.mxu0 %v13320_v29  ;;  %v4870_v29 = vld [vmem:[#allocation7 + $0x1f00] sm:$0xff] }
 0x5a9   :  { %11343 = vmatpush1.bf16.msra.mxu1 %v13322_v30  ;;  %11180 = vmatprep.subr.bf16.mxu0 %v13337_v34  ;;  %v4878_v30 = vld [vmem:[#allocation7 + $0x1f60] sm:$0xff]  ;;  %v4871_v34 = vld [vmem:[#allocation7 + $0x1f08] sm:$0xff] }
 0x5aa   :  { %11344 = vmatprep.subr.bf16.mxu1 %v13339_v32  ;;  %v4879_v32 = vld [vmem:[#allocation7 + $0x1f68] sm:$0xff]  ;;  %v13433_v38 = vcombine.high %v4870_v29, %v4878_v30  ;;  %v13432_v53 = vcombine.low %v4870_v29, %v4878_v30 }
 0x5ab   :  { %v13435_v41 = vcombine.high %v4871_v34, %v4879_v32  ;;  %v13434_v54 = vcombine.low %v4871_v34, %v4879_v32 }
 0x5ac   :  { %11181 = vmatpush1.bf16.msra.mxu0 %v13336_v43  ;;  %v4886_v43 = vld [vmem:[#allocation7 + $0x1fc0] sm:$0xff] }
 0x5ad   :  { %11345 = vmatpush1.bf16.msra.mxu1 %v13338_v46  ;;  %11182 = vmatprep.subr.bf16.mxu0 %v13353_v2  ;;  %v4894_v46 = vld [vmem:[#allocation7 + $0x2020] sm:$0xff]  ;;  %v4887_v2 = vld [vmem:[#allocation7 + $0x1fc8] sm:$0xff] }
 0x5ae   :  { %11346 = vmatprep.subr.bf16.mxu1 %v13355_v44  ;;  %v4895_v44 = vld [vmem:[#allocation7 + $0x2028] sm:$0xff]  ;;  %v13449_v55 = vcombine.high %v4886_v43, %v4894_v46  ;;  %v13448_v1 = vcombine.low %v4886_v43, %v4894_v46 }
 0x5af   :  { %v13451_v18 = vcombine.high %v4887_v2, %v4895_v44  ;;  %v13450_v3 = vcombine.low %v4887_v2, %v4895_v44 }
 0x5b0   :  { %11183 = vmatpush1.bf16.msra.mxu0 %v13352_v59  ;;  %v4902_v59 = vld [vmem:[#allocation7 + $0x2080] sm:$0xff] }
 0x5b1   :  { %11347 = vmatpush1.bf16.msra.mxu1 %v13354_v56  ;;  %11184 = vmatprep.subr.bf16.mxu0 %v13369_v60  ;;  %v4910_v56 = vld [vmem:[#allocation7 + $0x20e0] sm:$0xff]  ;;  %v4903_v60 = vld [vmem:[#allocation7 + $0x2088] sm:$0xff] }
 0x5b2   :  { %11348 = vmatprep.subr.bf16.mxu1 %v13371_v62  ;;  %v4911_v62 = vld [vmem:[#allocation7 + $0x20e8] sm:$0xff]  ;;  %v13465_v47 = vcombine.high %v4902_v59, %v4910_v56  ;;  %v13464_v63 = vcombine.low %v4902_v59, %v4910_v56 }
 0x5b3   :  { %v13467_v5 = vcombine.high %v4903_v60, %v4911_v62  ;;  %v13466_v10 = vcombine.low %v4903_v60, %v4911_v62 }
 0x5b4   :  { %11185 = vmatpush1.bf16.msra.mxu0 %v13368_v39  ;;  %v4918_v39 = vld [vmem:[#allocation7 + $0x2140] sm:$0xff] }
 0x5b5   :  { %11349 = vmatpush1.bf16.msra.mxu1 %v13370_v6  ;;  %11186 = vmatprep.subr.bf16.mxu0 %v13385_v7  ;;  %v4926_v6 = vld [vmem:[#allocation7 + $0x21a0] sm:$0xff]  ;;  %v4919_v7 = vld [vmem:[#allocation7 + $0x2148] sm:$0xff] }
 0x5b6   :  { %11350 = vmatprep.subr.bf16.mxu1 %v13387_v8  ;;  %v4927_v8 = vld [vmem:[#allocation7 + $0x21a8] sm:$0xff]  ;;  %v13481_v12 = vcombine.high %v4918_v39, %v4926_v6  ;;  %v13480_v19 = vcombine.low %v4918_v39, %v4926_v6 }
 0x5b7   :  { %v13483_v13 = vcombine.high %v4919_v7, %v4927_v8  ;;  %v13482_v20 = vcombine.low %v4919_v7, %v4927_v8  ;;  %v5007_v39 = vld [vmem:[#allocation7 + $0x2568] sm:$0xff]  ;;  %v5014_v8 = vld [vmem:[#allocation7 + $0x25c0] sm:$0xff] }
 0x5b8   :  { %11187 = vmatpush1.bf16.msra.mxu0 %v13384_v51  ;;  %v4934_v51 = vld [vmem:[#allocation7 + $0x2200] sm:$0xff] }
 0x5b9   :  { %11351 = vmatpush1.bf16.msra.mxu1 %v13386_v0  ;;  %11188 = vmatprep.subr.bf16.mxu0 %v13401_v16  ;;  %v4942_v0 = vld [vmem:[#allocation7 + $0x2260] sm:$0xff]  ;;  %v4935_v16 = vld [vmem:[#allocation7 + $0x2208] sm:$0xff] }
 0x5ba   :  { %11352 = vmatprep.subr.bf16.mxu1 %v13403_v42  ;;  %v4943_v42 = vld [vmem:[#allocation7 + $0x2268] sm:$0xff]  ;;  %v13497_v24 = vcombine.high %v4934_v51, %v4942_v0  ;;  %v13496_v29 = vcombine.low %v4934_v51, %v4942_v0 }
 0x5bb   :  { %v13499_v26 = vcombine.high %v4935_v16, %v4943_v42  ;;  %v13498_v30 = vcombine.low %v4935_v16, %v4943_v42 }
 0x5bc   :  { %11189 = vmatpush1.bf16.msra.mxu0 %v13400_v17  ;;  %v4950_v17 = vld [vmem:[#allocation7 + $0x22c0] sm:$0xff] }
 0x5bd   :  { %11353 = vmatpush1.bf16.msra.mxu1 %v13402_v33  ;;  %11190 = vmatprep.subr.bf16.mxu0 %v13417_v27  ;;  %v4958_v33 = vld [vmem:[#allocation7 + $0x2320] sm:$0xff]  ;;  %v4951_v27 = vld [vmem:[#allocation7 + $0x22c8] sm:$0xff] }
 0x5be   :  { %11354 = vmatprep.subr.bf16.mxu1 %v13419_v28  ;;  %v4959_v28 = vld [vmem:[#allocation7 + $0x2328] sm:$0xff]  ;;  %v13513_v34 = vcombine.high %v4950_v17, %v4958_v33  ;;  %v13512_v43 = vcombine.low %v4950_v17, %v4958_v33 }
 0x5bf   :  { %v13515_v32 = vcombine.high %v4951_v27, %v4959_v28  ;;  %v13514_v46 = vcombine.low %v4951_v27, %v4959_v28 }
 0x5c0   :  { %11191 = vmatpush1.bf16.msra.mxu0 %v13416_v36  ;;  %v4966_v36 = vld [vmem:[#allocation7 + $0x2380] sm:$0xff] }
 0x5c1   :  { %11355 = vmatpush1.bf16.msra.mxu1 %v13418_v40  ;;  %11192 = vmatprep.subr.bf16.mxu0 %v13433_v38  ;;  %v4974_v40 = vld [vmem:[#allocation7 + $0x23e0] sm:$0xff]  ;;  %v4967_v38 = vld [vmem:[#allocation7 + $0x2388] sm:$0xff] }
 0x5c2   :  { %11356 = vmatprep.subr.bf16.mxu1 %v13435_v41  ;;  %v4975_v41 = vld [vmem:[#allocation7 + $0x23e8] sm:$0xff]  ;;  %v13529_v2 = vcombine.high %v4966_v36, %v4974_v40  ;;  %v13528_v59 = vcombine.low %v4966_v36, %v4974_v40 }
 0x5c3   :  { %v13531_v44 = vcombine.high %v4967_v38, %v4975_v41  ;;  %v13530_v56 = vcombine.low %v4967_v38, %v4975_v41 }
 0x5c4   :  { %11193 = vmatpush1.bf16.msra.mxu0 %v13432_v53  ;;  %v4982_v53 = vld [vmem:[#allocation7 + $0x2440] sm:$0xff] }
 0x5c5   :  { %11357 = vmatpush1.bf16.msra.mxu1 %v13434_v54  ;;  %11194 = vmatprep.subr.bf16.mxu0 %v13449_v55  ;;  %v4990_v54 = vld [vmem:[#allocation7 + $0x24a0] sm:$0xff]  ;;  %v4983_v55 = vld [vmem:[#allocation7 + $0x2448] sm:$0xff] }
 0x5c6   :  { %11358 = vmatprep.subr.bf16.mxu1 %v13451_v18  ;;  %v4991_v18 = vld [vmem:[#allocation7 + $0x24a8] sm:$0xff]  ;;  %v13545_v60 = vcombine.high %v4982_v53, %v4990_v54 }
 0x5c7   :  { %v13547_v62 = vcombine.high %v4983_v55, %v4991_v18  ;;  %v13546_v6 = vcombine.low %v4983_v55, %v4991_v18 }
 0x5c8   :  { %11195 = vmatpush1.bf16.msra.mxu0 %v13448_v1  ;;  %v4998_v1 = vld [vmem:[#allocation7 + $0x2500] sm:$0xff] }
 0x5c9   :  { %11359 = vmatpush1.bf16.msra.mxu1 %v13450_v3  ;;  %11196 = vmatprep.subr.bf16.mxu0 %v13465_v47  ;;  %v5006_v3 = vld [vmem:[#allocation7 + $0x2560] sm:$0xff]  ;;  %v13544_v47 = vcombine.low %v4982_v53, %v4990_v54 }
 0x5ca   :  { %11360 = vmatprep.subr.bf16.mxu1 %v13467_v5  ;;  %v4999_v5 = vld [vmem:[#allocation7 + $0x2508] sm:$0xff]  ;;  %v13561_v7 = vcombine.high %v4998_v1, %v5006_v3  ;;  %v13560_v51 = vcombine.low %v4998_v1, %v5006_v3 }
 0x5cb   :  { %v13562_v0 = vcombine.low %v4999_v5, %v5007_v39 }
 0x5cc   :  { %11197 = vmatpush1.bf16.msra.mxu0 %v13464_v63  ;;  %v5022_v63 = vld [vmem:[#allocation7 + $0x2620] sm:$0xff] }
 0x5cd   :  { %11361 = vmatpush1.bf16.msra.mxu1 %v13466_v10  ;;  %11198 = vmatprep.subr.bf16.mxu0 %v13481_v12  ;;  %v13563_v10 = vcombine.high %v4999_v5, %v5007_v39  ;;  %v5015_v12 = vld [vmem:[#allocation7 + $0x25c8] sm:$0xff]  ;;  %v13577_v16 = vcombine.high %v5014_v8, %v5022_v63  ;;  %v13576_v17 = vcombine.low %v5014_v8, %v5022_v63 }
 0x5ce   :  { %11362 = vmatprep.subr.bf16.mxu1 %v13483_v13  ;;  %v5023_v13 = vld [vmem:[#allocation7 + $0x2628] sm:$0xff] }
 0x5cf   :  { %v13579_v42 = vcombine.high %v5015_v12, %v5023_v13  ;;  %v13578_v33 = vcombine.low %v5015_v12, %v5023_v13  ;;  %v5103_v12 = vld [vmem:[#allocation7 + $0x29e8] sm:$0xff] }
 0x5d0   :  { %11199 = vmatpush1.bf16.msra.mxu0 %v13480_v19  ;;  %v5030_v19 = vld [vmem:[#allocation7 + $0x2680] sm:$0xff] }
 0x5d1   :  { %11363 = vmatpush1.bf16.msra.mxu1 %v13482_v20  ;;  %11200 = vmatprep.subr.bf16.mxu0 %v13497_v24  ;;  %v5038_v20 = vld [vmem:[#allocation7 + $0x26e0] sm:$0xff]  ;;  %v5031_v24 = vld [vmem:[#allocation7 + $0x2688] sm:$0xff] }
 0x5d2   :  { %11364 = vmatprep.subr.bf16.mxu1 %v13499_v26  ;;  %v5039_v26 = vld [vmem:[#allocation7 + $0x26e8] sm:$0xff]  ;;  %v13593_v27 = vcombine.high %v5030_v19, %v5038_v20  ;;  %v13592_v36 = vcombine.low %v5030_v19, %v5038_v20 }
 0x5d3   :  { %v13595_v28 = vcombine.high %v5031_v24, %v5039_v26  ;;  %v13594_v40 = vcombine.low %v5031_v24, %v5039_v26 }
 0x5d4   :  { %11201 = vmatpush1.bf16.msra.mxu0 %v13496_v29  ;;  %v5046_v29 = vld [vmem:[#allocation7 + $0x2740] sm:$0xff] }
 0x5d5   :  { %11365 = vmatpush1.bf16.msra.mxu1 %v13498_v30  ;;  %11202 = vmatprep.subr.bf16.mxu0 %v13513_v34  ;;  %v5054_v30 = vld [vmem:[#allocation7 + $0x27a0] sm:$0xff]  ;;  %v5047_v34 = vld [vmem:[#allocation7 + $0x2748] sm:$0xff] }
 0x5d6   :  { %11366 = vmatprep.subr.bf16.mxu1 %v13515_v32  ;;  %v5055_v32 = vld [vmem:[#allocation7 + $0x27a8] sm:$0xff]  ;;  %v13609_v38 = vcombine.high %v5046_v29, %v5054_v30  ;;  %v13608_v53 = vcombine.low %v5046_v29, %v5054_v30 }
 0x5d7   :  { %v13611_v41 = vcombine.high %v5047_v34, %v5055_v32  ;;  %v13610_v54 = vcombine.low %v5047_v34, %v5055_v32 }
 0x5d8   :  { %11203 = vmatpush1.bf16.msra.mxu0 %v13512_v43  ;;  %v5062_v43 = vld [vmem:[#allocation7 + $0x2800] sm:$0xff] }
 0x5d9   :  { %11367 = vmatpush1.bf16.msra.mxu1 %v13514_v46  ;;  %11204 = vmatprep.subr.bf16.mxu0 %v13529_v2  ;;  %v5070_v46 = vld [vmem:[#allocation7 + $0x2860] sm:$0xff]  ;;  %v5063_v2 = vld [vmem:[#allocation7 + $0x2808] sm:$0xff] }
 0x5da   :  { %11368 = vmatprep.subr.bf16.mxu1 %v13531_v44  ;;  %v5071_v44 = vld [vmem:[#allocation7 + $0x2868] sm:$0xff]  ;;  %v13625_v55 = vcombine.high %v5062_v43, %v5070_v46  ;;  %v13624_v1 = vcombine.low %v5062_v43, %v5070_v46 }
 0x5db   :  { %v13627_v18 = vcombine.high %v5063_v2, %v5071_v44  ;;  %v13626_v3 = vcombine.low %v5063_v2, %v5071_v44 }
 0x5dc   :  { %11205 = vmatpush1.bf16.msra.mxu0 %v13528_v59  ;;  %v5078_v59 = vld [vmem:[#allocation7 + $0x28c0] sm:$0xff] }
 0x5dd   :  { %11369 = vmatpush1.bf16.msra.mxu1 %v13530_v56  ;;  %11215 = vmatprep.subr.bf16.mxu0 %v13545_v60  ;;  %v5086_v56 = vld [vmem:[#allocation7 + $0x2920] sm:$0xff]  ;;  %v5079_v60 = vld [vmem:[#allocation7 + $0x28c8] sm:$0xff] }
 0x5de   :  { %11379 = vmatprep.subr.bf16.mxu1 %v13547_v62  ;;  %v5087_v62 = vld [vmem:[#allocation7 + $0x2928] sm:$0xff] }
 0x5df   :  { %11207 = vmatmul.mubr.bf16.vlgmr.msra.gmra.mrb[16].mxu0 %v14439_v11  ;;  %v13643_v39 = vcombine.high %v5079_v60, %v5087_v62  ;;  %v13642_v19 = vcombine.low %v5079_v60, %v5087_v62 }
 0x5e0   :  { %11371 = vmatmul.mubr.bf16.vlgmr.msra.gmra.mrb[32].mxu1 %v14439_v11  ;;  %11216 = vmatpush1.bf16.msra.mxu0 %v13544_v47  ;;  %v13641_v47 = vcombine.high %v5078_v59, %v5086_v56 }
 0x5e1   :  { %11247 = vmatprep.mubr.bf16.mxu0 %v14443_v52  ;;  %11380 = vmatpush1.bf16.msra.mxu1 %v13546_v6  ;;  %v5094_v6 = vld [vmem:[#allocation7 + $0x2980] sm:$0xff] }
 0x5e2   :  { %11411 = vmatprep.mubr.bf16.mxu1 %v14443_v52  ;;  %11217 = vmatprep.subr.bf16.mxu0 %v13561_v7  ;;  %v5102_v7 = vld [vmem:[#allocation7 + $0x29e0] sm:$0xff] }
 0x5e3   :  { %11381 = vmatprep.subr.bf16.mxu1 %v13563_v10  ;;  %v5095_v10 = vld [vmem:[#allocation7 + $0x2988] sm:$0xff]  ;;  %v13657_v20 = vcombine.high %v5094_v6, %v5102_v7  ;;  %v13656_v29 = vcombine.low %v5094_v6, %v5102_v7 }
 0x5e4   :  { %11218 = vmatpush1.bf16.msra.mxu0 %v13560_v51  ;;  %v13659_v26 = vcombine.high %v5095_v10, %v5103_v12  ;;  %v13658_v30 = vcombine.low %v5095_v10, %v5103_v12 }
 0x5e5   :  { %11382 = vmatpush1.bf16.msra.mxu1 %v13562_v0  ;;  %11219 = vmatprep.subr.bf16.mxu0 %v13577_v16  ;;  %v13640_v0 = vcombine.low %v5078_v59, %v5086_v56 }
 0x5e6   :  { %11383 = vmatprep.subr.bf16.mxu1 %v13579_v42 }
 0x5e8   :  { %11220 = vmatpush1.bf16.msra.mxu0 %v13576_v17  ;;  %v5110_v17 = vld [vmem:[#allocation7 + $0x2a40] sm:$0xff] }
 0x5e9   :  { %11384 = vmatpush1.bf16.msra.mxu1 %v13578_v33  ;;  %11221 = vmatprep.subr.bf16.mxu0 %v13593_v27  ;;  %v5118_v33 = vld [vmem:[#allocation7 + $0x2aa0] sm:$0xff]  ;;  %v5111_v27 = vld [vmem:[#allocation7 + $0x2a48] sm:$0xff] }
 0x5ea   :  { %11385 = vmatprep.subr.bf16.mxu1 %v13595_v28  ;;  %v5119_v28 = vld [vmem:[#allocation7 + $0x2aa8] sm:$0xff]  ;;  %v13673_v34 = vcombine.high %v5110_v17, %v5118_v33  ;;  %v13672_v43 = vcombine.low %v5110_v17, %v5118_v33  ;;  %v5190_v17 = vld [vmem:[#allocation7 + $0x2e00] sm:$0xff] }
 0x5eb   :  { %v13675_v32 = vcombine.high %v5111_v27, %v5119_v28  ;;  %v13674_v46 = vcombine.low %v5111_v27, %v5119_v28  ;;  %v5198_v33 = vld [vmem:[#allocation7 + $0x2e60] sm:$0xff]  ;;  %v5191_v27 = vld [vmem:[#allocation7 + $0x2e08] sm:$0xff] }
 0x5ec   :  { %11222 = vmatpush1.bf16.msra.mxu0 %v13592_v36  ;;  %v5126_v36 = vld [vmem:[#allocation7 + $0x2b00] sm:$0xff]  ;;  %v5199_v28 = vld [vmem:[#allocation7 + $0x2e68] sm:$0xff] }
 0x5ed   :  { %11386 = vmatpush1.bf16.msra.mxu1 %v13594_v40  ;;  %11223 = vmatprep.subr.bf16.mxu0 %v13609_v38  ;;  %v5134_v40 = vld [vmem:[#allocation7 + $0x2b60] sm:$0xff]  ;;  %v5127_v38 = vld [vmem:[#allocation7 + $0x2b08] sm:$0xff] }
 0x5ee   :  { %11387 = vmatprep.subr.bf16.mxu1 %v13611_v41  ;;  %v5135_v41 = vld [vmem:[#allocation7 + $0x2b68] sm:$0xff]  ;;  %v13689_v2 = vcombine.high %v5126_v36, %v5134_v40  ;;  %v13688_v59 = vcombine.low %v5126_v36, %v5134_v40  ;;  %v5206_v36 = vld [vmem:[#allocation7 + $0x2ec0] sm:$0xff] }
 0x5ef   :  { %v13691_v44 = vcombine.high %v5127_v38, %v5135_v41  ;;  %v13690_v56 = vcombine.low %v5127_v38, %v5135_v41  ;;  %v5214_v40 = vld [vmem:[#allocation7 + $0x2f20] sm:$0xff]  ;;  %v5207_v38 = vld [vmem:[#allocation7 + $0x2ec8] sm:$0xff] }
 0x5f0   :  { %11224 = vmatpush1.bf16.msra.mxu0 %v13608_v53  ;;  %v5142_v53 = vld [vmem:[#allocation7 + $0x2bc0] sm:$0xff]  ;;  %v5215_v41 = vld [vmem:[#allocation7 + $0x2f28] sm:$0xff] }
 0x5f1   :  { %11388 = vmatpush1.bf16.msra.mxu1 %v13610_v54  ;;  %11225 = vmatprep.subr.bf16.mxu0 %v13625_v55  ;;  %v5150_v54 = vld [vmem:[#allocation7 + $0x2c20] sm:$0xff]  ;;  %v5143_v55 = vld [vmem:[#allocation7 + $0x2bc8] sm:$0xff] }
 0x5f2   :  { %v14494_v5 = vpop.f32.mrb[12].mxu0  ;;  %11389 = vmatprep.subr.bf16.mxu1 %v13627_v18  ;;  %v5151_v18 = vld [vmem:[#allocation7 + $0x2c28] sm:$0xff]  ;;  %v13705_v60 = vcombine.high %v5142_v53, %v5150_v54  ;;  %v13704_v6 = vcombine.low %v5142_v53, %v5150_v54  ;;  %v5222_v53 = vld [vmem:[#allocation7 + $0x2f80] sm:$0xff] }
 0x5f3   :  { %v14496_v8 = vpop.f32.mrb[28].mxu1  ;;  %v14498_v63 = vpop.f32.mrb[13].mxu0  ;;  %v13707_v62 = vcombine.high %v5143_v55, %v5151_v18  ;;  %v13706_v7 = vcombine.low %v5143_v55, %v5151_v18  ;;  %v5230_v54 = vld [vmem:[#allocation7 + $0x2fe0] sm:$0xff]  ;;  %v5223_v55 = vld [vmem:[#allocation7 + $0x2f88] sm:$0xff] }
 0x5f4   :  { %v14500_v13 = vpop.f32.mrb[29].mxu1  ;;  %v10925_v51 = vpop.f32.mrb[14].mxu0  ;;  %11226 = vmatpush1.bf16.msra.mxu0 %v13624_v1  ;;  %v5158_v1 = vld [vmem:[#allocation7 + $0x2c80] sm:$0xff]  ;;  %v5231_v18 = vld [vmem:[#allocation7 + $0x2fe8] sm:$0xff] }
 0x5f5   :  { %v11089_v16 = vpop.f32.mrb[30].mxu1  ;;  %11390 = vmatpush1.bf16.msra.mxu1 %v13626_v3  ;;  %v10926_v42 = vpop.f32.mrb[15].mxu0  ;;  %11227 = vmatprep.subr.bf16.mxu0 %v13641_v47  ;;  %v5166_v3 = vld [vmem:[#allocation7 + $0x2ce0] sm:$0xff]  ;;  %v5159_v47 = vld [vmem:[#allocation7 + $0x2c88] sm:$0xff] }
 0x5f6   :  { %v11090_v24 = vpop.f32.mrb[31].mxu1  ;;  %11391 = vmatprep.subr.bf16.mxu1 %v13643_v39  ;;  %v5167_v39 = vld [vmem:[#allocation7 + $0x2ce8] sm:$0xff]  ;;  %v13721_v10 = vcombine.high %v5158_v1, %v5166_v3  ;;  %v5174_v51 = vld [vmem:[#allocation7 + $0x2d40] sm:$0xff] }
 0x5f7   :  { %v13723_v12 = vcombine.high %v5159_v47, %v5167_v39  ;;  %v5175_v16 = vld [vmem:[#allocation7 + $0x2d48] sm:$0xff] }
 0x5f8   :  { %11228 = vmatpush1.bf16.msra.mxu0 %v13640_v0  ;;  %v5182_v0 = vld [vmem:[#allocation7 + $0x2da0] sm:$0xff]  ;;  %v5183_v42 = vld [vmem:[#allocation7 + $0x2da8] sm:$0xff] }
 0x5f9   :  { %11392 = vmatpush1.bf16.msra.mxu1 %v13642_v19  ;;  %11229 = vmatprep.subr.bf16.mxu0 %v13657_v20  ;;  %v13720_v19 = vcombine.low %v5158_v1, %v5166_v3  ;;  %v13722_v20 = vcombine.low %v5159_v47, %v5167_v39  ;;  %v13737_v24 = vcombine.high %v5174_v51, %v5182_v0  ;;  %v4216_v1 = vld [vmem:[#allocation7 + $0x50] sm:$0xff]  ;;  %v4217_v47 = vld [vmem:[#allocation7 + $0x58] sm:$0xff] }
 0x5fa   :  { %11393 = vmatprep.subr.bf16.mxu1 %v13659_v26  ;;  %v13739_v26 = vcombine.high %v5175_v16, %v5183_v42  ;;  %v4224_v3 = vld [vmem:[#allocation7 + $0xb0] sm:$0xff]  ;;  %v4225_v39 = vld [vmem:[#allocation7 + $0xb8] sm:$0xff] }
 0x5fc   :  { %11230 = vmatpush1.bf16.msra.mxu0 %v13656_v29  ;;  %v13736_v29 = vcombine.low %v5174_v51, %v5182_v0  ;;  %v4232_v51 = vld [vmem:[#allocation7 + $0x110] sm:$0xff] }
 0x5fd   :  { %11394 = vmatpush1.bf16.msra.mxu1 %v13658_v30  ;;  %11231 = vmatprep.subr.bf16.mxu0 %v13673_v34  ;;  %v13738_v30 = vcombine.low %v5175_v16, %v5183_v42  ;;  %v13753_v34 = vcombine.high %v5190_v17, %v5198_v33  ;;  %v4240_v0 = vld [vmem:[#allocation7 + $0x170] sm:$0xff]  ;;  %v12780_v16 = vcombine.low %v4216_v1, %v4224_v3  ;;  %v4233_v42 = vld [vmem:[#allocation7 + $0x118] sm:$0xff] }
 0x5fe   :  { %11395 = vmatprep.subr.bf16.mxu1 %v13675_v32  ;;  %v13755_v32 = vcombine.high %v5191_v27, %v5199_v28 }
 0x600   :  { %11232 = vmatpush1.bf16.msra.mxu0 %v13672_v43  ;;  %v13752_v43 = vcombine.low %v5190_v17, %v5198_v33  ;;  %v4256_v17 = vld [vmem:[#allocation7 + $0x230] sm:$0xff] }
 0x601   :  { %11396 = vmatpush1.bf16.msra.mxu1 %v13674_v46  ;;  %11233 = vmatprep.subr.bf16.mxu0 %v13689_v2  ;;  %v13754_v46 = vcombine.low %v5191_v27, %v5199_v28  ;;  %v13769_v2 = vcombine.high %v5206_v36, %v5214_v40  ;;  %v4249_v27 = vld [vmem:[#allocation7 + $0x1d8] sm:$0xff] }
 0x602   :  { %11397 = vmatprep.subr.bf16.mxu1 %v13691_v44  ;;  %v13771_v44 = vcombine.high %v5207_v38, %v5215_v41  ;;  %v4257_v28 = vld [vmem:[#allocation7 + $0x238] sm:$0xff] }
 0x604   :  { %11234 = vmatpush1.bf16.msra.mxu0 %v13688_v59  ;;  %v13768_v59 = vcombine.low %v5206_v36, %v5214_v40  ;;  %v4264_v36 = vld [vmem:[#allocation7 + $0x290] sm:$0xff] }
 0x605   :  { %11398 = vmatpush1.bf16.msra.mxu1 %v13690_v56  ;;  %11235 = vmatprep.subr.bf16.mxu0 %v13705_v60  ;;  %v13770_v56 = vcombine.low %v5207_v38, %v5215_v41  ;;  %v13785_v60 = vcombine.high %v5222_v53, %v5230_v54  ;;  %v4272_v40 = vld [vmem:[#allocation7 + $0x2f0] sm:$0xff]  ;;  %v4265_v38 = vld [vmem:[#allocation7 + $0x298] sm:$0xff] }
 0x606   :  { %11399 = vmatprep.subr.bf16.mxu1 %v13707_v62  ;;  %v13787_v62 = vcombine.high %v5223_v55, %v5231_v18  ;;  %v4273_v41 = vld [vmem:[#allocation7 + $0x2f8] sm:$0xff] }
 0x608   :  { %11236 = vmatpush1.bf16.msra.mxu0 %v13704_v6  ;;  %v13784_v6 = vcombine.low %v5222_v53, %v5230_v54  ;;  %v4280_v53 = vld [vmem:[#allocation7 + $0x350] sm:$0xff] }
 0x609   :  { %11400 = vmatpush1.bf16.msra.mxu1 %v13706_v7  ;;  %11237 = vmatprep.subr.bf16.mxu0 %v13721_v10  ;;  %v13786_v7 = vcombine.low %v5223_v55, %v5231_v18  ;;  %v12781_v10 = vcombine.high %v4216_v1, %v4224_v3  ;;  %v4288_v54 = vld [vmem:[#allocation7 + $0x3b0] sm:$0xff]  ;;  %v4281_v55 = vld [vmem:[#allocation7 + $0x358] sm:$0xff] }
 0x60a   :  { %11401 = vmatprep.subr.bf16.mxu1 %v13723_v12  ;;  %v12783_v12 = vcombine.high %v4217_v47, %v4225_v39  ;;  %v4289_v18 = vld [vmem:[#allocation7 + $0x3b8] sm:$0xff]  ;;  %v4304_v1 = vld [vmem:[#allocation7 + $0x470] sm:$0xff] }
 0x60b   :  { %v4297_v3 = vld [vmem:[#allocation7 + $0x418] sm:$0xff] }
 0x60c   :  { %11238 = vmatpush1.bf16.msra.mxu0 %v13720_v19  ;;  %v4241_v19 = vld [vmem:[#allocation7 + $0x178] sm:$0xff] }
 0x60d   :  { %11402 = vmatpush1.bf16.msra.mxu1 %v13722_v20  ;;  %11239 = vmatprep.subr.bf16.mxu0 %v13737_v24  ;;  %v12782_v20 = vcombine.low %v4217_v47, %v4225_v39  ;;  %v12797_v24 = vcombine.high %v4232_v51, %v4240_v0  ;;  %v12799_v33 = vcombine.high %v4233_v42, %v4241_v19  ;;  %v4305_v47 = vld [vmem:[#allocation7 + $0x478] sm:$0xff] }
 0x60e   :  { %11403 = vmatprep.subr.bf16.mxu1 %v13739_v26  ;;  %v4248_v26 = vld [vmem:[#allocation7 + $0x1d0] sm:$0xff]  ;;  %v12844_v39 = vcombine.low %v4280_v53, %v4288_v54 }
 0x610   :  { %11240 = vmatpush1.bf16.msra.mxu0 %v13736_v29  ;;  %v12796_v29 = vcombine.low %v4232_v51, %v4240_v0  ;;  %v4320_v51 = vld [vmem:[#allocation7 + $0x530] sm:$0xff]  ;;  %v4313_v0 = vld [vmem:[#allocation7 + $0x4d8] sm:$0xff] }
 0x611   :  { %11404 = vmatpush1.bf16.msra.mxu1 %v13738_v30  ;;  %11241 = vmatprep.subr.bf16.mxu0 %v13753_v34  ;;  %v12798_v30 = vcombine.low %v4233_v42, %v4241_v19  ;;  %v12813_v34 = vcombine.high %v4248_v26, %v4256_v17  ;;  %v12862_v19 = vcombine.low %v4297_v3, %v4305_v47 }
 0x612   :  { %11405 = vmatprep.subr.bf16.mxu1 %v13755_v32  ;;  %v12815_v32 = vcombine.high %v4249_v27, %v4257_v28 }
 0x614   :  { %11242 = vmatpush1.bf16.msra.mxu0 %v13752_v43  ;;  %v12812_v43 = vcombine.low %v4248_v26, %v4256_v17  ;;  %v4328_v26 = vld [vmem:[#allocation7 + $0x590] sm:$0xff] }
 0x615   :  { %11406 = vmatpush1.bf16.msra.mxu1 %v13754_v46  ;;  %11243 = vmatprep.subr.bf16.mxu0 %v13769_v2  ;;  %v12814_v46 = vcombine.low %v4249_v27, %v4257_v28  ;;  %v12829_v2 = vcombine.high %v4264_v36, %v4272_v40  ;;  %v4336_v17 = vld [vmem:[#allocation7 + $0x5f0] sm:$0xff]  ;;  %v4337_v27 = vld [vmem:[#allocation7 + $0x5f8] sm:$0xff] }
 0x616   :  { %11407 = vmatprep.subr.bf16.mxu1 %v13771_v44  ;;  %v12831_v44 = vcombine.high %v4265_v38, %v4273_v41 }
 0x618   :  { %11244 = vmatpush1.bf16.msra.mxu0 %v13768_v59  ;;  %v12830_v59 = vcombine.low %v4265_v38, %v4273_v41  ;;  %v4353_v38 = vld [vmem:[#allocation7 + $0x6b8] sm:$0xff]  ;;  %v12892_v41 = vcombine.low %v4328_v26, %v4336_v17 }
 0x619   :  { %11408 = vmatpush1.bf16.msra.mxu1 %v13770_v56  ;;  %11245 = vmatprep.subr.bf16.mxu0 %v13785_v60  ;;  %v12845_v56 = vcombine.high %v4280_v53, %v4288_v54  ;;  %v12847_v60 = vcombine.high %v4281_v55, %v4289_v18  ;;  %v4368_v53 = vld [vmem:[#allocation7 + $0x770] sm:$0xff]  ;;  %v4361_v54 = vld [vmem:[#allocation7 + $0x718] sm:$0xff] }
 0x61a   :  { %11409 = vmatprep.subr.bf16.mxu1 %v13787_v62  ;;  %v4296_v62 = vld [vmem:[#allocation7 + $0x410] sm:$0xff] }
 0x61b   :  { %v12860_v42 = vcombine.low %v4296_v62, %v4304_v1 }
 0x61c   :  { %11246 = vmatpush1.bf16.msra.mxu0 %v13784_v6  ;;  %v12846_v6 = vcombine.low %v4281_v55, %v4289_v18  ;;  %v4369_v55 = vld [vmem:[#allocation7 + $0x778] sm:$0xff] }
 0x61d   :  { %11410 = vmatpush1.bf16.msra.mxu1 %v13786_v7  ;;  %11420 = vmatprep.subr.bf16.mxu0 %v12781_v10  ;;  %v12861_v7 = vcombine.high %v4296_v62, %v4304_v1  ;;  %v12863_v10 = vcombine.high %v4297_v3, %v4305_v47  ;;  %v4384_v62 = vld [vmem:[#allocation7 + $0x830] sm:$0xff]  ;;  %v4377_v1 = vld [vmem:[#allocation7 + $0x7d8] sm:$0xff] }
 0x61e   :  { %11584 = vmatprep.subr.bf16.mxu1 %v12783_v12  ;;  %v4312_v12 = vld [vmem:[#allocation7 + $0x4d0] sm:$0xff]  ;;  %v4385_v3 = vld [vmem:[#allocation7 + $0x838] sm:$0xff] }
 0x61f   :  { %11248 = vmatmul.mubr.bf16.vlgmr.msra.gmra.mrb[16].mxu0 %v14452_v22  ;;  %v12876_v28 = vcombine.low %v4312_v12, %v4320_v51 }
 0x620   :  { %11412 = vmatmul.mubr.bf16.vlgmr.msra.gmra.mrb[32].mxu1 %v14452_v22  ;;  %11421 = vmatpush1.bf16.msra.mxu0 %v12780_v16  ;;  %v4321_v16 = vld [vmem:[#allocation7 + $0x538] sm:$0xff] }
 0x621   :  { %11452 = vmatprep.mubr.bf16.mxu0 %v14402_v25  ;;  %11585 = vmatpush1.bf16.msra.mxu1 %v12782_v20  ;;  %v12877_v20 = vcombine.high %v4312_v12, %v4320_v51  ;;  %v4400_v12 = vld [vmem:[#allocation7 + $0x8f0] sm:$0xff]  ;;  %v4393_v51 = vld [vmem:[#allocation7 + $0x898] sm:$0xff] }
 0x622   :  { %11616 = vmatprep.mubr.bf16.mxu1 %v14402_v25  ;;  %11422 = vmatprep.subr.bf16.mxu0 %v12797_v24  ;;  %v12828_v25 = vcombine.low %v4264_v36, %v4272_v40  ;;  %v12879_v24 = vcombine.high %v4313_v0, %v4321_v16  ;;  %v4352_v36 = vld [vmem:[#allocation7 + $0x6b0] sm:$0xff]  ;;  %v4345_v40 = vld [vmem:[#allocation7 + $0x658] sm:$0xff] }
 0x623   :  { %11586 = vmatprep.subr.bf16.mxu1 %v12799_v33  ;;  %v4329_v33 = vld [vmem:[#allocation7 + $0x598] sm:$0xff] }
 0x624   :  { %11423 = vmatpush1.bf16.msra.mxu0 %v12796_v29  ;;  %v12878_v29 = vcombine.low %v4313_v0, %v4321_v16  ;;  %v4401_v0 = vld [vmem:[#allocation7 + $0x8f8] sm:$0xff] }
 0x625   :  { %11587 = vmatpush1.bf16.msra.mxu1 %v12798_v30  ;;  %11424 = vmatprep.subr.bf16.mxu0 %v12813_v34  ;;  %v12893_v30 = vcombine.high %v4328_v26, %v4336_v17  ;;  %v12895_v34 = vcombine.high %v4329_v33, %v4337_v27  ;;  %v4416_v26 = vld [vmem:[#allocation7 + $0x9b0] sm:$0xff]  ;;  %v4409_v17 = vld [vmem:[#allocation7 + $0x958] sm:$0xff] }
 0x626   :  { %11588 = vmatprep.subr.bf16.mxu1 %v12815_v32  ;;  %v4344_v32 = vld [vmem:[#allocation7 + $0x650] sm:$0xff] }
 0x627   :  { %v12908_v18 = vcombine.low %v4344_v32, %v4352_v36 }
 0x628   :  { %11425 = vmatpush1.bf16.msra.mxu0 %v12812_v43  ;;  %v12894_v43 = vcombine.low %v4329_v33, %v4337_v27  ;;  %v4417_v33 = vld [vmem:[#allocation7 + $0x9b8] sm:$0xff] }
 0x629   :  { %11589 = vmatpush1.bf16.msra.mxu1 %v12814_v46  ;;  %11426 = vmatprep.subr.bf16.mxu0 %v12829_v2  ;;  %v12909_v46 = vcombine.high %v4344_v32, %v4352_v36  ;;  %v12911_v2 = vcombine.high %v4345_v40, %v4353_v38  ;;  %v4432_v32 = vld [vmem:[#allocation7 + $0xa70] sm:$0xff]  ;;  %v4425_v36 = vld [vmem:[#allocation7 + $0xa18] sm:$0xff] }
 0x62a   :  { %11590 = vmatprep.subr.bf16.mxu1 %v12831_v44  ;;  %v4360_v44 = vld [vmem:[#allocation7 + $0x710] sm:$0xff] }
 0x62b   :  { %v12924_v47 = vcombine.low %v4360_v44, %v4368_v53 }
 0x62c   :  { %11427 = vmatpush1.bf16.msra.mxu0 %v12828_v25  ;;  %v12910_v25 = vcombine.low %v4345_v40, %v4353_v38  ;;  %v4433_v40 = vld [vmem:[#allocation7 + $0xa78] sm:$0xff] }
 0x62d   :  { %11591 = vmatpush1.bf16.msra.mxu1 %v12830_v59  ;;  %11428 = vmatprep.subr.bf16.mxu0 %v12845_v56  ;;  %v12925_v59 = vcombine.high %v4360_v44, %v4368_v53  ;;  %v12927_v56 = vcombine.high %v4361_v54, %v4369_v55  ;;  %v4448_v44 = vld [vmem:[#allocation7 + $0xb30] sm:$0xff]  ;;  %v4441_v53 = vld [vmem:[#allocation7 + $0xad8] sm:$0xff] }
 0x62e   :  { %11592 = vmatprep.subr.bf16.mxu1 %v12847_v60  ;;  %v4376_v60 = vld [vmem:[#allocation7 + $0x7d0] sm:$0xff] }
 0x62f   :  { %v12940_v16 = vcombine.low %v4376_v60, %v4384_v62 }
 0x630   :  { %11429 = vmatpush1.bf16.msra.mxu0 %v12844_v39  ;;  %v12926_v39 = vcombine.low %v4361_v54, %v4369_v55  ;;  %v4449_v54 = vld [vmem:[#allocation7 + $0xb38] sm:$0xff] }
 0x631   :  { %11593 = vmatpush1.bf16.msra.mxu1 %v12846_v6  ;;  %11430 = vmatprep.subr.bf16.mxu0 %v12861_v7  ;;  %v12941_v6 = vcombine.high %v4376_v60, %v4384_v62  ;;  %v12943_v7 = vcombine.high %v4377_v1, %v4385_v3  ;;  %v4464_v60 = vld [vmem:[#allocation7 + $0xbf0] sm:$0xff]  ;;  %v4457_v62 = vld [vmem:[#allocation7 + $0xb98] sm:$0xff] }
 0x632   :  { %11594 = vmatprep.subr.bf16.mxu1 %v12863_v10  ;;  %v4392_v10 = vld [vmem:[#allocation7 + $0x890] sm:$0xff] }
 0x633   :  { %v12956_v27 = vcombine.low %v4392_v10, %v4400_v12 }
 0x634   :  { %11431 = vmatpush1.bf16.msra.mxu0 %v12860_v42  ;;  %v12942_v42 = vcombine.low %v4377_v1, %v4385_v3  ;;  %v4465_v1 = vld [vmem:[#allocation7 + $0xbf8] sm:$0xff] }
 0x635   :  { %11595 = vmatpush1.bf16.msra.mxu1 %v12862_v19  ;;  %11432 = vmatprep.subr.bf16.mxu0 %v12877_v20  ;;  %v12957_v19 = vcombine.high %v4392_v10, %v4400_v12  ;;  %v12959_v20 = vcombine.high %v4393_v51, %v4401_v0  ;;  %v4480_v10 = vld [vmem:[#allocation7 + $0xcb0] sm:$0xff]  ;;  %v4473_v12 = vld [vmem:[#allocation7 + $0xc58] sm:$0xff] }
 0x636   :  { %11596 = vmatprep.subr.bf16.mxu1 %v12879_v24  ;;  %v4408_v24 = vld [vmem:[#allocation7 + $0x950] sm:$0xff] }
 0x637   :  { %v12972_v38 = vcombine.low %v4408_v24, %v4416_v26 }
 0x638   :  { %11433 = vmatpush1.bf16.msra.mxu0 %v12876_v28  ;;  %v12958_v28 = vcombine.low %v4393_v51, %v4401_v0  ;;  %v4481_v51 = vld [vmem:[#allocation7 + $0xcb8] sm:$0xff] }
 0x639   :  { %11597 = vmatpush1.bf16.msra.mxu1 %v12878_v29  ;;  %11434 = vmatprep.subr.bf16.mxu0 %v12893_v30  ;;  %v12973_v29 = vcombine.high %v4408_v24, %v4416_v26  ;;  %v12975_v30 = vcombine.high %v4409_v17, %v4417_v33  ;;  %v4496_v24 = vld [vmem:[#allocation7 + $0xd70] sm:$0xff] }
 0x63a   :  { %11598 = vmatprep.subr.bf16.mxu1 %v12895_v34  ;;  %v4424_v34 = vld [vmem:[#allocation7 + $0xa10] sm:$0xff] }
 0x63b   :  { %v12988_v55 = vcombine.low %v4424_v34, %v4432_v32 }
 0x63c   :  { %11435 = vmatpush1.bf16.msra.mxu0 %v12892_v41  ;;  %v12974_v41 = vcombine.low %v4409_v17, %v4417_v33  ;;  %v4489_v17 = vld [vmem:[#allocation7 + $0xd18] sm:$0xff] }
 0x63d   :  { %11599 = vmatpush1.bf16.msra.mxu1 %v12894_v43  ;;  %11436 = vmatprep.subr.bf16.mxu0 %v12909_v46  ;;  %v12989_v43 = vcombine.high %v4424_v34, %v4432_v32  ;;  %v12991_v46 = vcombine.high %v4425_v36, %v4433_v40  ;;  %v4497_v33 = vld [vmem:[#allocation7 + $0xd78] sm:$0xff] }
 0x63e   :  { %11600 = vmatprep.subr.bf16.mxu1 %v12911_v2  ;;  %v4440_v2 = vld [vmem:[#allocation7 + $0xad0] sm:$0xff]  ;;  %v13055_v34 = vcombine.high %v4489_v17, %v4497_v33  ;;  %v4505_v32 = vld [vmem:[#allocation7 + $0xdd8] sm:$0xff] }
 0x63f   :  { %v13004_v3 = vcombine.low %v4440_v2, %v4448_v44 }
 0x640   :  { %11437 = vmatpush1.bf16.msra.mxu0 %v12908_v18  ;;  %v12990_v18 = vcombine.low %v4425_v36, %v4433_v40  ;;  %v4513_v36 = vld [vmem:[#allocation7 + $0xe38] sm:$0xff] }
 0x641   :  { %11601 = vmatpush1.bf16.msra.mxu1 %v12910_v25  ;;  %11438 = vmatprep.subr.bf16.mxu0 %v12925_v59  ;;  %v13005_v25 = vcombine.high %v4440_v2, %v4448_v44  ;;  %v13007_v59 = vcombine.high %v4441_v53, %v4449_v54  ;;  %v4528_v2 = vld [vmem:[#allocation7 + $0xef0] sm:$0xff]  ;;  %v4521_v44 = vld [vmem:[#allocation7 + $0xe98] sm:$0xff] }
 0x642   :  { %11602 = vmatprep.subr.bf16.mxu1 %v12927_v56  ;;  %v4456_v56 = vld [vmem:[#allocation7 + $0xb90] sm:$0xff] }
 0x643   :  { %v13020_v0 = vcombine.low %v4456_v56, %v4464_v60 }
 0x644   :  { %11439 = vmatpush1.bf16.msra.mxu0 %v12924_v47  ;;  %v13006_v47 = vcombine.low %v4441_v53, %v4449_v54  ;;  %v4529_v53 = vld [vmem:[#allocation7 + $0xef8] sm:$0xff] }
 0x645   :  { %11603 = vmatpush1.bf16.msra.mxu1 %v12926_v39  ;;  %11440 = vmatprep.subr.bf16.mxu0 %v12941_v6  ;;  %v13021_v39 = vcombine.high %v4456_v56, %v4464_v60  ;;  %v13023_v6 = vcombine.high %v4457_v62, %v4465_v1  ;;  %v4537_v56 = vld [vmem:[#allocation7 + $0xf58] sm:$0xff] }
 0x646   :  { %11604 = vmatprep.subr.bf16.mxu1 %v12943_v7  ;;  %v4472_v7 = vld [vmem:[#allocation7 + $0xc50] sm:$0xff]  ;;  %v4545_v60 = vld [vmem:[#allocation7 + $0xfb8] sm:$0xff] }
 0x647   :  { %v13036_v26 = vcombine.low %v4472_v7, %v4480_v10 }
 0x648   :  { %11441 = vmatpush1.bf16.msra.mxu0 %v12940_v16  ;;  %v13022_v16 = vcombine.low %v4457_v62, %v4465_v1  ;;  %v13086_v62 = vcombine.low %v4521_v44, %v4529_v53 }
 0x649   :  { %11605 = vmatpush1.bf16.msra.mxu1 %v12942_v42  ;;  %11442 = vmatprep.subr.bf16.mxu0 %v12957_v19  ;;  %v13037_v42 = vcombine.high %v4472_v7, %v4480_v10  ;;  %v13039_v19 = vcombine.high %v4473_v12, %v4481_v51  ;;  %v4561_v7 = vld [vmem:[#allocation7 + $0x1078] sm:$0xff] }
 0x64a   :  { %11606 = vmatprep.subr.bf16.mxu1 %v12959_v20  ;;  %v4488_v20 = vld [vmem:[#allocation7 + $0xd10] sm:$0xff] }
 0x64b   :  { %v13052_v40 = vcombine.low %v4488_v20, %v4496_v24 }
 0x64c   :  { %11443 = vmatpush1.bf16.msra.mxu0 %v12956_v27  ;;  %v13038_v27 = vcombine.low %v4473_v12, %v4481_v51  ;;  %v13102_v12 = vcombine.low %v4537_v56, %v4545_v60 }
 0x64d   :  { %11607 = vmatpush1.bf16.msra.mxu1 %v12958_v28  ;;  %11444 = vmatprep.subr.bf16.mxu0 %v12973_v29  ;;  %v13053_v28 = vcombine.high %v4488_v20, %v4496_v24  ;;  %v4504_v29 = vld [vmem:[#allocation7 + $0xdd0] sm:$0xff]  ;;  %v4577_v20 = vld [vmem:[#allocation7 + $0x1138] sm:$0xff] }
 0x64e   :  { %11608 = vmatprep.subr.bf16.mxu1 %v12975_v30  ;;  %v4512_v30 = vld [vmem:[#allocation7 + $0xe30] sm:$0xff] }
 0x64f   :  { %v13068_v54 = vcombine.low %v4504_v29, %v4512_v30 }
 0x650   :  { %11445 = vmatpush1.bf16.msra.mxu0 %v12972_v38  ;;  %v13054_v38 = vcombine.low %v4489_v17, %v4497_v33 }
 0x651   :  { %11609 = vmatpush1.bf16.msra.mxu1 %v12974_v41  ;;  %11446 = vmatprep.subr.bf16.mxu0 %v12989_v43  ;;  %v13069_v41 = vcombine.high %v4504_v29, %v4512_v30  ;;  %v13071_v43 = vcombine.high %v4505_v32, %v4513_v36  ;;  %v4585_v29 = vld [vmem:[#allocation7 + $0x1198] sm:$0xff] }
 0x652   :  { %11610 = vmatprep.subr.bf16.mxu1 %v12991_v46  ;;  %v4520_v46 = vld [vmem:[#allocation7 + $0xe90] sm:$0xff]  ;;  %v4593_v30 = vld [vmem:[#allocation7 + $0x11f8] sm:$0xff] }
 0x654   :  { %11447 = vmatpush1.bf16.msra.mxu0 %v12988_v55  ;;  %v13085_v55 = vcombine.high %v4520_v46, %v4528_v2 }
 0x655   :  { %11611 = vmatpush1.bf16.msra.mxu1 %v12990_v18  ;;  %11448 = vmatprep.subr.bf16.mxu0 %v13005_v25  ;;  %v13087_v18 = vcombine.high %v4521_v44, %v4529_v53  ;;  %v4536_v25 = vld [vmem:[#allocation7 + $0xf50] sm:$0xff]  ;;  %v13150_v44 = vcombine.low %v4585_v29, %v4593_v30 }
 0x656   :  { %11612 = vmatprep.subr.bf16.mxu1 %v13007_v59  ;;  %v4544_v59 = vld [vmem:[#allocation7 + $0xfb0] sm:$0xff] }
 0x657   :  { %v13101_v1 = vcombine.high %v4536_v25, %v4544_v59  ;;  %v13100_v10 = vcombine.low %v4536_v25, %v4544_v59  ;;  %v4625_v25 = vld [vmem:[#allocation7 + $0x1378] sm:$0xff] }
 0x658   :  { %11449 = vmatpush1.bf16.msra.mxu0 %v13004_v3  ;;  %v13103_v3 = vcombine.high %v4537_v56, %v4545_v60 }
 0x659   :  { %11613 = vmatpush1.bf16.msra.mxu1 %v13006_v47  ;;  %11450 = vmatprep.subr.bf16.mxu0 %v13021_v39  ;;  %v4552_v47 = vld [vmem:[#allocation7 + $0x1010] sm:$0xff] }
 0x65a   :  { %11614 = vmatprep.subr.bf16.mxu1 %v13023_v6  ;;  %v4560_v39 = vld [vmem:[#allocation7 + $0x1070] sm:$0xff]  ;;  %v4553_v6 = vld [vmem:[#allocation7 + $0x1018] sm:$0xff] }
 0x65b   :  { %v13117_v51 = vcombine.high %v4552_v47, %v4560_v39  ;;  %v13116_v24 = vcombine.low %v4552_v47, %v4560_v39  ;;  %v4641_v47 = vld [vmem:[#allocation7 + $0x1438] sm:$0xff] }
 0x65c   :  { %11451 = vmatpush1.bf16.msra.mxu0 %v13020_v0  ;;  %v13119_v0 = vcombine.high %v4553_v6, %v4561_v7 }
 0x65d   :  { %11615 = vmatpush1.bf16.msra.mxu1 %v13022_v16  ;;  %11461 = vmatprep.subr.bf16.mxu0 %v13037_v42  ;;  %v4568_v16 = vld [vmem:[#allocation7 + $0x10d0] sm:$0xff] }
 0x65e   :  { %11625 = vmatprep.subr.bf16.mxu1 %v13039_v19  ;;  %v4576_v42 = vld [vmem:[#allocation7 + $0x1130] sm:$0xff]  ;;  %v4569_v19 = vld [vmem:[#allocation7 + $0x10d8] sm:$0xff] }
 0x65f   :  { %11453 = vmatmul.mubr.bf16.vlgmr.msra.gmra.mrb[20].mxu0 %v14414_v35  ;;  %v13133_v17 = vcombine.high %v4568_v16, %v4576_v42  ;;  %v13135_v33 = vcombine.high %v4569_v19, %v4577_v20 }
 0x660   :  { %11617 = vmatmul.mubr.bf16.vlgmr.msra.gmra.mrb[36].mxu1 %v14414_v35  ;;  %11462 = vmatpush1.bf16.msra.mxu0 %v13036_v26  ;;  %v13070_v35 = vcombine.low %v4505_v32, %v4513_v36  ;;  %v13118_v26 = vcombine.low %v4553_v6, %v4561_v7  ;;  %v13134_v32 = vcombine.low %v4569_v19, %v4577_v20 }
 0x661   :  { %11493 = vmatprep.mubr.bf16.mxu0 %v14416_v15  ;;  %11626 = vmatpush1.bf16.msra.mxu1 %v13038_v27  ;;  %v4584_v27 = vld [vmem:[#allocation7 + $0x1190] sm:$0xff] }
 0x662   :  { %11657 = vmatprep.mubr.bf16.mxu1 %v14416_v15  ;;  %11463 = vmatprep.subr.bf16.mxu0 %v13053_v28  ;;  %v13084_v15 = vcombine.low %v4520_v46, %v4528_v2  ;;  %v4592_v28 = vld [vmem:[#allocation7 + $0x11f0] sm:$0xff]  ;;  %v4609_v46 = vld [vmem:[#allocation7 + $0x12b8] sm:$0xff] }
 0x663   :  { %11627 = vmatprep.subr.bf16.mxu1 %v13055_v34  ;;  %v13132_v34 = vcombine.low %v4568_v16, %v4576_v42  ;;  %v13149_v36 = vcombine.high %v4584_v27, %v4592_v28  ;;  %v13148_v2 = vcombine.low %v4584_v27, %v4592_v28  ;;  %v4657_v16 = vld [vmem:[#allocation7 + $0x14f8] sm:$0xff] }
 0x664   :  { %11464 = vmatpush1.bf16.msra.mxu0 %v13052_v40  ;;  %v13151_v40 = vcombine.high %v4585_v29, %v4593_v30  ;;  %v4673_v27 = vld [vmem:[#allocation7 + $0x15b8] sm:$0xff] }
 0x665   :  { %11628 = vmatpush1.bf16.msra.mxu1 %v13054_v38  ;;  %11465 = vmatprep.subr.bf16.mxu0 %v13069_v41  ;;  %v4600_v38 = vld [vmem:[#allocation7 + $0x1250] sm:$0xff] }
 0x666   :  { %11629 = vmatprep.subr.bf16.mxu1 %v13071_v43  ;;  %v4608_v41 = vld [vmem:[#allocation7 + $0x12b0] sm:$0xff]  ;;  %v4601_v43 = vld [vmem:[#allocation7 + $0x1258] sm:$0xff] }
 0x667   :  { %v13165_v53 = vcombine.high %v4600_v38, %v4608_v41  ;;  %v13164_v59 = vcombine.low %v4600_v38, %v4608_v41  ;;  %v13166_v56 = vcombine.low %v4601_v43, %v4609_v46  ;;  %v4689_v38 = vld [vmem:[#allocation7 + $0x1678] sm:$0xff] }
 0x668   :  { %11466 = vmatpush1.bf16.msra.mxu0 %v13068_v54  ;;  %v13167_v54 = vcombine.high %v4601_v43, %v4609_v46 }
 0x669   :  { %11630 = vmatpush1.bf16.msra.mxu1 %v13070_v35  ;;  %11467 = vmatprep.subr.bf16.mxu0 %v13085_v55  ;;  %v4616_v35 = vld [vmem:[#allocation7 + $0x1310] sm:$0xff] }
 0x66a   :  { %11631 = vmatprep.subr.bf16.mxu1 %v13087_v18  ;;  %v4624_v55 = vld [vmem:[#allocation7 + $0x1370] sm:$0xff]  ;;  %v4617_v18 = vld [vmem:[#allocation7 + $0x1318] sm:$0xff] }
 0x66b   :  { %v13181_v60 = vcombine.high %v4616_v35, %v4624_v55  ;;  %v13180_v39 = vcombine.low %v4616_v35, %v4624_v55  ;;  %v13182_v6 = vcombine.low %v4617_v18, %v4625_v25  ;;  %v4705_v35 = vld [vmem:[#allocation7 + $0x1738] sm:$0xff] }
 0x66c   :  { %11468 = vmatpush1.bf16.msra.mxu0 %v13084_v15  ;;  %v13183_v15 = vcombine.high %v4617_v18, %v4625_v25 }
 0x66d   :  { %11632 = vmatpush1.bf16.msra.mxu1 %v13086_v62  ;;  %11469 = vmatprep.subr.bf16.mxu0 %v13101_v1  ;;  %v4632_v62 = vld [vmem:[#allocation7 + $0x13d0] sm:$0xff] }
 0x66e   :  { %11633 = vmatprep.subr.bf16.mxu1 %v13103_v3  ;;  %v4640_v1 = vld [vmem:[#allocation7 + $0x1430] sm:$0xff]  ;;  %v4633_v3 = vld [vmem:[#allocation7 + $0x13d8] sm:$0xff] }
 0x66f   :  { %v13197_v7 = vcombine.high %v4632_v62, %v4640_v1  ;;  %v13196_v42 = vcombine.low %v4632_v62, %v4640_v1  ;;  %v13198_v19 = vcombine.low %v4633_v3, %v4641_v47  ;;  %v4721_v62 = vld [vmem:[#allocation7 + $0x17f8] sm:$0xff] }
 0x670   :  { %11470 = vmatpush1.bf16.msra.mxu0 %v13100_v10  ;;  %v13199_v10 = vcombine.high %v4633_v3, %v4641_v47 }
 0x671   :  { %11634 = vmatpush1.bf16.msra.mxu1 %v13102_v12  ;;  %11471 = vmatprep.subr.bf16.mxu0 %v13117_v51  ;;  %v4648_v12 = vld [vmem:[#allocation7 + $0x1490] sm:$0xff] }
 0x672   :  { %11635 = vmatprep.subr.bf16.mxu1 %v13119_v0  ;;  %v4656_v51 = vld [vmem:[#allocation7 + $0x14f0] sm:$0xff]  ;;  %v4649_v0 = vld [vmem:[#allocation7 + $0x1498] sm:$0xff] }
 0x673   :  { %v13213_v20 = vcombine.high %v4648_v12, %v4656_v51  ;;  %v13212_v28 = vcombine.low %v4648_v12, %v4656_v51  ;;  %v13214_v29 = vcombine.low %v4649_v0, %v4657_v16  ;;  %v4737_v12 = vld [vmem:[#allocation7 + $0x18b8] sm:$0xff] }
 0x674   :  { %11472 = vmatpush1.bf16.msra.mxu0 %v13116_v24  ;;  %v13215_v24 = vcombine.high %v4649_v0, %v4657_v16 }
 0x675   :  { %11636 = vmatpush1.bf16.msra.mxu1 %v13118_v26  ;;  %11473 = vmatprep.subr.bf16.mxu0 %v13133_v17  ;;  %v4664_v26 = vld [vmem:[#allocation7 + $0x1550] sm:$0xff] }
 0x676   :  { %11637 = vmatprep.subr.bf16.mxu1 %v13135_v33  ;;  %v4672_v17 = vld [vmem:[#allocation7 + $0x15b0] sm:$0xff]  ;;  %v4665_v33 = vld [vmem:[#allocation7 + $0x1558] sm:$0xff] }
 0x677   :  { %v13229_v30 = vcombine.high %v4664_v26, %v4672_v17  ;;  %v13228_v41 = vcombine.low %v4664_v26, %v4672_v17  ;;  %v13230_v43 = vcombine.low %v4665_v33, %v4673_v27  ;;  %v4745_v26 = vld [vmem:[#allocation7 + $0x1918] sm:$0xff] }
 0x678   :  { %11474 = vmatpush1.bf16.msra.mxu0 %v13132_v34  ;;  %v13231_v34 = vcombine.high %v4665_v33, %v4673_v27  ;;  %v4753_v17 = vld [vmem:[#allocation7 + $0x1978] sm:$0xff] }
 0x679   :  { %11638 = vmatpush1.bf16.msra.mxu1 %v13134_v32  ;;  %11475 = vmatprep.subr.bf16.mxu0 %v13149_v36  ;;  %v4680_v32 = vld [vmem:[#allocation7 + $0x1610] sm:$0xff] }
 0x67a   :  { %11639 = vmatprep.subr.bf16.mxu1 %v13151_v40  ;;  %v4688_v36 = vld [vmem:[#allocation7 + $0x1670] sm:$0xff]  ;;  %v4681_v40 = vld [vmem:[#allocation7 + $0x1618] sm:$0xff] }
 0x67b   :  { %v13245_v46 = vcombine.high %v4680_v32, %v4688_v36  ;;  %v13244_v55 = vcombine.low %v4680_v32, %v4688_v36  ;;  %v13246_v18 = vcombine.low %v4681_v40, %v4689_v38  ;;  %v4769_v32 = vld [vmem:[#allocation7 + $0x1a38] sm:$0xff] }
 0x67c   :  { %11476 = vmatpush1.bf16.msra.mxu0 %v13148_v2  ;;  %v13247_v2 = vcombine.high %v4681_v40, %v4689_v38  ;;  %v13310_v40 = vcombine.low %v4745_v26, %v4753_v17 }
 0x67d   :  { %11640 = vmatpush1.bf16.msra.mxu1 %v13150_v44  ;;  %11477 = vmatprep.subr.bf16.mxu0 %v13165_v53  ;;  %v4696_v44 = vld [vmem:[#allocation7 + $0x16d0] sm:$0xff] }
 0x67e   :  { %11641 = vmatprep.subr.bf16.mxu1 %v13167_v54  ;;  %v4704_v53 = vld [vmem:[#allocation7 + $0x1730] sm:$0xff]  ;;  %v4697_v54 = vld [vmem:[#allocation7 + $0x16d8] sm:$0xff] }
 0x67f   :  { %v13261_v25 = vcombine.high %v4696_v44, %v4704_v53  ;;  %v13260_v1 = vcombine.low %v4696_v44, %v4704_v53  ;;  %v13262_v3 = vcombine.low %v4697_v54, %v4705_v35  ;;  %v4785_v44 = vld [vmem:[#allocation7 + $0x1af8] sm:$0xff] }
 0x680   :  { %11478 = vmatpush1.bf16.msra.mxu0 %v13164_v59  ;;  %v13263_v59 = vcombine.high %v4697_v54, %v4705_v35 }
 0x681   :  { %11642 = vmatpush1.bf16.msra.mxu1 %v13166_v56  ;;  %11479 = vmatprep.subr.bf16.mxu0 %v13181_v60  ;;  %v4712_v56 = vld [vmem:[#allocation7 + $0x1790] sm:$0xff] }
 0x682   :  { %11643 = vmatprep.subr.bf16.mxu1 %v13183_v15  ;;  %v4720_v60 = vld [vmem:[#allocation7 + $0x17f0] sm:$0xff]  ;;  %v4713_v15 = vld [vmem:[#allocation7 + $0x1798] sm:$0xff] }
 0x683   :  { %v13277_v47 = vcombine.high %v4712_v56, %v4720_v60  ;;  %v13276_v51 = vcombine.low %v4712_v56, %v4720_v60  ;;  %v13278_v0 = vcombine.low %v4713_v15, %v4721_v62 }
 0x684   :  { %11480 = vmatpush1.bf16.msra.mxu0 %v13180_v39  ;;  %v13279_v39 = vcombine.high %v4713_v15, %v4721_v62  ;;  %v4808_v62 = vld [vmem:[#allocation7 + $0x1c10] sm:$0xff] }
 0x685   :  { %11644 = vmatpush1.bf16.msra.mxu1 %v13182_v6  ;;  %11481 = vmatprep.subr.bf16.mxu0 %v13197_v7  ;;  %v4728_v6 = vld [vmem:[#allocation7 + $0x1850] sm:$0xff] }
 0x686   :  { %11645 = vmatprep.subr.bf16.mxu1 %v13199_v10  ;;  %v4736_v7 = vld [vmem:[#allocation7 + $0x18b0] sm:$0xff]  ;;  %v4729_v10 = vld [vmem:[#allocation7 + $0x1858] sm:$0xff] }
 0x687   :  { %v13293_v16 = vcombine.high %v4728_v6, %v4736_v7  ;;  %v13294_v33 = vcombine.low %v4729_v10, %v4737_v12 }
 0x688   :  { %11482 = vmatpush1.bf16.msra.mxu0 %v13196_v42  ;;  %v13295_v42 = vcombine.high %v4729_v10, %v4737_v12  ;;  %v4824_v12 = vld [vmem:[#allocation7 + $0x1cd0] sm:$0xff] }
 0x689   :  { %11646 = vmatpush1.bf16.msra.mxu1 %v13198_v19  ;;  %11483 = vmatprep.subr.bf16.mxu0 %v13213_v20  ;;  %v4744_v19 = vld [vmem:[#allocation7 + $0x1910] sm:$0xff] }
 0x68a   :  { %11647 = vmatprep.subr.bf16.mxu1 %v13215_v24  ;;  %v4752_v20 = vld [vmem:[#allocation7 + $0x1970] sm:$0xff]  ;;  %v13292_v24 = vcombine.low %v4728_v6, %v4736_v7 }
 0x68b   :  { %v13309_v27 = vcombine.high %v4744_v19, %v4752_v20  ;;  %v13308_v36 = vcombine.low %v4744_v19, %v4752_v20 }
 0x68c   :  { %11484 = vmatpush1.bf16.msra.mxu0 %v13212_v28  ;;  %v4760_v28 = vld [vmem:[#allocation7 + $0x19d0] sm:$0xff] }
 0x68d   :  { %11648 = vmatpush1.bf16.msra.mxu1 %v13214_v29  ;;  %11485 = vmatprep.subr.bf16.mxu0 %v13229_v30  ;;  %v4768_v29 = vld [vmem:[#allocation7 + $0x1a30] sm:$0xff]  ;;  %v13311_v30 = vcombine.high %v4745_v26, %v4753_v17 }
 0x68e   :  { %11649 = vmatprep.subr.bf16.mxu1 %v13231_v34  ;;  %v4761_v34 = vld [vmem:[#allocation7 + $0x19d8] sm:$0xff]  ;;  %v13325_v38 = vcombine.high %v4760_v28, %v4768_v29  ;;  %v13324_v53 = vcombine.low %v4760_v28, %v4768_v29  ;;  %v4840_v26 = vld [vmem:[#allocation7 + $0x1d90] sm:$0xff] }
 0x68f   :  { %v4848_v17 = vld [vmem:[#allocation7 + $0x1df0] sm:$0xff] }
 0x690   :  { %11486 = vmatpush1.bf16.msra.mxu0 %v13228_v41  ;;  %v13327_v41 = vcombine.high %v4761_v34, %v4769_v32 }
 0x691   :  { %11650 = vmatpush1.bf16.msra.mxu1 %v13230_v43  ;;  %11487 = vmatprep.subr.bf16.mxu0 %v13245_v46  ;;  %v4776_v43 = vld [vmem:[#allocation7 + $0x1a90] sm:$0xff] }
 0x692   :  { %11651 = vmatprep.subr.bf16.mxu1 %v13247_v2  ;;  %v4784_v46 = vld [vmem:[#allocation7 + $0x1af0] sm:$0xff]  ;;  %v4777_v2 = vld [vmem:[#allocation7 + $0x1a98] sm:$0xff] }
 0x693   :  { %v13341_v54 = vcombine.high %v4776_v43, %v4784_v46  ;;  %v13343_v35 = vcombine.high %v4777_v2, %v4785_v44  ;;  %v13342_v56 = vcombine.low %v4777_v2, %v4785_v44  ;;  %v4872_v44 = vld [vmem:[#allocation7 + $0x1f10] sm:$0xff] }
 0x694   :  { %11488 = vmatpush1.bf16.msra.mxu0 %v13244_v55  ;;  %v4792_v55 = vld [vmem:[#allocation7 + $0x1b50] sm:$0xff] }
 0x695   :  { %11652 = vmatpush1.bf16.msra.mxu1 %v13246_v18  ;;  %11489 = vmatprep.subr.bf16.mxu0 %v13261_v25  ;;  %v4800_v18 = vld [vmem:[#allocation7 + $0x1bb0] sm:$0xff]  ;;  %v4793_v25 = vld [vmem:[#allocation7 + $0x1b58] sm:$0xff] }
 0x696   :  { %11653 = vmatprep.subr.bf16.mxu1 %v13263_v59  ;;  %v4801_v59 = vld [vmem:[#allocation7 + $0x1bb8] sm:$0xff]  ;;  %v13357_v60 = vcombine.high %v4792_v55, %v4800_v18 }
 0x697   :  { %v13359_v15 = vcombine.high %v4793_v25, %v4801_v59  ;;  %v13358_v6 = vcombine.low %v4793_v25, %v4801_v59  ;;  %v4888_v59 = vld [vmem:[#allocation7 + $0x1fd0] sm:$0xff] }
 0x698   :  { %11490 = vmatpush1.bf16.msra.mxu0 %v13260_v1  ;;  %v4816_v1 = vld [vmem:[#allocation7 + $0x1c70] sm:$0xff] }
 0x699   :  { %11654 = vmatpush1.bf16.msra.mxu1 %v13262_v3  ;;  %11491 = vmatprep.subr.bf16.mxu0 %v13277_v47  ;;  %v4809_v3 = vld [vmem:[#allocation7 + $0x1c18] sm:$0xff]  ;;  %v13373_v7 = vcombine.high %v4808_v62, %v4816_v1 }
 0x69a   :  { %11655 = vmatprep.subr.bf16.mxu1 %v13279_v39  ;;  %v4817_v47 = vld [vmem:[#allocation7 + $0x1c78] sm:$0xff]  ;;  %v13356_v39 = vcombine.low %v4792_v55, %v4800_v18 }
 0x69b   :  { %v13375_v10 = vcombine.high %v4809_v3, %v4817_v47  ;;  %v13374_v19 = vcombine.low %v4809_v3, %v4817_v47  ;;  %v4904_v47 = vld [vmem:[#allocation7 + $0x2090] sm:$0xff] }
 0x69c   :  { %11492 = vmatpush1.bf16.msra.mxu0 %v13276_v51  ;;  %v4832_v51 = vld [vmem:[#allocation7 + $0x1d30] sm:$0xff] }
 0x69d   :  { %11656 = vmatpush1.bf16.msra.mxu1 %v13278_v0  ;;  %11502 = vmatprep.subr.bf16.mxu0 %v13293_v16  ;;  %v4825_v0 = vld [vmem:[#allocation7 + $0x1cd8] sm:$0xff]  ;;  %v13389_v20 = vcombine.high %v4824_v12, %v4832_v51  ;;  %v13388_v28 = vcombine.low %v4824_v12, %v4832_v51 }
 0x69e   :  { %11666 = vmatprep.subr.bf16.mxu1 %v13295_v42  ;;  %v4833_v16 = vld [vmem:[#allocation7 + $0x1d38] sm:$0xff]  ;;  %v13372_v42 = vcombine.low %v4808_v62, %v4816_v1 }
 0x69f   :  { %11494 = vmatmul.mubr.bf16.vlgmr.msra.gmra.mrb[20].mxu0 %v14425_v50  ;;  %v13390_v29 = vcombine.low %v4825_v0, %v4833_v16 }
 0x6a0   :  { %11658 = vmatmul.mubr.bf16.vlgmr.msra.gmra.mrb[36].mxu1 %v14425_v50  ;;  %11503 = vmatpush1.bf16.msra.mxu0 %v13292_v24  ;;  %v13326_v50 = vcombine.low %v4761_v34, %v4769_v32  ;;  %v13391_v24 = vcombine.high %v4825_v0, %v4833_v16  ;;  %v4856_v32 = vld [vmem:[#allocation7 + $0x1e50] sm:$0xff] }
 0x6a1   :  { %11534 = vmatprep.mubr.bf16.mxu0 %v14437_v31  ;;  %11667 = vmatpush1.bf16.msra.mxu1 %v13294_v33  ;;  %v4841_v33 = vld [vmem:[#allocation7 + $0x1d98] sm:$0xff]  ;;  %v4920_v16 = vld [vmem:[#allocation7 + $0x2150] sm:$0xff] }
 0x6a2   :  { %11698 = vmatprep.mubr.bf16.mxu1 %v14437_v31  ;;  %11504 = vmatprep.subr.bf16.mxu0 %v13309_v27  ;;  %v13340_v31 = vcombine.low %v4776_v43, %v4784_v46  ;;  %v4849_v27 = vld [vmem:[#allocation7 + $0x1df8] sm:$0xff] }
 0x6a3   :  { %11668 = vmatprep.subr.bf16.mxu1 %v13311_v30  ;;  %v13405_v30 = vcombine.high %v4840_v26, %v4848_v17  ;;  %v13407_v34 = vcombine.high %v4841_v33, %v4849_v27  ;;  %v13406_v43 = vcombine.low %v4841_v33, %v4849_v27  ;;  %v4936_v27 = vld [vmem:[#allocation7 + $0x2210] sm:$0xff] }
 0x6a4   :  { %11505 = vmatpush1.bf16.msra.mxu0 %v13308_v36  ;;  %v4864_v36 = vld [vmem:[#allocation7 + $0x1eb0] sm:$0xff] }
 0x6a5   :  { %11669 = vmatpush1.bf16.msra.mxu1 %v13310_v40  ;;  %11506 = vmatprep.subr.bf16.mxu0 %v13325_v38  ;;  %v4857_v40 = vld [vmem:[#allocation7 + $0x1e58] sm:$0xff]  ;;  %v13421_v46 = vcombine.high %v4856_v32, %v4864_v36 }
 0x6a6   :  { %11670 = vmatprep.subr.bf16.mxu1 %v13327_v41  ;;  %v4865_v38 = vld [vmem:[#allocation7 + $0x1eb8] sm:$0xff]  ;;  %v13404_v41 = vcombine.low %v4840_v26, %v4848_v17 }
 0x6a7   :  { %v13423_v2 = vcombine.high %v4857_v40, %v4865_v38  ;;  %v13422_v55 = vcombine.low %v4857_v40, %v4865_v38  ;;  %v4952_v38 = vld [vmem:[#allocation7 + $0x22d0] sm:$0xff] }
 0x6a8   :  { %11507 = vmatpush1.bf16.msra.mxu0 %v13324_v53  ;;  %v4880_v53 = vld [vmem:[#allocation7 + $0x1f70] sm:$0xff] }
 0x6a9   :  { %11671 = vmatpush1.bf16.msra.mxu1 %v13326_v50  ;;  %11508 = vmatprep.subr.bf16.mxu0 %v13341_v54  ;;  %v4873_v50 = vld [vmem:[#allocation7 + $0x1f18] sm:$0xff]  ;;  %v13437_v18 = vcombine.high %v4872_v44, %v4880_v53 }
 0x6aa   :  { %11672 = vmatprep.subr.bf16.mxu1 %v13343_v35  ;;  %v4881_v54 = vld [vmem:[#allocation7 + $0x1f78] sm:$0xff]  ;;  %v13420_v35 = vcombine.low %v4856_v32, %v4864_v36 }
 0x6ab   :  { %v13439_v25 = vcombine.high %v4873_v50, %v4881_v54  ;;  %v13438_v62 = vcombine.low %v4873_v50, %v4881_v54  ;;  %v4968_v54 = vld [vmem:[#allocation7 + $0x2390] sm:$0xff] }
 0x6ac   :  { %11509 = vmatpush1.bf16.msra.mxu0 %v13340_v31  ;;  %v4896_v31 = vld [vmem:[#allocation7 + $0x2030] sm:$0xff] }
 0x6ad   :  { %11673 = vmatpush1.bf16.msra.mxu1 %v13342_v56  ;;  %11510 = vmatprep.subr.bf16.mxu0 %v13357_v60  ;;  %v4889_v56 = vld [vmem:[#allocation7 + $0x1fd8] sm:$0xff]  ;;  %v13453_v1 = vcombine.high %v4888_v59, %v4896_v31 }
 0x6ae   :  { %11674 = vmatprep.subr.bf16.mxu1 %v13359_v15  ;;  %v4897_v60 = vld [vmem:[#allocation7 + $0x2038] sm:$0xff]  ;;  %v13436_v15 = vcombine.low %v4872_v44, %v4880_v53 }
 0x6af   :  { %v13455_v3 = vcombine.high %v4889_v56, %v4897_v60  ;;  %v13454_v12 = vcombine.low %v4889_v56, %v4897_v60  ;;  %v4984_v60 = vld [vmem:[#allocation7 + $0x2450] sm:$0xff] }
 0x6b0   :  { %11511 = vmatpush1.bf16.msra.mxu0 %v13356_v39  ;;  %v4912_v39 = vld [vmem:[#allocation7 + $0x20f0] sm:$0xff] }
 0x6b1   :  { %11675 = vmatpush1.bf16.msra.mxu1 %v13358_v6  ;;  %11512 = vmatprep.subr.bf16.mxu0 %v13373_v7  ;;  %v4905_v6 = vld [vmem:[#allocation7 + $0x2098] sm:$0xff]  ;;  %v13469_v51 = vcombine.high %v4904_v47, %v4912_v39 }
 0x6b2   :  { %11676 = vmatprep.subr.bf16.mxu1 %v13375_v10  ;;  %v4913_v7 = vld [vmem:[#allocation7 + $0x20f8] sm:$0xff]  ;;  %v13452_v10 = vcombine.low %v4888_v59, %v4896_v31 }
 0x6b3   :  { %v13471_v0 = vcombine.high %v4905_v6, %v4913_v7  ;;  %v13470_v26 = vcombine.low %v4905_v6, %v4913_v7  ;;  %v5000_v7 = vld [vmem:[#allocation7 + $0x2510] sm:$0xff] }
 0x6b4   :  { %11513 = vmatpush1.bf16.msra.mxu0 %v13372_v42  ;;  %v4928_v42 = vld [vmem:[#allocation7 + $0x21b0] sm:$0xff] }
 0x6b5   :  { %11677 = vmatpush1.bf16.msra.mxu1 %v13374_v19  ;;  %11514 = vmatprep.subr.bf16.mxu0 %v13389_v20  ;;  %v4921_v19 = vld [vmem:[#allocation7 + $0x2158] sm:$0xff]  ;;  %v13485_v17 = vcombine.high %v4920_v16, %v4928_v42 }
 0x6b6   :  { %11678 = vmatprep.subr.bf16.mxu1 %v13391_v24  ;;  %v4929_v20 = vld [vmem:[#allocation7 + $0x21b8] sm:$0xff]  ;;  %v13468_v24 = vcombine.low %v4904_v47, %v4912_v39 }
 0x6b7   :  { %v13487_v33 = vcombine.high %v4921_v19, %v4929_v20  ;;  %v13486_v32 = vcombine.low %v4921_v19, %v4929_v20  ;;  %v5016_v19 = vld [vmem:[#allocation7 + $0x25d0] sm:$0xff] }
 0x6b8   :  { %11515 = vmatpush1.bf16.msra.mxu0 %v13388_v28  ;;  %v4944_v28 = vld [vmem:[#allocation7 + $0x2270] sm:$0xff] }
 0x6b9   :  { %11679 = vmatpush1.bf16.msra.mxu1 %v13390_v29  ;;  %11516 = vmatprep.subr.bf16.mxu0 %v13405_v30  ;;  %v4937_v29 = vld [vmem:[#allocation7 + $0x2218] sm:$0xff]  ;;  %v13501_v36 = vcombine.high %v4936_v27, %v4944_v28  ;;  %v5024_v20 = vld [vmem:[#allocation7 + $0x2630] sm:$0xff] }
 0x6ba   :  { %11680 = vmatprep.subr.bf16.mxu1 %v13407_v34  ;;  %v4945_v30 = vld [vmem:[#allocation7 + $0x2278] sm:$0xff]  ;;  %v13484_v34 = vcombine.low %v4920_v16, %v4928_v42 }
 0x6bb   :  { %v13503_v40 = vcombine.high %v4937_v29, %v4945_v30  ;;  %v13502_v44 = vcombine.low %v4937_v29, %v4945_v30  ;;  %v5032_v30 = vld [vmem:[#allocation7 + $0x2690] sm:$0xff] }
 0x6bc   :  { %11517 = vmatpush1.bf16.msra.mxu0 %v13404_v41  ;;  %v4960_v41 = vld [vmem:[#allocation7 + $0x2330] sm:$0xff] }
 0x6bd   :  { %11681 = vmatpush1.bf16.msra.mxu1 %v13406_v43  ;;  %11518 = vmatprep.subr.bf16.mxu0 %v13421_v46  ;;  %v4953_v43 = vld [vmem:[#allocation7 + $0x22d8] sm:$0xff]  ;;  %v13517_v53 = vcombine.high %v4952_v38, %v4960_v41 }
 0x6be   :  { %11682 = vmatprep.subr.bf16.mxu1 %v13423_v2  ;;  %v4961_v46 = vld [vmem:[#allocation7 + $0x2338] sm:$0xff]  ;;  %v13500_v2 = vcombine.low %v4936_v27, %v4944_v28  ;;  %v13581_v28 = vcombine.high %v5016_v19, %v5024_v20 }
 0x6bf   :  { %v13519_v50 = vcombine.high %v4953_v43, %v4961_v46  ;;  %v13518_v59 = vcombine.low %v4953_v43, %v4961_v46  ;;  %v5048_v43 = vld [vmem:[#allocation7 + $0x2750] sm:$0xff] }
 0x6c0   :  { %11519 = vmatpush1.bf16.msra.mxu0 %v13420_v35  ;;  %v4976_v35 = vld [vmem:[#allocation7 + $0x23f0] sm:$0xff] }
 0x6c1   :  { %11683 = vmatpush1.bf16.msra.mxu1 %v13422_v55  ;;  %11520 = vmatprep.subr.bf16.mxu0 %v13437_v18  ;;  %v4969_v55 = vld [vmem:[#allocation7 + $0x2398] sm:$0xff]  ;;  %v13533_v31 = vcombine.high %v4968_v54, %v4976_v35  ;;  %v5056_v46 = vld [vmem:[#allocation7 + $0x27b0] sm:$0xff] }
 0x6c2   :  { %11684 = vmatprep.subr.bf16.mxu1 %v13439_v25  ;;  %v4977_v18 = vld [vmem:[#allocation7 + $0x23f8] sm:$0xff]  ;;  %v13516_v25 = vcombine.low %v4952_v38, %v4960_v41 }
 0x6c3   :  { %v13535_v56 = vcombine.high %v4969_v55, %v4977_v18  ;;  %v13534_v47 = vcombine.low %v4969_v55, %v4977_v18  ;;  %v5072_v55 = vld [vmem:[#allocation7 + $0x2870] sm:$0xff]  ;;  %v5065_v18 = vld [vmem:[#allocation7 + $0x2818] sm:$0xff] }
 0x6c4   :  { %11521 = vmatpush1.bf16.msra.mxu0 %v13436_v15  ;;  %v4992_v15 = vld [vmem:[#allocation7 + $0x24b0] sm:$0xff] }
 0x6c5   :  { %11685 = vmatpush1.bf16.msra.mxu1 %v13438_v62  ;;  %11522 = vmatprep.subr.bf16.mxu0 %v13453_v1  ;;  %v4985_v62 = vld [vmem:[#allocation7 + $0x2458] sm:$0xff]  ;;  %v13549_v39 = vcombine.high %v4984_v60, %v4992_v15 }
 0x6c6   :  { %11686 = vmatprep.subr.bf16.mxu1 %v13455_v3  ;;  %v4993_v1 = vld [vmem:[#allocation7 + $0x24b8] sm:$0xff]  ;;  %v13532_v3 = vcombine.low %v4968_v54, %v4976_v35  ;;  %v5064_v35 = vld [vmem:[#allocation7 + $0x2810] sm:$0xff] }
 0x6c7   :  { %v13551_v6 = vcombine.high %v4985_v62, %v4993_v1  ;;  %v13550_v16 = vcombine.low %v4985_v62, %v4993_v1  ;;  %v5088_v62 = vld [vmem:[#allocation7 + $0x2930] sm:$0xff]  ;;  %v5081_v1 = vld [vmem:[#allocation7 + $0x28d8] sm:$0xff] }
 0x6c8   :  { %11523 = vmatpush1.bf16.msra.mxu0 %v13452_v10  ;;  %v5008_v10 = vld [vmem:[#allocation7 + $0x2570] sm:$0xff] }
 0x6c9   :  { %11687 = vmatpush1.bf16.msra.mxu1 %v13454_v12  ;;  %11524 = vmatprep.subr.bf16.mxu0 %v13469_v51  ;;  %v13548_v12 = vcombine.low %v4984_v60, %v4992_v15  ;;  %v5001_v51 = vld [vmem:[#allocation7 + $0x2518] sm:$0xff]  ;;  %v13565_v42 = vcombine.high %v5000_v7, %v5008_v10  ;;  %v5080_v15 = vld [vmem:[#allocation7 + $0x28d0] sm:$0xff] }
 0x6ca   :  { %11688 = vmatprep.subr.bf16.mxu1 %v13471_v0  ;;  %v5009_v0 = vld [vmem:[#allocation7 + $0x2578] sm:$0xff] }
 0x6cb   :  { %v13566_v27 = vcombine.low %v5001_v51, %v5009_v0 }
 0x6cc   :  { %11525 = vmatpush1.bf16.msra.mxu0 %v13468_v24  ;;  %v13567_v24 = vcombine.high %v5001_v51, %v5009_v0  ;;  %v5104_v51 = vld [vmem:[#allocation7 + $0x29f0] sm:$0xff] }
 0x6cd   :  { %11689 = vmatpush1.bf16.msra.mxu1 %v13470_v26  ;;  %11526 = vmatprep.subr.bf16.mxu0 %v13485_v17  ;;  %v5017_v26 = vld [vmem:[#allocation7 + $0x25d8] sm:$0xff] }
 0x6ce   :  { %11690 = vmatprep.subr.bf16.mxu1 %v13487_v33  ;;  %v5025_v17 = vld [vmem:[#allocation7 + $0x2638] sm:$0xff]  ;;  %v13564_v33 = vcombine.low %v5000_v7, %v5008_v10 }
 0x6cf   :  { %v13583_v29 = vcombine.high %v5017_v26, %v5025_v17 }
 0x6d0   :  { %11527 = vmatpush1.bf16.msra.mxu0 %v13484_v34  ;;  %v5040_v34 = vld [vmem:[#allocation7 + $0x26f0] sm:$0xff] }
 0x6d1   :  { %11691 = vmatpush1.bf16.msra.mxu1 %v13486_v32  ;;  %11528 = vmatprep.subr.bf16.mxu0 %v13501_v36  ;;  %v5033_v32 = vld [vmem:[#allocation7 + $0x2698] sm:$0xff]  ;;  %v13597_v38 = vcombine.high %v5032_v30, %v5040_v34 }
 0x6d2   :  { %11692 = vmatprep.subr.bf16.mxu1 %v13503_v40  ;;  %v5041_v36 = vld [vmem:[#allocation7 + $0x26f8] sm:$0xff]  ;;  %v13580_v40 = vcombine.low %v5016_v19, %v5024_v20 }
 0x6d3   :  { %v13599_v41 = vcombine.high %v5033_v32, %v5041_v36  ;;  %v5105_v19 = vld [vmem:[#allocation7 + $0x29f8] sm:$0xff] }
 0x6d4   :  { %11529 = vmatpush1.bf16.msra.mxu0 %v13500_v2  ;;  %v5049_v2 = vld [vmem:[#allocation7 + $0x2758] sm:$0xff] }
 0x6d5   :  { %11693 = vmatpush1.bf16.msra.mxu1 %v13502_v44  ;;  %11530 = vmatprep.subr.bf16.mxu0 %v13517_v53  ;;  %v5057_v44 = vld [vmem:[#allocation7 + $0x27b8] sm:$0xff]  ;;  %v13598_v53 = vcombine.low %v5033_v32, %v5041_v36  ;;  %v5120_v32 = vld [vmem:[#allocation7 + $0x2ab0] sm:$0xff] }
 0x6d6   :  { %11694 = vmatprep.subr.bf16.mxu1 %v13519_v50  ;;  %v13613_v50 = vcombine.high %v5048_v43, %v5056_v46  ;;  %v13615_v54 = vcombine.high %v5049_v2, %v5057_v44  ;;  %v5113_v36 = vld [vmem:[#allocation7 + $0x2a58] sm:$0xff] }
 0x6d8   :  { %11531 = vmatpush1.bf16.msra.mxu0 %v13516_v25  ;;  %v5073_v25 = vld [vmem:[#allocation7 + $0x2878] sm:$0xff] }
 0x6d9   :  { %11695 = vmatpush1.bf16.msra.mxu1 %v13518_v59  ;;  %11532 = vmatprep.subr.bf16.mxu0 %v13533_v31  ;;  %v13612_v59 = vcombine.low %v5048_v43, %v5056_v46  ;;  %v13614_v31 = vcombine.low %v5049_v2, %v5057_v44  ;;  %v13631_v60 = vcombine.high %v5065_v18, %v5073_v25  ;;  %v5128_v46 = vld [vmem:[#allocation7 + $0x2b10] sm:$0xff]  ;;  %v5129_v44 = vld [vmem:[#allocation7 + $0x2b18] sm:$0xff] }
 0x6da   :  { %11696 = vmatprep.subr.bf16.mxu1 %v13535_v56  ;;  %v13629_v56 = vcombine.high %v5064_v35, %v5072_v55  ;;  %v5136_v2 = vld [vmem:[#allocation7 + $0x2b70] sm:$0xff] }
 0x6dc   :  { %11533 = vmatpush1.bf16.msra.mxu0 %v13532_v3  ;;  %v5089_v3 = vld [vmem:[#allocation7 + $0x2938] sm:$0xff] }
 0x6dd   :  { %11697 = vmatpush1.bf16.msra.mxu1 %v13534_v47  ;;  %11543 = vmatprep.subr.bf16.mxu0 %v13549_v39  ;;  %v13628_v47 = vcombine.low %v5064_v35, %v5072_v55  ;;  %v13630_v39 = vcombine.low %v5065_v18, %v5073_v25  ;;  %v13647_v10 = vcombine.high %v5081_v1, %v5089_v3  ;;  %v5144_v55 = vld [vmem:[#allocation7 + $0x2bd0] sm:$0xff]  ;;  %v5145_v25 = vld [vmem:[#allocation7 + $0x2bd8] sm:$0xff] }
 0x6de   :  { %11707 = vmatprep.subr.bf16.mxu1 %v13551_v6  ;;  %v13645_v6 = vcombine.high %v5080_v15, %v5088_v62  ;;  %v5152_v18 = vld [vmem:[#allocation7 + $0x2c30] sm:$0xff] }
 0x6df   :  { %11535 = vmatmul.mubr.bf16.vlgmr.msra.gmra.mrb[20].mxu0 %v14439_v11 }
 0x6e0   :  { %11699 = vmatmul.mubr.bf16.vlgmr.msra.gmra.mrb[36].mxu1 %v14439_v11  ;;  %11544 = vmatpush1.bf16.msra.mxu0 %v13548_v12  ;;  %v13582_v11 = vcombine.low %v5017_v26, %v5025_v17  ;;  %v5096_v12 = vld [vmem:[#allocation7 + $0x2990] sm:$0xff]  ;;  %v13644_v26 = vcombine.low %v5080_v15, %v5088_v62 }
 0x6e1   :  { %11575 = vmatprep.mubr.bf16.mxu0 %v14443_v52  ;;  %11708 = vmatpush1.bf16.msra.mxu1 %v13550_v16  ;;  %v5160_v62 = vld [vmem:[#allocation7 + $0x2c90] sm:$0xff] }
 0x6e2   :  { %11739 = vmatprep.mubr.bf16.mxu1 %v14443_v52  ;;  %11545 = vmatprep.subr.bf16.mxu0 %v13565_v42  ;;  %v13596_v52 = vcombine.low %v5032_v30, %v5040_v34  ;;  %v5097_v42 = vld [vmem:[#allocation7 + $0x2998] sm:$0xff]  ;;  %v5112_v34 = vld [vmem:[#allocation7 + $0x2a50] sm:$0xff] }
 0x6e3   :  { %11709 = vmatprep.subr.bf16.mxu1 %v13567_v24  ;;  %v13663_v30 = vcombine.high %v5097_v42, %v5105_v19 }
 0x6e4   :  { %11546 = vmatpush1.bf16.msra.mxu0 %v13564_v33 }
 0x6e5   :  { %11710 = vmatpush1.bf16.msra.mxu1 %v13566_v27  ;;  %11547 = vmatprep.subr.bf16.mxu0 %v13581_v28  ;;  %v13646_v27 = vcombine.low %v5081_v1, %v5089_v3  ;;  %v13661_v28 = vcombine.high %v5096_v12, %v5104_v51  ;;  %v5168_v1 = vld [vmem:[#allocation7 + $0x2cf0] sm:$0xff]  ;;  %v5161_v3 = vld [vmem:[#allocation7 + $0x2c98] sm:$0xff] }
 0x6e6   :  { %11711 = vmatprep.subr.bf16.mxu1 %v13583_v29 }
 0x6e8   :  { %11548 = vmatpush1.bf16.msra.mxu0 %v13580_v40  ;;  %v5121_v40 = vld [vmem:[#allocation7 + $0x2ab8] sm:$0xff] }
 0x6e9   :  { %11712 = vmatpush1.bf16.msra.mxu1 %v13582_v11  ;;  %11549 = vmatprep.subr.bf16.mxu0 %v13597_v38  ;;  %v13660_v11 = vcombine.low %v5096_v12, %v5104_v51  ;;  %v13662_v38 = vcombine.low %v5097_v42, %v5105_v19  ;;  %v13679_v43 = vcombine.high %v5113_v36, %v5121_v40  ;;  %v5176_v51 = vld [vmem:[#allocation7 + $0x2d50] sm:$0xff]  ;;  %v5177_v19 = vld [vmem:[#allocation7 + $0x2d58] sm:$0xff] }
 0x6ea   :  { %11713 = vmatprep.subr.bf16.mxu1 %v13599_v41  ;;  %v13677_v41 = vcombine.high %v5112_v34, %v5120_v32  ;;  %v5184_v42 = vld [vmem:[#allocation7 + $0x2db0] sm:$0xff] }
 0x6ec   :  { %11550 = vmatpush1.bf16.msra.mxu0 %v13596_v52  ;;  %v5137_v52 = vld [vmem:[#allocation7 + $0x2b78] sm:$0xff] }
 0x6ed   :  { %11714 = vmatpush1.bf16.msra.mxu1 %v13598_v53  ;;  %11551 = vmatprep.subr.bf16.mxu0 %v13613_v50  ;;  %v13676_v53 = vcombine.low %v5112_v34, %v5120_v32  ;;  %v13678_v50 = vcombine.low %v5113_v36, %v5121_v40  ;;  %v13695_v35 = vcombine.high %v5129_v44, %v5137_v52  ;;  %v5201_v34 = vld [vmem:[#allocation7 + $0x2e78] sm:$0xff] }
 0x6ee   :  { %11715 = vmatprep.subr.bf16.mxu1 %v13615_v54  ;;  %v13693_v54 = vcombine.high %v5128_v46, %v5136_v2  ;;  %v94_v32 = vld [vmem:[#allocation10 + $0x1] ss:$8 sm:$0xf]  ;;  %v13740_v40 = vcombine.low %v5176_v51, %v5184_v42 }
 0x6ef   :  { %v95_v36 = vld [vmem:[#allocation10 + $0x1] ss:$8 sm:$0xf0] }
 0x6f0   :  { %11552 = vmatpush1.bf16.msra.mxu0 %v13612_v59  ;;  %v5153_v59 = vld [vmem:[#allocation7 + $0x2c38] sm:$0xff] }
 0x6f1   :  { %11716 = vmatpush1.bf16.msra.mxu1 %v13614_v31  ;;  %11553 = vmatprep.subr.bf16.mxu0 %v13629_v56  ;;  %v13692_v31 = vcombine.low %v5128_v46, %v5136_v2  ;;  %v13694_v56 = vcombine.low %v5129_v44, %v5137_v52  ;;  %v13711_v15 = vcombine.high %v5145_v25, %v5153_v59  ;;  %v5216_v46 = vld [vmem:[#allocation7 + $0x2f30] sm:$0xff]  ;;  %v5209_v44 = vld [vmem:[#allocation7 + $0x2ed8] sm:$0xff] }
 0x6f2   :  { %v14518_v7 = vpop.f32.mrb[16].mxu0  ;;  %11717 = vmatprep.subr.bf16.mxu1 %v13631_v60  ;;  %v13709_v60 = vcombine.high %v5144_v55, %v5152_v18  ;;  %v14526_v2 = vor.u32 %v95_v36, %v94_v32  ;;  %v5217_v52 = vld [vmem:[#allocation7 + $0x2f38] sm:$0xff]  ;;  %v11781_v32 = vld [vmem:[#allocation8 + $0x8] sm:$0xff] }
 0x6f3   :  { %v14520_v0 = vpop.f32.mrb[32].mxu1  ;;  %v14522_v16 = vpop.f32.mrb[17].mxu0  ;;  %v11789_v36 = vld [vmem:[#allocation8 + $0x48] sm:$0xff] }
 0x6f4   :  { %v14524_v20 = vpop.f32.mrb[33].mxu1  ;;  %v11253_v24 = vpop.f32.mrb[18].mxu0  ;;  %11554 = vmatpush1.bf16.msra.mxu0 %v13628_v47  ;;  %v5169_v47 = vld [vmem:[#allocation7 + $0x2cf8] sm:$0xff] }
 0x6f5   :  { %v11417_v17 = vpop.f32.mrb[34].mxu1  ;;  %11718 = vmatpush1.bf16.msra.mxu1 %v13630_v39  ;;  %v11254_v33 = vpop.f32.mrb[19].mxu0  ;;  %11555 = vmatprep.subr.bf16.mxu0 %v13645_v6  ;;  %v13708_v39 = vcombine.low %v5144_v55, %v5152_v18  ;;  %v13710_v6 = vcombine.low %v5145_v25, %v5153_v59  ;;  %v13727_v12 = vcombine.high %v5161_v3, %v5169_v47  ;;  %v5185_v24 = vld [vmem:[#allocation7 + $0x2db8] sm:$0xff]  ;;  %v5224_v18 = vld [vmem:[#allocation7 + $0x2f90] sm:$0xff] }
 0x6f6   :  { %v11418_v29 = vpop.f32.mrb[35].mxu1  ;;  %11719 = vmatprep.subr.bf16.mxu1 %v13647_v10  ;;  %v13725_v10 = vcombine.high %v5160_v62, %v5168_v1  ;;  %v13726_v17 = vcombine.low %v5161_v3, %v5169_v47  ;;  %v13741_v33 = vcombine.high %v5176_v51, %v5184_v42  ;;  %v13775_v55 = vcombine.high %v5209_v44, %v5217_v52  ;;  %v5232_v25 = vld [vmem:[#allocation7 + $0x2ff0] sm:$0xff] }
 0x6f7   :  { %v5200_v29 = vld [vmem:[#allocation7 + $0x2e70] sm:$0xff]  ;;  %v5243_v59 = vrot.slane %v14526_v2, %v14292_v49  ;;  %v13788_v51 = vcombine.low %v5224_v18, %v5232_v25 }
 0x6f8   :  { %11556 = vmatpush1.bf16.msra.mxu0 %v13644_v26  ;;  %v13724_v26 = vcombine.low %v5160_v62, %v5168_v1  ;;  %v13789_v62 = vcombine.high %v5224_v18, %v5232_v25  ;;  %v11782_v47 = vld [vmem:[#allocation8 + $0x10] sm:$0xff]  ;;  %v11784_v18 = vld [vmem:[#allocation8 + $0x20] sm:$0xff] }
 0x6f9   :  { %11720 = vmatpush1.bf16.msra.mxu1 %v13646_v27  ;;  %11557 = vmatprep.subr.bf16.mxu0 %v13661_v28  ;;  %v13743_v27 = vcombine.high %v5177_v19, %v5185_v24  ;;  %v5192_v28 = vld [vmem:[#allocation7 + $0x2e10] sm:$0xff]  ;;  %v11792_v25 = vld [vmem:[#allocation8 + $0x60] sm:$0xff] }
 0x6fa   :  { %11721 = vmatprep.subr.bf16.mxu1 %v13663_v30  ;;  %v5193_v30 = vld [vmem:[#allocation7 + $0x2e18] sm:$0xff] }
 0x6fc   :  { %11558 = vmatpush1.bf16.msra.mxu0 %v13660_v11  ;;  %v13742_v11 = vcombine.low %v5177_v19, %v5185_v24 }
 0x6fd   :  { %11722 = vmatpush1.bf16.msra.mxu1 %v13662_v38  ;;  %11559 = vmatprep.subr.bf16.mxu0 %v13677_v41  ;;  %v13757_v38 = vcombine.high %v5192_v28, %v5200_v29  ;;  %v13759_v41 = vcombine.high %v5193_v30, %v5201_v34 }
 0x6fe   :  { %11723 = vmatprep.subr.bf16.mxu1 %v13679_v43  ;;  %v5208_v43 = vld [vmem:[#allocation7 + $0x2ed0] sm:$0xff] }
 0x700   :  { %11560 = vmatpush1.bf16.msra.mxu0 %v13676_v53  ;;  %v13756_v53 = vcombine.low %v5192_v28, %v5200_v29  ;;  %v5267_v28 = vrot.slane %v14526_v2, %v14349_v58  ;;  %v11783_v29 = vld [vmem:[#allocation8 + $0x18] sm:$0xff] }
 0x701   :  { %11724 = vmatpush1.bf16.msra.mxu1 %v13678_v50  ;;  %11561 = vmatprep.subr.bf16.mxu0 %v13693_v54  ;;  %v13758_v50 = vcombine.low %v5193_v30, %v5201_v34  ;;  %v13773_v54 = vcombine.high %v5208_v43, %v5216_v46  ;;  %v11791_v30 = vld [vmem:[#allocation8 + $0x58] sm:$0xff]  ;;  %v5251_v34 = vrot.slane %v14526_v2, %v14299_v57 }
 0x702   :  { %11725 = vmatprep.subr.bf16.mxu1 %v13695_v35  ;;  %v5259_v35 = vrot.slane %v14526_v2, %v14325_v9 }
 0x704   :  { %11562 = vmatpush1.bf16.msra.mxu0 %v13692_v31  ;;  %v5225_v31 = vld [vmem:[#allocation7 + $0x2f98] sm:$0xff]  ;;  %v13821_v1 = vadd.f32 %v14498_v63, %v5259_v35  ;;  %v5255_v63 = vrot.slane %v14526_v2, %v14346_v45 }
 0x705   :  { %11726 = vmatpush1.bf16.msra.mxu1 %v13694_v56  ;;  %11563 = vmatprep.subr.bf16.mxu0 %v13709_v60  ;;  %v5233_v56 = vld [vmem:[#allocation7 + $0x2ff8] sm:$0xff]  ;;  %v13772_v60 = vcombine.low %v5208_v43, %v5216_v46  ;;  %v13823_v46 = vadd.f32 %v14500_v13, %v5267_v28 }
 0x706   :  { %11727 = vmatprep.subr.bf16.mxu1 %v13711_v15  ;;  %v13774_v15 = vcombine.low %v5209_v44, %v5217_v52  ;;  %v13791_v3 = vcombine.high %v5225_v31, %v5233_v56  ;;  %v13790_v42 = vcombine.low %v5225_v31, %v5233_v56  ;;  %v11753_v24 = vmax.f32 %v13821_v1, 0.0 }
 0x707   :  { %v13795_v44 = vcombine.high %v11781_v32, %v11789_v36  ;;  %v13819_v52 = vadd.f32 %v14476_v23, %v5251_v34  ;;  %v11755_v35 = vmax.f32 %v13823_v46, 0.0  ;;  %v5263_v23 = vrot.slane %v14526_v2, %v14366_v37 }
 0x708   :  { %11564 = vmatpush1.bf16.msra.mxu0 %v13708_v39  ;;  %v11790_v39 = vld [vmem:[#allocation8 + $0x50] sm:$0xff]  ;;  %v13801_v1 = vcombine.high %v11784_v18, %v11792_v25 }
 0x709   :  { %11728 = vmatpush1.bf16.msra.mxu1 %v13710_v6  ;;  %11565 = vmatprep.subr.bf16.mxu0 %v13725_v10  ;;  %v13817_v6 = vadd.f32 %v14474_v21, %v5243_v59  ;;  %v11780_v10 = vld [vmem:[#allocation8] sm:$0xff]  ;;  %v13797_v19 = vcombine.high %v11782_v47, %v11790_v39  ;;  %v5239_v21 = vrot.slane %v14526_v2, %v14289_v48 }
 0x70a   :  { %11729 = vmatprep.subr.bf16.mxu1 %v13727_v12  ;;  %v11788_v12 = vld [vmem:[#allocation8 + $0x40] sm:$0xff]  ;;  %v13794_v59 = vcombine.low %v11781_v32, %v11789_v36  ;;  %v11771_v56 = vpack.c.bf16 %v11755_v35, %v11755_v35  ;;  %v11787_v36 = vld [vmem:[#allocation8 + $0x38] sm:$0xff] }
 0x70b   :  { %v13816_v43 = vadd.f32 %v14470_v14, %v5239_v21  ;;  %v5247_v14 = vrot.slane %v14526_v2, %v14322_v61  ;;  %v11786_v21 = vld [vmem:[#allocation8 + $0x30] sm:$0xff] }
 0x70c   :  { %11566 = vmatpush1.bf16.msra.mxu0 %v13724_v26  ;;  %v13793_v26 = vcombine.high %v11780_v10, %v11788_v12 }
 0x70d   :  { %11730 = vmatpush1.bf16.msra.mxu1 %v13726_v17  ;;  %11567 = vmatprep.subr.bf16.mxu0 %v13741_v33  ;;  %v11749_v17 = vmax.f32 %v13817_v6, 0.0  ;;  %v11769_v33 = vpack.c.bf16 %v11753_v24, %v11753_v24 }
 0x70e   :  { %11731 = vmatprep.subr.bf16.mxu1 %v13743_v27 }
 0x70f   :  { %v11765_v27 = vpack.c.bf16 %v11749_v17, %v11749_v17 }
 0x710   :  { %11568 = vmatpush1.bf16.msra.mxu0 %v13740_v40  ;;  %v13796_v40 = vcombine.low %v11782_v47, %v11790_v39  ;;  %v13818_v47 = vadd.f32 %v14472_v4, %v5247_v14 }
 0x711   :  { %11732 = vmatpush1.bf16.msra.mxu1 %v13742_v11  ;;  %11569 = vmatprep.subr.bf16.mxu0 %v13757_v38  ;;  %v13820_v11 = vadd.f32 %v14494_v5, %v5255_v63  ;;  %v13792_v38 = vcombine.low %v11780_v10, %v11788_v12  ;;  %v11751_v5 = vmax.f32 %v13819_v52, 0.0  ;;  %v11793_v12 = vld [vmem:[#allocation8 + $0x68] sm:$0xff] }
 0x712   :  { %11733 = vmatprep.subr.bf16.mxu1 %v13759_v41  ;;  %v13799_v41 = vcombine.high %v11783_v29, %v11791_v30  ;;  %v11750_v6 = vmax.f32 %v13818_v47, 0.0  ;;  %v101_v47 = vld [vmem:[#allocation10 + $0x2] ss:$0 sm:$0xff] }
 0x714   :  { %11570 = vmatpush1.bf16.msra.mxu0 %v13756_v53  ;;  %v98_v53 = vld [vmem:[#allocation10 + $0x41] ss:$8 sm:$0xf]  ;;  %v11766_v24 = vpack.c.bf16 %v11750_v6, %v11750_v6 }
 0x715   :  { %11734 = vmatpush1.bf16.msra.mxu1 %v13758_v50  ;;  %11571 = vmatprep.subr.bf16.mxu0 %v13773_v54  ;;  %v99_v50 = vld [vmem:[#allocation10 + $0x41] ss:$8 sm:$0xf0]  ;;  %v11748_v54 = vmax.f32 %v13816_v43, 0.0 }
 0x716   :  { %11735 = vmatprep.subr.bf16.mxu1 %v13775_v55  ;;  %v14548_v55 = vor.u32 %v99_v50, %v98_v53 }
 0x717   :  { %v11764_v31 = vpack.c.bf16 %v11748_v54, %v11748_v54 }
 0x718   :  { %11572 = vmatpush1.bf16.msra.mxu0 %v13772_v60  ;;  %v5275_v60 = vrot.slane %v14548_v55, %v14292_v49  ;;  %v11785_v49 = vld [vmem:[#allocation8 + $0x28] sm:$0xff] }
 0x719   :  { %11736 = vmatpush1.bf16.msra.mxu1 %v13774_v15  ;;  %11573 = vmatprep.subr.bf16.mxu0 %v13789_v62  ;;  %v13798_v15 = vcombine.low %v11783_v29, %v11791_v30  ;;  %v11767_v62 = vpack.c.bf16 %v11751_v5, %v11751_v5  ;;  %v13803_v4 = vcombine.high %v11785_v49, %v11793_v12 }
 0x71a   :  { %11737 = vmatprep.subr.bf16.mxu1 %v13791_v3  ;;  %v13822_v3 = vadd.f32 %v14496_v8, %v5263_v23  ;;  %v13825_v2 = vadd.f32 %v14522_v16, %v5275_v60  ;;  %v5279_v29 = vrot.slane %v14548_v55, %v14322_v61  ;;  %v5287_v61 = vrot.slane %v14548_v55, %v14346_v45 }
 0x71c   :  { %11574 = vmatpush1.bf16.msra.mxu0 %v13788_v51  ;;  %v11754_v39 = vmax.f32 %v13822_v3, 0.0  ;;  %v11757_v10 = vmax.f32 %v13825_v2, 0.0  ;;  %v14171_v3 = vmov 8  }
 0x71d   :  { %11738 = vmatpush1.bf16.msra.mxu1 %v13790_v42  ;;  %11956 = vmatprep.subr.bf16.mxu0 %v13797_v19  ;;  %v5271_v42 = vrot.slane %v14548_v55, %v14289_v48  ;;  %v13800_v19 = vcombine.low %v11784_v18, %v11792_v25  ;;  %v11794_v48 = vld [vmem:[#allocation8 + $0x70] sm:$0xff] }
 0x71e   :  { %11876 = vmatprep.subr.bf16.mxu1 %v13793_v26  ;;  %v11770_v51 = vpack.c.bf16 %v11754_v39, %v11754_v39  ;;  %v11773_v8 = vpack.c.bf16 %v11757_v10, %v11757_v10  ;;  %v5283_v26 = vrot.slane %v14548_v55, %v14299_v57  ;;  %v13805_v57 = vcombine.high %v11786_v21, %v11794_v48 }
 0x71f   :  { %11576 = vmatmul.mubr.bf16.vlgmr.msra.gmra.mrb[20].mxu0 %v14452_v22  ;;  %v13824_v16 = vadd.f32 %v14518_v7, %v5271_v42  ;;  %v13826_v7 = vadd.f32 %v14520_v0, %v5279_v29  ;;  %v5299_v0 = vrot.slane %v14548_v55, %v14349_v58  ;;  %14018 = vset.pattern.permute.xlu0 %v14171_v3 }
 0x720   :  { %11740 = vmatmul.mubr.bf16.vlgmr.msra.gmra.mrb[36].mxu1 %v14452_v22  ;;  %11988 = vmatprep.mubr.bf16.mxu0 %v11769_v33  ;;  %v11752_v22 = vmax.f32 %v13820_v11, 0.0  ;;  %v13827_v17 = vadd.f32 %v14524_v20, %v5283_v26  ;;  %v13804_v20 = vcombine.low %v11786_v21, %v11794_v48 }
 0x721   :  { %11908 = vmatprep.mubr.bf16.mxu1 %v11765_v27  ;;  %v11756_v63 = vmax.f32 %v13824_v16, 0.0  ;;  %v13802_v27 = vcombine.low %v11785_v49, %v11793_v12  ;;  %v11758_v34 = vmax.f32 %v13826_v7, 0.0 }
 0x722   :  { %v11768_v13 = vpack.c.bf16 %v11752_v22, %v11752_v22  ;;  %v11759_v33 = vmax.f32 %v13827_v17, 0.0 }
 0x723   :  { %v11772_v28 = vpack.c.bf16 %v11756_v63, %v11756_v63  ;;  %v11774_v32 = vpack.c.bf16 %v11758_v34, %v11758_v34 }
 0x724   :  { %v11775_v30 = vpack.c.bf16 %v11759_v33, %v11759_v33 }
 0x725   :  { %11957 = vmatpush1.bf16.xpose.msra.mxu0 %v13796_v40  ;;  %v11795_v40 = vld [vmem:[#allocation8 + $0x78] sm:$0xff] }
 0x726   :  { %11877 = vmatpush1.bf16.xpose.msra.mxu1 %v13792_v38  ;;  %11996 = vmatprep.subr.bf16.mxu0 %v13799_v41  ;;  %v13806_v11 = vcombine.low %v11787_v36, %v11795_v40  ;;  %v13807_v38 = vcombine.high %v11787_v36, %v11795_v40  ;;  %v5291_v41 = vrot.slane %v14548_v55, %v14325_v9 }
 0x727   :  { %11916 = vmatprep.subr.bf16.mxu1 %v13795_v44  ;;  %v5295_v9 = vrot.slane %v14548_v55, %v14366_v37 }
 0x72c   :  { %11989 = vmatmul.mubr.bf16.vlgmr.msra.gmra.mrb[24].mxu0 %v11768_v13 }
 0x72d   :  { %11909 = vmatmul.mubr.bf16.vlgmr.msra.gmra.mrb[40].mxu1 %v11764_v31  ;;  %12028 = vmatprep.mubr.bf16.mxu0 %v11771_v56 }
 0x72e   :  { %11948 = vmatprep.mubr.bf16.mxu1 %v11767_v62  ;;  %11917 = vmatpush1.bf16.xpose.msra.mxu1 %v13794_v59 }
 0x72f   :  { %11997 = vmatpush1.bf16.xpose.msra.mxu0 %v13798_v15 }
 0x730   :  { %12036 = vmatprep.subr.bf16.mxu0 %v13801_v1 }
 0x738   :  { %12029 = vmatmul.mubr.bf16.vlgmr.msra.gmra.mrb[24].mxu0 %v11770_v51 }
 0x739   :  { %11949 = vmatmul.mubr.bf16.vlgmr.msra.gmra.mrb[40].mxu1 %v11766_v24  ;;  %12068 = vmatprep.mubr.bf16.mxu0 %v11773_v8 }
 0x73a   :  { %12037 = vmatpush1.bf16.xpose.msra.mxu0 %v13800_v19 }
 0x73b   :  { %12076 = vmatprep.subr.bf16.mxu0 %v13803_v4 }
 0x744   :  { %12069 = vmatmul.mubr.bf16.vlgmr.msra.gmra.mrb[24].mxu0 %v11772_v28 }
 0x745   :  { %12108 = vmatprep.mubr.bf16.mxu0 %v11775_v30  ;;  %12077 = vmatpush1.bf16.xpose.msra.mxu0 %v13802_v27 }
 0x746   :  { %12116 = vmatprep.subr.bf16.mxu0 %v13805_v57 }
 0x750   :  { %12109 = vmatmul.mubr.bf16.vlgmr.msra.gmra.mrb[24].mxu0 %v11774_v32 }
 0x751   :  { %12117 = vmatpush1.bf16.xpose.msra.mxu0 %v13804_v20 }
 0x752   :  { %12156 = vmatprep.subr.bf16.mxu0 %v13807_v38 }
 0x7f2   :  { %v11577_v43 = vpop.f32.mrb[20].mxu0 }
 0x7f3   :  { %v13828_v46 = vadd.f32 %v11577_v43, %v5287_v61  ;;  %v11741_v44 = vpop.f32.mrb[36].mxu1  ;;  %v11579_v52 = vpop.f32.mrb[21].mxu0 }
 0x7f4   :  { %v13829_v53 = vadd.f32 %v11579_v52, %v5291_v41  ;;  %v11743_v50 = vpop.f32.mrb[37].mxu1  ;;  %v11581_v22 = vpop.f32.mrb[22].mxu0  ;;  %v13830_v59 = vadd.f32 %v11741_v44, %v5295_v9 }
 0x7f5   :  { %v11760_v54 = vmax.f32 %v13828_v46, 0.0  ;;  %v13831_v35 = vadd.f32 %v11743_v50, %v5299_v0  ;;  %v11745_v5 = vpop.f32.mrb[38].mxu1  ;;  %v11582_v18 = vpop.f32.mrb[23].mxu0 }
 0x7f6   :  { %v11761_v25 = vmax.f32 %v13829_v53, 0.0  ;;  %v11746_v14 = vpop.f32.mrb[39].mxu1  ;;  %v11762_v31 = vmax.f32 %v13830_v59, 0.0 }
 0x7f7   :  { %v11763_v45 = vmax.f32 %v13831_v35, 0.0  ;;  %v11776_v23 = vpack.c.bf16 %v11760_v54, %v11760_v54 }
 0x7f8   :  { %v11777_v13 = vpack.c.bf16 %v11761_v25, %v11761_v25  ;;  %v11778_v56 = vpack.c.bf16 %v11762_v31, %v11762_v31 }
 0x7f9   :  { %v11779_v58 = vpack.c.bf16 %v11763_v45, %v11763_v45 }
 0x7fa   :  { %12148 = vmatprep.mubr.bf16.mxu0 %v11777_v13 }
 0x7fb   :  { %12149 = vmatmul.mubr.bf16.vlgmr.msra.gmra.mrb[24].mxu0 %v11776_v23 }
 0x7fc   :  { %12157 = vmatpush1.bf16.xpose.msra.mxu0 %v13806_v11  ;;  %12188 = vmatprep.mubr.bf16.mxu0 %v11779_v58 }
 0x807   :  { %12189 = vmatmul.mubr.bf16.vlgmr.msra.gmra.mrb[24].mxu0 %v11778_v56 }
 0x80c   :  { %v11950_v60 = vpop.f32.mrb[40].mxu1 }
 0x80d   :  { %v11952_v15 = vpop.f32.mrb[41].mxu1  ;;  %v13832_v2 = vadd.f32 %v11950_v60, %v101_v47 }
 0x80e   :  { %v11953_v62 = vpop.f32.mrb[42].mxu1 }
 0x80f   :  { %v11954_v1 = vpop.f32.mrb[43].mxu1 }
 0x8da   :  { %v12190_v39 = vpop.f32.mrb[24].mxu0 }
 0x8db   :  { %v13833_v37 = vadd.f32 %v13832_v2, %v12190_v39  ;;  %v12192_v55 = vpop.f32.mrb[25].mxu0 }
 0x8dc   :  { %v12193_v6 = vpop.f32.mrb[26].mxu0 }
 0x8dd   :  { %v12194_v10 = vpop.f32.mrb[27].mxu0  ;;  %v12197_v49 = vsel %vm12196_vm1, %v13833_v37, 0.0 }
 0x8de   :  { %12198 = vadd.xlane.f32.xlu0 %v12197_v49 }
 0x8f4   :  { %12214 = vperm.xlu0 %14018, %v13833_v37  }
 0x96b   :  { %v12199_v12 = vpop.xlane.xlu0 %12198 }
 0x96c   :  { %v12200_v51 = vrot.slane %v12199_v12, 4 }
 0x96e   :  { %v12201_v42 = vadd.f32 %v12200_v51, %v12199_v12 }
 0x970   :  { %v12202_v19 = vrot.slane %v12201_v42, 2 }
 0x972   :  { %v12203_v24 = vadd.f32 %v12202_v19, %v12201_v42 }
 0x973   :  { %v12215_v17 = vpop.permute.xlu0 %12214 }
 0x974   :  { %v12204_v8 = vrot.slane %v12203_v24, 1 }
 0x976   :  { %v12205_v26 = vadd.f32 %v12204_v8, %v12203_v24 }
 0x978   :  { %14002 = vpush %v12205_v26 }
 0x9a9   :  { %s14003_s4 = spop %14002 }
 0x9aa   :  { %s12209_s29 = smul.f32 0.0625, %s14003_s4 }
 0x9ac   :  { %v12210_v4 = vstv %s12209_s29 }
 0x9ad   :  { %v12211_v16 = vsub.f32 %v13833_v37, %v12210_v4 }
 0x9af   :  { %v12217_v63 = vadd.f32 %v12215_v17, %v12211_v16 }
 0x9b1   :  { %12218 = vst.msk [vmem:[#allocation11] sm:$0x3] %vm12196_vm1, %v12217_v63 }
 0x9b2   :  { %14140 = shalt.err (!%p14137_p2)
}
 0x9b3   :  { %s14141_s9 = scalar_lea.hbm %s14595_s5, 32 }
 0x9b4   :  { %p14142_p3 = scmp.ne.s32.totalorder %s14595_s5, %s14141_s9  ;;  %p14145_p4 = scmp.lt.u32.totalorder %s14141_s9, %s14595_s5 }
 0x9b6   :  { %p14147_p5 = pnand %p14145_p4, %p14142_p3 }
 0x9b8   :  { %14150 = shalt.err (!%p14147_p5)
}
 0x9b9   :  { %12228 = dma.vmem_to_hbm [thread:$0]  %s12226_s3, 32, %s14595_s5, [#allocation4]  }
 0x9ba   :  { %14157 = dma.done.wait [#allocation4], 32  }
 0x9bb   :  { %14158 = vsyncadd [#allocation4], 4294967264 }
 0x9bc   :  { %12232 = vsyncpa [#allocation3], 1 }
 0x9bd   :  { %12233 = vsyncpa [#allocation6], 1 }
 0x9be   :  { %12234 = vsyncpa [#allocation9], 1 }
 0x9bf   :  { %12235 = vsyncpa [#allocation4], 1 }

</bundles_post_ra>
